<compile_context>
chip_gen: v7x
topology: tpu7x:2x2x1
jax: 0.10.0
libtpu: 0.0.40
codegen_flags: <defaults>
</compile_context>

<pallas_src>
import functools

import jax
import jax.numpy as jnp
from jax.experimental import pallas as pl
from jax.experimental.pallas import tpu as pltpu

NUM_CLASSES = 32
BN_EPS = 1e-5


def _round_up(x, m):
    return (x + m - 1) // m * m


# ---------------------------------------------------------------------------
# Pallas kernels
# ---------------------------------------------------------------------------
def _matmul_bias_kernel(a_ref, b_ref, c_ref, o_ref, *, relu):
    """o = [relu]( A @ B + bias ).  Single full-K step: bf16 operands, f32 MXU
    accumulate via preferred_element_type, f32 epilogue."""
    y = jnp.dot(a_ref[...], b_ref[...], preferred_element_type=jnp.float32)
    y = y + c_ref[...]
    if relu:
        y = jnp.maximum(y, 0.0)
    o_ref[...] = y.astype(o_ref.dtype)


def _max_window_kernel(x_ref, o_ref):
    """x: (M, KK, C) window patches -> o: (M, C) max over the KK window axis."""
    o_ref[...] = jnp.max(x_ref[...], axis=1)


def _avg_spatial_kernel(x_ref, o_ref):
    """x: (N, HW, C) -> o: (N, C) mean over the HW axis (global avg pool)."""
    o_ref[...] = jnp.mean(x_ref[...].astype(jnp.float32), axis=1).astype(o_ref.dtype)


# ---------------------------------------------------------------------------
# Wrappers around pallas_call
# ---------------------------------------------------------------------------
def fused_matmul_bias(a, b_padded, bias_padded, n_real, relu):
    """out[:M, :n_real] = [relu]( a @ b + bias ).

    `b_padded`  : pre-folded (Kp, Np) bf16 weight (BN scale already in the columns).
    `bias_padded`: (1, Np) f32 per-output-column bias.  Kp, Np are multiples of 128.
    """
    M, K = a.shape
    Kp, Np = b_padded.shape

    # Tiny-M network: tile M to the real (16-aligned for bf16 sublanes) row count.
    tm = min(_round_up(M, 16), 128)
    Mp = _round_up(M, tm)
    # 256-wide N tiles where they divide evenly (v6e/v7x 256x256 MXU); 128 otherwise.
    tn = 256 if Np % 256 == 0 else 128

    a_p = jnp.pad(a, ((0, Mp - M), (0, Kp - K))).astype(jnp.bfloat16)

    kernel = functools.partial(_matmul_bias_kernel, relu=relu)
    out = pl.pallas_call(
        kernel,
        out_shape=jax.ShapeDtypeStruct((Mp, Np), jnp.float32),
        grid=(Mp // tm, Np // tn),
        in_specs=[
            pl.BlockSpec((tm, Kp), lambda i, j: (i, 0)),   # full-K LHS row tile
            pl.BlockSpec((Kp, tn), lambda i, j: (0, j)),   # full-K weight column tile
            pl.BlockSpec((1, tn), lambda i, j: (0, j)),    # per-column bias
        ],
        out_specs=pl.BlockSpec((tm, tn), lambda i, j: (i, j)),
        compiler_params=pltpu.CompilerParams(
            dimension_semantics=("parallel", "parallel")),
    )(a_p, b_padded, bias_padded)
    return out[:M, :n_real]


def _extract_patches(x, ksize, stride, padding, pad_value=0.0):
    """x: (N,H,W,C) NHWC -> (N, OH, OW, ksize*ksize*C); window-major [dy,dx,cin].
    Runs under jit, so the slices/concat fuse with the surrounding graph."""
    N, H, W, C = x.shape
    OH = (H + 2 * padding - ksize) // stride + 1
    OW = (W + 2 * padding - ksize) // stride + 1
    xp = jnp.pad(x, ((0, 0), (padding, padding), (padding, padding), (0, 0)),
                 constant_values=pad_value)
    cols = []
    for dy in range(ksize):
        for dx in range(ksize):
            cols.append(xp[:, dy:dy + stride * OH:stride,
                           dx:dx + stride * OW:stride, :])
    return jnp.concatenate(cols, axis=-1), OH, OW


def conv_bn_relu(x, fp, cout, ksize, stride, padding, relu=True):
    """x NHWC; fp holds the pre-folded, padded bf16 weight matrix and f32 bias."""
    N, _, _, cin = x.shape
    patches, OH, OW = _extract_patches(x, ksize, stride, padding)
    a = patches.reshape(N * OH * OW, ksize * ksize * cin)
    y = fused_matmul_bias(a, fp["w"], fp["b"], n_real=cout, relu=relu)
    return y.reshape(N, OH, OW, cout)


def maxpool2d(x, ksize=3, stride=2, padding=1):
    N, H, W, C = x.shape
    patches, OH, OW = _extract_patches(x, ksize, stride, padding,
                                       pad_value=-jnp.inf)
    p = patches.reshape(N * OH * OW, ksize * ksize, C)
    # TODO(synk): C=64 output is not lane-dense (masked stores), but the tensor is only
    # 32x64 here so re-layout plumbing is not worth it.
    out = pl.pallas_call(
        _max_window_kernel,
        out_shape=jax.ShapeDtypeStruct((N * OH * OW, C), x.dtype),
    )(p)
    return out.reshape(N, OH, OW, C)


def global_avgpool(x):
    N, H, W, C = x.shape
    xr = x.reshape(N, H * W, C)
    return pl.pallas_call(
        _avg_spatial_kernel,
        out_shape=jax.ShapeDtypeStruct((N, C), x.dtype),
    )(xr)


# ---------------------------------------------------------------------------
# Parameters (deterministic synthetic init) + one-time folding
# ---------------------------------------------------------------------------
def make_conv_bn(key, cin, cout, ksize):
    kw, kb = jax.random.split(key)
    fan_in = cin * ksize * ksize
    return {
        "w": jax.random.normal(kw, (cout, cin, ksize, ksize), jnp.float32)
             * (1.0 / fan_in) ** 0.5,
        "b": jax.random.normal(kb, (cout,), jnp.float32) * 0.01,
        "gamma": jnp.ones((cout,), jnp.float32),
        "beta": jnp.zeros((cout,), jnp.float32),
        "mean": jnp.zeros((cout,), jnp.float32),
        "var": jnp.ones((cout,), jnp.float32),
    }


def _fold_conv_bn(p):
    """Fold conv bias + inference-mode BN into a padded, bf16, matmul-ready weight
    (K=kh*kw*cin rows, window-major [dy,dx,cin]) and a (1, Np) f32 bias."""
    w, b = p["w"], p["b"]                      # w: (Cout, Cin, KH, KW) PyTorch layout
    cout, cin, kh, kw = w.shape
    scale = p["gamma"] / jnp.sqrt(p["var"] + BN_EPS)
    bias_eff = (b - p["mean"]) * scale + p["beta"]
    wmat = jnp.transpose(w, (2, 3, 1, 0)).reshape(kh * kw * cin, cout) * scale[None, :]
    K, N = wmat.shape
    Kp, Np = _round_up(K, 128), _round_up(N, 128)
    return {
        "w": jnp.pad(wmat, ((0, Kp - K), (0, Np - N))).astype(jnp.bfloat16),
        "b": jnp.pad(bias_eff.reshape(1, -1).astype(jnp.float32),
                     ((0, 0), (0, Np - N))),
    }


def _fold_linear(w, b):
    """PyTorch Linear weight (out, in) -> padded bf16 (Kp, Np) weight + f32 bias."""
    wmat = w.T
    K, N = wmat.shape
    Kp, Np = _round_up(K, 128), _round_up(N, 128)
    return {
        "w": jnp.pad(wmat, ((0, Kp - K), (0, Np - N))).astype(jnp.bfloat16),
        "b": jnp.pad(b.reshape(1, -1).astype(jnp.float32), ((0, 0), (0, Np - N))),
    }


# (cin, cout, stride) for each conv in each "layer" (as written in the module)
LAYER_CFG = {
    "layer1": [(64, 64, 1), (64, 64, 1)],
    "layer2": [(64, 128, 2), (128, 128, 1), (128, 128, 1), (128, 128, 1)],
    "layer3": [(128, 256, 2), (256, 256, 1), (256, 256, 1), (256, 256, 1),
               (256, 256, 1)],
    "layer4": [(256, 512, 2), (512, 512, 1), (512, 512, 1)],
}


def init_params(seed=0, num_classes=NUM_CLASSES):
    key = jax.random.PRNGKey(seed)
    keys = iter(jax.random.split(key, 64))
    params = {"stem": _fold_conv_bn(make_conv_bn(next(keys), 3, 64, 7))}
    for name, cfg in LAYER_CFG.items():
        params[name] = [_fold_conv_bn(make_conv_bn(next(keys), ci, co, 3))
                        for (ci, co, _) in cfg]
    kfc_w, kfc_b = jax.random.split(next(keys))
    fc_w = jax.random.normal(kfc_w, (num_classes, 512), jnp.float32) * (1.0 / 512) ** 0.5
    fc_b = jax.random.normal(kfc_b, (num_classes,), jnp.float32) * 0.01
    params["fc"] = _fold_linear(fc_w, fc_b)
    return params


# ---------------------------------------------------------------------------
# Forward pass (matches ResNet34.forward of the given module), fully jitted
# ---------------------------------------------------------------------------
@jax.jit
def resnet34_forward(params, x_nchw):
    x = jnp.transpose(x_nchw, (0, 2, 3, 1)).astype(jnp.float32)   # NCHW -> NHWC

    x = conv_bn_relu(x, params["stem"], cout=64, ksize=7, stride=2, padding=3)
    x = maxpool2d(x, ksize=3, stride=2, padding=1)

    for name in ("layer1", "layer2", "layer3", "layer4"):
        for fp, (_, cout, stride) in zip(params[name], LAYER_CFG[name]):
            x = conv_bn_relu(x, fp, cout=cout, ksize=3, stride=stride, padding=1)

    x = global_avgpool(x)                                          # (N, 512)
    logits = fused_matmul_bias(x, params["fc"]["w"], params["fc"]["b"],
                               n_real=NUM_CLASSES, relu=False)     # fc
    return logits


# ---------------------------------------------------------------------------
if __name__ == "__main__":
    key = jax.random.PRNGKey(0)
    x = jax.random.normal(key, (2, 3, 16, 16), jnp.float32)  # NCHW, like PyTorch

    params = init_params(seed=0)
    out = resnet34_forward(params, x)
    out = jax.block_until_ready(out)

    assert out.shape == (2, NUM_CLASSES), out.shape
    assert jnp.all(jnp.isfinite(out))
    print("KERNEL_OK")
</pallas_src>

<mosaic_0001>
module attributes {stable_mosaic.version = 11 : i64} {
  func.func @_matmul_bias_kernel(%arg0: i32, %arg1: i32, %arg2: memref<128x256xbf16, #tpu.memory_space<vmem>>, %arg3: memref<256x128xbf16, #tpu.memory_space<vmem>>, %arg4: memref<1x128xf32, #tpu.memory_space<vmem>>, %arg5: memref<128x128xf32, #tpu.memory_space<vmem>>) attributes {dimension_semantics = [#tpu.dimension_semantics<parallel>, #tpu.dimension_semantics<parallel>], iteration_bounds = array<i64: 1, 1>, scalar_prefetch = 0 : i64, scratch_operands = 0 : i64, tpu.core_type = #tpu.core_type<tc>, window_params = [{transform_indices = @transform_0, window_bounds = array<i64: 128, 256>}, {transform_indices = @transform_1, window_bounds = array<i64: 256, 128>}, {transform_indices = @transform_2, window_bounds = array<i64: 1, 128>}, {transform_indices = @transform_3, window_bounds = array<i64: 128, 128>}]} {
    %c0 = arith.constant 0 : index
    %c0_0 = arith.constant 0 : index
    %0 = vector.load %arg2[%c0, %c0_0] : memref<128x256xbf16, #tpu.memory_space<vmem>>, vector<128x256xbf16>
    %c0_1 = arith.constant 0 : index
    %c0_2 = arith.constant 0 : index
    %1 = vector.load %arg3[%c0_1, %c0_2] : memref<256x128xbf16, #tpu.memory_space<vmem>>, vector<256x128xbf16>
    %cst = arith.constant dense<0.000000e+00> : vector<128x128xf32>
    %2 = tpu.matmul %0, %1, %cst {dimension_numbers = #tpu.dot_dimension_numbers<[1], [0], [0], [1], [0, 0, 1, 1], [], []>} : vector<128x256xbf16>, vector<256x128xbf16>, vector<128x128xf32> -> vector<128x128xf32>
    %c0_3 = arith.constant 0 : index
    %c0_4 = arith.constant 0 : index
    %3 = vector.load %arg4[%c0_3, %c0_4] : memref<1x128xf32, #tpu.memory_space<vmem>>, vector<1x128xf32>
    %4 = vector.broadcast %3 : vector<1x128xf32> to vector<128x128xf32>
    %5 = arith.addf %2, %4 : vector<128x128xf32>
    %cst_5 = arith.constant 0.000000e+00 : f32
    %6 = vector.broadcast %cst_5 : f32 to vector<128x128xf32>
    %7 = arith.maximumf %5, %6 : vector<128x128xf32>
    %c0_6 = arith.constant 0 : index
    %c0_7 = arith.constant 0 : index
    %8 = vector.load %arg5[%c0_6, %c0_7] : memref<128x128xf32, #tpu.memory_space<vmem>>, vector<128x128xf32>
    tpu.vector_store %arg5[%c0_6, %c0_7], %7 {strides = array<i32>} : memref<128x128xf32, #tpu.memory_space<vmem>>, vector<128x128xf32>,
    return
  }
  func.func @transform_0(%arg0: i32, %arg1: i32) -> (i32, i32) {
    %c0_i32 = arith.constant 0 : i32
    %c0_i32_0 = arith.constant 0 : i32
    return %arg0, %c0_i32 : i32, i32
  }
  func.func @transform_1(%arg0: i32, %arg1: i32) -> (i32, i32) {
    %c0_i32 = arith.constant 0 : i32
    %c0_i32_0 = arith.constant 0 : i32
    return %c0_i32, %arg1 : i32, i32
  }
  func.func @transform_2(%arg0: i32, %arg1: i32) -> (i32, i32) {
    %c0_i32 = arith.constant 0 : i32
    %c0_i32_0 = arith.constant 0 : i32
    return %c0_i32, %arg1 : i32, i32
  }
  func.func @transform_3(%arg0: i32, %arg1: i32) -> (i32, i32) {
    %c0_i32 = arith.constant 0 : i32
    return %arg0, %arg1 : i32, i32
  }
}

module attributes {stable_mosaic.version = 11 : i64} {
  func.func @_max_window_kernel(%arg0: memref<32x9x64xf32, #tpu.memory_space<vmem>>, %arg1: memref<32x64xf32, #tpu.memory_space<vmem>>) attributes {dimension_semantics = [], scalar_prefetch = 0 : i64, scratch_operands = 0 : i64, tpu.core_type = #tpu.core_type<tc>} {
    %c0 = arith.constant 0 : index
    %c0_0 = arith.constant 0 : index
    %c0_1 = arith.constant 0 : index
    %0 = vector.load %arg0[%c0, %c0_0, %c0_1] : memref<32x9x64xf32, #tpu.memory_space<vmem>>, vector<32x9x64xf32>
    %cst = arith.constant dense<0xFF800000> : vector<32x64xf32>
    %1 = vector.multi_reduction <maximumf>, %0, %cst [1] : vector<32x9x64xf32> to vector<32x64xf32>
    %c0_2 = arith.constant 0 : index
    %c0_3 = arith.constant 0 : index
    %2 = vector.load %arg1[%c0_2, %c0_3] : memref<32x64xf32, #tpu.memory_space<vmem>>, vector<32x64xf32>
    tpu.vector_store %arg1[%c0_2, %c0_3], %1 {strides = array<i32>} : memref<32x64xf32, #tpu.memory_space<vmem>>, vector<32x64xf32>,
    return
  }
}

module attributes {stable_mosaic.version = 11 : i64} {
  func.func @_matmul_bias_kernel(%arg0: i32, %arg1: i32, %arg2: memref<32x640xbf16, #tpu.memory_space<vmem>>, %arg3: memref<640x128xbf16, #tpu.memory_space<vmem>>, %arg4: memref<1x128xf32, #tpu.memory_space<vmem>>, %arg5: memref<32x128xf32, #tpu.memory_space<vmem>>) attributes {dimension_semantics = [#tpu.dimension_semantics<parallel>, #tpu.dimension_semantics<parallel>], iteration_bounds = array<i64: 1, 1>, scalar_prefetch = 0 : i64, scratch_operands = 0 : i64, tpu.core_type = #tpu.core_type<tc>, window_params = [{transform_indices = @transform_0, window_bounds = array<i64: 32, 640>}, {transform_indices = @transform_1, window_bounds = array<i64: 640, 128>}, {transform_indices = @transform_2, window_bounds = array<i64: 1, 128>}, {transform_indices = @transform_3, window_bounds = array<i64: 32, 128>}]} {
    %c0 = arith.constant 0 : index
    %c0_0 = arith.constant 0 : index
    %0 = vector.load %arg2[%c0, %c0_0] : memref<32x640xbf16, #tpu.memory_space<vmem>>, vector<32x640xbf16>
    %c0_1 = arith.constant 0 : index
    %c0_2 = arith.constant 0 : index
    %1 = vector.load %arg3[%c0_1, %c0_2] : memref<640x128xbf16, #tpu.memory_space<vmem>>, vector<640x128xbf16>
    %cst = arith.constant dense<0.000000e+00> : vector<32x128xf32>
    %2 = tpu.matmul %0, %1, %cst {dimension_numbers = #tpu.dot_dimension_numbers<[1], [0], [0], [1], [0, 0, 1, 1], [], []>} : vector<32x640xbf16>, vector<640x128xbf16>, vector<32x128xf32> -> vector<32x128xf32>
    %c0_3 = arith.constant 0 : index
    %c0_4 = arith.constant 0 : index
    %3 = vector.load %arg4[%c0_3, %c0_4] : memref<1x128xf32, #tpu.memory_space<vmem>>, vector<1x128xf32>
    %4 = vector.broadcast %3 : vector<1x128xf32> to vector<32x128xf32>
    %5 = arith.addf %2, %4 : vector<32x128xf32>
    %cst_5 = arith.constant 0.000000e+00 : f32
    %6 = vector.broadcast %cst_5 : f32 to vector<32x128xf32>
    %7 = arith.maximumf %5, %6 : vector<32x128xf32>
    %c0_6 = arith.constant 0 : index
    %c0_7 = arith.constant 0 : index
    %8 = vector.load %arg5[%c0_6, %c0_7] : memref<32x128xf32, #tpu.memory_space<vmem>>, vector<32x128xf32>
    tpu.vector_store %arg5[%c0_6, %c0_7], %7 {strides = array<i32>} : memref<32x128xf32, #tpu.memory_space<vmem>>, vector<32x128xf32>,
    return
  }
  func.func @transform_0(%arg0: i32, %arg1: i32) -> (i32, i32) {
    %c0_i32 = arith.constant 0 : i32
    %c0_i32_0 = arith.constant 0 : i32
    return %arg0, %c0_i32 : i32, i32
  }
  func.func @transform_1(%arg0: i32, %arg1: i32) -> (i32, i32) {
    %c0_i32 = arith.constant 0 : i32
    %c0_i32_0 = arith.constant 0 : i32
    return %c0_i32, %arg1 : i32, i32
  }
  func.func @transform_2(%arg0: i32, %arg1: i32) -> (i32, i32) {
    %c0_i32 = arith.constant 0 : i32
    %c0_i32_0 = arith.constant 0 : i32
    return %c0_i32, %arg1 : i32, i32
  }
  func.func @transform_3(%arg0: i32, %arg1: i32) -> (i32, i32) {
    %c0_i32 = arith.constant 0 : i32
    return %arg0, %arg1 : i32, i32
  }
}

module attributes {stable_mosaic.version = 11 : i64} {
  func.func @_matmul_bias_kernel(%arg0: i32, %arg1: i32, %arg2: memref<16x640xbf16, #tpu.memory_space<vmem>>, %arg3: memref<640x128xbf16, #tpu.memory_space<vmem>>, %arg4: memref<1x128xf32, #tpu.memory_space<vmem>>, %arg5: memref<16x128xf32, #tpu.memory_space<vmem>>) attributes {dimension_semantics = [#tpu.dimension_semantics<parallel>, #tpu.dimension_semantics<parallel>], iteration_bounds = array<i64: 1, 1>, scalar_prefetch = 0 : i64, scratch_operands = 0 : i64, tpu.core_type = #tpu.core_type<tc>, window_params = [{transform_indices = @transform_0, window_bounds = array<i64: 16, 640>}, {transform_indices = @transform_1, window_bounds = array<i64: 640, 128>}, {transform_indices = @transform_2, window_bounds = array<i64: 1, 128>}, {transform_indices = @transform_3, window_bounds = array<i64: 16, 128>}]} {
    %c0 = arith.constant 0 : index
    %c0_0 = arith.constant 0 : index
    %0 = vector.load %arg2[%c0, %c0_0] : memref<16x640xbf16, #tpu.memory_space<vmem>>, vector<16x640xbf16>
    %c0_1 = arith.constant 0 : index
    %c0_2 = arith.constant 0 : index
    %1 = vector.load %arg3[%c0_1, %c0_2] : memref<640x128xbf16, #tpu.memory_space<vmem>>, vector<640x128xbf16>
    %cst = arith.constant dense<0.000000e+00> : vector<16x128xf32>
    %2 = tpu.matmul %0, %1, %cst {dimension_numbers = #tpu.dot_dimension_numbers<[1], [0], [0], [1], [0, 0, 1, 1], [], []>} : vector<16x640xbf16>, vector<640x128xbf16>, vector<16x128xf32> -> vector<16x128xf32>
    %c0_3 = arith.constant 0 : index
    %c0_4 = arith.constant 0 : index
    %3 = vector.load %arg4[%c0_3, %c0_4] : memref<1x128xf32, #tpu.memory_space<vmem>>, vector<1x128xf32>
    %4 = vector.broadcast %3 : vector<1x128xf32> to vector<16x128xf32>
    %5 = arith.addf %2, %4 : vector<16x128xf32>
    %cst_5 = arith.constant 0.000000e+00 : f32
    %6 = vector.broadcast %cst_5 : f32 to vector<16x128xf32>
    %7 = arith.maximumf %5, %6 : vector<16x128xf32>
    %c0_6 = arith.constant 0 : index
    %c0_7 = arith.constant 0 : index
    %8 = vector.load %arg5[%c0_6, %c0_7] : memref<16x128xf32, #tpu.memory_space<vmem>>, vector<16x128xf32>
    tpu.vector_store %arg5[%c0_6, %c0_7], %7 {strides = array<i32>} : memref<16x128xf32, #tpu.memory_space<vmem>>, vector<16x128xf32>,
    return
  }
  func.func @transform_0(%arg0: i32, %arg1: i32) -> (i32, i32) {
    %c0_i32 = arith.constant 0 : i32
    %c0_i32_0 = arith.constant 0 : i32
    return %arg0, %c0_i32 : i32, i32
  }
  func.func @transform_1(%arg0: i32, %arg1: i32) -> (i32, i32) {
    %c0_i32 = arith.constant 0 : i32
    %c0_i32_0 = arith.constant 0 : i32
    return %c0_i32, %arg1 : i32, i32
  }
  func.func @transform_2(%arg0: i32, %arg1: i32) -> (i32, i32) {
    %c0_i32 = arith.constant 0 : i32
    %c0_i32_0 = arith.constant 0 : i32
    return %c0_i32, %arg1 : i32, i32
  }
  func.func @transform_3(%arg0: i32, %arg1: i32) -> (i32, i32) {
    %c0_i32 = arith.constant 0 : i32
    return %arg0, %arg1 : i32, i32
  }
}

module attributes {stable_mosaic.version = 11 : i64} {
  func.func @_matmul_bias_kernel(%arg0: i32, %arg1: i32, %arg2: memref<16x1152xbf16, #tpu.memory_space<vmem>>, %arg3: memref<1152x128xbf16, #tpu.memory_space<vmem>>, %arg4: memref<1x128xf32, #tpu.memory_space<vmem>>, %arg5: memref<16x128xf32, #tpu.memory_space<vmem>>) attributes {dimension_semantics = [#tpu.dimension_semantics<parallel>, #tpu.dimension_semantics<parallel>], iteration_bounds = array<i64: 1, 1>, scalar_prefetch = 0 : i64, scratch_operands = 0 : i64, tpu.core_type = #tpu.core_type<tc>, window_params = [{transform_indices = @transform_0, window_bounds = array<i64: 16, 1152>}, {transform_indices = @transform_1, window_bounds = array<i64: 1152, 128>}, {transform_indices = @transform_2, window_bounds = array<i64: 1, 128>}, {transform_indices = @transform_3, window_bounds = array<i64: 16, 128>}]} {
    %c0 = arith.constant 0 : index
    %c0_0 = arith.constant 0 : index
    %0 = vector.load %arg2[%c0, %c0_0] : memref<16x1152xbf16, #tpu.memory_space<vmem>>, vector<16x1152xbf16>
    %c0_1 = arith.constant 0 : index
    %c0_2 = arith.constant 0 : index
    %1 = vector.load %arg3[%c0_1, %c0_2] : memref<1152x128xbf16, #tpu.memory_space<vmem>>, vector<1152x128xbf16>
    %cst = arith.constant dense<0.000000e+00> : vector<16x128xf32>
    %2 = tpu.matmul %0, %1, %cst {dimension_numbers = #tpu.dot_dimension_numbers<[1], [0], [0], [1], [0, 0, 1, 1], [], []>} : vector<16x1152xbf16>, vector<1152x128xbf16>, vector<16x128xf32> -> vector<16x128xf32>
    %c0_3 = arith.constant 0 : index
    %c0_4 = arith.constant 0 : index
    %3 = vector.load %arg4[%c0_3, %c0_4] : memref<1x128xf32, #tpu.memory_space<vmem>>, vector<1x128xf32>
    %4 = vector.broadcast %3 : vector<1x128xf32> to vector<16x128xf32>
    %5 = arith.addf %2, %4 : vector<16x128xf32>
    %cst_5 = arith.constant 0.000000e+00 : f32
    %6 = vector.broadcast %cst_5 : f32 to vector<16x128xf32>
    %7 = arith.maximumf %5, %6 : vector<16x128xf32>
    %c0_6 = arith.constant 0 : index
    %c0_7 = arith.constant 0 : index
    %8 = vector.load %arg5[%c0_6, %c0_7] : memref<16x128xf32, #tpu.memory_space<vmem>>, vector<16x128xf32>
    tpu.vector_store %arg5[%c0_6, %c0_7], %7 {strides = array<i32>} : memref<16x128xf32, #tpu.memory_space<vmem>>, vector<16x128xf32>,
    return
  }
  func.func @transform_0(%arg0: i32, %arg1: i32) -> (i32, i32) {
    %c0_i32 = arith.constant 0 : i32
    %c0_i32_0 = arith.constant 0 : i32
    return %arg0, %c0_i32 : i32, i32
  }
  func.func @transform_1(%arg0: i32, %arg1: i32) -> (i32, i32) {
    %c0_i32 = arith.constant 0 : i32
    %c0_i32_0 = arith.constant 0 : i32
    return %c0_i32, %arg1 : i32, i32
  }
  func.func @transform_2(%arg0: i32, %arg1: i32) -> (i32, i32) {
    %c0_i32 = arith.constant 0 : i32
    %c0_i32_0 = arith.constant 0 : i32
    return %c0_i32, %arg1 : i32, i32
  }
  func.func @transform_3(%arg0: i32, %arg1: i32) -> (i32, i32) {
    %c0_i32 = arith.constant 0 : i32
    return %arg0, %arg1 : i32, i32
  }
}

module attributes {stable_mosaic.version = 11 : i64} {
  func.func @_matmul_bias_kernel(%arg0: i32, %arg1: i32, %arg2: memref<16x1152xbf16, #tpu.memory_space<vmem>>, %arg3: memref<1152x256xbf16, #tpu.memory_space<vmem>>, %arg4: memref<1x256xf32, #tpu.memory_space<vmem>>, %arg5: memref<16x256xf32, #tpu.memory_space<vmem>>) attributes {dimension_semantics = [#tpu.dimension_semantics<parallel>, #tpu.dimension_semantics<parallel>], iteration_bounds = array<i64: 1, 1>, scalar_prefetch = 0 : i64, scratch_operands = 0 : i64, tpu.core_type = #tpu.core_type<tc>, window_params = [{transform_indices = @transform_0, window_bounds = array<i64: 16, 1152>}, {transform_indices = @transform_1, window_bounds = array<i64: 1152, 256>}, {transform_indices = @transform_2, window_bounds = array<i64: 1, 256>}, {transform_indices = @transform_3, window_bounds = array<i64: 16, 256>}]} {
    %c0 = arith.constant 0 : index
    %c0_0 = arith.constant 0 : index
    %0 = vector.load %arg2[%c0, %c0_0] : memref<16x1152xbf16, #tpu.memory_space<vmem>>, vector<16x1152xbf16>
    %c0_1 = arith.constant 0 : index
    %c0_2 = arith.constant 0 : index
    %1 = vector.load %arg3[%c0_1, %c0_2] : memref<1152x256xbf16, #tpu.memory_space<vmem>>, vector<1152x256xbf16>
    %cst = arith.constant dense<0.000000e+00> : vector<16x256xf32>
    %2 = tpu.matmul %0, %1, %cst {dimension_numbers = #tpu.dot_dimension_numbers<[1], [0], [0], [1], [0, 0, 1, 1], [], []>} : vector<16x1152xbf16>, vector<1152x256xbf16>, vector<16x256xf32> -> vector<16x256xf32>
    %c0_3 = arith.constant 0 : index
    %c0_4 = arith.constant 0 : index
    %3 = vector.load %arg4[%c0_3, %c0_4] : memref<1x256xf32, #tpu.memory_space<vmem>>, vector<1x256xf32>
    %4 = vector.broadcast %3 : vector<1x256xf32> to vector<16x256xf32>
    %5 = arith.addf %2, %4 : vector<16x256xf32>
    %cst_5 = arith.constant 0.000000e+00 : f32
    %6 = vector.broadcast %cst_5 : f32 to vector<16x256xf32>
    %7 = arith.maximumf %5, %6 : vector<16x256xf32>
    %c0_6 = arith.constant 0 : index
    %c0_7 = arith.constant 0 : index
    %8 = vector.load %arg5[%c0_6, %c0_7] : memref<16x256xf32, #tpu.memory_space<vmem>>, vector<16x256xf32>
    tpu.vector_store %arg5[%c0_6, %c0_7], %7 {strides = array<i32>} : memref<16x256xf32, #tpu.memory_space<vmem>>, vector<16x256xf32>,
    return
  }
  func.func @transform_0(%arg0: i32, %arg1: i32) -> (i32, i32) {
    %c0_i32 = arith.constant 0 : i32
    %c0_i32_0 = arith.constant 0 : i32
    return %arg0, %c0_i32 : i32, i32
  }
  func.func @transform_1(%arg0: i32, %arg1: i32) -> (i32, i32) {
    %c0_i32 = arith.constant 0 : i32
    %c0_i32_0 = arith.constant 0 : i32
    return %c0_i32, %arg1 : i32, i32
  }
  func.func @transform_2(%arg0: i32, %arg1: i32) -> (i32, i32) {
    %c0_i32 = arith.constant 0 : i32
    %c0_i32_0 = arith.constant 0 : i32
    return %c0_i32, %arg1 : i32, i32
  }
  func.func @transform_3(%arg0: i32, %arg1: i32) -> (i32, i32) {
    %c0_i32 = arith.constant 0 : i32
    return %arg0, %arg1 : i32, i32
  }
}

module attributes {stable_mosaic.version = 11 : i64} {
  func.func @_matmul_bias_kernel(%arg0: i32, %arg1: i32, %arg2: memref<16x2304xbf16, #tpu.memory_space<vmem>>, %arg3: memref<2304x256xbf16, #tpu.memory_space<vmem>>, %arg4: memref<1x256xf32, #tpu.memory_space<vmem>>, %arg5: memref<16x256xf32, #tpu.memory_space<vmem>>) attributes {dimension_semantics = [#tpu.dimension_semantics<parallel>, #tpu.dimension_semantics<parallel>], iteration_bounds = array<i64: 1, 1>, scalar_prefetch = 0 : i64, scratch_operands = 0 : i64, tpu.core_type = #tpu.core_type<tc>, window_params = [{transform_indices = @transform_0, window_bounds = array<i64: 16, 2304>}, {transform_indices = @transform_1, window_bounds = array<i64: 2304, 256>}, {transform_indices = @transform_2, window_bounds = array<i64: 1, 256>}, {transform_indices = @transform_3, window_bounds = array<i64: 16, 256>}]} {
    %c0 = arith.constant 0 : index
    %c0_0 = arith.constant 0 : index
    %0 = vector.load %arg2[%c0, %c0_0] : memref<16x2304xbf16, #tpu.memory_space<vmem>>, vector<16x2304xbf16>
    %c0_1 = arith.constant 0 : index
    %c0_2 = arith.constant 0 : index
    %1 = vector.load %arg3[%c0_1, %c0_2] : memref<2304x256xbf16, #tpu.memory_space<vmem>>, vector<2304x256xbf16>
    %cst = arith.constant dense<0.000000e+00> : vector<16x256xf32>
    %2 = tpu.matmul %0, %1, %cst {dimension_numbers = #tpu.dot_dimension_numbers<[1], [0], [0], [1], [0, 0, 1, 1], [], []>} : vector<16x2304xbf16>, vector<2304x256xbf16>, vector<16x256xf32> -> vector<16x256xf32>
    %c0_3 = arith.constant 0 : index
    %c0_4 = arith.constant 0 : index
    %3 = vector.load %arg4[%c0_3, %c0_4] : memref<1x256xf32, #tpu.memory_space<vmem>>, vector<1x256xf32>
    %4 = vector.broadcast %3 : vector<1x256xf32> to vector<16x256xf32>
    %5 = arith.addf %2, %4 : vector<16x256xf32>
    %cst_5 = arith.constant 0.000000e+00 : f32
    %6 = vector.broadcast %cst_5 : f32 to vector<16x256xf32>
    %7 = arith.maximumf %5, %6 : vector<16x256xf32>
    %c0_6 = arith.constant 0 : index
    %c0_7 = arith.constant 0 : index
    %8 = vector.load %arg5[%c0_6, %c0_7] : memref<16x256xf32, #tpu.memory_space<vmem>>, vector<16x256xf32>
    tpu.vector_store %arg5[%c0_6, %c0_7], %7 {strides = array<i32>} : memref<16x256xf32, #tpu.memory_space<vmem>>, vector<16x256xf32>,
    return
  }
  func.func @transform_0(%arg0: i32, %arg1: i32) -> (i32, i32) {
    %c0_i32 = arith.constant 0 : i32
    %c0_i32_0 = arith.constant 0 : i32
    return %arg0, %c0_i32 : i32, i32
  }
  func.func @transform_1(%arg0: i32, %arg1: i32) -> (i32, i32) {
    %c0_i32 = arith.constant 0 : i32
    %c0_i32_0 = arith.constant 0 : i32
    return %c0_i32, %arg1 : i32, i32
  }
  func.func @transform_2(%arg0: i32, %arg1: i32) -> (i32, i32) {
    %c0_i32 = arith.constant 0 : i32
    %c0_i32_0 = arith.constant 0 : i32
    return %c0_i32, %arg1 : i32, i32
  }
  func.func @transform_3(%arg0: i32, %arg1: i32) -> (i32, i32) {
    %c0_i32 = arith.constant 0 : i32
    return %arg0, %arg1 : i32, i32
  }
}

module attributes {stable_mosaic.version = 11 : i64} {
  func.func @_matmul_bias_kernel(%arg0: i32, %arg1: i32, %arg2: memref<16x2304xbf16, #tpu.memory_space<vmem>>, %arg3: memref<2304x256xbf16, #tpu.memory_space<vmem>>, %arg4: memref<1x256xf32, #tpu.memory_space<vmem>>, %arg5: memref<16x256xf32, #tpu.memory_space<vmem>>) attributes {dimension_semantics = [#tpu.dimension_semantics<parallel>, #tpu.dimension_semantics<parallel>], iteration_bounds = array<i64: 1, 2>, scalar_prefetch = 0 : i64, scratch_operands = 0 : i64, tpu.core_type = #tpu.core_type<tc>, window_params = [{transform_indices = @transform_0, window_bounds = array<i64: 16, 2304>}, {transform_indices = @transform_1, window_bounds = array<i64: 2304, 256>}, {transform_indices = @transform_2, window_bounds = array<i64: 1, 256>}, {transform_indices = @transform_3, window_bounds = array<i64: 16, 256>}]} {
    %c0 = arith.constant 0 : index
    %c0_0 = arith.constant 0 : index
    %0 = vector.load %arg2[%c0, %c0_0] : memref<16x2304xbf16, #tpu.memory_space<vmem>>, vector<16x2304xbf16>
    %c0_1 = arith.constant 0 : index
    %c0_2 = arith.constant 0 : index
    %1 = vector.load %arg3[%c0_1, %c0_2] : memref<2304x256xbf16, #tpu.memory_space<vmem>>, vector<2304x256xbf16>
    %cst = arith.constant dense<0.000000e+00> : vector<16x256xf32>
    %2 = tpu.matmul %0, %1, %cst {dimension_numbers = #tpu.dot_dimension_numbers<[1], [0], [0], [1], [0, 0, 1, 1], [], []>} : vector<16x2304xbf16>, vector<2304x256xbf16>, vector<16x256xf32> -> vector<16x256xf32>
    %c0_3 = arith.constant 0 : index
    %c0_4 = arith.constant 0 : index
    %3 = vector.load %arg4[%c0_3, %c0_4] : memref<1x256xf32, #tpu.memory_space<vmem>>, vector<1x256xf32>
    %4 = vector.broadcast %3 : vector<1x256xf32> to vector<16x256xf32>
    %5 = arith.addf %2, %4 : vector<16x256xf32>
    %cst_5 = arith.constant 0.000000e+00 : f32
    %6 = vector.broadcast %cst_5 : f32 to vector<16x256xf32>
    %7 = arith.maximumf %5, %6 : vector<16x256xf32>
    %c0_6 = arith.constant 0 : index
    %c0_7 = arith.constant 0 : index
    %8 = vector.load %arg5[%c0_6, %c0_7] : memref<16x256xf32, #tpu.memory_space<vmem>>, vector<16x256xf32>
    tpu.vector_store %arg5[%c0_6, %c0_7], %7 {strides = array<i32>} : memref<16x256xf32, #tpu.memory_space<vmem>>, vector<16x256xf32>,
    return
  }
  func.func @transform_0(%arg0: i32, %arg1: i32) -> (i32, i32) {
    %c0_i32 = arith.constant 0 : i32
    %c0_i32_0 = arith.constant 0 : i32
    return %arg0, %c0_i32 : i32, i32
  }
  func.func @transform_1(%arg0: i32, %arg1: i32) -> (i32, i32) {
    %c0_i32 = arith.constant 0 : i32
    %c0_i32_0 = arith.constant 0 : i32
    return %c0_i32, %arg1 : i32, i32
  }
  func.func @transform_2(%arg0: i32, %arg1: i32) -> (i32, i32) {
    %c0_i32 = arith.constant 0 : i32
    %c0_i32_0 = arith.constant 0 : i32
    return %c0_i32, %arg1 : i32, i32
  }
  func.func @transform_3(%arg0: i32, %arg1: i32) -> (i32, i32) {
    %c0_i32 = arith.constant 0 : i32
    return %arg0, %arg1 : i32, i32
  }
}

module attributes {stable_mosaic.version = 11 : i64} {
  func.func @_matmul_bias_kernel(%arg0: i32, %arg1: i32, %arg2: memref<16x4608xbf16, #tpu.memory_space<vmem>>, %arg3: memref<4608x256xbf16, #tpu.memory_space<vmem>>, %arg4: memref<1x256xf32, #tpu.memory_space<vmem>>, %arg5: memref<16x256xf32, #tpu.memory_space<vmem>>) attributes {dimension_semantics = [#tpu.dimension_semantics<parallel>, #tpu.dimension_semantics<parallel>], iteration_bounds = array<i64: 1, 2>, scalar_prefetch = 0 : i64, scratch_operands = 0 : i64, tpu.core_type = #tpu.core_type<tc>, window_params = [{transform_indices = @transform_0, window_bounds = array<i64: 16, 4608>}, {transform_indices = @transform_1, window_bounds = array<i64: 4608, 256>}, {transform_indices = @transform_2, window_bounds = array<i64: 1, 256>}, {transform_indices = @transform_3, window_bounds = array<i64: 16, 256>}]} {
    %c0 = arith.constant 0 : index
    %c0_0 = arith.constant 0 : index
    %0 = vector.load %arg2[%c0, %c0_0] : memref<16x4608xbf16, #tpu.memory_space<vmem>>, vector<16x4608xbf16>
    %c0_1 = arith.constant 0 : index
    %c0_2 = arith.constant 0 : index
    %1 = vector.load %arg3[%c0_1, %c0_2] : memref<4608x256xbf16, #tpu.memory_space<vmem>>, vector<4608x256xbf16>
    %cst = arith.constant dense<0.000000e+00> : vector<16x256xf32>
    %2 = tpu.matmul %0, %1, %cst {dimension_numbers = #tpu.dot_dimension_numbers<[1], [0], [0], [1], [0, 0, 1, 1], [], []>} : vector<16x4608xbf16>, vector<4608x256xbf16>, vector<16x256xf32> -> vector<16x256xf32>
    %c0_3 = arith.constant 0 : index
    %c0_4 = arith.constant 0 : index
    %3 = vector.load %arg4[%c0_3, %c0_4] : memref<1x256xf32, #tpu.memory_space<vmem>>, vector<1x256xf32>
    %4 = vector.broadcast %3 : vector<1x256xf32> to vector<16x256xf32>
    %5 = arith.addf %2, %4 : vector<16x256xf32>
    %cst_5 = arith.constant 0.000000e+00 : f32
    %6 = vector.broadcast %cst_5 : f32 to vector<16x256xf32>
    %7 = arith.maximumf %5, %6 : vector<16x256xf32>
    %c0_6 = arith.constant 0 : index
    %c0_7 = arith.constant 0 : index
    %8 = vector.load %arg5[%c0_6, %c0_7] : memref<16x256xf32, #tpu.memory_space<vmem>>, vector<16x256xf32>
    tpu.vector_store %arg5[%c0_6, %c0_7], %7 {strides = array<i32>} : memref<16x256xf32, #tpu.memory_space<vmem>>, vector<16x256xf32>,
    return
  }
  func.func @transform_0(%arg0: i32, %arg1: i32) -> (i32, i32) {
    %c0_i32 = arith.constant 0 : i32
    %c0_i32_0 = arith.constant 0 : i32
    return %arg0, %c0_i32 : i32, i32
  }
  func.func @transform_1(%arg0: i32, %arg1: i32) -> (i32, i32) {
    %c0_i32 = arith.constant 0 : i32
    %c0_i32_0 = arith.constant 0 : i32
    return %c0_i32, %arg1 : i32, i32
  }
  func.func @transform_2(%arg0: i32, %arg1: i32) -> (i32, i32) {
    %c0_i32 = arith.constant 0 : i32
    %c0_i32_0 = arith.constant 0 : i32
    return %c0_i32, %arg1 : i32, i32
  }
  func.func @transform_3(%arg0: i32, %arg1: i32) -> (i32, i32) {
    %c0_i32 = arith.constant 0 : i32
    return %arg0, %arg1 : i32, i32
  }
}

module attributes {stable_mosaic.version = 11 : i64} {
  func.func @_avg_spatial_kernel(%arg0: memref<2x1x512xf32, #tpu.memory_space<vmem>>, %arg1: memref<2x512xf32, #tpu.memory_space<vmem>>) attributes {dimension_semantics = [], scalar_prefetch = 0 : i64, scratch_operands = 0 : i64, tpu.core_type = #tpu.core_type<tc>} {
    %c0 = arith.constant 0 : index
    %c0_0 = arith.constant 0 : index
    %c0_1 = arith.constant 0 : index
    %0 = vector.load %arg0[%c0, %c0_0, %c0_1] : memref<2x1x512xf32, #tpu.memory_space<vmem>>, vector<2x1x512xf32>
    %cst = arith.constant dense<0.000000e+00> : vector<2x512xf32>
    %1 = vector.multi_reduction <add>, %0, %cst [1] : vector<2x1x512xf32> to vector<2x512xf32>
    %cst_2 = arith.constant 1.000000e+00 : f32
    %2 = vector.broadcast %cst_2 : f32 to vector<2x512xf32>
    %3 = arith.divf %1, %2 : vector<2x512xf32>
    %c0_3 = arith.constant 0 : index
    %c0_4 = arith.constant 0 : index
    %4 = vector.load %arg1[%c0_3, %c0_4] : memref<2x512xf32, #tpu.memory_space<vmem>>, vector<2x512xf32>
    tpu.vector_store %arg1[%c0_3, %c0_4], %3 {strides = array<i32>} : memref<2x512xf32, #tpu.memory_space<vmem>>, vector<2x512xf32>,
    return
  }
}

module attributes {stable_mosaic.version = 11 : i64} {
  func.func @_matmul_bias_kernel(%arg0: i32, %arg1: i32, %arg2: memref<16x512xbf16, #tpu.memory_space<vmem>>, %arg3: memref<512x128xbf16, #tpu.memory_space<vmem>>, %arg4: memref<1x128xf32, #tpu.memory_space<vmem>>, %arg5: memref<16x128xf32, #tpu.memory_space<vmem>>) attributes {dimension_semantics = [#tpu.dimension_semantics<parallel>, #tpu.dimension_semantics<parallel>], iteration_bounds = array<i64: 1, 1>, scalar_prefetch = 0 : i64, scratch_operands = 0 : i64, tpu.core_type = #tpu.core_type<tc>, window_params = [{transform_indices = @transform_0, window_bounds = array<i64: 16, 512>}, {transform_indices = @transform_1, window_bounds = array<i64: 512, 128>}, {transform_indices = @transform_2, window_bounds = array<i64: 1, 128>}, {transform_indices = @transform_3, window_bounds = array<i64: 16, 128>}]} {
    %c0 = arith.constant 0 : index
    %c0_0 = arith.constant 0 : index
    %0 = vector.load %arg2[%c0, %c0_0] : memref<16x512xbf16, #tpu.memory_space<vmem>>, vector<16x512xbf16>
    %c0_1 = arith.constant 0 : index
    %c0_2 = arith.constant 0 : index
    %1 = vector.load %arg3[%c0_1, %c0_2] : memref<512x128xbf16, #tpu.memory_space<vmem>>, vector<512x128xbf16>
    %cst = arith.constant dense<0.000000e+00> : vector<16x128xf32>
    %2 = tpu.matmul %0, %1, %cst {dimension_numbers = #tpu.dot_dimension_numbers<[1], [0], [0], [1], [0, 0, 1, 1], [], []>} : vector<16x512xbf16>, vector<512x128xbf16>, vector<16x128xf32> -> vector<16x128xf32>
    %c0_3 = arith.constant 0 : index
    %c0_4 = arith.constant 0 : index
    %3 = vector.load %arg4[%c0_3, %c0_4] : memref<1x128xf32, #tpu.memory_space<vmem>>, vector<1x128xf32>
    %4 = vector.broadcast %3 : vector<1x128xf32> to vector<16x128xf32>
    %5 = arith.addf %2, %4 : vector<16x128xf32>
    %c0_5 = arith.constant 0 : index
    %c0_6 = arith.constant 0 : index
    %6 = vector.load %arg5[%c0_5, %c0_6] : memref<16x128xf32, #tpu.memory_space<vmem>>, vector<16x128xf32>
    tpu.vector_store %arg5[%c0_5, %c0_6], %5 {strides = array<i32>} : memref<16x128xf32, #tpu.memory_space<vmem>>, vector<16x128xf32>,
    return
  }
  func.func @transform_0(%arg0: i32, %arg1: i32) -> (i32, i32) {
    %c0_i32 = arith.constant 0 : i32
    %c0_i32_0 = arith.constant 0 : i32
    return %arg0, %c0_i32 : i32, i32
  }
  func.func @transform_1(%arg0: i32, %arg1: i32) -> (i32, i32) {
    %c0_i32 = arith.constant 0 : i32
    %c0_i32_0 = arith.constant 0 : i32
    return %c0_i32, %arg1 : i32, i32
  }
  func.func @transform_2(%arg0: i32, %arg1: i32) -> (i32, i32) {
    %c0_i32 = arith.constant 0 : i32
    %c0_i32_0 = arith.constant 0 : i32
    return %c0_i32, %arg1 : i32, i32
  }
  func.func @transform_3(%arg0: i32, %arg1: i32) -> (i32, i32) {
    %c0_i32 = arith.constant 0 : i32
    return %arg0, %arg1 : i32, i32
  }
}

</mosaic_0001>

<bundles_post_ra>
// kernel: resnet34_forward.18
= control target key start
LH: loop header
LB: loop body
LE: loop exit
PB: predicated region body
PF: predicated region fallthrough
CT: control target
= control target key end

     0   :  { %s717_s1 = inlined_call_operand.vmem [shape: bf16[256,128], index: 1, kind: input, shape index: {}]   ;;  %s718_s0 = inlined_call_operand.vmem [shape: bf16[128,256], index: 0, kind: input, shape index: {}]   ;;  %s719_s2 = inlined_call_operand.vmem [shape: f32[1,128], index: 2, kind: input, shape index: {}]   ;;  %s720_s3 = inlined_call_operand.vmem [shape: f32[128,128], index: 3, kind: output, shape index: {}]  }
   0x1   :  { %v492_v0 = vld [vmem:[%s717_s1 + $0x40] sm:$0xff]   ;;  %v494_v2 = vld [vmem:[%s717_s1 + $0x48] sm:$0xff]   ;;  %v496_v4 = vld [vmem:[%s717_s1 + $0x50] sm:$0xff]  }
   0x2   :  { %v493_v1 = vld [vmem:[%s717_s1] sm:$0xff]   ;;  %412 = vmatprep.subr.bf16.mxu0 %v492_v0  ;;  %476 = vmatprep.subr.bf16.mxu1 %v492_v0  ;;  %v495_v3 = vld [vmem:[%s717_s1 + $0x8] sm:$0xff]   ;;  %v497_v5 = vld [vmem:[%s717_s1 + $0x10] sm:$0xff]  }
   0x3   :  { %413 = vmatpush3.bf16.msra.mxu0 %v493_v1  ;;  %484 = vmatpush3.bf16.msra.mxu1 %v493_v1  ;;  %v498_v6 = vld [vmem:[%s717_s1 + $0x58] sm:$0xff]   ;;  %v500_v8 = vld [vmem:[%s717_s1 + $0x60] sm:$0xff]   ;;  %v502_v10 = vld [vmem:[%s717_s1 + $0x68] sm:$0xff]  }
   0x4   :  { %414 = vmatprep.subr.bf16.mxu0 %v494_v2  ;;  %477 = vmatprep.subr.bf16.mxu1 %v494_v2  ;;  %v499_v7 = vld [vmem:[%s717_s1 + $0x18] sm:$0xff]   ;;  %v501_v9 = vld [vmem:[%s717_s1 + $0x20] sm:$0xff]   ;;  %v503_v13 = vld [vmem:[%s717_s1 + $0x28] sm:$0xff]  }
   0x5   :  { %v510_v11 = vld [vmem:[%s718_s0 + $0x4] ss:$8 sps:$4 sm:$0xff]   ;;  %v504_v14 = vld [vmem:[%s717_s1 + $0x70] sm:$0xff]   ;;  %v506_v16 = vld [vmem:[%s717_s1 + $0x78] sm:$0xff]  }
   0x6   :  { %v513_v12 = vld [vmem:[%s718_s0 + $0x44] ss:$8 sps:$4 sm:$0xff]   ;;  %278 = vmatprep.mubr.bf16.mxu0 %v510_v11  ;;  %v505_v15 = vld [vmem:[%s717_s1 + $0x30] sm:$0xff]   ;;  %v507_v17 = vld [vmem:[%s717_s1 + $0x38] sm:$0xff]  }
   0x7   :  { %415 = vmatpush3.bf16.msra.mxu0 %v495_v3  ;;  %485 = vmatpush3.bf16.msra.mxu1 %v495_v3  ;;  %v508_v18 = vld [vmem:[%s718_s0] ss:$8 sps:$4 sm:$0xff]   ;;  %v514_v20 = vld [vmem:[%s718_s0 + $0x14] ss:$8 sps:$4 sm:$0xff]   ;;  %v518_v22 = vld [vmem:[%s718_s0 + $0x10] ss:$8 sps:$4 sm:$0xff]  }
   0x8   :  { %416 = vmatprep.subr.bf16.mxu0 %v496_v4  ;;  %478 = vmatprep.subr.bf16.mxu1 %v496_v4  ;;  %v511_v19 = vld [vmem:[%s718_s0 + $0x40] ss:$8 sps:$4 sm:$0xff]   ;;  %v516_v21 = vld [vmem:[%s718_s0 + $0x54] ss:$8 sps:$4 sm:$0xff]   ;;  %v519_v23 = vld [vmem:[%s718_s0 + $0x50] ss:$8 sps:$4 sm:$0xff]  }
   0x9   :  { %310 = vmatprep.mubr.bf16.mxu1 %v513_v12  ;;  %v520_v24 = vld [vmem:[%s718_s0 + $0x24] ss:$8 sps:$4 sm:$0xff]   ;;  %v524_v26 = vld [vmem:[%s718_s0 + $0x20] ss:$8 sps:$4 sm:$0xff]   ;;  %v526_v28 = vld [vmem:[%s718_s0 + $0x34] ss:$8 sps:$4 sm:$0xff]  }
   0xa   :  { %v522_v25 = vld [vmem:[%s718_s0 + $0x64] ss:$8 sps:$4 sm:$0xff]   ;;  %v525_v27 = vld [vmem:[%s718_s0 + $0x60] ss:$8 sps:$4 sm:$0xff]   ;;  %v528_v29 = vld [vmem:[%s718_s0 + $0x74] ss:$8 sps:$4 sm:$0xff]  }
   0xb   :  { %417 = vmatpush3.bf16.msra.mxu0 %v497_v5  ;;  %486 = vmatpush3.bf16.msra.mxu1 %v497_v5  ;;  %v530_v30 = vld [vmem:[%s718_s0 + $0x30] ss:$8 sps:$4 sm:$0xff]   ;;  %v651_v34 = vld [vmem:[%s719_s2] ss:$0 sm:$0xff] }
   0xc   :  { %418 = vmatprep.subr.bf16.mxu0 %v498_v6  ;;  %479 = vmatprep.subr.bf16.mxu1 %v498_v6  ;;  %v531_v31 = vld [vmem:[%s718_s0 + $0x70] ss:$8 sps:$4 sm:$0xff]  }
   0xf   :  { %419 = vmatpush3.bf16.msra.mxu0 %v499_v7  ;;  %487 = vmatpush3.bf16.msra.mxu1 %v499_v7 }
  0x10   :  { %420 = vmatprep.subr.bf16.mxu0 %v500_v8  ;;  %480 = vmatprep.subr.bf16.mxu1 %v500_v8 }
  0x13   :  { %421 = vmatpush3.bf16.msra.mxu0 %v501_v9  ;;  %488 = vmatpush3.bf16.msra.mxu1 %v501_v9 }
  0x14   :  { %422 = vmatprep.subr.bf16.mxu0 %v502_v10  ;;  %481 = vmatprep.subr.bf16.mxu1 %v502_v10 }
  0x17   :  { %423 = vmatpush3.bf16.msra.mxu0 %v503_v13  ;;  %489 = vmatpush3.bf16.msra.mxu1 %v503_v13 }
  0x18   :  { %424 = vmatprep.subr.bf16.mxu0 %v504_v14  ;;  %482 = vmatprep.subr.bf16.mxu1 %v504_v14 }
  0x1b   :  { %425 = vmatpush3.bf16.msra.mxu0 %v505_v15  ;;  %490 = vmatpush3.bf16.msra.mxu1 %v505_v15 }
  0x1c   :  { %426 = vmatprep.subr.bf16.mxu0 %v506_v16  ;;  %483 = vmatprep.subr.bf16.mxu1 %v506_v16 }
  0x1f   :  { %427 = vmatpush3.bf16.msra.mxu0 %v507_v17  ;;  %491 = vmatpush3.bf16.msra.mxu1 %v507_v17 }
  0x22   :  { %279 = vmatmul.mubr.bf16.vlgmr.msra.gmra.mrb[0].mxu0 %v508_v18  ;;  %311 = vmatmul.mubr.bf16.vlgmr.msra.gmra.mrb[0].mxu1 %v511_v19 }
  0x23   :  { %286 = vmatprep.mubr.bf16.mxu0 %v514_v20  ;;  %318 = vmatprep.mubr.bf16.mxu1 %v516_v21 }
  0x2a   :  { %287 = vmatmul.mubr.bf16.gmra.mrb[4].mxu0 %v518_v22  ;;  %319 = vmatmul.mubr.bf16.gmra.mrb[4].mxu1 %v519_v23 }
  0x2b   :  { %294 = vmatprep.mubr.bf16.mxu0 %v520_v24  ;;  %326 = vmatprep.mubr.bf16.mxu1 %v522_v25 }
  0x32   :  { %295 = vmatmul.mubr.bf16.gmra.mrb[8].mxu0 %v524_v26  ;;  %327 = vmatmul.mubr.bf16.gmra.mrb[8].mxu1 %v525_v27 }
  0x33   :  { %302 = vmatprep.mubr.bf16.mxu0 %v526_v28  ;;  %334 = vmatprep.mubr.bf16.mxu1 %v528_v29 }
  0x3a   :  { %303 = vmatmul.mubr.bf16.gmra.mrb[12].mxu0 %v530_v30  ;;  %335 = vmatmul.mubr.bf16.gmra.mrb[12].mxu1 %v531_v31 }
  0xf5   :  { %v428_v32 = vpop.f32.mrb[0].mxu0  ;;  %v452_v33 = vpop.f32.mrb[0].mxu1 }
  0xf6   :  { %v429_v35 = vpop.f32.mrb[1].mxu0  ;;  %v453_v36 = vpop.f32.mrb[1].mxu1 }
  0xf7   :  { %v430_v37 = vadd.f32 %v429_v35, %v428_v32  ;;  %v454_v38 = vadd.f32 %v453_v36, %v452_v33  ;;  %v431_v39 = vpop.f32.mrb[2].mxu0  ;;  %v455_v40 = vpop.f32.mrb[2].mxu1 }
  0xf8   :  { %v432_v41 = vpop.f32.mrb[3].mxu0  ;;  %v456_v42 = vpop.f32.mrb[3].mxu1 }
  0xf9   :  { %v281_v43 = vadd.f32 %v430_v37, %v651_v34  ;;  %v313_v44 = vadd.f32 %v454_v38, %v651_v34  ;;  %v433_v45 = vadd.f32 %v432_v41, %v431_v39  ;;  %v457_v46 = vadd.f32 %v456_v42, %v455_v40 }
  0xfb   :  { %v343_v47 = vmax.f32 %v281_v43, 0.0  ;;  %v351_v48 = vmax.f32 %v313_v44, 0.0  ;;  %v284_v49 = vadd.f32 %v433_v45, %v651_v34  ;;  %v316_v50 = vadd.f32 %v457_v46, %v651_v34 }
  0xfd   :  { %359 = vst [vmem:[%s720_s3] sm:$0xff] %v343_v47  ;;  %367 = vst [vmem:[%s720_s3 + $0x40] sm:$0xff] %v351_v48  ;;  %v344_v51 = vmax.f32 %v284_v49, 0.0  ;;  %v352_v52 = vmax.f32 %v316_v50, 0.0  ;;  %v434_v53 = vpop.f32.mrb[4].mxu0  ;;  %v458_v54 = vpop.f32.mrb[4].mxu1 }
  0xfe   :  { %v435_v55 = vpop.f32.mrb[5].mxu0  ;;  %v459_v56 = vpop.f32.mrb[5].mxu1 }
  0xff   :  { %360 = vst [vmem:[%s720_s3 + $0x8] sm:$0xff] %v344_v51  ;;  %368 = vst [vmem:[%s720_s3 + $0x48] sm:$0xff] %v352_v52  ;;  %v436_v57 = vadd.f32 %v435_v55, %v434_v53  ;;  %v460_v58 = vadd.f32 %v459_v56, %v458_v54  ;;  %v437_v59 = vpop.f32.mrb[6].mxu0  ;;  %v461_v60 = vpop.f32.mrb[6].mxu1 }
 0x100   :  { %v438_v61 = vpop.f32.mrb[7].mxu0  ;;  %v462_v62 = vpop.f32.mrb[7].mxu1 }
 0x101   :  { %v289_v63 = vadd.f32 %v436_v57, %v651_v34  ;;  %v321_v0 = vadd.f32 %v460_v58, %v651_v34  ;;  %v439_v1 = vadd.f32 %v438_v61, %v437_v59  ;;  %v463_v2 = vadd.f32 %v462_v62, %v461_v60 }
 0x103   :  { %v345_v3 = vmax.f32 %v289_v63, 0.0  ;;  %v353_v4 = vmax.f32 %v321_v0, 0.0  ;;  %v292_v5 = vadd.f32 %v439_v1, %v651_v34  ;;  %v324_v6 = vadd.f32 %v463_v2, %v651_v34 }
 0x105   :  { %361 = vst [vmem:[%s720_s3 + $0x10] sm:$0xff] %v345_v3  ;;  %369 = vst [vmem:[%s720_s3 + $0x50] sm:$0xff] %v353_v4  ;;  %v346_v7 = vmax.f32 %v292_v5, 0.0  ;;  %v354_v8 = vmax.f32 %v324_v6, 0.0  ;;  %v440_v9 = vpop.f32.mrb[8].mxu0  ;;  %v464_v10 = vpop.f32.mrb[8].mxu1 }
 0x106   :  { %v441_v11 = vpop.f32.mrb[9].mxu0  ;;  %v465_v12 = vpop.f32.mrb[9].mxu1 }
 0x107   :  { %362 = vst [vmem:[%s720_s3 + $0x18] sm:$0xff] %v346_v7  ;;  %370 = vst [vmem:[%s720_s3 + $0x58] sm:$0xff] %v354_v8  ;;  %v442_v13 = vadd.f32 %v441_v11, %v440_v9  ;;  %v466_v14 = vadd.f32 %v465_v12, %v464_v10  ;;  %v443_v15 = vpop.f32.mrb[10].mxu0  ;;  %v467_v16 = vpop.f32.mrb[10].mxu1 }
 0x108   :  { %v444_v17 = vpop.f32.mrb[11].mxu0  ;;  %v468_v18 = vpop.f32.mrb[11].mxu1 }
 0x109   :  { %v297_v19 = vadd.f32 %v442_v13, %v651_v34  ;;  %v329_v20 = vadd.f32 %v466_v14, %v651_v34  ;;  %v445_v21 = vadd.f32 %v444_v17, %v443_v15  ;;  %v469_v22 = vadd.f32 %v468_v18, %v467_v16 }
 0x10b   :  { %v347_v23 = vmax.f32 %v297_v19, 0.0  ;;  %v355_v24 = vmax.f32 %v329_v20, 0.0  ;;  %v300_v25 = vadd.f32 %v445_v21, %v651_v34  ;;  %v332_v26 = vadd.f32 %v469_v22, %v651_v34 }
 0x10d   :  { %363 = vst [vmem:[%s720_s3 + $0x20] sm:$0xff] %v347_v23  ;;  %371 = vst [vmem:[%s720_s3 + $0x60] sm:$0xff] %v355_v24  ;;  %v348_v27 = vmax.f32 %v300_v25, 0.0  ;;  %v356_v28 = vmax.f32 %v332_v26, 0.0  ;;  %v446_v29 = vpop.f32.mrb[12].mxu0  ;;  %v470_v30 = vpop.f32.mrb[12].mxu1 }
 0x10e   :  { %v447_v31 = vpop.f32.mrb[13].mxu0  ;;  %v471_v32 = vpop.f32.mrb[13].mxu1 }
 0x10f   :  { %364 = vst [vmem:[%s720_s3 + $0x28] sm:$0xff] %v348_v27  ;;  %372 = vst [vmem:[%s720_s3 + $0x68] sm:$0xff] %v356_v28  ;;  %v448_v33 = vadd.f32 %v447_v31, %v446_v29  ;;  %v472_v35 = vadd.f32 %v471_v32, %v470_v30  ;;  %v449_v36 = vpop.f32.mrb[14].mxu0  ;;  %v473_v37 = vpop.f32.mrb[14].mxu1 }
 0x110   :  { %v450_v38 = vpop.f32.mrb[15].mxu0  ;;  %v474_v39 = vpop.f32.mrb[15].mxu1 }
 0x111   :  { %v305_v40 = vadd.f32 %v448_v33, %v651_v34  ;;  %v337_v41 = vadd.f32 %v472_v35, %v651_v34  ;;  %v451_v42 = vadd.f32 %v450_v38, %v449_v36  ;;  %v475_v43 = vadd.f32 %v474_v39, %v473_v37 }
 0x113   :  { %v349_v44 = vmax.f32 %v305_v40, 0.0  ;;  %v357_v45 = vmax.f32 %v337_v41, 0.0  ;;  %v308_v46 = vadd.f32 %v451_v42, %v651_v34  ;;  %v340_v47 = vadd.f32 %v475_v43, %v651_v34 }
 0x115   :  { %365 = vst [vmem:[%s720_s3 + $0x30] sm:$0xff] %v349_v44  ;;  %373 = vst [vmem:[%s720_s3 + $0x70] sm:$0xff] %v357_v45  ;;  %v350_v48 = vmax.f32 %v308_v46, 0.0  ;;  %v358_v49 = vmax.f32 %v340_v47, 0.0 }
 0x117   :  { %366 = vst [vmem:[%s720_s3 + $0x38] sm:$0xff] %v350_v48  ;;  %374 = vst [vmem:[%s720_s3 + $0x78] sm:$0xff] %v358_v49 }

// kernel: resnet34_forward.19
= control target key start
LH: loop header
LB: loop body
LE: loop exit
PB: predicated region body
PF: predicated region fallthrough
CT: control target
= control target key end

     0   :  { %vm72_vm0 = vcmask 523264   ;;  %vm74_vm1 = vcmask 516096   ;;  %vm394_vm2 = vcmask 1041409   ;;  %vm396_vm3 = vcmask 1042434   ;;  %s817_s0 = inlined_call_operand.vmem [shape: f32[32,9,64], index: 0, kind: input, shape index: {}]   ;;  %s818_s1 = inlined_call_operand.vmem [shape: f32[32,64], index: 1, kind: output, shape index: {}]  }
   0x1   :  { %v8_v0 = vld [vmem:[%s817_s0] sm:$0xff]  ;;  %v9_v1 = vld [vmem:[%s817_s0 + $0x8] sm:$0x1]  ;;  %v10_v2 = vld [vmem:[%s817_s0 + $0x10] sm:$0xff]  ;;  %vm398_vm4 = vcmask 1043459   ;;  %vm400_vm5 = vcmask 1044484  }
   0x2   :  { %v11_v3 = vld [vmem:[%s817_s0 + $0x18] sm:$0x1]  ;;  %v12_v4 = vld [vmem:[%s817_s0 + $0x20] sm:$0xff]  ;;  %v13_v5 = vld [vmem:[%s817_s0 + $0x28] sm:$0x1]  ;;  %v73_v6 = vsel %vm72_vm0, %v8_v0, -inf }
   0x3   :  { %v75_v7 = vsel %vm74_vm1, %v9_v1, -inf  ;;  %v83_v8 = vsel %vm72_vm0, %v10_v2, -inf  ;;  %v14_v9 = vld [vmem:[%s817_s0 + $0x30] sm:$0xff]  ;;  %v84_v11 = vsel %vm74_vm1, %v11_v3, -inf  ;;  %v92_v13 = vsel %vm72_vm0, %v12_v4, -inf  ;;  %v16_v16 = vld [vmem:[%s817_s0 + $0x40] sm:$0xff] }
   0x4   :  { %v76_v10 = vmax.f32 %v73_v6, %v75_v7  ;;  %v85_v12 = vmax.f32 %v83_v8, %v84_v11  ;;  %v93_v14 = vsel %vm74_vm1, %v13_v5, -inf  ;;  %v15_v15 = vld [vmem:[%s817_s0 + $0x38] sm:$0x1]  ;;  %v101_v20 = vsel %vm72_vm0, %v14_v9, -inf  ;;  %v17_v21 = vld [vmem:[%s817_s0 + $0x48] sm:$0x1] }
   0x5   :  { %v94_v18 = vmax.f32 %v92_v13, %v93_v14  ;;  %v102_v25 = vsel %vm74_vm1, %v15_v15, -inf  ;;  %v110_v26 = vsel %vm72_vm0, %v16_v16, -inf  ;;  %v111_v31 = vsel %vm74_vm1, %v17_v21, -inf  ;;  %v18_v32 = vld [vmem:[%s817_s0 + $0x50] sm:$0xff]  ;;  %v19_v38 = vld [vmem:[%s817_s0 + $0x58] sm:$0x1] }
   0x6   :  { %v77_v17 = vrot.slane %v76_v10, 4  ;;  %v86_v19 = vrot.slane %v85_v12, 4  ;;  %v103_v29 = vmax.f32 %v101_v20, %v102_v25  ;;  %v112_v35 = vmax.f32 %v110_v26, %v111_v31  ;;  %v20_v41 = vld [vmem:[%s817_s0 + $0x60] sm:$0xff]  ;;  %v21_v46 = vld [vmem:[%s817_s0 + $0x68] sm:$0x1]  ;;  %v22_v53 = vld [vmem:[%s817_s0 + $0x70] sm:$0xff] }
   0x7   :  { %v95_v23 = vrot.slane %v94_v18, 4  ;;  %v119_v45 = vsel %vm72_vm0, %v18_v32, -inf  ;;  %v120_v52 = vsel %vm74_vm1, %v19_v38, -inf  ;;  %v128_v56 = vsel %vm72_vm0, %v20_v41, -inf  ;;  %v23_v57 = vld [vmem:[%s817_s0 + $0x78] sm:$0x1] }
   0x8   :  { %v78_v22 = vmax.f32 %v76_v10, %v77_v17  ;;  %v87_v24 = vmax.f32 %v85_v12, %v86_v19  ;;  %v104_v37 = vrot.slane %v103_v29, 4  ;;  %v113_v44 = vrot.slane %v112_v35, 4  ;;  %v24_v58 = vld [vmem:[%s817_s0 + $0x80] sm:$0xff]  ;;  %v25_v63 = vld [vmem:[%s817_s0 + $0x88] sm:$0x1]  ;;  %v26_v2 = vld [vmem:[%s817_s0 + $0x90] sm:$0xff] }
   0x9   :  { %v96_v28 = vmax.f32 %v94_v18, %v95_v23  ;;  %v121_v55 = vmax.f32 %v119_v45, %v120_v52  ;;  %v129_v61 = vsel %vm74_vm1, %v21_v46, -inf  ;;  %v137_v5 = vsel %vm72_vm0, %v22_v53, -inf  ;;  %v27_v7 = vld [vmem:[%s817_s0 + $0x98] sm:$0x1]  ;;  %v28_v8 = vld [vmem:[%s817_s0 + $0xa0] sm:$0xff]  ;;  %v30_v18 = vld [vmem:[%s817_s0 + $0xb0] sm:$0xff] }
   0xa   :  { %v79_v27 = vrot.slane %v78_v22, 2  ;;  %v88_v30 = vrot.slane %v87_v24, 2  ;;  %v105_v43 = vmax.f32 %v103_v29, %v104_v37  ;;  %v114_v51 = vmax.f32 %v112_v35, %v113_v44  ;;  %v29_v13 = vld [vmem:[%s817_s0 + $0xa8] sm:$0x1]  ;;  %v31_v19 = vld [vmem:[%s817_s0 + $0xb8] sm:$0x1] }
   0xb   :  { %v97_v34 = vrot.slane %v96_v28, 2  ;;  %v122_v0 = vrot.slane %v121_v55, 4  ;;  %v130_v1 = vmax.f32 %v128_v56, %v129_v61  ;;  %v138_v11 = vsel %vm74_vm1, %v23_v57, -inf  ;;  %v33_v37 = vld [vmem:[%s817_s0 + $0xc8] sm:$0x1]  ;;  %v34_v46 = vld [vmem:[%s817_s0 + $0xd0] sm:$0xff] }
   0xc   :  { %v80_v33 = vmax.f32 %v78_v22, %v79_v27  ;;  %v89_v36 = vmax.f32 %v87_v24, %v88_v30  ;;  %v106_v50 = vrot.slane %v105_v43, 2  ;;  %v115_v60 = vrot.slane %v114_v51, 2 }
   0xd   :  { %v98_v40 = vmax.f32 %v96_v28, %v97_v34  ;;  %v123_v9 = vmax.f32 %v121_v55, %v122_v0  ;;  %v131_v10 = vrot.slane %v130_v1, 4  ;;  %v146_v12 = vsel %vm72_vm0, %v24_v58, -inf  ;;  %v32_v28 = vld [vmem:[%s817_s0 + $0xc0] sm:$0xff] }
   0xe   :  { %v81_v39 = vrot.slane %v80_v33, 1  ;;  %v90_v42 = vrot.slane %v89_v36, 1  ;;  %v107_v59 = vmax.f32 %v105_v43, %v106_v50  ;;  %v116_v4 = vmax.f32 %v114_v51, %v115_v60  ;;  %v35_v51 = vld [vmem:[%s817_s0 + $0xd8] sm:$0x1]  ;;  %v36_v60 = vld [vmem:[%s817_s0 + $0xe0] sm:$0xff] }
   0xf   :  { %v99_v48 = vrot.slane %v98_v40, 1  ;;  %v139_v16 = vmax.f32 %v137_v5, %v138_v11  ;;  %v147_v17 = vsel %vm74_vm1, %v25_v63, -inf  ;;  %v124_v20 = vrot.slane %v123_v9, 2 }
  0x10   :  { %v82_v47 = vmax.f32 %v80_v33, %v81_v39  ;;  %v91_v49 = vmax.f32 %v89_v36, %v90_v42  ;;  %v108_v3 = vrot.slane %v107_v59, 1  ;;  %v117_v15 = vrot.slane %v116_v4, 1 }
  0x11   :  { %v100_v54 = vmax.f32 %v98_v40, %v99_v48  ;;  %v132_v21 = vmax.f32 %v130_v1, %v131_v10  ;;  %v148_v22 = vmax.f32 %v146_v12, %v147_v17  ;;  %v155_v23 = vsel %vm72_vm0, %v26_v2, -inf  ;;  %v37_v1 = vld [vmem:[%s817_s0 + $0xe8] sm:$0x1]  ;;  %v39_v12 = vld [vmem:[%s817_s0 + $0xf8] sm:$0x1] }
  0x12   :  { %v395_v62 = vsel %vm394_vm2, %v91_v49, %v82_v47  ;;  %v538_v14 = vmax.f32 %v107_v59, %v108_v3  ;;  %v548_v24 = vmax.f32 %v116_v4, %v117_v15  ;;  %v140_v25 = vrot.slane %v139_v16, 4 }
  0x13   :  { %v525_v6 = vsel %vm396_vm3, %v100_v54, %v395_v62  ;;  %v156_v26 = vsel %vm74_vm1, %v27_v7, -inf  ;;  %v164_v27 = vsel %vm72_vm0, %v28_v8, -inf  ;;  %v125_v29 = vmax.f32 %v123_v9, %v124_v20  ;;  %v38_v7 = vld [vmem:[%s817_s0 + $0xf0] sm:$0xff] }
  0x14   :  { %v133_v30 = vrot.slane %v132_v21, 2  ;;  %v149_v31 = vrot.slane %v148_v22, 4  ;;  %v157_v32 = vmax.f32 %v155_v23, %v156_v26  ;;  %v141_v33 = vmax.f32 %v139_v16, %v140_v25  ;;  %v41_v23 = vld [vmem:[%s817_s0 + $0x108] sm:$0x1] }
  0x15   :  { %v165_v34 = vsel %vm74_vm1, %v29_v13, -inf  ;;  %v173_v35 = vsel %vm72_vm0, %v30_v18, -inf  ;;  %v174_v36 = vsel %vm74_vm1, %v31_v19, -inf  ;;  %v126_v38 = vrot.slane %v125_v29, 1  ;;  %v40_v18 = vld [vmem:[%s817_s0 + $0x100] sm:$0xff] }
  0x16   :  { %v134_v39 = vmax.f32 %v132_v21, %v133_v30  ;;  %v150_v40 = vmax.f32 %v148_v22, %v149_v31  ;;  %v158_v41 = vrot.slane %v157_v32, 4  ;;  %v142_v42 = vrot.slane %v141_v33, 2 }
  0x17   :  { %v166_v43 = vmax.f32 %v164_v27, %v165_v34  ;;  %v175_v44 = vmax.f32 %v173_v35, %v174_v36  ;;  %v182_v45 = vsel %vm72_vm0, %v32_v28, -inf  ;;  %v565_v47 = vmax.f32 %v125_v29, %v126_v38  ;;  %v43_v34 = vld [vmem:[%s817_s0 + $0x118] sm:$0x1]  ;;  %v44_v35 = vld [vmem:[%s817_s0 + $0x120] sm:$0xff] }
  0x18   :  { %v135_v48 = vrot.slane %v134_v39, 1  ;;  %v151_v49 = vrot.slane %v150_v40, 2  ;;  %v159_v50 = vmax.f32 %v157_v32, %v158_v41  ;;  %v143_v52 = vmax.f32 %v141_v33, %v142_v42  ;;  %v42_v33 = vld [vmem:[%s817_s0 + $0x110] sm:$0xff] }
  0x19   :  { %v167_v53 = vrot.slane %v166_v43, 4  ;;  %v176_v54 = vrot.slane %v175_v44, 4  ;;  %v183_v55 = vsel %vm74_vm1, %v33_v37, -inf  ;;  %v191_v0 = vsel %vm72_vm0, %v34_v46, -inf }
  0x1a   :  { %v571_v56 = vmax.f32 %v134_v39, %v135_v48  ;;  %v152_v57 = vmax.f32 %v150_v40, %v151_v49  ;;  %v160_v58 = vrot.slane %v159_v50, 2  ;;  %v184_v59 = vmax.f32 %v182_v45, %v183_v55  ;;  %v46_v45 = vld [vmem:[%s817_s0 + $0x130] sm:$0xff]  ;;  %v47_v55 = vld [vmem:[%s817_s0 + $0x138] sm:$0x1] }
  0x1b   :  { %v144_v61 = vrot.slane %v143_v52, 1  ;;  %v168_v62 = vmax.f32 %v166_v43, %v167_v53  ;;  %v177_v63 = vmax.f32 %v175_v44, %v176_v54  ;;  %v192_v5 = vsel %vm74_vm1, %v35_v51, -inf  ;;  %v45_v44 = vld [vmem:[%s817_s0 + $0x128] sm:$0x1] }
  0x1c   :  { %v153_v2 = vrot.slane %v152_v57, 1  ;;  %v161_v3 = vmax.f32 %v159_v50, %v160_v58  ;;  %v185_v4 = vrot.slane %v184_v59, 4  ;;  %v193_v11 = vmax.f32 %v191_v0, %v192_v5 }
  0x1d   :  { %v584_v8 = vmax.f32 %v143_v52, %v144_v61  ;;  %v169_v9 = vrot.slane %v168_v62, 2  ;;  %v178_v10 = vrot.slane %v177_v63, 2  ;;  %v200_v17 = vsel %vm72_vm0, %v36_v60, -inf }
  0x1e   :  { %v589_v13 = vmax.f32 %v152_v57, %v153_v2  ;;  %v162_v15 = vrot.slane %v161_v3, 1  ;;  %v186_v16 = vmax.f32 %v184_v59, %v185_v4  ;;  %v194_v21 = vrot.slane %v193_v11, 4  ;;  %v48_v57 = vld [vmem:[%s817_s0 + $0x140] sm:$0xff]  ;;  %v49_v2 = vld [vmem:[%s817_s0 + $0x148] sm:$0x1] }
  0x1f   :  { %v170_v19 = vmax.f32 %v168_v62, %v169_v9  ;;  %v179_v20 = vmax.f32 %v177_v63, %v178_v10  ;;  %v201_v22 = vsel %vm74_vm1, %v37_v1, -inf  ;;  %v209_v28 = vsel %vm72_vm0, %v38_v7, -inf }
  0x20   :  { %v599_v25 = vmax.f32 %v161_v3, %v162_v15  ;;  %v187_v26 = vrot.slane %v186_v16, 2  ;;  %v202_v27 = vmax.f32 %v200_v17, %v201_v22  ;;  %v195_v31 = vmax.f32 %v193_v11, %v194_v21  ;;  %v50_v3 = vld [vmem:[%s817_s0 + $0x150] sm:$0xff] }
  0x21   :  { %v171_v29 = vrot.slane %v170_v19, 1  ;;  %v180_v30 = vrot.slane %v179_v20, 1  ;;  %v210_v32 = vsel %vm74_vm1, %v39_v12, -inf  ;;  %v218_v39 = vsel %vm72_vm0, %v40_v18, -inf }
  0x22   :  { %v188_v36 = vmax.f32 %v186_v16, %v187_v26  ;;  %v203_v37 = vrot.slane %v202_v27, 4  ;;  %v211_v38 = vmax.f32 %v209_v28, %v210_v32  ;;  %v196_v42 = vrot.slane %v195_v31, 2  ;;  %v51_v16 = vld [vmem:[%s817_s0 + $0x158] sm:$0x1]  ;;  %v53_v32 = vld [vmem:[%s817_s0 + $0x168] sm:$0x1] }
  0x23   :  { %v613_v40 = vmax.f32 %v170_v19, %v171_v29  ;;  %v615_v41 = vmax.f32 %v179_v20, %v180_v30  ;;  %v219_v43 = vsel %vm74_vm1, %v41_v23, -inf  ;;  %v227_v52 = vsel %vm72_vm0, %v42_v33, -inf }
  0x24   :  { %v189_v46 = vrot.slane %v188_v36, 1  ;;  %v204_v48 = vmax.f32 %v202_v27, %v203_v37  ;;  %v212_v49 = vrot.slane %v211_v38, 4  ;;  %v220_v50 = vmax.f32 %v218_v39, %v219_v43  ;;  %v52_v27 = vld [vmem:[%s817_s0 + $0x160] sm:$0xff]  ;;  %v54_v43 = vld [vmem:[%s817_s0 + $0x170] sm:$0xff] }
  0x25   :  { %v197_v51 = vmax.f32 %v195_v31, %v196_v42  ;;  %v228_v53 = vsel %vm74_vm1, %v43_v34, -inf  ;;  %v236_v54 = vsel %vm72_vm0, %v44_v35, -inf  ;;  %v237_v0 = vsel %vm74_vm1, %v45_v44, -inf  ;;  %v55_v44 = vld [vmem:[%s817_s0 + $0x178] sm:$0x1] }
  0x26   :  { %v633_v58 = vmax.f32 %v188_v36, %v189_v46  ;;  %v205_v59 = vrot.slane %v204_v48, 2  ;;  %v213_v60 = vmax.f32 %v211_v38, %v212_v49  ;;  %v221_v61 = vrot.slane %v220_v50, 4 }
  0x27   :  { %v198_v62 = vrot.slane %v197_v51, 1  ;;  %v229_v63 = vmax.f32 %v227_v52, %v228_v53  ;;  %v245_v1 = vsel %vm72_vm0, %v46_v45, -inf  ;;  %v238_v9 = vmax.f32 %v236_v54, %v237_v0  ;;  %v56_v54 = vld [vmem:[%s817_s0 + $0x180] sm:$0xff] }
  0x28   :  { %v206_v4 = vmax.f32 %v204_v48, %v205_v59  ;;  %v214_v5 = vrot.slane %v213_v60, 2  ;;  %v222_v7 = vmax.f32 %v220_v50, %v221_v61  ;;  %v246_v12 = vsel %vm74_vm1, %v47_v55, -inf  ;;  %v57_v61 = vld [vmem:[%s817_s0 + $0x188] sm:$0x1] }
  0x29   :  { %v643_v10 = vmax.f32 %v197_v51, %v198_v62  ;;  %v230_v11 = vrot.slane %v229_v63, 4  ;;  %v254_v15 = vsel %vm72_vm0, %v48_v57, -inf  ;;  %v239_v20 = vrot.slane %v238_v9, 4 }
  0x2a   :  { %v207_v17 = vrot.slane %v206_v4, 1  ;;  %v215_v18 = vmax.f32 %v213_v60, %v214_v5  ;;  %v223_v19 = vrot.slane %v222_v7, 2  ;;  %v247_v22 = vmax.f32 %v245_v1, %v246_v12 }
  0x2b   :  { %v231_v21 = vmax.f32 %v229_v63, %v230_v11  ;;  %v255_v23 = vsel %vm74_vm1, %v49_v2, -inf  ;;  %v263_v26 = vsel %vm72_vm0, %v50_v3, -inf  ;;  %v240_v31 = vmax.f32 %v238_v9, %v239_v20  ;;  %v58_v2 = vld [vmem:[%s817_s0 + $0x190] sm:$0xff]  ;;  %v59_v9 = vld [vmem:[%s817_s0 + $0x198] sm:$0x1] }
  0x2c   :  { %v655_v28 = vmax.f32 %v206_v4, %v207_v17  ;;  %v216_v29 = vrot.slane %v215_v18, 1  ;;  %v224_v30 = vmax.f32 %v222_v7, %v223_v19  ;;  %v248_v34 = vrot.slane %v247_v22, 4 }
  0x2d   :  { %v232_v33 = vrot.slane %v231_v21, 2  ;;  %v256_v35 = vmax.f32 %v254_v15, %v255_v23  ;;  %v264_v36 = vsel %vm74_vm1, %v51_v16, -inf  ;;  %v241_v39 = vrot.slane %v240_v31, 2 }
  0x2e   :  { %v661_v37 = vmax.f32 %v215_v18, %v216_v29  ;;  %v225_v38 = vrot.slane %v224_v30, 1  ;;  %v265_v42 = vmax.f32 %v263_v26, %v264_v36  ;;  %v249_v46 = vmax.f32 %v247_v22, %v248_v34  ;;  %v61_v22 = vld [vmem:[%s817_s0 + $0x1a8] sm:$0x1]  ;;  %v62_v34 = vld [vmem:[%s817_s0 + $0x1b0] sm:$0xff] }
  0x2f   :  { %v233_v45 = vmax.f32 %v231_v21, %v232_v33  ;;  %v257_v48 = vrot.slane %v256_v35, 4  ;;  %v272_v49 = vsel %vm72_vm0, %v52_v27, -inf  ;;  %v242_v51 = vmax.f32 %v240_v31, %v241_v39  ;;  %v60_v21 = vld [vmem:[%s817_s0 + $0x1a0] sm:$0xff] }
  0x30   :  { %v670_v50 = vmax.f32 %v224_v30, %v225_v38  ;;  %v266_v52 = vrot.slane %v265_v42, 4  ;;  %v273_v53 = vsel %vm74_vm1, %v53_v32, -inf  ;;  %v250_v57 = vrot.slane %v249_v46, 2 }
  0x31   :  { %v234_v55 = vrot.slane %v233_v45, 1  ;;  %v258_v59 = vmax.f32 %v256_v35, %v257_v48  ;;  %v274_v60 = vmax.f32 %v272_v49, %v273_v53  ;;  %v243_v62 = vrot.slane %v242_v51, 1  ;;  %v63_v35 = vld [vmem:[%s817_s0 + $0x1b8] sm:$0x1]  ;;  %v64_v48 = vld [vmem:[%s817_s0 + $0x1c0] sm:$0xff] }
  0x32   :  { %v267_v63 = vmax.f32 %v265_v42, %v266_v52  ;;  %v281_v0 = vsel %vm72_vm0, %v54_v43, -inf  ;;  %v282_v1 = vsel %vm74_vm1, %v55_v44, -inf  ;;  %v251_v4 = vmax.f32 %v249_v46, %v250_v57  ;;  %v65_v49 = vld [vmem:[%s817_s0 + $0x1c8] sm:$0x1] }
  0x33   :  { %v684_v3 = vmax.f32 %v233_v45, %v234_v55  ;;  %v259_v5 = vrot.slane %v258_v59, 2  ;;  %v275_v7 = vrot.slane %v274_v60, 4  ;;  %v689_v11 = vmax.f32 %v242_v51, %v243_v62  ;;  %v67_v62 = vld [vmem:[%s817_s0 + $0x1d8] sm:$0x1] }
  0x34   :  { %v268_v12 = vrot.slane %v267_v63, 2  ;;  %v283_v15 = vmax.f32 %v281_v0, %v282_v1  ;;  %v290_v16 = vsel %vm72_vm0, %v56_v54, -inf  ;;  %v252_v17 = vrot.slane %v251_v4, 1 }
  0x35   :  { %v260_v18 = vmax.f32 %v258_v59, %v259_v5  ;;  %v276_v19 = vmax.f32 %v274_v60, %v275_v7  ;;  %v291_v20 = vsel %vm74_vm1, %v57_v61, -inf  ;;  %v299_v29 = vsel %vm72_vm0, %v58_v2, -inf  ;;  %v66_v61 = vld [vmem:[%s817_s0 + $0x1d0] sm:$0xff] }
  0x36   :  { %v269_v23 = vmax.f32 %v267_v63, %v268_v12  ;;  %v284_v26 = vrot.slane %v283_v15, 4  ;;  %v292_v27 = vmax.f32 %v290_v16, %v291_v20  ;;  %v700_v30 = vmax.f32 %v251_v4, %v252_v17  ;;  %v68_v12 = vld [vmem:[%s817_s0 + $0x1e0] sm:$0xff] }
  0x37   :  { %v261_v31 = vrot.slane %v260_v18, 1  ;;  %v277_v32 = vrot.slane %v276_v19, 2  ;;  %v300_v33 = vsel %vm74_vm1, %v59_v9, -inf  ;;  %v308_v45 = vsel %vm72_vm0, %v60_v21, -inf }
  0x38   :  { %v270_v36 = vrot.slane %v269_v23, 1  ;;  %v285_v38 = vmax.f32 %v283_v15, %v284_v26  ;;  %v293_v39 = vrot.slane %v292_v27, 4  ;;  %v301_v42 = vmax.f32 %v299_v29, %v300_v33  ;;  %v71_v33 = vld [vmem:[%s817_s0 + $0x1f8] sm:$0x1] }
  0x39   :  { %v709_v43 = vmax.f32 %v260_v18, %v261_v31  ;;  %v278_v44 = vmax.f32 %v276_v19, %v277_v32  ;;  %v309_v46 = vsel %vm74_vm1, %v61_v22, -inf  ;;  %v317_v59 = vsel %vm72_vm0, %v62_v34, -inf  ;;  %v69_v19 = vld [vmem:[%s817_s0 + $0x1e8] sm:$0x1]  ;;  %v70_v32 = vld [vmem:[%s817_s0 + $0x1f0] sm:$0xff] }
  0x3a   :  { %v719_v51 = vmax.f32 %v269_v23, %v270_v36  ;;  %v286_v52 = vrot.slane %v285_v38, 2  ;;  %v294_v53 = vmax.f32 %v292_v27, %v293_v39  ;;  %v302_v54 = vrot.slane %v301_v42, 4 }
  0x3b   :  { %v279_v55 = vrot.slane %v278_v44, 1  ;;  %v310_v57 = vmax.f32 %v308_v45, %v309_v46  ;;  %v318_v60 = vsel %vm74_vm1, %v63_v35, -inf  ;;  %v326_v7 = vsel %vm72_vm0, %v64_v48, -inf }
  0x3c   :  { %v287_v63 = vmax.f32 %v285_v38, %v286_v52  ;;  %v295_v0 = vrot.slane %v294_v53, 2  ;;  %v303_v1 = vmax.f32 %v301_v42, %v302_v54  ;;  %v319_v2 = vmax.f32 %v317_v59, %v318_v60 }
  0x3d   :  { %v729_v4 = vmax.f32 %v278_v44, %v279_v55  ;;  %v311_v5 = vrot.slane %v310_v57, 4  ;;  %v327_v9 = vsel %vm74_vm1, %v65_v49, -inf  ;;  %v335_v22 = vsel %vm72_vm0, %v66_v61, -inf }
  0x3e   :  { %v288_v15 = vrot.slane %v287_v63, 1  ;;  %v296_v16 = vmax.f32 %v294_v53, %v295_v0  ;;  %v304_v17 = vrot.slane %v303_v1, 2  ;;  %v320_v18 = vrot.slane %v319_v2, 4 }
  0x3f   :  { %v312_v20 = vmax.f32 %v310_v57, %v311_v5  ;;  %v328_v21 = vmax.f32 %v326_v7, %v327_v9  ;;  %v336_v23 = vsel %vm74_vm1, %v67_v62, -inf  ;;  %v344_v38 = vsel %vm72_vm0, %v68_v12, -inf }
  0x40   :  { %v741_v26 = vmax.f32 %v287_v63, %v288_v15  ;;  %v297_v27 = vrot.slane %v296_v16, 1  ;;  %v305_v29 = vmax.f32 %v303_v1, %v304_v17  ;;  %v321_v31 = vmax.f32 %v319_v2, %v320_v18 }
  0x41   :  { %v313_v34 = vrot.slane %v312_v20, 2  ;;  %v329_v35 = vrot.slane %v328_v21, 4  ;;  %v337_v36 = vmax.f32 %v335_v22, %v336_v23  ;;  %v345_v45 = vsel %vm74_vm1, %v69_v19, -inf }
  0x42   :  { %v298_v39 = vmax.f32 %v296_v16, %v297_v27  ;;  %v306_v42 = vrot.slane %v305_v29, 1  ;;  %v322_v44 = vrot.slane %v321_v31, 2  ;;  %v346_v52 = vmax.f32 %v344_v38, %v345_v45 }
  0x43   :  { %v314_v46 = vmax.f32 %v312_v20, %v313_v34  ;;  %v330_v48 = vmax.f32 %v328_v21, %v329_v35  ;;  %v338_v49 = vrot.slane %v337_v36, 4  ;;  %v353_v55 = vsel %vm72_vm0, %v70_v32, -inf }
  0x44   :  { %v307_v53 = vmax.f32 %v305_v29, %v306_v42  ;;  %v323_v54 = vmax.f32 %v321_v31, %v322_v44  ;;  %v354_v57 = vsel %vm74_vm1, %v71_v33, -inf  ;;  %v347_v62 = vrot.slane %v346_v52, 4 }
  0x45   :  { %v315_v59 = vrot.slane %v314_v46, 1  ;;  %v331_v60 = vrot.slane %v330_v48, 2  ;;  %v339_v61 = vmax.f32 %v337_v36, %v338_v49  ;;  %v355_v0 = vmax.f32 %v353_v55, %v354_v57 }
  0x46   :  { %v324_v63 = vrot.slane %v323_v54, 1  ;;  %v399_v1 = vsel %vm398_vm4, %v538_v14, %v525_v6  ;;  %vm402_vm6 = vcmask 1045509   ;;  %v348_v9 = vmax.f32 %v346_v52, %v347_v62 }
  0x47   :  { %v316_v2 = vmax.f32 %v314_v46, %v315_v59  ;;  %v332_v5 = vmax.f32 %v330_v48, %v331_v60  ;;  %v340_v7 = vrot.slane %v339_v61, 2  ;;  %v356_v15 = vrot.slane %v355_v0, 4 }
  0x48   :  { %v325_v12 = vmax.f32 %v323_v54, %v324_v63  ;;  %v401_v16 = vsel %vm400_vm5, %v548_v24, %v399_v1  ;;  %vm404_vm7 = vcmask 1046534   ;;  %v349_v19 = vrot.slane %v348_v9, 2 }
  0x49   :  { %v333_v17 = vrot.slane %v332_v5, 1  ;;  %v341_v18 = vmax.f32 %v339_v61, %v340_v7  ;;  %v403_v20 = vsel %vm402_vm6, %v565_v47, %v401_v16  ;;  %v357_v21 = vmax.f32 %v355_v0, %v356_v15 }
  0x4a   :  { %v405_v6 = vsel %vm404_vm7, %v571_v56, %v403_v20  ;;  %vm406_vm8 = vcmask 1047559   ;;  %v408_v14 = vsel %vm394_vm2, %v599_v25, %v589_v13  ;;  %v350_v27 = vmax.f32 %v348_v9, %v349_v19 }
  0x4b   :  { %v334_v22 = vmax.f32 %v332_v5, %v333_v17  ;;  %v342_v23 = vrot.slane %v341_v18, 1  ;;  %v407_v24 = vsel %vm406_vm8, %v584_v8, %v405_v6  ;;  %v358_v29 = vrot.slane %v357_v21, 2 }
  0x4c   :  { %v409_v31 = vsel %vm396_vm3, %v613_v40, %v408_v14  ;;  %v415_v47 = vsel %vm394_vm2, %v684_v3, %v670_v50  ;;  %v422_v56 = vsel %vm394_vm2, %v307_v53, %v298_v39  ;;  %433 = vst.msk [vmem:[%s818_s1] sm:$0xff] %vm72_vm0, %v407_v24  ;;  %v351_v25 = vrot.slane %v350_v27, 1 }
  0x4d   :  { %v343_v13 = vmax.f32 %v341_v18, %v342_v23  ;;  %v410_v8 = vsel %vm398_vm4, %v615_v41, %v409_v31  ;;  %v416_v32 = vsel %vm396_vm3, %v689_v11, %v415_v47  ;;  %v359_v40 = vmax.f32 %v357_v21, %v358_v29 }
  0x4e   :  { %v411_v33 = vsel %vm400_vm5, %v633_v58, %v410_v8  ;;  %v417_v50 = vsel %vm398_vm4, %v700_v30, %v416_v32  ;;  %v423_v3 = vsel %vm396_vm3, %v316_v2, %v422_v56  ;;  %v352_v34 = vmax.f32 %v350_v27, %v351_v25 }
  0x4f   :  { %v412_v35 = vsel %vm402_vm6, %v643_v10, %v411_v33  ;;  %v418_v36 = vsel %vm400_vm5, %v709_v43, %v417_v50  ;;  %v424_v41 = vsel %vm398_vm4, %v325_v12, %v423_v3  ;;  %v360_v38 = vrot.slane %v359_v40, 1 }
  0x50   :  { %v413_v11 = vsel %vm404_vm7, %v655_v28, %v412_v35  ;;  %v419_v58 = vsel %vm402_vm6, %v719_v51, %v418_v36  ;;  %v425_v30 = vsel %vm400_vm5, %v334_v22, %v424_v41 }
  0x51   :  { %v414_v39 = vsel %vm406_vm8, %v661_v37, %v413_v11  ;;  %v420_v10 = vsel %vm404_vm7, %v729_v4, %v419_v58  ;;  %v426_v42 = vsel %vm402_vm6, %v343_v13, %v425_v30  ;;  %v361_v43 = vmax.f32 %v359_v40, %v360_v38 }
  0x52   :  { %v421_v44 = vsel %vm406_vm8, %v741_v26, %v420_v10  ;;  %v427_v45 = vsel %vm404_vm7, %v352_v34, %v426_v42  ;;  %434 = vst.msk [vmem:[%s818_s1 + $0x8] sm:$0xff] %vm72_vm0, %v414_v39 }
  0x53   :  { %435 = vst.msk [vmem:[%s818_s1 + $0x10] sm:$0xff] %vm72_vm0, %v421_v44  ;;  %v428_v28 = vsel %vm406_vm8, %v361_v43, %v427_v45 }
  0x54   :  { %436 = vst.msk [vmem:[%s818_s1 + $0x18] sm:$0xff] %vm72_vm0, %v428_v28 }

// kernel: resnet34_forward.20
= control target key start
LH: loop header
LB: loop body
LE: loop exit
PB: predicated region body
PF: predicated region fallthrough
CT: control target
= control target key end

     0   :  { %s941_s1 = inlined_call_operand.vmem [shape: bf16[640,128], index: 1, kind: input, shape index: {}]   ;;  %s942_s0 = inlined_call_operand.vmem [shape: bf16[32,640], index: 0, kind: input, shape index: {}]   ;;  %s943_s2 = inlined_call_operand.vmem [shape: f32[1,128], index: 2, kind: input, shape index: {}]   ;;  %s944_s3 = inlined_call_operand.vmem [shape: f32[32,128], index: 3, kind: output, shape index: {}]  }
   0x1   :  { %v702_v0 = vld [vmem:[%s941_s1 + $0x40] sm:$0xff]   ;;  %v706_v4 = vld [vmem:[%s941_s1 + $0x48] sm:$0xff]   ;;  %v710_v8 = vld [vmem:[%s941_s1 + $0x50] sm:$0xff]  }
   0x2   :  { %v703_v1 = vld [vmem:[%s941_s1] sm:$0xff]   ;;  %616 = vmatprep.subr.bf16.mxu0 %v702_v0  ;;  %v707_v5 = vld [vmem:[%s941_s1 + $0x8] sm:$0xff]   ;;  %v711_v9 = vld [vmem:[%s941_s1 + $0x10] sm:$0xff]  }
   0x3   :  { %v704_v2 = vld [vmem:[%s941_s1 + $0xc0] sm:$0xff]   ;;  %617 = vmatpush3.bf16.msra.mxu0 %v703_v1  ;;  %v708_v6 = vld [vmem:[%s941_s1 + $0xc8] sm:$0xff]   ;;  %v712_v10 = vld [vmem:[%s941_s1 + $0xd0] sm:$0xff]  }
   0x4   :  { %v705_v3 = vld [vmem:[%s941_s1 + $0x80] sm:$0xff]   ;;  %644 = vmatprep.subr.bf16.mxu1 %v704_v2  ;;  %618 = vmatprep.subr.bf16.mxu0 %v706_v4  ;;  %v709_v7 = vld [vmem:[%s941_s1 + $0x88] sm:$0xff]   ;;  %v713_v11 = vld [vmem:[%s941_s1 + $0x90] sm:$0xff]  }
   0x5   :  { %645 = vmatpush3.bf16.msra.mxu1 %v705_v3  ;;  %v714_v12 = vld [vmem:[%s941_s1 + $0x58] sm:$0xff]   ;;  %v718_v16 = vld [vmem:[%s941_s1 + $0x60] sm:$0xff]   ;;  %v722_v20 = vld [vmem:[%s941_s1 + $0x68] sm:$0xff]  }
   0x6   :  { %646 = vmatprep.subr.bf16.mxu1 %v708_v6  ;;  %v715_v13 = vld [vmem:[%s941_s1 + $0x18] sm:$0xff]   ;;  %v719_v17 = vld [vmem:[%s941_s1 + $0x20] sm:$0xff]   ;;  %v723_v21 = vld [vmem:[%s941_s1 + $0x28] sm:$0xff]  }
   0x7   :  { %619 = vmatpush3.bf16.msra.mxu0 %v707_v5  ;;  %v716_v14 = vld [vmem:[%s941_s1 + $0xd8] sm:$0xff]   ;;  %v720_v18 = vld [vmem:[%s941_s1 + $0xe0] sm:$0xff]   ;;  %v724_v22 = vld [vmem:[%s941_s1 + $0xe8] sm:$0xff]  }
   0x8   :  { %620 = vmatprep.subr.bf16.mxu0 %v710_v8  ;;  %v717_v15 = vld [vmem:[%s941_s1 + $0x98] sm:$0xff]   ;;  %v721_v19 = vld [vmem:[%s941_s1 + $0xa0] sm:$0xff]   ;;  %v725_v23 = vld [vmem:[%s941_s1 + $0xa8] sm:$0xff]  }
   0x9   :  { %647 = vmatpush3.bf16.msra.mxu1 %v709_v7  ;;  %v726_v24 = vld [vmem:[%s941_s1 + $0x70] sm:$0xff]   ;;  %v730_v28 = vld [vmem:[%s941_s1 + $0x78] sm:$0xff]   ;;  %v737_v34 = vld [vmem:[%s941_s1 + $0x100] sm:$0xff]  }
   0xa   :  { %648 = vmatprep.subr.bf16.mxu1 %v712_v10  ;;  %v727_v25 = vld [vmem:[%s941_s1 + $0x30] sm:$0xff]   ;;  %v731_v29 = vld [vmem:[%s941_s1 + $0x38] sm:$0xff]   ;;  %v740_v36 = vld [vmem:[%s942_s0 + $0xc] ss:$20 sps:$4 sm:$0xff]  }
   0xb   :  { %621 = vmatpush3.bf16.msra.mxu0 %v711_v9  ;;  %v728_v26 = vld [vmem:[%s941_s1 + $0xf0] sm:$0xff]   ;;  %v732_v30 = vld [vmem:[%s941_s1 + $0xf8] sm:$0xff]   ;;  %v741_v37 = vld [vmem:[%s941_s1 + $0x108] sm:$0xff]   ;;  %487 = vmatprep.mubr.bf16.mxu1 %v740_v36 }
   0xc   :  { %622 = vmatprep.subr.bf16.mxu0 %v714_v12  ;;  %v729_v27 = vld [vmem:[%s941_s1 + $0xb0] sm:$0xff]   ;;  %v735_v32 = vld [vmem:[%s942_s0 + $0x4] ss:$20 sps:$4 sm:$0xff]   ;;  %v738_v35 = vld [vmem:[%s942_s0 + $0x8] ss:$20 sps:$4 sm:$0xff]  }
   0xd   :  { %649 = vmatpush3.bf16.msra.mxu1 %v713_v11  ;;  %v733_v31 = vld [vmem:[%s942_s0] ss:$20 sps:$4 sm:$0xff]   ;;  %v736_v33 = vld [vmem:[%s941_s1 + $0xb8] sm:$0xff]   ;;  %438 = vmatprep.mubr.bf16.mxu0 %v735_v32  ;;  %v751_v43 = vld [vmem:[%s942_s0 + $0x30] ss:$20 sps:$4 sm:$0xff]  }
   0xe   :  { %650 = vmatprep.subr.bf16.mxu1 %v716_v14  ;;  %v742_v38 = vld [vmem:[%s941_s1 + $0x110] sm:$0xff]   ;;  %v745_v39 = vld [vmem:[%s942_s0 + $0x2c] ss:$20 sps:$4 sm:$0xff]   ;;  %v743_v40 = vld [vmem:[%s941_s1 + $0x118] sm:$0xff]  }
   0xf   :  { %623 = vmatpush3.bf16.msra.mxu0 %v715_v13  ;;  %v748_v41 = vld [vmem:[%s942_s0 + $0x28] ss:$20 sps:$4 sm:$0xff]   ;;  %v744_v44 = vld [vmem:[%s941_s1 + $0x120] sm:$0xff]   ;;  %v752_v47 = vld [vmem:[%s941_s1 + $0x130] sm:$0xff]  }
  0x10   :  { %624 = vmatprep.subr.bf16.mxu0 %v718_v16  ;;  %v749_v42 = vld [vmem:[%s942_s0 + $0x34] ss:$20 sps:$4 sm:$0xff]   ;;  %v754_v45 = vld [vmem:[%s942_s0 + $0x10] ss:$20 sps:$4 sm:$0xff]   ;;  %v753_v48 = vld [vmem:[%s941_s1 + $0x138] sm:$0xff]  }
  0x11   :  { %651 = vmatpush3.bf16.msra.mxu1 %v717_v15  ;;  %v747_v46 = vld [vmem:[%s941_s1 + $0x128] sm:$0xff]   ;;  %v565_v51 = vld [vmem:[%s943_s2] ss:$0 sm:$0xff] }
  0x12   :  { %652 = vmatprep.subr.bf16.mxu1 %v720_v18  ;;  %v755_v49 = vld [vmem:[%s942_s0 + $0x38] ss:$20 sps:$4 sm:$0xff]  }
  0x13   :  { %625 = vmatpush3.bf16.msra.mxu0 %v719_v17 }
  0x14   :  { %626 = vmatprep.subr.bf16.mxu0 %v722_v20 }
  0x15   :  { %653 = vmatpush3.bf16.msra.mxu1 %v721_v19 }
  0x16   :  { %654 = vmatprep.subr.bf16.mxu1 %v724_v22 }
  0x17   :  { %627 = vmatpush3.bf16.msra.mxu0 %v723_v21 }
  0x18   :  { %628 = vmatprep.subr.bf16.mxu0 %v726_v24 }
  0x19   :  { %655 = vmatpush3.bf16.msra.mxu1 %v725_v23 }
  0x1a   :  { %656 = vmatprep.subr.bf16.mxu1 %v728_v26 }
  0x1b   :  { %629 = vmatpush3.bf16.msra.mxu0 %v727_v25 }
  0x1c   :  { %630 = vmatprep.subr.bf16.mxu0 %v730_v28 }
  0x1d   :  { %657 = vmatpush3.bf16.msra.mxu1 %v729_v27 }
  0x1e   :  { %658 = vmatprep.subr.bf16.mxu1 %v732_v30 }
  0x1f   :  { %631 = vmatpush3.bf16.msra.mxu0 %v731_v29 }
  0x20   :  { %682 = vmatprep.subr.bf16.mxu0 %v737_v34 }
  0x21   :  { %659 = vmatpush3.bf16.msra.mxu1 %v736_v33 }
  0x22   :  { %439 = vmatmul.mubr.bf16.vlgmr.msra.gmra.mrb[0].mxu0 %v733_v31 }
  0x23   :  { %683 = vmatpush3.bf16.msra.mxu0 %v737_v34  ;;  %446 = vmatprep.mubr.bf16.mxu0 %v745_v39 }
  0x24   :  { %488 = vmatmul.mubr.bf16.vlgmr.msra.gmra.mrb[0].mxu1 %v738_v35  ;;  %684 = vmatprep.subr.bf16.mxu0 %v741_v37 }
  0x25   :  { %495 = vmatprep.mubr.bf16.mxu1 %v749_v42 }
  0x27   :  { %685 = vmatpush3.bf16.msra.mxu0 %v741_v37 }
  0x28   :  { %686 = vmatprep.subr.bf16.mxu0 %v742_v38 }
  0x2a   :  { %447 = vmatmul.mubr.bf16.gmra.mrb[4].mxu0 %v748_v41 }
  0x2b   :  { %687 = vmatpush3.bf16.msra.mxu0 %v742_v38  ;;  %698 = vmatprep.mubr.bf16.mxu0 %v754_v45 }
  0x2c   :  { %688 = vmatprep.subr.bf16.mxu0 %v743_v40  ;;  %496 = vmatmul.mubr.bf16.gmra.mrb[4].mxu1 %v751_v43 }
  0x2f   :  { %689 = vmatpush3.bf16.msra.mxu0 %v743_v40 }
  0x30   :  { %690 = vmatprep.subr.bf16.mxu0 %v744_v44 }
  0x33   :  { %691 = vmatpush3.bf16.msra.mxu0 %v744_v44 }
  0x34   :  { %692 = vmatprep.subr.bf16.mxu0 %v747_v46 }
  0x37   :  { %693 = vmatpush3.bf16.msra.mxu0 %v747_v46 }
  0x38   :  { %694 = vmatprep.subr.bf16.mxu0 %v752_v47 }
  0x3b   :  { %695 = vmatpush3.bf16.msra.mxu0 %v752_v47 }
  0x3c   :  { %696 = vmatprep.subr.bf16.mxu0 %v753_v48 }
  0x3f   :  { %697 = vmatpush3.bf16.msra.mxu0 %v753_v48 }
  0x42   :  { %699 = vmatmul.mubr.bf16.vlgmr.msra.gmra.mrb[8].mxu0 %v755_v49 }
  0xf5   :  { %v632_v50 = vpop.f32.mrb[0].mxu0 }
  0xf6   :  { %v633_v52 = vpop.f32.mrb[1].mxu0 }
  0xf7   :  { %v634_v53 = vadd.f32 %v633_v52, %v632_v50  ;;  %v635_v54 = vpop.f32.mrb[2].mxu0  ;;  %v660_v55 = vpop.f32.mrb[0].mxu1 }
  0xf8   :  { %v636_v56 = vpop.f32.mrb[3].mxu0  ;;  %v661_v59 = vpop.f32.mrb[1].mxu1 }
  0xf9   :  { %v441_v57 = vadd.f32 %v634_v53, %v565_v51  ;;  %v637_v58 = vadd.f32 %v636_v56, %v635_v54  ;;  %v662_v60 = vadd.f32 %v661_v59, %v660_v55  ;;  %v663_v61 = vpop.f32.mrb[2].mxu1 }
  0xfa   :  { %v664_v63 = vpop.f32.mrb[3].mxu1 }
  0xfb   :  { %v444_v62 = vadd.f32 %v637_v58, %v565_v51  ;;  %v665_v0 = vadd.f32 %v664_v63, %v663_v61  ;;  %v490_v1 = vadd.f32 %v662_v60, %v441_v57 }
  0xfd   :  { %v638_v2 = vpop.f32.mrb[4].mxu0  ;;  %v493_v4 = vadd.f32 %v665_v0, %v444_v62 }
  0xfe   :  { %v639_v3 = vpop.f32.mrb[5].mxu0 }
  0xff   :  { %v640_v5 = vadd.f32 %v639_v3, %v638_v2  ;;  %v641_v6 = vpop.f32.mrb[6].mxu0  ;;  %v666_v7 = vpop.f32.mrb[4].mxu1 }
 0x100   :  { %v642_v8 = vpop.f32.mrb[7].mxu0  ;;  %v667_v11 = vpop.f32.mrb[5].mxu1 }
 0x101   :  { %v449_v9 = vadd.f32 %v640_v5, %v565_v51  ;;  %v643_v10 = vadd.f32 %v642_v8, %v641_v6  ;;  %v668_v12 = vadd.f32 %v667_v11, %v666_v7  ;;  %v669_v13 = vpop.f32.mrb[6].mxu1 }
 0x102   :  { %v670_v15 = vpop.f32.mrb[7].mxu1 }
 0x103   :  { %v452_v14 = vadd.f32 %v643_v10, %v565_v51  ;;  %v671_v16 = vadd.f32 %v670_v15, %v669_v13  ;;  %v498_v17 = vadd.f32 %v668_v12, %v449_v9 }
 0x105   :  { %v501_v18 = vadd.f32 %v671_v16, %v452_v14 }
 0x115   :  { %v700_v19 = vpop.f32.mrb[8].mxu0 }
 0x116   :  { %v547_v20 = vadd.f32 %v700_v19, %v498_v17  ;;  %v538_v21 = vpop.f32.mrb[9].mxu0 }
 0x117   :  { %v539_v22 = vadd.f32 %v538_v21, %v490_v1  ;;  %v701_v23 = vpop.f32.mrb[10].mxu0 }
 0x118   :  { %v555_v24 = vmax.f32 %v547_v20, 0.0  ;;  %v550_v25 = vadd.f32 %v701_v23, %v501_v18  ;;  %v541_v26 = vpop.f32.mrb[11].mxu0 }
 0x119   :  { %v553_v27 = vmax.f32 %v539_v22, 0.0  ;;  %v542_v28 = vadd.f32 %v541_v26, %v493_v4 }
 0x11a   :  { %559 = vst [vmem:[%s944_s3 + $0x10] sm:$0xff] %v555_v24  ;;  %v556_v29 = vmax.f32 %v550_v25, 0.0 }
 0x11b   :  { %557 = vst [vmem:[%s944_s3] sm:$0xff] %v553_v27  ;;  %v554_v30 = vmax.f32 %v542_v28, 0.0 }
 0x11c   :  { %560 = vst [vmem:[%s944_s3 + $0x18] sm:$0xff] %v556_v29 }
 0x11d   :  { %558 = vst [vmem:[%s944_s3 + $0x8] sm:$0xff] %v554_v30 }

// kernel: resnet34_forward.22
= control target key start
LH: loop header
LB: loop body
LE: loop exit
PB: predicated region body
PF: predicated region fallthrough
CT: control target
= control target key end

     0   :  { %v673_v33 = vmov 0.0   ;;  %vm674_vm0 = vmmov 0   ;;  %s839_s1 = inlined_call_operand.vmem [shape: bf16[640,128], index: 1, kind: input, shape index: {}]   ;;  %s840_s0 = inlined_call_operand.vmem [shape: bf16[16,640], index: 0, kind: input, shape index: {}]   ;;  %s841_s2 = inlined_call_operand.vmem [shape: f32[1,128], index: 2, kind: input, shape index: {}]   ;;  %s842_s3 = inlined_call_operand.vmem [shape: f32[16,128], index: 3, kind: output, shape index: {}]  }
   0x1   :  { %v626_v0 = vld [vmem:[%s839_s1 + $0x40] sm:$0xff]   ;;  %v630_v4 = vld [vmem:[%s839_s1 + $0x48] sm:$0xff]   ;;  %v634_v8 = vld [vmem:[%s839_s1 + $0x50] sm:$0xff]  }
   0x2   :  { %v627_v1 = vld [vmem:[%s839_s1] sm:$0xff]   ;;  %551 = vmatprep.subr.bf16.mxu0 %v626_v0  ;;  %v631_v5 = vld [vmem:[%s839_s1 + $0x8] sm:$0xff]   ;;  %v635_v9 = vld [vmem:[%s839_s1 + $0x10] sm:$0xff]  }
   0x3   :  { %v628_v2 = vld [vmem:[%s839_s1 + $0xc0] sm:$0xff]   ;;  %552 = vmatpush3.bf16.msra.mxu0 %v627_v1  ;;  %v632_v6 = vld [vmem:[%s839_s1 + $0xc8] sm:$0xff]   ;;  %v636_v10 = vld [vmem:[%s839_s1 + $0xd0] sm:$0xff]  }
   0x4   :  { %v629_v3 = vld [vmem:[%s839_s1 + $0x80] sm:$0xff]   ;;  %573 = vmatprep.subr.bf16.mxu1 %v628_v2  ;;  %553 = vmatprep.subr.bf16.mxu0 %v630_v4  ;;  %v633_v7 = vld [vmem:[%s839_s1 + $0x88] sm:$0xff]   ;;  %v637_v11 = vld [vmem:[%s839_s1 + $0x90] sm:$0xff]  }
   0x5   :  { %574 = vmatpush3.bf16.msra.mxu1 %v629_v3  ;;  %v638_v12 = vld [vmem:[%s839_s1 + $0x58] sm:$0xff]   ;;  %v642_v16 = vld [vmem:[%s839_s1 + $0x60] sm:$0xff]   ;;  %v646_v20 = vld [vmem:[%s839_s1 + $0x68] sm:$0xff]  }
   0x6   :  { %575 = vmatprep.subr.bf16.mxu1 %v632_v6  ;;  %v639_v13 = vld [vmem:[%s839_s1 + $0x18] sm:$0xff]   ;;  %v643_v17 = vld [vmem:[%s839_s1 + $0x20] sm:$0xff]   ;;  %v647_v21 = vld [vmem:[%s839_s1 + $0x28] sm:$0xff]  }
   0x7   :  { %554 = vmatpush3.bf16.msra.mxu0 %v631_v5  ;;  %v640_v14 = vld [vmem:[%s839_s1 + $0xd8] sm:$0xff]   ;;  %v644_v18 = vld [vmem:[%s839_s1 + $0xe0] sm:$0xff]   ;;  %v648_v22 = vld [vmem:[%s839_s1 + $0xe8] sm:$0xff]  }
   0x8   :  { %555 = vmatprep.subr.bf16.mxu0 %v634_v8  ;;  %v641_v15 = vld [vmem:[%s839_s1 + $0x98] sm:$0xff]   ;;  %v645_v19 = vld [vmem:[%s839_s1 + $0xa0] sm:$0xff]   ;;  %v649_v23 = vld [vmem:[%s839_s1 + $0xa8] sm:$0xff]  }
   0x9   :  { %576 = vmatpush3.bf16.msra.mxu1 %v633_v7  ;;  %v650_v24 = vld [vmem:[%s839_s1 + $0x70] sm:$0xff]   ;;  %v654_v28 = vld [vmem:[%s839_s1 + $0x78] sm:$0xff]   ;;  %v663_v36 = vld [vmem:[%s840_s0 + $0xc] ss:$20 sps:$4 sm:$0xff]  }
   0xa   :  { %577 = vmatprep.subr.bf16.mxu1 %v636_v10  ;;  %v651_v25 = vld [vmem:[%s839_s1 + $0x30] sm:$0xff]   ;;  %v655_v29 = vld [vmem:[%s839_s1 + $0x38] sm:$0xff]   ;;  %v664_v37 = vld [vmem:[%s839_s1 + $0x100] sm:$0xff]   ;;  %447 = vmatprep.mubr.bf16.mxu1 %v663_v36 }
   0xb   :  { %556 = vmatpush3.bf16.msra.mxu0 %v635_v9  ;;  %v652_v26 = vld [vmem:[%s839_s1 + $0xf0] sm:$0xff]   ;;  %v656_v30 = vld [vmem:[%s839_s1 + $0xf8] sm:$0xff]   ;;  %v665_v38 = vld [vmem:[%s839_s1 + $0x108] sm:$0xff]  }
   0xc   :  { %557 = vmatprep.subr.bf16.mxu0 %v638_v12  ;;  %v653_v27 = vld [vmem:[%s839_s1 + $0xb0] sm:$0xff]   ;;  %v659_v32 = vld [vmem:[%s840_s0 + $0x4] ss:$20 sps:$4 sm:$0xff]   ;;  %v661_v35 = vld [vmem:[%s840_s0 + $0x8] ss:$20 sps:$4 sm:$0xff]  }
   0xd   :  { %578 = vmatpush3.bf16.msra.mxu1 %v637_v11  ;;  %v657_v31 = vld [vmem:[%s840_s0] ss:$20 sps:$4 sm:$0xff]   ;;  %v660_v34 = vld [vmem:[%s839_s1 + $0xb8] sm:$0xff]   ;;  %406 = vmatprep.mubr.bf16.mxu0 %v659_v32  ;;  %v669_v42 = vld [vmem:[%s839_s1 + $0x128] sm:$0xff]  }
   0xe   :  { %579 = vmatprep.subr.bf16.mxu1 %v640_v14  ;;  %v666_v39 = vld [vmem:[%s839_s1 + $0x110] sm:$0xff]   ;;  %v667_v40 = vld [vmem:[%s839_s1 + $0x118] sm:$0xff]   ;;  %v668_v41 = vld [vmem:[%s839_s1 + $0x120] sm:$0xff]  }
   0xf   :  { %558 = vmatpush3.bf16.msra.mxu0 %v639_v13  ;;  %v670_v43 = vld [vmem:[%s839_s1 + $0x130] sm:$0xff]   ;;  %v671_v44 = vld [vmem:[%s839_s1 + $0x138] sm:$0xff]   ;;  %v505_v47 = vld [vmem:[%s841_s2] ss:$0 sm:$0xff] }
  0x10   :  { %559 = vmatprep.subr.bf16.mxu0 %v642_v16  ;;  %v672_v45 = vld [vmem:[%s840_s0 + $0x10] ss:$20 sps:$4 sm:$0xff]  }
  0x11   :  { %580 = vmatpush3.bf16.msra.mxu1 %v641_v15 }
  0x12   :  { %581 = vmatprep.subr.bf16.mxu1 %v644_v18 }
  0x13   :  { %560 = vmatpush3.bf16.msra.mxu0 %v643_v17 }
  0x14   :  { %561 = vmatprep.subr.bf16.mxu0 %v646_v20 }
  0x15   :  { %582 = vmatpush3.bf16.msra.mxu1 %v645_v19 }
  0x16   :  { %583 = vmatprep.subr.bf16.mxu1 %v648_v22 }
  0x17   :  { %562 = vmatpush3.bf16.msra.mxu0 %v647_v21 }
  0x18   :  { %563 = vmatprep.subr.bf16.mxu0 %v650_v24 }
  0x19   :  { %584 = vmatpush3.bf16.msra.mxu1 %v649_v23 }
  0x1a   :  { %585 = vmatprep.subr.bf16.mxu1 %v652_v26 }
  0x1b   :  { %564 = vmatpush3.bf16.msra.mxu0 %v651_v25 }
  0x1c   :  { %565 = vmatprep.subr.bf16.mxu0 %v654_v28 }
  0x1d   :  { %586 = vmatpush3.bf16.msra.mxu1 %v653_v27 }
  0x1e   :  { %587 = vmatprep.subr.bf16.mxu1 %v656_v30 }
  0x1f   :  { %566 = vmatpush3.bf16.msra.mxu0 %v655_v29 }
  0x20   :  { %604 = vmatprep.subr.bf16.mxu0 %v673_v33 }
  0x21   :  { %588 = vmatpush3.bf16.msra.mxu1 %v660_v34 }
  0x22   :  { %407 = vmatmul.mubr.bf16.vlgmr.msra.gmra.mrb[0].mxu0 %v657_v31 }
  0x23   :  { %620 = vmatprep.mubr.msk.bf16.mxu0 %vm674_vm0, %v673_v33  ;;  %605 = vmatpush3.bf16.msra.mxu0 %v664_v37 }
  0x24   :  { %448 = vmatmul.mubr.bf16.vlgmr.msra.gmra.mrb[0].mxu1 %v661_v35  ;;  %606 = vmatprep.subr.bf16.mxu0 %v673_v33 }
  0x27   :  { %607 = vmatpush3.bf16.msra.mxu0 %v665_v38 }
  0x28   :  { %608 = vmatprep.subr.bf16.mxu0 %v673_v33 }
  0x2b   :  { %609 = vmatpush3.bf16.msra.mxu0 %v666_v39 }
  0x2c   :  { %610 = vmatprep.subr.bf16.mxu0 %v673_v33 }
  0x2f   :  { %611 = vmatpush3.bf16.msra.mxu0 %v667_v40 }
  0x30   :  { %612 = vmatprep.subr.bf16.mxu0 %v673_v33 }
  0x33   :  { %613 = vmatpush3.bf16.msra.mxu0 %v668_v41 }
  0x34   :  { %614 = vmatprep.subr.bf16.mxu0 %v673_v33 }
  0x37   :  { %615 = vmatpush3.bf16.msra.mxu0 %v669_v42 }
  0x38   :  { %616 = vmatprep.subr.bf16.mxu0 %v673_v33 }
  0x3b   :  { %617 = vmatpush3.bf16.msra.mxu0 %v670_v43 }
  0x3c   :  { %618 = vmatprep.subr.bf16.mxu0 %v673_v33 }
  0x3f   :  { %619 = vmatpush3.bf16.msra.mxu0 %v671_v44 }
  0x42   :  { %621 = vmatmul.mubr.bf16.vlgmr.msra.gmra.mrb[4].mxu0 %v672_v45 }
  0xf5   :  { %v567_v46 = vpop.f32.mrb[0].mxu0 }
  0xf6   :  { %v568_v48 = vpop.f32.mrb[1].mxu0 }
  0xf7   :  { %v569_v49 = vadd.f32 %v568_v48, %v567_v46  ;;  %v570_v50 = vpop.f32.mrb[2].mxu0  ;;  %v589_v51 = vpop.f32.mrb[0].mxu1 }
  0xf8   :  { %v571_v52 = vpop.f32.mrb[3].mxu0  ;;  %v590_v55 = vpop.f32.mrb[1].mxu1 }
  0xf9   :  { %v409_v53 = vadd.f32 %v569_v49, %v505_v47  ;;  %v572_v54 = vadd.f32 %v571_v52, %v570_v50  ;;  %v591_v56 = vadd.f32 %v590_v55, %v589_v51  ;;  %v592_v57 = vpop.f32.mrb[2].mxu1 }
  0xfa   :  { %v593_v59 = vpop.f32.mrb[3].mxu1 }
  0xfb   :  { %v412_v58 = vadd.f32 %v572_v54, %v505_v47  ;;  %v594_v60 = vadd.f32 %v593_v59, %v592_v57  ;;  %v450_v61 = vadd.f32 %v591_v56, %v409_v53 }
  0xfd   :  { %v453_v62 = vadd.f32 %v594_v60, %v412_v58 }
 0x115   :  { %v490_v63 = vpop.f32.mrb[4].mxu0 }
 0x116   :  { %v491_v0 = vadd.f32 %v490_v63, %v450_v61  ;;  %v622_v1 = vpop.f32.mrb[5].mxu0 }
 0x117   :  { %v493_v2 = vpop.f32.mrb[6].mxu0 }
 0x118   :  { %v497_v3 = vmax.f32 %v491_v0, 0.0  ;;  %v494_v4 = vadd.f32 %v493_v2, %v453_v62  ;;  %v623_v5 = vpop.f32.mrb[7].mxu0 }
 0x11a   :  { %499 = vst [vmem:[%s842_s3] sm:$0xff] %v497_v3  ;;  %v498_v6 = vmax.f32 %v494_v4, 0.0 }
 0x11c   :  { %500 = vst [vmem:[%s842_s3 + $0x8] sm:$0xff] %v498_v6 }

// kernel: resnet34_forward.23
= control target key start
LH: loop header
LB: loop body
LE: loop exit
PB: predicated region body
PF: predicated region fallthrough
CT: control target
= control target key end

     0   :  { %vm1154_vm0 = vmmov 0   ;;  %s1427_s1 = inlined_call_operand.vmem [shape: bf16[1152,128], index: 1, kind: input, shape index: {}]   ;;  %s1428_s0 = inlined_call_operand.vmem [shape: bf16[16,1152], index: 0, kind: input, shape index: {}]   ;;  %s1429_s2 = inlined_call_operand.vmem [shape: f32[1,128], index: 2, kind: input, shape index: {}]   ;;  %s1430_s3 = inlined_call_operand.vmem [shape: f32[16,128], index: 3, kind: output, shape index: {}]  }
   0x1   :  { %v1068_v0 = vld [vmem:[%s1427_s1 + $0x40] sm:$0xff]   ;;  %v1072_v4 = vld [vmem:[%s1427_s1 + $0x48] sm:$0xff]   ;;  %v1076_v8 = vld [vmem:[%s1427_s1 + $0x50] sm:$0xff]  }
   0x2   :  { %v1069_v1 = vld [vmem:[%s1427_s1] sm:$0xff]   ;;  %949 = vmatprep.subr.bf16.mxu0 %v1068_v0  ;;  %v1073_v5 = vld [vmem:[%s1427_s1 + $0x8] sm:$0xff]   ;;  %v1077_v9 = vld [vmem:[%s1427_s1 + $0x10] sm:$0xff]  }
   0x3   :  { %v1070_v2 = vld [vmem:[%s1427_s1 + $0xc0] sm:$0xff]   ;;  %950 = vmatpush3.bf16.msra.mxu0 %v1069_v1  ;;  %v1074_v6 = vld [vmem:[%s1427_s1 + $0xc8] sm:$0xff]   ;;  %v1078_v10 = vld [vmem:[%s1427_s1 + $0xd0] sm:$0xff]  }
   0x4   :  { %v1071_v3 = vld [vmem:[%s1427_s1 + $0x80] sm:$0xff]   ;;  %971 = vmatprep.subr.bf16.mxu1 %v1070_v2  ;;  %951 = vmatprep.subr.bf16.mxu0 %v1072_v4  ;;  %v1075_v7 = vld [vmem:[%s1427_s1 + $0x88] sm:$0xff]   ;;  %v1079_v11 = vld [vmem:[%s1427_s1 + $0x90] sm:$0xff]  }
   0x5   :  { %972 = vmatpush3.bf16.msra.mxu1 %v1071_v3  ;;  %v1080_v12 = vld [vmem:[%s1427_s1 + $0x58] sm:$0xff]   ;;  %v1084_v16 = vld [vmem:[%s1427_s1 + $0x60] sm:$0xff]   ;;  %v1088_v20 = vld [vmem:[%s1427_s1 + $0x68] sm:$0xff]  }
   0x6   :  { %973 = vmatprep.subr.bf16.mxu1 %v1074_v6  ;;  %v1081_v13 = vld [vmem:[%s1427_s1 + $0x18] sm:$0xff]   ;;  %v1085_v17 = vld [vmem:[%s1427_s1 + $0x20] sm:$0xff]   ;;  %v1089_v21 = vld [vmem:[%s1427_s1 + $0x28] sm:$0xff]   ;;  %v1153_v6 = vmov 0.0  }
   0x7   :  { %952 = vmatpush3.bf16.msra.mxu0 %v1073_v5  ;;  %v1082_v14 = vld [vmem:[%s1427_s1 + $0xd8] sm:$0xff]   ;;  %v1086_v18 = vld [vmem:[%s1427_s1 + $0xe0] sm:$0xff]   ;;  %v1090_v22 = vld [vmem:[%s1427_s1 + $0xe8] sm:$0xff]  }
   0x8   :  { %953 = vmatprep.subr.bf16.mxu0 %v1076_v8  ;;  %v1083_v15 = vld [vmem:[%s1427_s1 + $0x98] sm:$0xff]   ;;  %v1087_v19 = vld [vmem:[%s1427_s1 + $0xa0] sm:$0xff]   ;;  %v1091_v23 = vld [vmem:[%s1427_s1 + $0xa8] sm:$0xff]  }
   0x9   :  { %974 = vmatpush3.bf16.msra.mxu1 %v1075_v7  ;;  %v1092_v24 = vld [vmem:[%s1427_s1 + $0x70] sm:$0xff]   ;;  %v1096_v28 = vld [vmem:[%s1427_s1 + $0x78] sm:$0xff]   ;;  %v1099_v31 = vld [vmem:[%s1428_s0] ss:$36 sps:$4 sm:$0xff]  }
   0xa   :  { %975 = vmatprep.subr.bf16.mxu1 %v1078_v10  ;;  %v1093_v25 = vld [vmem:[%s1427_s1 + $0x30] sm:$0xff]   ;;  %v1097_v29 = vld [vmem:[%s1427_s1 + $0x38] sm:$0xff]   ;;  %v1101_v32 = vld [vmem:[%s1428_s0 + $0x4] ss:$36 sps:$4 sm:$0xff]  }
   0xb   :  { %954 = vmatpush3.bf16.msra.mxu0 %v1077_v9  ;;  %v1094_v26 = vld [vmem:[%s1427_s1 + $0xf0] sm:$0xff]   ;;  %v1098_v30 = vld [vmem:[%s1427_s1 + $0xf8] sm:$0xff]   ;;  %686 = vmatprep.mubr.bf16.mxu0 %v1101_v32  ;;  %v1103_v34 = vld [vmem:[%s1427_s1 + $0x140] sm:$0xff]  }
   0xc   :  { %955 = vmatprep.subr.bf16.mxu0 %v1080_v12  ;;  %v1095_v27 = vld [vmem:[%s1427_s1 + $0xb0] sm:$0xff]   ;;  %v1102_v33 = vld [vmem:[%s1427_s1 + $0xb8] sm:$0xff]   ;;  %v1104_v35 = vld [vmem:[%s1428_s0 + $0x8] ss:$36 sps:$4 sm:$0xff]  }
   0xd   :  { %976 = vmatpush3.bf16.msra.mxu1 %v1079_v11  ;;  %v1106_v36 = vld [vmem:[%s1428_s0 + $0xc] ss:$36 sps:$4 sm:$0xff]   ;;  %v1107_v37 = vld [vmem:[%s1427_s1 + $0x100] sm:$0xff]   ;;  %v1118_v48 = vld [vmem:[%s1427_s1 + $0x158] sm:$0xff]  }
   0xe   :  { %977 = vmatprep.subr.bf16.mxu1 %v1082_v14  ;;  %727 = vmatprep.mubr.bf16.mxu1 %v1106_v36  ;;  %v1108_v38 = vld [vmem:[%s1427_s1 + $0x1c0] sm:$0xff]   ;;  %v1110_v40 = vld [vmem:[%s1427_s1 + $0x148] sm:$0xff]   ;;  %v1114_v44 = vld [vmem:[%s1427_s1 + $0x150] sm:$0xff]  }
   0xf   :  { %956 = vmatpush3.bf16.msra.mxu0 %v1081_v13  ;;  %v1109_v39 = vld [vmem:[%s1427_s1 + $0x180] sm:$0xff]   ;;  %v1111_v41 = vld [vmem:[%s1427_s1 + $0x108] sm:$0xff]   ;;  %v1115_v45 = vld [vmem:[%s1427_s1 + $0x110] sm:$0xff]  }
  0x10   :  { %957 = vmatprep.subr.bf16.mxu0 %v1084_v16  ;;  %v1112_v42 = vld [vmem:[%s1427_s1 + $0x1c8] sm:$0xff]   ;;  %v1116_v46 = vld [vmem:[%s1427_s1 + $0x1d0] sm:$0xff]   ;;  %v1119_v49 = vld [vmem:[%s1427_s1 + $0x118] sm:$0xff]  }
  0x11   :  { %978 = vmatpush3.bf16.msra.mxu1 %v1083_v15  ;;  %v1113_v43 = vld [vmem:[%s1427_s1 + $0x188] sm:$0xff]   ;;  %v1117_v47 = vld [vmem:[%s1427_s1 + $0x190] sm:$0xff]   ;;  %v1120_v50 = vld [vmem:[%s1427_s1 + $0x1d8] sm:$0xff]  }
  0x12   :  { %979 = vmatprep.subr.bf16.mxu1 %v1086_v18  ;;  %v1121_v51 = vld [vmem:[%s1427_s1 + $0x198] sm:$0xff]   ;;  %v1122_v52 = vld [vmem:[%s1427_s1 + $0x160] sm:$0xff]   ;;  %v1126_v56 = vld [vmem:[%s1427_s1 + $0x168] sm:$0xff]  }
  0x13   :  { %958 = vmatpush3.bf16.msra.mxu0 %v1085_v17  ;;  %v1123_v53 = vld [vmem:[%s1427_s1 + $0x120] sm:$0xff]   ;;  %v1127_v57 = vld [vmem:[%s1427_s1 + $0x128] sm:$0xff]   ;;  %v1130_v60 = vld [vmem:[%s1427_s1 + $0x170] sm:$0xff]  }
  0x14   :  { %959 = vmatprep.subr.bf16.mxu0 %v1088_v20  ;;  %v1124_v54 = vld [vmem:[%s1427_s1 + $0x1e0] sm:$0xff]   ;;  %v1128_v58 = vld [vmem:[%s1427_s1 + $0x1e8] sm:$0xff]   ;;  %v1131_v61 = vld [vmem:[%s1427_s1 + $0x130] sm:$0xff]  }
  0x15   :  { %980 = vmatpush3.bf16.msra.mxu1 %v1087_v19  ;;  %v1125_v55 = vld [vmem:[%s1427_s1 + $0x1a0] sm:$0xff]   ;;  %v1129_v59 = vld [vmem:[%s1427_s1 + $0x1a8] sm:$0xff]   ;;  %v1132_v62 = vld [vmem:[%s1427_s1 + $0x1f0] sm:$0xff]  }
  0x16   :  { %981 = vmatprep.subr.bf16.mxu1 %v1090_v22  ;;  %v1133_v63 = vld [vmem:[%s1427_s1 + $0x1b0] sm:$0xff]   ;;  %v1134_v0 = vld [vmem:[%s1427_s1 + $0x178] sm:$0xff]   ;;  %v1144_v9 = vld [vmem:[%s1427_s1 + $0x200] sm:$0xff]  }
  0x17   :  { %960 = vmatpush3.bf16.msra.mxu0 %v1089_v21  ;;  %v1135_v1 = vld [vmem:[%s1427_s1 + $0x138] sm:$0xff]   ;;  %v1137_v3 = vld [vmem:[%s1428_s0 + $0x10] ss:$36 sps:$4 sm:$0xff]   ;;  %v1145_v10 = vld [vmem:[%s1427_s1 + $0x208] sm:$0xff]  }
  0x18   :  { %961 = vmatprep.subr.bf16.mxu0 %v1092_v24  ;;  %v1136_v2 = vld [vmem:[%s1427_s1 + $0x1f8] sm:$0xff]   ;;  %v1146_v11 = vld [vmem:[%s1427_s1 + $0x210] sm:$0xff]   ;;  %v1148_v13 = vld [vmem:[%s1427_s1 + $0x220] sm:$0xff]  }
  0x19   :  { %982 = vmatpush3.bf16.msra.mxu1 %v1091_v23  ;;  %v1139_v4 = vld [vmem:[%s1428_s0 + $0x14] ss:$36 sps:$4 sm:$0xff]   ;;  %v1143_v8 = vld [vmem:[%s1428_s0 + $0x1c] ss:$36 sps:$4 sm:$0xff]   ;;  %v1149_v14 = vld [vmem:[%s1427_s1 + $0x228] sm:$0xff]  }
  0x1a   :  { %983 = vmatprep.subr.bf16.mxu1 %v1094_v26  ;;  %v1140_v5 = vld [vmem:[%s1427_s1 + $0x1b8] sm:$0xff]   ;;  %v1150_v15 = vld [vmem:[%s1427_s1 + $0x230] sm:$0xff]   ;;  %v1152_v17 = vld [vmem:[%s1428_s0 + $0x20] ss:$36 sps:$4 sm:$0xff]  }
  0x1b   :  { %962 = vmatpush3.bf16.msra.mxu0 %v1093_v25  ;;  %v1141_v7 = vld [vmem:[%s1428_s0 + $0x18] ss:$36 sps:$4 sm:$0xff]   ;;  %v867_v19 = vld [vmem:[%s1429_s2] ss:$0 sm:$0xff] }
  0x1c   :  { %963 = vmatprep.subr.bf16.mxu0 %v1096_v28  ;;  %v1147_v12 = vld [vmem:[%s1427_s1 + $0x218] sm:$0xff]  }
  0x1d   :  { %984 = vmatpush3.bf16.msra.mxu1 %v1095_v27  ;;  %v1151_v16 = vld [vmem:[%s1427_s1 + $0x238] sm:$0xff]  }
  0x1e   :  { %985 = vmatprep.subr.bf16.mxu1 %v1098_v30 }
  0x1f   :  { %964 = vmatpush3.bf16.msra.mxu0 %v1097_v29 }
  0x20   :  { %993 = vmatprep.subr.bf16.mxu0 %v1103_v34 }
  0x21   :  { %986 = vmatpush3.bf16.msra.mxu1 %v1102_v33 }
  0x22   :  { %687 = vmatmul.mubr.bf16.vlgmr.msra.gmra.mrb[0].mxu0 %v1099_v31  ;;  %1015 = vmatprep.subr.bf16.mxu1 %v1108_v38 }
  0x23   :  { %994 = vmatpush3.bf16.msra.mxu0 %v1107_v37  ;;  %768 = vmatprep.mubr.bf16.mxu0 %v1139_v4 }
  0x24   :  { %728 = vmatmul.mubr.bf16.vlgmr.msra.gmra.mrb[0].mxu1 %v1104_v35  ;;  %995 = vmatprep.subr.bf16.mxu0 %v1110_v40 }
  0x25   :  { %1016 = vmatpush3.bf16.msra.mxu1 %v1109_v39  ;;  %809 = vmatprep.mubr.bf16.mxu1 %v1143_v8 }
  0x26   :  { %1017 = vmatprep.subr.bf16.mxu1 %v1112_v42 }
  0x27   :  { %996 = vmatpush3.bf16.msra.mxu0 %v1111_v41 }
  0x28   :  { %997 = vmatprep.subr.bf16.mxu0 %v1114_v44 }
  0x29   :  { %1018 = vmatpush3.bf16.msra.mxu1 %v1113_v43 }
  0x2a   :  { %1019 = vmatprep.subr.bf16.mxu1 %v1116_v46 }
  0x2b   :  { %998 = vmatpush3.bf16.msra.mxu0 %v1115_v45 }
  0x2c   :  { %999 = vmatprep.subr.bf16.mxu0 %v1118_v48 }
  0x2d   :  { %1020 = vmatpush3.bf16.msra.mxu1 %v1117_v47 }
  0x2e   :  { %1021 = vmatprep.subr.bf16.mxu1 %v1120_v50 }
  0x2f   :  { %1000 = vmatpush3.bf16.msra.mxu0 %v1119_v49 }
  0x30   :  { %1001 = vmatprep.subr.bf16.mxu0 %v1122_v52 }
  0x31   :  { %1022 = vmatpush3.bf16.msra.mxu1 %v1121_v51 }
  0x32   :  { %1023 = vmatprep.subr.bf16.mxu1 %v1124_v54 }
  0x33   :  { %1002 = vmatpush3.bf16.msra.mxu0 %v1123_v53 }
  0x34   :  { %1003 = vmatprep.subr.bf16.mxu0 %v1126_v56 }
  0x35   :  { %1024 = vmatpush3.bf16.msra.mxu1 %v1125_v55 }
  0x36   :  { %1025 = vmatprep.subr.bf16.mxu1 %v1128_v58 }
  0x37   :  { %1004 = vmatpush3.bf16.msra.mxu0 %v1127_v57 }
  0x38   :  { %1005 = vmatprep.subr.bf16.mxu0 %v1130_v60 }
  0x39   :  { %1026 = vmatpush3.bf16.msra.mxu1 %v1129_v59 }
  0x3a   :  { %1027 = vmatprep.subr.bf16.mxu1 %v1132_v62 }
  0x3b   :  { %1006 = vmatpush3.bf16.msra.mxu0 %v1131_v61 }
  0x3c   :  { %1007 = vmatprep.subr.bf16.mxu0 %v1134_v0 }
  0x3d   :  { %1028 = vmatpush3.bf16.msra.mxu1 %v1133_v63 }
  0x3e   :  { %1029 = vmatprep.subr.bf16.mxu1 %v1136_v2 }
  0x3f   :  { %1008 = vmatpush3.bf16.msra.mxu0 %v1135_v1 }
  0x40   :  { %1046 = vmatprep.subr.bf16.mxu0 %v1153_v6 }
  0x41   :  { %1030 = vmatpush3.bf16.msra.mxu1 %v1140_v5 }
  0x42   :  { %769 = vmatmul.mubr.bf16.vlgmr.msra.gmra.mrb[4].mxu0 %v1137_v3 }
  0x43   :  { %1062 = vmatprep.mubr.msk.bf16.mxu0 %vm1154_vm0, %v1153_v6  ;;  %1047 = vmatpush3.bf16.msra.mxu0 %v1144_v9 }
  0x44   :  { %810 = vmatmul.mubr.bf16.vlgmr.msra.gmra.mrb[4].mxu1 %v1141_v7  ;;  %1048 = vmatprep.subr.bf16.mxu0 %v1153_v6 }
  0x47   :  { %1049 = vmatpush3.bf16.msra.mxu0 %v1145_v10 }
  0x48   :  { %1050 = vmatprep.subr.bf16.mxu0 %v1153_v6 }
  0x4b   :  { %1051 = vmatpush3.bf16.msra.mxu0 %v1146_v11 }
  0x4c   :  { %1052 = vmatprep.subr.bf16.mxu0 %v1153_v6 }
  0x4f   :  { %1053 = vmatpush3.bf16.msra.mxu0 %v1147_v12 }
  0x50   :  { %1054 = vmatprep.subr.bf16.mxu0 %v1153_v6 }
  0x53   :  { %1055 = vmatpush3.bf16.msra.mxu0 %v1148_v13 }
  0x54   :  { %1056 = vmatprep.subr.bf16.mxu0 %v1153_v6 }
  0x57   :  { %1057 = vmatpush3.bf16.msra.mxu0 %v1149_v14 }
  0x58   :  { %1058 = vmatprep.subr.bf16.mxu0 %v1153_v6 }
  0x5b   :  { %1059 = vmatpush3.bf16.msra.mxu0 %v1150_v15 }
  0x5c   :  { %1060 = vmatprep.subr.bf16.mxu0 %v1153_v6 }
  0x5f   :  { %1061 = vmatpush3.bf16.msra.mxu0 %v1151_v16 }
  0x62   :  { %1063 = vmatmul.mubr.bf16.vlgmr.msra.gmra.mrb[8].mxu0 %v1152_v17 }
  0xf5   :  { %v965_v18 = vpop.f32.mrb[0].mxu0 }
  0xf6   :  { %v966_v20 = vpop.f32.mrb[1].mxu0 }
  0xf7   :  { %v967_v21 = vadd.f32 %v966_v20, %v965_v18  ;;  %v968_v22 = vpop.f32.mrb[2].mxu0  ;;  %v987_v23 = vpop.f32.mrb[0].mxu1 }
  0xf8   :  { %v969_v24 = vpop.f32.mrb[3].mxu0  ;;  %v988_v27 = vpop.f32.mrb[1].mxu1 }
  0xf9   :  { %v689_v25 = vadd.f32 %v967_v21, %v867_v19  ;;  %v970_v26 = vadd.f32 %v969_v24, %v968_v22  ;;  %v989_v28 = vadd.f32 %v988_v27, %v987_v23  ;;  %v990_v29 = vpop.f32.mrb[2].mxu1 }
  0xfa   :  { %v991_v31 = vpop.f32.mrb[3].mxu1 }
  0xfb   :  { %v692_v30 = vadd.f32 %v970_v26, %v867_v19  ;;  %v730_v32 = vadd.f32 %v989_v28, %v689_v25  ;;  %v992_v33 = vadd.f32 %v991_v31, %v990_v29 }
  0xfd   :  { %v733_v34 = vadd.f32 %v992_v33, %v692_v30 }
 0x115   :  { %v1009_v35 = vpop.f32.mrb[4].mxu0 }
 0x116   :  { %v1010_v36 = vpop.f32.mrb[5].mxu0 }
 0x117   :  { %v1011_v37 = vadd.f32 %v1010_v36, %v1009_v35  ;;  %v1012_v38 = vpop.f32.mrb[6].mxu0  ;;  %v1031_v39 = vpop.f32.mrb[4].mxu1 }
 0x118   :  { %v1013_v40 = vpop.f32.mrb[7].mxu0  ;;  %v1032_v43 = vpop.f32.mrb[5].mxu1 }
 0x119   :  { %v771_v41 = vadd.f32 %v1011_v37, %v730_v32  ;;  %v1014_v42 = vadd.f32 %v1013_v40, %v1012_v38  ;;  %v1033_v44 = vadd.f32 %v1032_v43, %v1031_v39  ;;  %v1034_v45 = vpop.f32.mrb[6].mxu1 }
 0x11a   :  { %v1035_v47 = vpop.f32.mrb[7].mxu1 }
 0x11b   :  { %v774_v46 = vadd.f32 %v1014_v42, %v733_v34  ;;  %v1036_v48 = vadd.f32 %v1035_v47, %v1034_v45  ;;  %v812_v49 = vadd.f32 %v1033_v44, %v771_v41 }
 0x11d   :  { %v815_v50 = vadd.f32 %v1036_v48, %v774_v46 }
 0x135   :  { %v852_v51 = vpop.f32.mrb[8].mxu0 }
 0x136   :  { %v853_v52 = vadd.f32 %v852_v51, %v812_v49  ;;  %v1064_v53 = vpop.f32.mrb[9].mxu0 }
 0x137   :  { %v855_v54 = vpop.f32.mrb[10].mxu0 }
 0x138   :  { %v859_v55 = vmax.f32 %v853_v52, 0.0  ;;  %v856_v56 = vadd.f32 %v855_v54, %v815_v50  ;;  %v1065_v57 = vpop.f32.mrb[11].mxu0 }
 0x13a   :  { %861 = vst [vmem:[%s1430_s3] sm:$0xff] %v859_v55  ;;  %v860_v58 = vmax.f32 %v856_v56, 0.0 }
 0x13c   :  { %862 = vst [vmem:[%s1430_s3 + $0x8] sm:$0xff] %v860_v58 }

// kernel: resnet34_forward.26
= control target key start
LH: loop header
LB: loop body
LE: loop exit
PB: predicated region body
PF: predicated region fallthrough
CT: control target
= control target key end

     0   :  { %s2072_s1 = inlined_call_operand.vmem [shape: bf16[1152,256], index: 1, kind: input, shape index: {}]   ;;  %s2073_s0 = inlined_call_operand.vmem [shape: bf16[16,1152], index: 0, kind: input, shape index: {}]   ;;  %s2074_s2 = inlined_call_operand.vmem [shape: f32[1,256], index: 2, kind: input, shape index: {}]   ;;  %s2075_s3 = inlined_call_operand.vmem [shape: f32[16,256], index: 3, kind: output, shape index: {}]  }
   0x1   :  { %v1348_v0 = vld [vmem:[%s2072_s1 + $0x4] ss:$8 sps:$4 sm:$0xff]   ;;  %v1352_v2 = vld [vmem:[%s2072_s1] ss:$8 sps:$4 sm:$0xff]   ;;  %v1354_v4 = vld [vmem:[%s2072_s1 + $0x14] ss:$8 sps:$4 sm:$0xff]  }
   0x2   :  { %v1350_v1 = vld [vmem:[%s2072_s1 + $0x204] ss:$8 sps:$4 sm:$0xff]   ;;  %947 = vmatprep.subr.bf16.mxu1 %v1348_v0  ;;  %v1353_v3 = vld [vmem:[%s2072_s1 + $0x200] ss:$8 sps:$4 sm:$0xff]   ;;  %v1356_v5 = vld [vmem:[%s2072_s1 + $0x214] ss:$8 sps:$4 sm:$0xff]  }
   0x3   :  { %1033 = vmatprep.subr.bf16.mxu0 %v1350_v1  ;;  %948 = vmatpush1.bf16.msra.mxu1 %v1352_v2  ;;  %v1358_v6 = vld [vmem:[%s2072_s1 + $0x10] ss:$8 sps:$4 sm:$0xff]   ;;  %v1360_v8 = vld [vmem:[%s2072_s1 + $0x24] ss:$8 sps:$4 sm:$0xff]   ;;  %v1364_v10 = vld [vmem:[%s2072_s1 + $0x20] ss:$8 sps:$4 sm:$0xff]  }
   0x4   :  { %1034 = vmatpush1.bf16.msra.mxu0 %v1353_v3  ;;  %949 = vmatprep.subr.bf16.mxu1 %v1354_v4  ;;  %v1359_v7 = vld [vmem:[%s2072_s1 + $0x210] ss:$8 sps:$4 sm:$0xff]   ;;  %v1362_v9 = vld [vmem:[%s2072_s1 + $0x224] ss:$8 sps:$4 sm:$0xff]   ;;  %v1365_v11 = vld [vmem:[%s2072_s1 + $0x220] ss:$8 sps:$4 sm:$0xff]  }
   0x5   :  { %1035 = vmatprep.subr.bf16.mxu0 %v1356_v5  ;;  %v1366_v12 = vld [vmem:[%s2072_s1 + $0x34] ss:$8 sps:$4 sm:$0xff]   ;;  %v1370_v14 = vld [vmem:[%s2072_s1 + $0x30] ss:$8 sps:$4 sm:$0xff]   ;;  %v1372_v16 = vld [vmem:[%s2072_s1 + $0x44] ss:$8 sps:$4 sm:$0xff]  }
   0x6   :  { %v1368_v13 = vld [vmem:[%s2072_s1 + $0x234] ss:$8 sps:$4 sm:$0xff]   ;;  %v1371_v15 = vld [vmem:[%s2072_s1 + $0x230] ss:$8 sps:$4 sm:$0xff]   ;;  %v1374_v17 = vld [vmem:[%s2072_s1 + $0x244] ss:$8 sps:$4 sm:$0xff]  }
   0x7   :  { %950 = vmatpush1.bf16.msra.mxu1 %v1358_v6  ;;  %v1376_v18 = vld [vmem:[%s2072_s1 + $0x40] ss:$8 sps:$4 sm:$0xff]   ;;  %v1378_v20 = vld [vmem:[%s2072_s1 + $0x54] ss:$8 sps:$4 sm:$0xff]   ;;  %v1382_v22 = vld [vmem:[%s2072_s1 + $0x50] ss:$8 sps:$4 sm:$0xff]  }
   0x8   :  { %1036 = vmatpush1.bf16.msra.mxu0 %v1359_v7  ;;  %951 = vmatprep.subr.bf16.mxu1 %v1360_v8  ;;  %v1377_v19 = vld [vmem:[%s2072_s1 + $0x240] ss:$8 sps:$4 sm:$0xff]   ;;  %v1380_v21 = vld [vmem:[%s2072_s1 + $0x254] ss:$8 sps:$4 sm:$0xff]   ;;  %v1383_v23 = vld [vmem:[%s2072_s1 + $0x250] ss:$8 sps:$4 sm:$0xff]  }
   0x9   :  { %1037 = vmatprep.subr.bf16.mxu0 %v1362_v9  ;;  %v1384_v24 = vld [vmem:[%s2072_s1 + $0x64] ss:$8 sps:$4 sm:$0xff]   ;;  %v1388_v26 = vld [vmem:[%s2072_s1 + $0x60] ss:$8 sps:$4 sm:$0xff]   ;;  %v1390_v28 = vld [vmem:[%s2072_s1 + $0x74] ss:$8 sps:$4 sm:$0xff]  }
   0xa   :  { %v1386_v25 = vld [vmem:[%s2072_s1 + $0x264] ss:$8 sps:$4 sm:$0xff]   ;;  %v1389_v27 = vld [vmem:[%s2072_s1 + $0x260] ss:$8 sps:$4 sm:$0xff]   ;;  %v1392_v29 = vld [vmem:[%s2072_s1 + $0x274] ss:$8 sps:$4 sm:$0xff]  }
   0xb   :  { %952 = vmatpush1.bf16.msra.mxu1 %v1364_v10  ;;  %v1394_v30 = vld [vmem:[%s2072_s1 + $0x70] ss:$8 sps:$4 sm:$0xff]   ;;  %v1396_v32 = vld [vmem:[%s2072_s1 + $0x84] ss:$8 sps:$4 sm:$0xff]   ;;  %v1400_v34 = vld [vmem:[%s2072_s1 + $0x80] ss:$8 sps:$4 sm:$0xff]  }
   0xc   :  { %1038 = vmatpush1.bf16.msra.mxu0 %v1365_v11  ;;  %953 = vmatprep.subr.bf16.mxu1 %v1366_v12  ;;  %v1395_v31 = vld [vmem:[%s2072_s1 + $0x270] ss:$8 sps:$4 sm:$0xff]   ;;  %v1398_v33 = vld [vmem:[%s2072_s1 + $0x284] ss:$8 sps:$4 sm:$0xff]   ;;  %v1401_v35 = vld [vmem:[%s2072_s1 + $0x280] ss:$8 sps:$4 sm:$0xff]  }
   0xd   :  { %1039 = vmatprep.subr.bf16.mxu0 %v1368_v13  ;;  %v1402_v36 = vld [vmem:[%s2072_s1 + $0x94] ss:$8 sps:$4 sm:$0xff]   ;;  %v1406_v38 = vld [vmem:[%s2072_s1 + $0x90] ss:$8 sps:$4 sm:$0xff]   ;;  %v1408_v40 = vld [vmem:[%s2072_s1 + $0xa4] ss:$8 sps:$4 sm:$0xff]  }
   0xe   :  { %v1404_v37 = vld [vmem:[%s2072_s1 + $0x294] ss:$8 sps:$4 sm:$0xff]   ;;  %v1407_v39 = vld [vmem:[%s2072_s1 + $0x290] ss:$8 sps:$4 sm:$0xff]   ;;  %v1410_v41 = vld [vmem:[%s2072_s1 + $0x2a4] ss:$8 sps:$4 sm:$0xff]  }
   0xf   :  { %954 = vmatpush1.bf16.msra.mxu1 %v1370_v14  ;;  %v1412_v42 = vld [vmem:[%s2072_s1 + $0xa0] ss:$8 sps:$4 sm:$0xff]   ;;  %v1414_v44 = vld [vmem:[%s2072_s1 + $0xb4] ss:$8 sps:$4 sm:$0xff]   ;;  %v1418_v46 = vld [vmem:[%s2072_s1 + $0xb0] ss:$8 sps:$4 sm:$0xff]  }
  0x10   :  { %1040 = vmatpush1.bf16.msra.mxu0 %v1371_v15  ;;  %955 = vmatprep.subr.bf16.mxu1 %v1372_v16  ;;  %v1413_v43 = vld [vmem:[%s2072_s1 + $0x2a0] ss:$8 sps:$4 sm:$0xff]   ;;  %v1416_v45 = vld [vmem:[%s2072_s1 + $0x2b4] ss:$8 sps:$4 sm:$0xff]   ;;  %v1419_v47 = vld [vmem:[%s2072_s1 + $0x2b0] ss:$8 sps:$4 sm:$0xff]  }
  0x11   :  { %1041 = vmatprep.subr.bf16.mxu0 %v1374_v17  ;;  %v1446_v48 = vld [vmem:[%s2073_s0 + $0x4] ss:$36 sps:$4 sm:$0xff]   ;;  %v1452_v51 = vld [vmem:[%s2073_s0 + $0x14] ss:$36 sps:$4 sm:$0xff]  }
  0x12   :  { %v1420_v49 = vld [vmem:[%s2072_s1 + $0xc4] ss:$8 sps:$4 sm:$0xff]   ;;  %979 = vmatprep.mubr.bf16.mxu1 %v1446_v48  ;;  %v1424_v52 = vld [vmem:[%s2072_s1 + $0xc0] ss:$8 sps:$4 sm:$0xff]   ;;  %v1426_v54 = vld [vmem:[%s2072_s1 + $0xd4] ss:$8 sps:$4 sm:$0xff]   ;;  %1065 = vmatprep.mubr.bf16.mxu0 %v1452_v51 }
  0x13   :  { %956 = vmatpush1.bf16.msra.mxu1 %v1376_v18  ;;  %v1422_v50 = vld [vmem:[%s2072_s1 + $0x2c4] ss:$8 sps:$4 sm:$0xff]   ;;  %v1425_v53 = vld [vmem:[%s2072_s1 + $0x2c0] ss:$8 sps:$4 sm:$0xff]   ;;  %v1428_v55 = vld [vmem:[%s2072_s1 + $0x2d4] ss:$8 sps:$4 sm:$0xff]  }
  0x14   :  { %1042 = vmatpush1.bf16.msra.mxu0 %v1377_v19  ;;  %957 = vmatprep.subr.bf16.mxu1 %v1378_v20  ;;  %v1430_v56 = vld [vmem:[%s2072_s1 + $0xd0] ss:$8 sps:$4 sm:$0xff]   ;;  %v1432_v58 = vld [vmem:[%s2072_s1 + $0xe4] ss:$8 sps:$4 sm:$0xff]   ;;  %v1436_v60 = vld [vmem:[%s2072_s1 + $0xe0] ss:$8 sps:$4 sm:$0xff]  }
  0x15   :  { %1043 = vmatprep.subr.bf16.mxu0 %v1380_v21  ;;  %v1431_v57 = vld [vmem:[%s2072_s1 + $0x2d0] ss:$8 sps:$4 sm:$0xff]   ;;  %v1434_v59 = vld [vmem:[%s2072_s1 + $0x2e4] ss:$8 sps:$4 sm:$0xff]   ;;  %v1437_v61 = vld [vmem:[%s2072_s1 + $0x2e0] ss:$8 sps:$4 sm:$0xff]  }
  0x16   :  { %v1438_v62 = vld [vmem:[%s2072_s1 + $0xf4] ss:$8 sps:$4 sm:$0xff]   ;;  %v1442_v0 = vld [vmem:[%s2072_s1 + $0xf0] ss:$8 sps:$4 sm:$0xff]   ;;  %v1449_v2 = vld [vmem:[%s2072_s1 + $0x104] ss:$8 sps:$4 sm:$0xff]  }
  0x17   :  { %958 = vmatpush1.bf16.msra.mxu1 %v1382_v22  ;;  %v1440_v63 = vld [vmem:[%s2072_s1 + $0x2f4] ss:$8 sps:$4 sm:$0xff]   ;;  %v1443_v1 = vld [vmem:[%s2072_s1 + $0x2f0] ss:$8 sps:$4 sm:$0xff]   ;;  %v1455_v3 = vld [vmem:[%s2072_s1 + $0x304] ss:$8 sps:$4 sm:$0xff]  }
  0x18   :  { %1044 = vmatpush1.bf16.msra.mxu0 %v1383_v23  ;;  %959 = vmatprep.subr.bf16.mxu1 %v1384_v24  ;;  %v1444_v4 = vld [vmem:[%s2073_s0] ss:$36 sps:$4 sm:$0xff]   ;;  %v1450_v6 = vld [vmem:[%s2073_s0 + $0x10] ss:$36 sps:$4 sm:$0xff]  }
  0x19   :  { %1045 = vmatprep.subr.bf16.mxu0 %v1386_v25  ;;  %v1447_v5 = vld [vmem:[%s2072_s1 + $0x100] ss:$8 sps:$4 sm:$0xff]   ;;  %v1458_v8 = vld [vmem:[%s2072_s1 + $0x114] ss:$8 sps:$4 sm:$0xff]   ;;  %v1456_v10 = vld [vmem:[%s2072_s1 + $0x110] ss:$8 sps:$4 sm:$0xff]  }
  0x1a   :  { %v1453_v7 = vld [vmem:[%s2072_s1 + $0x300] ss:$8 sps:$4 sm:$0xff]   ;;  %v1461_v9 = vld [vmem:[%s2072_s1 + $0x314] ss:$8 sps:$4 sm:$0xff]   ;;  %v1459_v11 = vld [vmem:[%s2072_s1 + $0x310] ss:$8 sps:$4 sm:$0xff]  }
  0x1b   :  { %960 = vmatpush1.bf16.msra.mxu1 %v1388_v26  ;;  %v1464_v12 = vld [vmem:[%s2072_s1 + $0x124] ss:$8 sps:$4 sm:$0xff]   ;;  %v1462_v14 = vld [vmem:[%s2072_s1 + $0x120] ss:$8 sps:$4 sm:$0xff]   ;;  %v1470_v16 = vld [vmem:[%s2072_s1 + $0x134] ss:$8 sps:$4 sm:$0xff]  }
  0x1c   :  { %1046 = vmatpush1.bf16.msra.mxu0 %v1389_v27  ;;  %961 = vmatprep.subr.bf16.mxu1 %v1390_v28  ;;  %v1467_v13 = vld [vmem:[%s2072_s1 + $0x324] ss:$8 sps:$4 sm:$0xff]   ;;  %v1465_v15 = vld [vmem:[%s2072_s1 + $0x320] ss:$8 sps:$4 sm:$0xff]   ;;  %v1473_v17 = vld [vmem:[%s2072_s1 + $0x334] ss:$8 sps:$4 sm:$0xff]  }
  0x1d   :  { %1047 = vmatprep.subr.bf16.mxu0 %v1392_v29  ;;  %v1468_v18 = vld [vmem:[%s2072_s1 + $0x130] ss:$8 sps:$4 sm:$0xff]   ;;  %v1476_v20 = vld [vmem:[%s2072_s1 + $0x144] ss:$8 sps:$4 sm:$0xff]   ;;  %v1474_v22 = vld [vmem:[%s2072_s1 + $0x140] ss:$8 sps:$4 sm:$0xff]  }
  0x1e   :  { %v1471_v19 = vld [vmem:[%s2072_s1 + $0x330] ss:$8 sps:$4 sm:$0xff]   ;;  %v1479_v21 = vld [vmem:[%s2072_s1 + $0x344] ss:$8 sps:$4 sm:$0xff]   ;;  %v1477_v23 = vld [vmem:[%s2072_s1 + $0x340] ss:$8 sps:$4 sm:$0xff]  }
  0x1f   :  { %962 = vmatpush1.bf16.msra.mxu1 %v1394_v30  ;;  %v1482_v24 = vld [vmem:[%s2072_s1 + $0x154] ss:$8 sps:$4 sm:$0xff]   ;;  %v1480_v26 = vld [vmem:[%s2072_s1 + $0x150] ss:$8 sps:$4 sm:$0xff]   ;;  %v1488_v28 = vld [vmem:[%s2072_s1 + $0x164] ss:$8 sps:$4 sm:$0xff]  }
  0x20   :  { %1048 = vmatpush1.bf16.msra.mxu0 %v1395_v31  ;;  %963 = vmatprep.subr.bf16.mxu1 %v1396_v32  ;;  %v1485_v25 = vld [vmem:[%s2072_s1 + $0x354] ss:$8 sps:$4 sm:$0xff]   ;;  %v1483_v27 = vld [vmem:[%s2072_s1 + $0x350] ss:$8 sps:$4 sm:$0xff]   ;;  %v1491_v29 = vld [vmem:[%s2072_s1 + $0x364] ss:$8 sps:$4 sm:$0xff]  }
  0x21   :  { %1049 = vmatprep.subr.bf16.mxu0 %v1398_v33  ;;  %v1486_v30 = vld [vmem:[%s2072_s1 + $0x160] ss:$8 sps:$4 sm:$0xff]   ;;  %v1494_v32 = vld [vmem:[%s2072_s1 + $0x174] ss:$8 sps:$4 sm:$0xff]  }
  0x22   :  { %v1489_v31 = vld [vmem:[%s2072_s1 + $0x360] ss:$8 sps:$4 sm:$0xff]   ;;  %v1497_v33 = vld [vmem:[%s2072_s1 + $0x374] ss:$8 sps:$4 sm:$0xff]  }
  0x23   :  { %964 = vmatpush1.bf16.msra.mxu1 %v1400_v34  ;;  %v1548_v34 = vld [vmem:[%s2073_s0 + $0xc] ss:$36 sps:$4 sm:$0xff]   ;;  %v1510_v48 = vld [vmem:[%s2072_s1 + $0x1a0] ss:$8 sps:$4 sm:$0xff]   ;;  %v1521_v51 = vld [vmem:[%s2072_s1 + $0x3b4] ss:$8 sps:$4 sm:$0xff]  }
  0x24   :  { %1050 = vmatpush1.bf16.msra.mxu0 %v1401_v35  ;;  %965 = vmatprep.subr.bf16.mxu1 %v1402_v36  ;;  %v1551_v35 = vld [vmem:[%s2073_s0 + $0x1c] ss:$36 sps:$4 sm:$0xff]   ;;  %v1492_v36 = vld [vmem:[%s2072_s1 + $0x170] ss:$8 sps:$4 sm:$0xff]  }
  0x25   :  { %1051 = vmatprep.subr.bf16.mxu0 %v1404_v37  ;;  %v1495_v37 = vld [vmem:[%s2072_s1 + $0x370] ss:$8 sps:$4 sm:$0xff]  }
  0x27   :  { %966 = vmatpush1.bf16.msra.mxu1 %v1406_v38  ;;  %v1500_v38 = vld [vmem:[%s2072_s1 + $0x184] ss:$8 sps:$4 sm:$0xff]  }
  0x28   :  { %1052 = vmatpush1.bf16.msra.mxu0 %v1407_v39  ;;  %967 = vmatprep.subr.bf16.mxu1 %v1408_v40  ;;  %v1503_v39 = vld [vmem:[%s2072_s1 + $0x384] ss:$8 sps:$4 sm:$0xff]   ;;  %v1498_v40 = vld [vmem:[%s2072_s1 + $0x180] ss:$8 sps:$4 sm:$0xff]  }
  0x29   :  { %1053 = vmatprep.subr.bf16.mxu0 %v1410_v41  ;;  %v1501_v41 = vld [vmem:[%s2072_s1 + $0x380] ss:$8 sps:$4 sm:$0xff]  }
  0x2b   :  { %968 = vmatpush1.bf16.msra.mxu1 %v1412_v42  ;;  %v1506_v42 = vld [vmem:[%s2072_s1 + $0x194] ss:$8 sps:$4 sm:$0xff]  }
  0x2c   :  { %1054 = vmatpush1.bf16.msra.mxu0 %v1413_v43  ;;  %969 = vmatprep.subr.bf16.mxu1 %v1414_v44  ;;  %v1509_v43 = vld [vmem:[%s2072_s1 + $0x394] ss:$8 sps:$4 sm:$0xff]   ;;  %v1504_v44 = vld [vmem:[%s2072_s1 + $0x190] ss:$8 sps:$4 sm:$0xff]  }
  0x2d   :  { %1055 = vmatprep.subr.bf16.mxu0 %v1416_v45  ;;  %v1507_v45 = vld [vmem:[%s2072_s1 + $0x390] ss:$8 sps:$4 sm:$0xff]  }
  0x2f   :  { %970 = vmatpush1.bf16.msra.mxu1 %v1418_v46  ;;  %v1512_v46 = vld [vmem:[%s2072_s1 + $0x1a4] ss:$8 sps:$4 sm:$0xff]  }
  0x30   :  { %1056 = vmatpush1.bf16.msra.mxu0 %v1419_v47  ;;  %971 = vmatprep.subr.bf16.mxu1 %v1420_v49  ;;  %v1515_v47 = vld [vmem:[%s2072_s1 + $0x3a4] ss:$8 sps:$4 sm:$0xff]   ;;  %v1513_v49 = vld [vmem:[%s2072_s1 + $0x3a0] ss:$8 sps:$4 sm:$0xff]  }
  0x31   :  { %1057 = vmatprep.subr.bf16.mxu0 %v1422_v50  ;;  %v1518_v50 = vld [vmem:[%s2072_s1 + $0x1b4] ss:$8 sps:$4 sm:$0xff]  }
  0x33   :  { %972 = vmatpush1.bf16.msra.mxu1 %v1424_v52  ;;  %v1516_v52 = vld [vmem:[%s2072_s1 + $0x1b0] ss:$8 sps:$4 sm:$0xff]  }
  0x34   :  { %1058 = vmatpush1.bf16.msra.mxu0 %v1425_v53  ;;  %973 = vmatprep.subr.bf16.mxu1 %v1426_v54  ;;  %v1519_v53 = vld [vmem:[%s2072_s1 + $0x3b0] ss:$8 sps:$4 sm:$0xff]   ;;  %v1524_v54 = vld [vmem:[%s2072_s1 + $0x1c4] ss:$8 sps:$4 sm:$0xff]  }
  0x35   :  { %1059 = vmatprep.subr.bf16.mxu0 %v1428_v55  ;;  %v1527_v55 = vld [vmem:[%s2072_s1 + $0x3c4] ss:$8 sps:$4 sm:$0xff]  }
  0x37   :  { %974 = vmatpush1.bf16.msra.mxu1 %v1430_v56  ;;  %v1522_v56 = vld [vmem:[%s2072_s1 + $0x1c0] ss:$8 sps:$4 sm:$0xff]  }
  0x38   :  { %1060 = vmatpush1.bf16.msra.mxu0 %v1431_v57  ;;  %975 = vmatprep.subr.bf16.mxu1 %v1432_v58  ;;  %v1525_v57 = vld [vmem:[%s2072_s1 + $0x3c0] ss:$8 sps:$4 sm:$0xff]   ;;  %v1530_v58 = vld [vmem:[%s2072_s1 + $0x1d4] ss:$8 sps:$4 sm:$0xff]  }
  0x39   :  { %1061 = vmatprep.subr.bf16.mxu0 %v1434_v59  ;;  %v1533_v59 = vld [vmem:[%s2072_s1 + $0x3d4] ss:$8 sps:$4 sm:$0xff]  }
  0x3b   :  { %976 = vmatpush1.bf16.msra.mxu1 %v1436_v60  ;;  %v1528_v60 = vld [vmem:[%s2072_s1 + $0x1d0] ss:$8 sps:$4 sm:$0xff]  }
  0x3c   :  { %1062 = vmatpush1.bf16.msra.mxu0 %v1437_v61  ;;  %977 = vmatprep.subr.bf16.mxu1 %v1438_v62  ;;  %v1531_v61 = vld [vmem:[%s2072_s1 + $0x3d0] ss:$8 sps:$4 sm:$0xff]   ;;  %v1536_v62 = vld [vmem:[%s2072_s1 + $0x1e4] ss:$8 sps:$4 sm:$0xff]  }
  0x3d   :  { %1063 = vmatprep.subr.bf16.mxu0 %v1440_v63  ;;  %v1539_v63 = vld [vmem:[%s2072_s1 + $0x3e4] ss:$8 sps:$4 sm:$0xff]  }
  0x3f   :  { %978 = vmatpush1.bf16.msra.mxu1 %v1442_v0  ;;  %v1534_v0 = vld [vmem:[%s2072_s1 + $0x1e0] ss:$8 sps:$4 sm:$0xff]  }
  0x40   :  { %1064 = vmatpush1.bf16.msra.mxu0 %v1443_v1  ;;  %990 = vmatprep.subr.bf16.mxu1 %v1449_v2  ;;  %v1537_v1 = vld [vmem:[%s2072_s1 + $0x3e0] ss:$8 sps:$4 sm:$0xff]   ;;  %v1542_v2 = vld [vmem:[%s2072_s1 + $0x1f4] ss:$8 sps:$4 sm:$0xff]  }
  0x41   :  { %1076 = vmatprep.subr.bf16.mxu0 %v1455_v3  ;;  %v1545_v3 = vld [vmem:[%s2072_s1 + $0x3f4] ss:$8 sps:$4 sm:$0xff]  }
  0x42   :  { %980 = vmatmul.mubr.bf16.vlgmr.msra.gmra.mrb[0].mxu1 %v1444_v4  ;;  %v1540_v4 = vld [vmem:[%s2072_s1 + $0x1f0] ss:$8 sps:$4 sm:$0xff]  }
  0x43   :  { %1066 = vmatmul.mubr.bf16.vlgmr.msra.gmra.mrb[0].mxu0 %v1450_v6  ;;  %991 = vmatpush1.bf16.msra.mxu1 %v1447_v5  ;;  %v1543_v5 = vld [vmem:[%s2072_s1 + $0x3f0] ss:$8 sps:$4 sm:$0xff]   ;;  %v1554_v6 = vld [vmem:[%s2072_s1 + $0x404] ss:$8 sps:$4 sm:$0xff]  }
  0x44   :  { %1077 = vmatpush1.bf16.msra.mxu0 %v1453_v7  ;;  %992 = vmatprep.subr.bf16.mxu1 %v1458_v8  ;;  %v1546_v7 = vld [vmem:[%s2073_s0 + $0x8] ss:$36 sps:$4 sm:$0xff]   ;;  %v1549_v8 = vld [vmem:[%s2073_s0 + $0x18] ss:$36 sps:$4 sm:$0xff]  }
  0x45   :  { %1078 = vmatprep.subr.bf16.mxu0 %v1461_v9  ;;  %1022 = vmatprep.mubr.bf16.mxu1 %v1548_v34  ;;  %v1552_v9 = vld [vmem:[%s2072_s1 + $0x400] ss:$8 sps:$4 sm:$0xff]  }
  0x46   :  { %1108 = vmatprep.mubr.bf16.mxu0 %v1551_v35 }
  0x47   :  { %993 = vmatpush1.bf16.msra.mxu1 %v1456_v10  ;;  %v1557_v10 = vld [vmem:[%s2072_s1 + $0x414] ss:$8 sps:$4 sm:$0xff]  }
  0x48   :  { %1079 = vmatpush1.bf16.msra.mxu0 %v1459_v11  ;;  %994 = vmatprep.subr.bf16.mxu1 %v1464_v12  ;;  %v1555_v11 = vld [vmem:[%s2072_s1 + $0x410] ss:$8 sps:$4 sm:$0xff]   ;;  %v1577_v12 = vmov 0  }
  0x49   :  { %1080 = vmatprep.subr.bf16.mxu0 %v1467_v13  ;;  %v1560_v13 = vld [vmem:[%s2072_s1 + $0x424] ss:$8 sps:$4 sm:$0xff]  }
  0x4b   :  { %995 = vmatpush1.bf16.msra.mxu1 %v1462_v14  ;;  %v1558_v14 = vld [vmem:[%s2072_s1 + $0x420] ss:$8 sps:$4 sm:$0xff]  }
  0x4c   :  { %1081 = vmatpush1.bf16.msra.mxu0 %v1465_v15  ;;  %996 = vmatprep.subr.bf16.mxu1 %v1470_v16  ;;  %v1563_v15 = vld [vmem:[%s2072_s1 + $0x434] ss:$8 sps:$4 sm:$0xff]   ;;  %v1561_v16 = vld [vmem:[%s2072_s1 + $0x430] ss:$8 sps:$4 sm:$0xff]  }
  0x4d   :  { %1082 = vmatprep.subr.bf16.mxu0 %v1473_v17  ;;  %v1566_v17 = vld [vmem:[%s2072_s1 + $0x444] ss:$8 sps:$4 sm:$0xff]  }
  0x4f   :  { %997 = vmatpush1.bf16.msra.mxu1 %v1468_v18  ;;  %v1564_v18 = vld [vmem:[%s2072_s1 + $0x440] ss:$8 sps:$4 sm:$0xff]  }
  0x50   :  { %1083 = vmatpush1.bf16.msra.mxu0 %v1471_v19  ;;  %998 = vmatprep.subr.bf16.mxu1 %v1476_v20  ;;  %v1569_v19 = vld [vmem:[%s2072_s1 + $0x454] ss:$8 sps:$4 sm:$0xff]   ;;  %v1567_v20 = vld [vmem:[%s2072_s1 + $0x450] ss:$8 sps:$4 sm:$0xff]  }
  0x51   :  { %1084 = vmatprep.subr.bf16.mxu0 %v1479_v21  ;;  %v1572_v21 = vld [vmem:[%s2072_s1 + $0x464] ss:$8 sps:$4 sm:$0xff]  }
  0x53   :  { %999 = vmatpush1.bf16.msra.mxu1 %v1474_v22  ;;  %v1570_v22 = vld [vmem:[%s2072_s1 + $0x460] ss:$8 sps:$4 sm:$0xff]  }
  0x54   :  { %1085 = vmatpush1.bf16.msra.mxu0 %v1477_v23  ;;  %1000 = vmatprep.subr.bf16.mxu1 %v1482_v24  ;;  %v1575_v23 = vld [vmem:[%s2072_s1 + $0x474] ss:$8 sps:$4 sm:$0xff]   ;;  %v1573_v24 = vld [vmem:[%s2072_s1 + $0x470] ss:$8 sps:$4 sm:$0xff]  }
  0x55   :  { %1086 = vmatprep.subr.bf16.mxu0 %v1485_v25  ;;  %v1576_v25 = vld [vmem:[%s2073_s0 + $0x20] ss:$36 sps:$4 sm:$0xff]  }
  0x57   :  { %1001 = vmatpush1.bf16.msra.mxu1 %v1480_v26 }
  0x58   :  { %1087 = vmatpush1.bf16.msra.mxu0 %v1483_v27  ;;  %1002 = vmatprep.subr.bf16.mxu1 %v1488_v28 }
  0x59   :  { %1088 = vmatprep.subr.bf16.mxu0 %v1491_v29 }
  0x5b   :  { %1003 = vmatpush1.bf16.msra.mxu1 %v1486_v30  ;;  %v171_v30 = vlaneseq }
  0x5c   :  { %1089 = vmatpush1.bf16.msra.mxu0 %v1489_v31  ;;  %1004 = vmatprep.subr.bf16.mxu1 %v1494_v32 }
  0x5d   :  { %1090 = vmatprep.subr.bf16.mxu0 %v1497_v33  ;;  %v172_v31 = vshrl.u32 %v171_v30, 7  ;;  %v169_v33 = vld [vmem:[%s2074_s2] sm:$0x3] }
  0x5f   :  { %1005 = vmatpush1.bf16.msra.mxu1 %v1492_v36  ;;  %v173_v32 = vsub.s32 0, %v172_v31  ;;  %v177_v34 = vsub.s32 1, %v172_v31 }
  0x60   :  { %1091 = vmatpush1.bf16.msra.mxu0 %v1495_v37  ;;  %1006 = vmatprep.subr.bf16.mxu1 %v1500_v38 }
  0x61   :  { %1092 = vmatprep.subr.bf16.mxu0 %v1503_v39  ;;  %v174_v35 = vrot.slane %v169_v33, %v173_v32  ;;  %v178_v36 = vrot.slane %v169_v33, %v177_v34 }
  0x63   :  { %1007 = vmatpush1.bf16.msra.mxu1 %v1498_v40 }
  0x64   :  { %1093 = vmatpush1.bf16.msra.mxu0 %v1501_v41  ;;  %1008 = vmatprep.subr.bf16.mxu1 %v1506_v42 }
  0x65   :  { %1094 = vmatprep.subr.bf16.mxu0 %v1509_v43 }
  0x67   :  { %1009 = vmatpush1.bf16.msra.mxu1 %v1504_v44 }
  0x68   :  { %1095 = vmatpush1.bf16.msra.mxu0 %v1507_v45  ;;  %1010 = vmatprep.subr.bf16.mxu1 %v1512_v46 }
  0x69   :  { %1096 = vmatprep.subr.bf16.mxu0 %v1515_v47 }
  0x6b   :  { %1011 = vmatpush1.bf16.msra.mxu1 %v1510_v48 }
  0x6c   :  { %1097 = vmatpush1.bf16.msra.mxu0 %v1513_v49  ;;  %1012 = vmatprep.subr.bf16.mxu1 %v1518_v50 }
  0x6d   :  { %1098 = vmatprep.subr.bf16.mxu0 %v1521_v51 }
  0x6f   :  { %1013 = vmatpush1.bf16.msra.mxu1 %v1516_v52 }
  0x70   :  { %1099 = vmatpush1.bf16.msra.mxu0 %v1519_v53  ;;  %1014 = vmatprep.subr.bf16.mxu1 %v1524_v54 }
  0x71   :  { %1100 = vmatprep.subr.bf16.mxu0 %v1527_v55 }
  0x73   :  { %1015 = vmatpush1.bf16.msra.mxu1 %v1522_v56 }
  0x74   :  { %1101 = vmatpush1.bf16.msra.mxu0 %v1525_v57  ;;  %1016 = vmatprep.subr.bf16.mxu1 %v1530_v58 }
  0x75   :  { %1102 = vmatprep.subr.bf16.mxu0 %v1533_v59 }
  0x77   :  { %1017 = vmatpush1.bf16.msra.mxu1 %v1528_v60 }
  0x78   :  { %1103 = vmatpush1.bf16.msra.mxu0 %v1531_v61  ;;  %1018 = vmatprep.subr.bf16.mxu1 %v1536_v62 }
  0x79   :  { %1104 = vmatprep.subr.bf16.mxu0 %v1539_v63 }
  0x7b   :  { %1019 = vmatpush1.bf16.msra.mxu1 %v1534_v0 }
  0x7c   :  { %1105 = vmatpush1.bf16.msra.mxu0 %v1537_v1  ;;  %1020 = vmatprep.subr.bf16.mxu1 %v1542_v2 }
  0x7d   :  { %1106 = vmatprep.subr.bf16.mxu0 %v1545_v3 }
  0x7f   :  { %1021 = vmatpush1.bf16.msra.mxu1 %v1540_v4 }
  0x80   :  { %1107 = vmatpush1.bf16.msra.mxu0 %v1543_v5 }
  0x81   :  { %1119 = vmatprep.subr.bf16.mxu0 %v1554_v6 }
  0x82   :  { %1023 = vmatmul.mubr.bf16.vlgmr.msra.gmra.mrb[0].mxu1 %v1546_v7 }
  0x83   :  { %1109 = vmatmul.mubr.bf16.vlgmr.msra.gmra.mrb[0].mxu0 %v1549_v8 }
  0x84   :  { %1120 = vmatpush1.bf16.msra.mxu0 %v1552_v9  ;;  %1151 = vmatprep.mubr.bf16.mxu0 %v1577_v12 }
  0x85   :  { %1121 = vmatprep.subr.bf16.mxu0 %v1557_v10 }
  0x88   :  { %1122 = vmatpush1.bf16.msra.mxu0 %v1555_v11 }
  0x89   :  { %1123 = vmatprep.subr.bf16.mxu0 %v1560_v13 }
  0x8c   :  { %1124 = vmatpush1.bf16.msra.mxu0 %v1558_v14 }
  0x8d   :  { %1125 = vmatprep.subr.bf16.mxu0 %v1563_v15 }
  0x90   :  { %1126 = vmatpush1.bf16.msra.mxu0 %v1561_v16 }
  0x91   :  { %1127 = vmatprep.subr.bf16.mxu0 %v1566_v17 }
  0x94   :  { %1128 = vmatpush1.bf16.msra.mxu0 %v1564_v18 }
  0x95   :  { %1129 = vmatprep.subr.bf16.mxu0 %v1569_v19 }
  0x98   :  { %1130 = vmatpush1.bf16.msra.mxu0 %v1567_v20 }
  0x99   :  { %1131 = vmatprep.subr.bf16.mxu0 %v1572_v21 }
  0x9c   :  { %1132 = vmatpush1.bf16.msra.mxu0 %v1570_v22 }
  0x9d   :  { %1133 = vmatprep.subr.bf16.mxu0 %v1575_v23 }
  0xa0   :  { %1134 = vmatpush1.bf16.msra.mxu0 %v1573_v24 }
  0xa3   :  { %1152 = vmatmul.mubr.bf16.vlgmr.msra.gmra.mrb[0].mxu0 %v1576_v25 }
 0x155   :  { %v1024_v26 = vpop.f32.mrb[0].mxu1 }
 0x156   :  { %v1026_v27 = vpop.f32.mrb[1].mxu1  ;;  %v1327_v37 = vadd.f32 %v1024_v26, %v174_v35 }
 0x157   :  { %v1028_v28 = vpop.f32.mrb[2].mxu1  ;;  %v1329_v38 = vadd.f32 %v1026_v27, %v178_v36 }
 0x158   :  { %v1030_v29 = vpop.f32.mrb[3].mxu1  ;;  %v1331_v40 = vadd.f32 %v1028_v28, %v174_v35 }
 0x159   :  { %v1333_v43 = vadd.f32 %v1030_v29, %v178_v36 }
 0x176   :  { %v1153_v39 = vpop.f32.mrb[0].mxu0 }
 0x177   :  { %v1328_v41 = vadd.f32 %v1327_v37, %v1153_v39  ;;  %v1155_v42 = vpop.f32.mrb[1].mxu0 }
 0x178   :  { %v1330_v44 = vadd.f32 %v1329_v38, %v1155_v42  ;;  %v1157_v45 = vpop.f32.mrb[2].mxu0 }
 0x179   :  { %v1162_v46 = vmax.f32 %v1328_v41, 0.0  ;;  %v1332_v47 = vadd.f32 %v1331_v40, %v1157_v45  ;;  %v1159_v48 = vpop.f32.mrb[3].mxu0 }
 0x17a   :  { %v1163_v49 = vmax.f32 %v1330_v44, 0.0  ;;  %v1334_v50 = vadd.f32 %v1333_v43, %v1159_v48 }
 0x17b   :  { %1166 = vst [vmem:[%s2075_s3] sm:$0xff] %v1162_v46  ;;  %v1164_v51 = vmax.f32 %v1332_v47, 0.0 }
 0x17c   :  { %1167 = vst [vmem:[%s2075_s3 + $0x8] sm:$0xff] %v1163_v49  ;;  %v1165_v52 = vmax.f32 %v1334_v50, 0.0 }
 0x17d   :  { %1168 = vst [vmem:[%s2075_s3 + $0x10] sm:$0xff] %v1164_v51 }
 0x17e   :  { %1169 = vst [vmem:[%s2075_s3 + $0x18] sm:$0xff] %v1165_v52 }

// kernel: resnet34_forward.27
= control target key start
LH: loop header
LB: loop body
LE: loop exit
PB: predicated region body
PF: predicated region fallthrough
CT: control target
= control target key end

     0   :  { %s4015_s1 = inlined_call_operand.vmem [shape: bf16[2304,256], index: 1, kind: input, shape index: {}]   ;;  %s4016_s0 = inlined_call_operand.vmem [shape: bf16[16,2304], index: 0, kind: input, shape index: {}]   ;;  %s4017_s2 = inlined_call_operand.vmem [shape: f32[1,256], index: 2, kind: input, shape index: {}]   ;;  %s4018_s3 = inlined_call_operand.vmem [shape: f32[16,256], index: 3, kind: output, shape index: {}]  }
   0x1   :  { %v2603_v0 = vld [vmem:[%s4015_s1 + $0x4] ss:$8 sps:$4 sm:$0xff]   ;;  %v2607_v2 = vld [vmem:[%s4015_s1] ss:$8 sps:$4 sm:$0xff]   ;;  %v2609_v4 = vld [vmem:[%s4015_s1 + $0x14] ss:$8 sps:$4 sm:$0xff]  }
   0x2   :  { %v2605_v1 = vld [vmem:[%s4015_s1 + $0x404] ss:$8 sps:$4 sm:$0xff]   ;;  %1862 = vmatprep.subr.bf16.mxu1 %v2603_v0  ;;  %v2608_v3 = vld [vmem:[%s4015_s1 + $0x400] ss:$8 sps:$4 sm:$0xff]   ;;  %v2611_v5 = vld [vmem:[%s4015_s1 + $0x414] ss:$8 sps:$4 sm:$0xff]  }
   0x3   :  { %2034 = vmatprep.subr.bf16.mxu0 %v2605_v1  ;;  %1863 = vmatpush1.bf16.msra.mxu1 %v2607_v2  ;;  %v2613_v6 = vld [vmem:[%s4015_s1 + $0x10] ss:$8 sps:$4 sm:$0xff]   ;;  %v2615_v8 = vld [vmem:[%s4015_s1 + $0x24] ss:$8 sps:$4 sm:$0xff]   ;;  %v2619_v10 = vld [vmem:[%s4015_s1 + $0x20] ss:$8 sps:$4 sm:$0xff]  }
   0x4   :  { %2035 = vmatpush1.bf16.msra.mxu0 %v2608_v3  ;;  %1864 = vmatprep.subr.bf16.mxu1 %v2609_v4  ;;  %v2614_v7 = vld [vmem:[%s4015_s1 + $0x410] ss:$8 sps:$4 sm:$0xff]   ;;  %v2617_v9 = vld [vmem:[%s4015_s1 + $0x424] ss:$8 sps:$4 sm:$0xff]   ;;  %v2620_v11 = vld [vmem:[%s4015_s1 + $0x420] ss:$8 sps:$4 sm:$0xff]  }
   0x5   :  { %2036 = vmatprep.subr.bf16.mxu0 %v2611_v5  ;;  %v2621_v12 = vld [vmem:[%s4015_s1 + $0x34] ss:$8 sps:$4 sm:$0xff]   ;;  %v2625_v14 = vld [vmem:[%s4015_s1 + $0x30] ss:$8 sps:$4 sm:$0xff]   ;;  %v2627_v16 = vld [vmem:[%s4015_s1 + $0x44] ss:$8 sps:$4 sm:$0xff]  }
   0x6   :  { %v2623_v13 = vld [vmem:[%s4015_s1 + $0x434] ss:$8 sps:$4 sm:$0xff]   ;;  %v2626_v15 = vld [vmem:[%s4015_s1 + $0x430] ss:$8 sps:$4 sm:$0xff]   ;;  %v2629_v17 = vld [vmem:[%s4015_s1 + $0x444] ss:$8 sps:$4 sm:$0xff]  }
   0x7   :  { %1865 = vmatpush1.bf16.msra.mxu1 %v2613_v6  ;;  %v2631_v18 = vld [vmem:[%s4015_s1 + $0x40] ss:$8 sps:$4 sm:$0xff]   ;;  %v2633_v20 = vld [vmem:[%s4015_s1 + $0x54] ss:$8 sps:$4 sm:$0xff]   ;;  %v2637_v22 = vld [vmem:[%s4015_s1 + $0x50] ss:$8 sps:$4 sm:$0xff]  }
   0x8   :  { %2037 = vmatpush1.bf16.msra.mxu0 %v2614_v7  ;;  %1866 = vmatprep.subr.bf16.mxu1 %v2615_v8  ;;  %v2632_v19 = vld [vmem:[%s4015_s1 + $0x440] ss:$8 sps:$4 sm:$0xff]   ;;  %v2635_v21 = vld [vmem:[%s4015_s1 + $0x454] ss:$8 sps:$4 sm:$0xff]   ;;  %v2638_v23 = vld [vmem:[%s4015_s1 + $0x450] ss:$8 sps:$4 sm:$0xff]  }
   0x9   :  { %2038 = vmatprep.subr.bf16.mxu0 %v2617_v9  ;;  %v2639_v24 = vld [vmem:[%s4015_s1 + $0x64] ss:$8 sps:$4 sm:$0xff]   ;;  %v2643_v26 = vld [vmem:[%s4015_s1 + $0x60] ss:$8 sps:$4 sm:$0xff]   ;;  %v2645_v28 = vld [vmem:[%s4015_s1 + $0x74] ss:$8 sps:$4 sm:$0xff]  }
   0xa   :  { %v2641_v25 = vld [vmem:[%s4015_s1 + $0x464] ss:$8 sps:$4 sm:$0xff]   ;;  %v2644_v27 = vld [vmem:[%s4015_s1 + $0x460] ss:$8 sps:$4 sm:$0xff]   ;;  %v2647_v29 = vld [vmem:[%s4015_s1 + $0x474] ss:$8 sps:$4 sm:$0xff]  }
   0xb   :  { %1867 = vmatpush1.bf16.msra.mxu1 %v2619_v10  ;;  %v2649_v30 = vld [vmem:[%s4015_s1 + $0x70] ss:$8 sps:$4 sm:$0xff]   ;;  %v2651_v32 = vld [vmem:[%s4015_s1 + $0x84] ss:$8 sps:$4 sm:$0xff]   ;;  %v2655_v34 = vld [vmem:[%s4015_s1 + $0x80] ss:$8 sps:$4 sm:$0xff]  }
   0xc   :  { %2039 = vmatpush1.bf16.msra.mxu0 %v2620_v11  ;;  %1868 = vmatprep.subr.bf16.mxu1 %v2621_v12  ;;  %v2650_v31 = vld [vmem:[%s4015_s1 + $0x470] ss:$8 sps:$4 sm:$0xff]   ;;  %v2653_v33 = vld [vmem:[%s4015_s1 + $0x484] ss:$8 sps:$4 sm:$0xff]   ;;  %v2656_v35 = vld [vmem:[%s4015_s1 + $0x480] ss:$8 sps:$4 sm:$0xff]  }
   0xd   :  { %2040 = vmatprep.subr.bf16.mxu0 %v2623_v13  ;;  %v2657_v36 = vld [vmem:[%s4015_s1 + $0x94] ss:$8 sps:$4 sm:$0xff]   ;;  %v2661_v38 = vld [vmem:[%s4015_s1 + $0x90] ss:$8 sps:$4 sm:$0xff]   ;;  %v2663_v40 = vld [vmem:[%s4015_s1 + $0xa4] ss:$8 sps:$4 sm:$0xff]  }
   0xe   :  { %v2659_v37 = vld [vmem:[%s4015_s1 + $0x494] ss:$8 sps:$4 sm:$0xff]   ;;  %v2662_v39 = vld [vmem:[%s4015_s1 + $0x490] ss:$8 sps:$4 sm:$0xff]   ;;  %v2665_v41 = vld [vmem:[%s4015_s1 + $0x4a4] ss:$8 sps:$4 sm:$0xff]  }
   0xf   :  { %1869 = vmatpush1.bf16.msra.mxu1 %v2625_v14  ;;  %v2667_v42 = vld [vmem:[%s4015_s1 + $0xa0] ss:$8 sps:$4 sm:$0xff]   ;;  %v2669_v44 = vld [vmem:[%s4015_s1 + $0xb4] ss:$8 sps:$4 sm:$0xff]   ;;  %v2673_v46 = vld [vmem:[%s4015_s1 + $0xb0] ss:$8 sps:$4 sm:$0xff]  }
  0x10   :  { %2041 = vmatpush1.bf16.msra.mxu0 %v2626_v15  ;;  %1870 = vmatprep.subr.bf16.mxu1 %v2627_v16  ;;  %v2668_v43 = vld [vmem:[%s4015_s1 + $0x4a0] ss:$8 sps:$4 sm:$0xff]   ;;  %v2671_v45 = vld [vmem:[%s4015_s1 + $0x4b4] ss:$8 sps:$4 sm:$0xff]   ;;  %v2674_v47 = vld [vmem:[%s4015_s1 + $0x4b0] ss:$8 sps:$4 sm:$0xff]  }
  0x11   :  { %2042 = vmatprep.subr.bf16.mxu0 %v2629_v17  ;;  %v2701_v48 = vld [vmem:[%s4016_s0 + $0x4] ss:$72 sps:$4 sm:$0xff]   ;;  %v2679_v52 = vld [vmem:[%s4015_s1 + $0xc0] ss:$8 sps:$4 sm:$0xff]   ;;  %v2681_v54 = vld [vmem:[%s4015_s1 + $0xd4] ss:$8 sps:$4 sm:$0xff]  }
  0x12   :  { %v2675_v49 = vld [vmem:[%s4015_s1 + $0xc4] ss:$8 sps:$4 sm:$0xff]   ;;  %1894 = vmatprep.mubr.bf16.mxu1 %v2701_v48  ;;  %v2680_v53 = vld [vmem:[%s4015_s1 + $0x4c0] ss:$8 sps:$4 sm:$0xff]   ;;  %v2683_v55 = vld [vmem:[%s4015_s1 + $0x4d4] ss:$8 sps:$4 sm:$0xff]  }
  0x13   :  { %1871 = vmatpush1.bf16.msra.mxu1 %v2631_v18  ;;  %v2677_v50 = vld [vmem:[%s4015_s1 + $0x4c4] ss:$8 sps:$4 sm:$0xff]   ;;  %v2685_v56 = vld [vmem:[%s4015_s1 + $0xd0] ss:$8 sps:$4 sm:$0xff]   ;;  %v2691_v60 = vld [vmem:[%s4015_s1 + $0xe0] ss:$8 sps:$4 sm:$0xff]  }
  0x14   :  { %2043 = vmatpush1.bf16.msra.mxu0 %v2632_v19  ;;  %1872 = vmatprep.subr.bf16.mxu1 %v2633_v20  ;;  %v2707_v51 = vld [vmem:[%s4016_s0 + $0x24] ss:$72 sps:$4 sm:$0xff]   ;;  %v2686_v57 = vld [vmem:[%s4015_s1 + $0x4d0] ss:$8 sps:$4 sm:$0xff]   ;;  %v2692_v61 = vld [vmem:[%s4015_s1 + $0x4e0] ss:$8 sps:$4 sm:$0xff]  }
  0x15   :  { %2044 = vmatprep.subr.bf16.mxu0 %v2635_v21  ;;  %2066 = vmatprep.mubr.bf16.mxu0 %v2707_v51  ;;  %v2687_v58 = vld [vmem:[%s4015_s1 + $0xe4] ss:$8 sps:$4 sm:$0xff]   ;;  %v2693_v62 = vld [vmem:[%s4015_s1 + $0xf4] ss:$8 sps:$4 sm:$0xff]   ;;  %v2697_v0 = vld [vmem:[%s4015_s1 + $0xf0] ss:$8 sps:$4 sm:$0xff]  }
  0x16   :  { %v2689_v59 = vld [vmem:[%s4015_s1 + $0x4e4] ss:$8 sps:$4 sm:$0xff]   ;;  %v2695_v63 = vld [vmem:[%s4015_s1 + $0x4f4] ss:$8 sps:$4 sm:$0xff]   ;;  %v2698_v1 = vld [vmem:[%s4015_s1 + $0x4f0] ss:$8 sps:$4 sm:$0xff]  }
  0x17   :  { %1873 = vmatpush1.bf16.msra.mxu1 %v2637_v22  ;;  %v2704_v2 = vld [vmem:[%s4015_s1 + $0x104] ss:$8 sps:$4 sm:$0xff]   ;;  %v2699_v4 = vld [vmem:[%s4016_s0] ss:$72 sps:$4 sm:$0xff]   ;;  %v2713_v8 = vld [vmem:[%s4015_s1 + $0x114] ss:$8 sps:$4 sm:$0xff]  }
  0x18   :  { %2045 = vmatpush1.bf16.msra.mxu0 %v2638_v23  ;;  %1874 = vmatprep.subr.bf16.mxu1 %v2639_v24  ;;  %v2710_v3 = vld [vmem:[%s4015_s1 + $0x504] ss:$8 sps:$4 sm:$0xff]   ;;  %v2702_v5 = vld [vmem:[%s4015_s1 + $0x100] ss:$8 sps:$4 sm:$0xff]   ;;  %v2716_v9 = vld [vmem:[%s4015_s1 + $0x514] ss:$8 sps:$4 sm:$0xff]  }
  0x19   :  { %2046 = vmatprep.subr.bf16.mxu0 %v2641_v25  ;;  %v2705_v6 = vld [vmem:[%s4016_s0 + $0x20] ss:$72 sps:$4 sm:$0xff]   ;;  %v2711_v10 = vld [vmem:[%s4015_s1 + $0x110] ss:$8 sps:$4 sm:$0xff]   ;;  %v2719_v12 = vld [vmem:[%s4015_s1 + $0x124] ss:$8 sps:$4 sm:$0xff]  }
  0x1a   :  { %v2708_v7 = vld [vmem:[%s4015_s1 + $0x500] ss:$8 sps:$4 sm:$0xff]   ;;  %v2714_v11 = vld [vmem:[%s4015_s1 + $0x510] ss:$8 sps:$4 sm:$0xff]   ;;  %v2722_v13 = vld [vmem:[%s4015_s1 + $0x524] ss:$8 sps:$4 sm:$0xff]  }
  0x1b   :  { %1875 = vmatpush1.bf16.msra.mxu1 %v2643_v26  ;;  %v2717_v14 = vld [vmem:[%s4015_s1 + $0x120] ss:$8 sps:$4 sm:$0xff]   ;;  %v2725_v16 = vld [vmem:[%s4015_s1 + $0x134] ss:$8 sps:$4 sm:$0xff]   ;;  %v2723_v18 = vld [vmem:[%s4015_s1 + $0x130] ss:$8 sps:$4 sm:$0xff]  }
  0x1c   :  { %2047 = vmatpush1.bf16.msra.mxu0 %v2644_v27  ;;  %1876 = vmatprep.subr.bf16.mxu1 %v2645_v28  ;;  %v2720_v15 = vld [vmem:[%s4015_s1 + $0x520] ss:$8 sps:$4 sm:$0xff]   ;;  %v2728_v17 = vld [vmem:[%s4015_s1 + $0x534] ss:$8 sps:$4 sm:$0xff]   ;;  %v2726_v19 = vld [vmem:[%s4015_s1 + $0x530] ss:$8 sps:$4 sm:$0xff]  }
  0x1d   :  { %2048 = vmatprep.subr.bf16.mxu0 %v2647_v29  ;;  %v2731_v20 = vld [vmem:[%s4015_s1 + $0x144] ss:$8 sps:$4 sm:$0xff]   ;;  %v2729_v22 = vld [vmem:[%s4015_s1 + $0x140] ss:$8 sps:$4 sm:$0xff]   ;;  %v2737_v24 = vld [vmem:[%s4015_s1 + $0x154] ss:$8 sps:$4 sm:$0xff]  }
  0x1e   :  { %v2734_v21 = vld [vmem:[%s4015_s1 + $0x544] ss:$8 sps:$4 sm:$0xff]   ;;  %v2732_v23 = vld [vmem:[%s4015_s1 + $0x540] ss:$8 sps:$4 sm:$0xff]   ;;  %v2740_v25 = vld [vmem:[%s4015_s1 + $0x554] ss:$8 sps:$4 sm:$0xff]  }
  0x1f   :  { %1877 = vmatpush1.bf16.msra.mxu1 %v2649_v30  ;;  %v2735_v26 = vld [vmem:[%s4015_s1 + $0x150] ss:$8 sps:$4 sm:$0xff]   ;;  %v2743_v28 = vld [vmem:[%s4015_s1 + $0x164] ss:$8 sps:$4 sm:$0xff]   ;;  %v2741_v30 = vld [vmem:[%s4015_s1 + $0x160] ss:$8 sps:$4 sm:$0xff]  }
  0x20   :  { %2049 = vmatpush1.bf16.msra.mxu0 %v2650_v31  ;;  %1878 = vmatprep.subr.bf16.mxu1 %v2651_v32  ;;  %v2738_v27 = vld [vmem:[%s4015_s1 + $0x550] ss:$8 sps:$4 sm:$0xff]   ;;  %v2746_v29 = vld [vmem:[%s4015_s1 + $0x564] ss:$8 sps:$4 sm:$0xff]   ;;  %v2744_v31 = vld [vmem:[%s4015_s1 + $0x560] ss:$8 sps:$4 sm:$0xff]  }
  0x21   :  { %2050 = vmatprep.subr.bf16.mxu0 %v2653_v33  ;;  %v2749_v32 = vld [vmem:[%s4015_s1 + $0x174] ss:$8 sps:$4 sm:$0xff]   ;;  %v2765_v48 = vld [vmem:[%s4015_s1 + $0x1a0] ss:$8 sps:$4 sm:$0xff]  }
  0x22   :  { %v2752_v33 = vld [vmem:[%s4015_s1 + $0x574] ss:$8 sps:$4 sm:$0xff]  }
  0x23   :  { %1879 = vmatpush1.bf16.msra.mxu1 %v2655_v34  ;;  %v2803_v34 = vld [vmem:[%s4016_s0 + $0xc] ss:$72 sps:$4 sm:$0xff]  }
  0x24   :  { %2051 = vmatpush1.bf16.msra.mxu0 %v2656_v35  ;;  %1880 = vmatprep.subr.bf16.mxu1 %v2657_v36  ;;  %v2747_v35 = vld [vmem:[%s4015_s1 + $0x170] ss:$8 sps:$4 sm:$0xff]   ;;  %v2776_v51 = vld [vmem:[%s4015_s1 + $0x5b4] ss:$8 sps:$4 sm:$0xff]  }
  0x25   :  { %2052 = vmatprep.subr.bf16.mxu0 %v2659_v37  ;;  %v2750_v36 = vld [vmem:[%s4015_s1 + $0x570] ss:$8 sps:$4 sm:$0xff]   ;;  %v2809_v37 = vld [vmem:[%s4016_s0 + $0x2c] ss:$72 sps:$4 sm:$0xff]  }
  0x27   :  { %1881 = vmatpush1.bf16.msra.mxu1 %v2661_v38  ;;  %v2755_v38 = vld [vmem:[%s4015_s1 + $0x184] ss:$8 sps:$4 sm:$0xff]  }
  0x28   :  { %2053 = vmatpush1.bf16.msra.mxu0 %v2662_v39  ;;  %1882 = vmatprep.subr.bf16.mxu1 %v2663_v40  ;;  %v2758_v39 = vld [vmem:[%s4015_s1 + $0x584] ss:$8 sps:$4 sm:$0xff]   ;;  %v2753_v40 = vld [vmem:[%s4015_s1 + $0x180] ss:$8 sps:$4 sm:$0xff]  }
  0x29   :  { %2054 = vmatprep.subr.bf16.mxu0 %v2665_v41  ;;  %v2756_v41 = vld [vmem:[%s4015_s1 + $0x580] ss:$8 sps:$4 sm:$0xff]  }
  0x2b   :  { %1883 = vmatpush1.bf16.msra.mxu1 %v2667_v42  ;;  %v2761_v42 = vld [vmem:[%s4015_s1 + $0x194] ss:$8 sps:$4 sm:$0xff]  }
  0x2c   :  { %2055 = vmatpush1.bf16.msra.mxu0 %v2668_v43  ;;  %1884 = vmatprep.subr.bf16.mxu1 %v2669_v44  ;;  %v2764_v43 = vld [vmem:[%s4015_s1 + $0x594] ss:$8 sps:$4 sm:$0xff]   ;;  %v2759_v44 = vld [vmem:[%s4015_s1 + $0x190] ss:$8 sps:$4 sm:$0xff]  }
  0x2d   :  { %2056 = vmatprep.subr.bf16.mxu0 %v2671_v45  ;;  %v2762_v45 = vld [vmem:[%s4015_s1 + $0x590] ss:$8 sps:$4 sm:$0xff]  }
  0x2f   :  { %1885 = vmatpush1.bf16.msra.mxu1 %v2673_v46  ;;  %v2767_v46 = vld [vmem:[%s4015_s1 + $0x1a4] ss:$8 sps:$4 sm:$0xff]  }
  0x30   :  { %2057 = vmatpush1.bf16.msra.mxu0 %v2674_v47  ;;  %1886 = vmatprep.subr.bf16.mxu1 %v2675_v49  ;;  %v2770_v47 = vld [vmem:[%s4015_s1 + $0x5a4] ss:$8 sps:$4 sm:$0xff]   ;;  %v2768_v49 = vld [vmem:[%s4015_s1 + $0x5a0] ss:$8 sps:$4 sm:$0xff]  }
  0x31   :  { %2058 = vmatprep.subr.bf16.mxu0 %v2677_v50  ;;  %v2773_v50 = vld [vmem:[%s4015_s1 + $0x1b4] ss:$8 sps:$4 sm:$0xff]  }
  0x33   :  { %1887 = vmatpush1.bf16.msra.mxu1 %v2679_v52  ;;  %v2771_v52 = vld [vmem:[%s4015_s1 + $0x1b0] ss:$8 sps:$4 sm:$0xff]  }
  0x34   :  { %2059 = vmatpush1.bf16.msra.mxu0 %v2680_v53  ;;  %1888 = vmatprep.subr.bf16.mxu1 %v2681_v54  ;;  %v2774_v53 = vld [vmem:[%s4015_s1 + $0x5b0] ss:$8 sps:$4 sm:$0xff]   ;;  %v2779_v54 = vld [vmem:[%s4015_s1 + $0x1c4] ss:$8 sps:$4 sm:$0xff]  }
  0x35   :  { %2060 = vmatprep.subr.bf16.mxu0 %v2683_v55  ;;  %v2782_v55 = vld [vmem:[%s4015_s1 + $0x5c4] ss:$8 sps:$4 sm:$0xff]  }
  0x37   :  { %1889 = vmatpush1.bf16.msra.mxu1 %v2685_v56  ;;  %v2777_v56 = vld [vmem:[%s4015_s1 + $0x1c0] ss:$8 sps:$4 sm:$0xff]  }
  0x38   :  { %2061 = vmatpush1.bf16.msra.mxu0 %v2686_v57  ;;  %1890 = vmatprep.subr.bf16.mxu1 %v2687_v58  ;;  %v2780_v57 = vld [vmem:[%s4015_s1 + $0x5c0] ss:$8 sps:$4 sm:$0xff]   ;;  %v2785_v58 = vld [vmem:[%s4015_s1 + $0x1d4] ss:$8 sps:$4 sm:$0xff]  }
  0x39   :  { %2062 = vmatprep.subr.bf16.mxu0 %v2689_v59  ;;  %v2788_v59 = vld [vmem:[%s4015_s1 + $0x5d4] ss:$8 sps:$4 sm:$0xff]  }
  0x3b   :  { %1891 = vmatpush1.bf16.msra.mxu1 %v2691_v60  ;;  %v2783_v60 = vld [vmem:[%s4015_s1 + $0x1d0] ss:$8 sps:$4 sm:$0xff]  }
  0x3c   :  { %2063 = vmatpush1.bf16.msra.mxu0 %v2692_v61  ;;  %1892 = vmatprep.subr.bf16.mxu1 %v2693_v62  ;;  %v2786_v61 = vld [vmem:[%s4015_s1 + $0x5d0] ss:$8 sps:$4 sm:$0xff]   ;;  %v2791_v62 = vld [vmem:[%s4015_s1 + $0x1e4] ss:$8 sps:$4 sm:$0xff]  }
  0x3d   :  { %2064 = vmatprep.subr.bf16.mxu0 %v2695_v63  ;;  %v2794_v63 = vld [vmem:[%s4015_s1 + $0x5e4] ss:$8 sps:$4 sm:$0xff]  }
  0x3f   :  { %1893 = vmatpush1.bf16.msra.mxu1 %v2697_v0  ;;  %v2789_v0 = vld [vmem:[%s4015_s1 + $0x1e0] ss:$8 sps:$4 sm:$0xff]  }
  0x40   :  { %2065 = vmatpush1.bf16.msra.mxu0 %v2698_v1  ;;  %1905 = vmatprep.subr.bf16.mxu1 %v2704_v2  ;;  %v2792_v1 = vld [vmem:[%s4015_s1 + $0x5e0] ss:$8 sps:$4 sm:$0xff]   ;;  %v2797_v2 = vld [vmem:[%s4015_s1 + $0x1f4] ss:$8 sps:$4 sm:$0xff]  }
  0x41   :  { %2077 = vmatprep.subr.bf16.mxu0 %v2710_v3  ;;  %v2800_v3 = vld [vmem:[%s4015_s1 + $0x5f4] ss:$8 sps:$4 sm:$0xff]  }
  0x42   :  { %1895 = vmatmul.mubr.bf16.vlgmr.msra.gmra.mrb[0].mxu1 %v2699_v4  ;;  %v2795_v4 = vld [vmem:[%s4015_s1 + $0x1f0] ss:$8 sps:$4 sm:$0xff]  }
  0x43   :  { %2067 = vmatmul.mubr.bf16.vlgmr.msra.gmra.mrb[0].mxu0 %v2705_v6  ;;  %1906 = vmatpush1.bf16.msra.mxu1 %v2702_v5  ;;  %v2798_v5 = vld [vmem:[%s4015_s1 + $0x5f0] ss:$8 sps:$4 sm:$0xff]   ;;  %v2806_v6 = vld [vmem:[%s4015_s1 + $0x204] ss:$8 sps:$4 sm:$0xff]  }
  0x44   :  { %2078 = vmatpush1.bf16.msra.mxu0 %v2708_v7  ;;  %1907 = vmatprep.subr.bf16.mxu1 %v2713_v8  ;;  %v2812_v7 = vld [vmem:[%s4015_s1 + $0x604] ss:$8 sps:$4 sm:$0xff]   ;;  %v2801_v8 = vld [vmem:[%s4016_s0 + $0x8] ss:$72 sps:$4 sm:$0xff]  }
  0x45   :  { %2079 = vmatprep.subr.bf16.mxu0 %v2716_v9  ;;  %1937 = vmatprep.mubr.bf16.mxu1 %v2803_v34  ;;  %v2804_v9 = vld [vmem:[%s4015_s1 + $0x200] ss:$8 sps:$4 sm:$0xff]   ;;  %v2845_v34 = vld [vmem:[%s4015_s1 + $0x264] ss:$8 sps:$4 sm:$0xff]  }
  0x46   :  { %2109 = vmatprep.mubr.bf16.mxu0 %v2809_v37  ;;  %v2846_v37 = vld [vmem:[%s4015_s1 + $0x660] ss:$8 sps:$4 sm:$0xff]  }
  0x47   :  { %1908 = vmatpush1.bf16.msra.mxu1 %v2711_v10  ;;  %v2807_v10 = vld [vmem:[%s4016_s0 + $0x28] ss:$72 sps:$4 sm:$0xff]  }
  0x48   :  { %2080 = vmatpush1.bf16.msra.mxu0 %v2714_v11  ;;  %1909 = vmatprep.subr.bf16.mxu1 %v2719_v12  ;;  %v2810_v11 = vld [vmem:[%s4015_s1 + $0x600] ss:$8 sps:$4 sm:$0xff]   ;;  %v2815_v12 = vld [vmem:[%s4015_s1 + $0x214] ss:$8 sps:$4 sm:$0xff]  }
  0x49   :  { %2081 = vmatprep.subr.bf16.mxu0 %v2722_v13  ;;  %v2818_v13 = vld [vmem:[%s4015_s1 + $0x614] ss:$8 sps:$4 sm:$0xff]  }
  0x4b   :  { %1910 = vmatpush1.bf16.msra.mxu1 %v2717_v14  ;;  %v2813_v14 = vld [vmem:[%s4015_s1 + $0x210] ss:$8 sps:$4 sm:$0xff]  }
  0x4c   :  { %2082 = vmatpush1.bf16.msra.mxu0 %v2720_v15  ;;  %1911 = vmatprep.subr.bf16.mxu1 %v2725_v16  ;;  %v2816_v15 = vld [vmem:[%s4015_s1 + $0x610] ss:$8 sps:$4 sm:$0xff]   ;;  %v2821_v16 = vld [vmem:[%s4015_s1 + $0x224] ss:$8 sps:$4 sm:$0xff]  }
  0x4d   :  { %2083 = vmatprep.subr.bf16.mxu0 %v2728_v17  ;;  %v2824_v17 = vld [vmem:[%s4015_s1 + $0x624] ss:$8 sps:$4 sm:$0xff]  }
  0x4f   :  { %1912 = vmatpush1.bf16.msra.mxu1 %v2723_v18  ;;  %v2819_v18 = vld [vmem:[%s4015_s1 + $0x220] ss:$8 sps:$4 sm:$0xff]  }
  0x50   :  { %2084 = vmatpush1.bf16.msra.mxu0 %v2726_v19  ;;  %1913 = vmatprep.subr.bf16.mxu1 %v2731_v20  ;;  %v2905_v19 = vld [vmem:[%s4016_s0 + $0x14] ss:$72 sps:$4 sm:$0xff]   ;;  %v2822_v20 = vld [vmem:[%s4015_s1 + $0x620] ss:$8 sps:$4 sm:$0xff]  }
  0x51   :  { %2085 = vmatprep.subr.bf16.mxu0 %v2734_v21  ;;  %v2827_v21 = vld [vmem:[%s4015_s1 + $0x234] ss:$8 sps:$4 sm:$0xff]  }
  0x53   :  { %1914 = vmatpush1.bf16.msra.mxu1 %v2729_v22  ;;  %v2830_v22 = vld [vmem:[%s4015_s1 + $0x634] ss:$8 sps:$4 sm:$0xff]  }
  0x54   :  { %2086 = vmatpush1.bf16.msra.mxu0 %v2732_v23  ;;  %1915 = vmatprep.subr.bf16.mxu1 %v2737_v24  ;;  %v2911_v23 = vld [vmem:[%s4016_s0 + $0x34] ss:$72 sps:$4 sm:$0xff]   ;;  %v2825_v24 = vld [vmem:[%s4015_s1 + $0x230] ss:$8 sps:$4 sm:$0xff]  }
  0x55   :  { %2087 = vmatprep.subr.bf16.mxu0 %v2740_v25  ;;  %v2828_v25 = vld [vmem:[%s4015_s1 + $0x630] ss:$8 sps:$4 sm:$0xff]  }
  0x57   :  { %1916 = vmatpush1.bf16.msra.mxu1 %v2735_v26  ;;  %v2833_v26 = vld [vmem:[%s4015_s1 + $0x244] ss:$8 sps:$4 sm:$0xff]  }
  0x58   :  { %2088 = vmatpush1.bf16.msra.mxu0 %v2738_v27  ;;  %1917 = vmatprep.subr.bf16.mxu1 %v2743_v28  ;;  %v2836_v27 = vld [vmem:[%s4015_s1 + $0x644] ss:$8 sps:$4 sm:$0xff]   ;;  %v2831_v28 = vld [vmem:[%s4015_s1 + $0x240] ss:$8 sps:$4 sm:$0xff]  }
  0x59   :  { %2089 = vmatprep.subr.bf16.mxu0 %v2746_v29  ;;  %v2834_v29 = vld [vmem:[%s4015_s1 + $0x640] ss:$8 sps:$4 sm:$0xff]  }
  0x5b   :  { %1918 = vmatpush1.bf16.msra.mxu1 %v2741_v30  ;;  %v2839_v30 = vld [vmem:[%s4015_s1 + $0x254] ss:$8 sps:$4 sm:$0xff]  }
  0x5c   :  { %2090 = vmatpush1.bf16.msra.mxu0 %v2744_v31  ;;  %1919 = vmatprep.subr.bf16.mxu1 %v2749_v32  ;;  %v2842_v31 = vld [vmem:[%s4015_s1 + $0x654] ss:$8 sps:$4 sm:$0xff]   ;;  %v2837_v32 = vld [vmem:[%s4015_s1 + $0x250] ss:$8 sps:$4 sm:$0xff]  }
  0x5d   :  { %2091 = vmatprep.subr.bf16.mxu0 %v2752_v33  ;;  %v2840_v33 = vld [vmem:[%s4015_s1 + $0x650] ss:$8 sps:$4 sm:$0xff]  }
  0x5f   :  { %1920 = vmatpush1.bf16.msra.mxu1 %v2747_v35  ;;  %v2848_v35 = vld [vmem:[%s4015_s1 + $0x664] ss:$8 sps:$4 sm:$0xff]  }
  0x60   :  { %2092 = vmatpush1.bf16.msra.mxu0 %v2750_v36  ;;  %1921 = vmatprep.subr.bf16.mxu1 %v2755_v38  ;;  %v2843_v36 = vld [vmem:[%s4015_s1 + $0x260] ss:$8 sps:$4 sm:$0xff]   ;;  %v2851_v38 = vld [vmem:[%s4015_s1 + $0x274] ss:$8 sps:$4 sm:$0xff]  }
  0x61   :  { %2093 = vmatprep.subr.bf16.mxu0 %v2758_v39  ;;  %v2854_v39 = vld [vmem:[%s4015_s1 + $0x674] ss:$8 sps:$4 sm:$0xff]  }
  0x63   :  { %1922 = vmatpush1.bf16.msra.mxu1 %v2753_v40  ;;  %v2849_v40 = vld [vmem:[%s4015_s1 + $0x270] ss:$8 sps:$4 sm:$0xff]  }
  0x64   :  { %2094 = vmatpush1.bf16.msra.mxu0 %v2756_v41  ;;  %1923 = vmatprep.subr.bf16.mxu1 %v2761_v42  ;;  %v2852_v41 = vld [vmem:[%s4015_s1 + $0x670] ss:$8 sps:$4 sm:$0xff]   ;;  %v2857_v42 = vld [vmem:[%s4015_s1 + $0x284] ss:$8 sps:$4 sm:$0xff]  }
  0x65   :  { %2095 = vmatprep.subr.bf16.mxu0 %v2764_v43  ;;  %v2860_v43 = vld [vmem:[%s4015_s1 + $0x684] ss:$8 sps:$4 sm:$0xff]  }
  0x67   :  { %1924 = vmatpush1.bf16.msra.mxu1 %v2759_v44  ;;  %v2855_v44 = vld [vmem:[%s4015_s1 + $0x280] ss:$8 sps:$4 sm:$0xff]  }
  0x68   :  { %2096 = vmatpush1.bf16.msra.mxu0 %v2762_v45  ;;  %1925 = vmatprep.subr.bf16.mxu1 %v2767_v46  ;;  %v2858_v45 = vld [vmem:[%s4015_s1 + $0x680] ss:$8 sps:$4 sm:$0xff]   ;;  %v2863_v46 = vld [vmem:[%s4015_s1 + $0x294] ss:$8 sps:$4 sm:$0xff]  }
  0x69   :  { %2097 = vmatprep.subr.bf16.mxu0 %v2770_v47  ;;  %v2866_v47 = vld [vmem:[%s4015_s1 + $0x694] ss:$8 sps:$4 sm:$0xff]  }
  0x6b   :  { %1926 = vmatpush1.bf16.msra.mxu1 %v2765_v48  ;;  %v2861_v48 = vld [vmem:[%s4015_s1 + $0x290] ss:$8 sps:$4 sm:$0xff]  }
  0x6c   :  { %2098 = vmatpush1.bf16.msra.mxu0 %v2768_v49  ;;  %1927 = vmatprep.subr.bf16.mxu1 %v2773_v50  ;;  %v2864_v49 = vld [vmem:[%s4015_s1 + $0x690] ss:$8 sps:$4 sm:$0xff]   ;;  %v2869_v50 = vld [vmem:[%s4015_s1 + $0x2a4] ss:$8 sps:$4 sm:$0xff]  }
  0x6d   :  { %2099 = vmatprep.subr.bf16.mxu0 %v2776_v51  ;;  %v2872_v51 = vld [vmem:[%s4015_s1 + $0x6a4] ss:$8 sps:$4 sm:$0xff]  }
  0x6f   :  { %1928 = vmatpush1.bf16.msra.mxu1 %v2771_v52  ;;  %v2867_v52 = vld [vmem:[%s4015_s1 + $0x2a0] ss:$8 sps:$4 sm:$0xff]  }
  0x70   :  { %2100 = vmatpush1.bf16.msra.mxu0 %v2774_v53  ;;  %1929 = vmatprep.subr.bf16.mxu1 %v2779_v54  ;;  %v2870_v53 = vld [vmem:[%s4015_s1 + $0x6a0] ss:$8 sps:$4 sm:$0xff]   ;;  %v2875_v54 = vld [vmem:[%s4015_s1 + $0x2b4] ss:$8 sps:$4 sm:$0xff]  }
  0x71   :  { %2101 = vmatprep.subr.bf16.mxu0 %v2782_v55  ;;  %v2878_v55 = vld [vmem:[%s4015_s1 + $0x6b4] ss:$8 sps:$4 sm:$0xff]  }
  0x73   :  { %1930 = vmatpush1.bf16.msra.mxu1 %v2777_v56  ;;  %v2873_v56 = vld [vmem:[%s4015_s1 + $0x2b0] ss:$8 sps:$4 sm:$0xff]  }
  0x74   :  { %2102 = vmatpush1.bf16.msra.mxu0 %v2780_v57  ;;  %1931 = vmatprep.subr.bf16.mxu1 %v2785_v58  ;;  %v2876_v57 = vld [vmem:[%s4015_s1 + $0x6b0] ss:$8 sps:$4 sm:$0xff]   ;;  %v2881_v58 = vld [vmem:[%s4015_s1 + $0x2c4] ss:$8 sps:$4 sm:$0xff]  }
  0x75   :  { %2103 = vmatprep.subr.bf16.mxu0 %v2788_v59  ;;  %v2884_v59 = vld [vmem:[%s4015_s1 + $0x6c4] ss:$8 sps:$4 sm:$0xff]  }
  0x77   :  { %1932 = vmatpush1.bf16.msra.mxu1 %v2783_v60  ;;  %v2879_v60 = vld [vmem:[%s4015_s1 + $0x2c0] ss:$8 sps:$4 sm:$0xff]  }
  0x78   :  { %2104 = vmatpush1.bf16.msra.mxu0 %v2786_v61  ;;  %1933 = vmatprep.subr.bf16.mxu1 %v2791_v62  ;;  %v2882_v61 = vld [vmem:[%s4015_s1 + $0x6c0] ss:$8 sps:$4 sm:$0xff]   ;;  %v2887_v62 = vld [vmem:[%s4015_s1 + $0x2d4] ss:$8 sps:$4 sm:$0xff]  }
  0x79   :  { %2105 = vmatprep.subr.bf16.mxu0 %v2794_v63  ;;  %v2890_v63 = vld [vmem:[%s4015_s1 + $0x6d4] ss:$8 sps:$4 sm:$0xff]  }
  0x7b   :  { %1934 = vmatpush1.bf16.msra.mxu1 %v2789_v0  ;;  %v2885_v0 = vld [vmem:[%s4015_s1 + $0x2d0] ss:$8 sps:$4 sm:$0xff]  }
  0x7c   :  { %2106 = vmatpush1.bf16.msra.mxu0 %v2792_v1  ;;  %1935 = vmatprep.subr.bf16.mxu1 %v2797_v2  ;;  %v2888_v1 = vld [vmem:[%s4015_s1 + $0x6d0] ss:$8 sps:$4 sm:$0xff]   ;;  %v2893_v2 = vld [vmem:[%s4015_s1 + $0x2e4] ss:$8 sps:$4 sm:$0xff]  }
  0x7d   :  { %2107 = vmatprep.subr.bf16.mxu0 %v2800_v3  ;;  %v2896_v3 = vld [vmem:[%s4015_s1 + $0x6e4] ss:$8 sps:$4 sm:$0xff]  }
  0x7f   :  { %1936 = vmatpush1.bf16.msra.mxu1 %v2795_v4  ;;  %v2891_v4 = vld [vmem:[%s4015_s1 + $0x2e0] ss:$8 sps:$4 sm:$0xff]  }
  0x80   :  { %2108 = vmatpush1.bf16.msra.mxu0 %v2798_v5  ;;  %1948 = vmatprep.subr.bf16.mxu1 %v2806_v6  ;;  %v2894_v5 = vld [vmem:[%s4015_s1 + $0x6e0] ss:$8 sps:$4 sm:$0xff]   ;;  %v2899_v6 = vld [vmem:[%s4015_s1 + $0x2f4] ss:$8 sps:$4 sm:$0xff]  }
  0x81   :  { %2120 = vmatprep.subr.bf16.mxu0 %v2812_v7  ;;  %v2902_v7 = vld [vmem:[%s4015_s1 + $0x6f4] ss:$8 sps:$4 sm:$0xff]  }
  0x82   :  { %1938 = vmatmul.mubr.bf16.vlgmr.msra.gmra.mrb[0].mxu1 %v2801_v8  ;;  %v2897_v8 = vld [vmem:[%s4015_s1 + $0x2f0] ss:$8 sps:$4 sm:$0xff]  }
  0x83   :  { %2110 = vmatmul.mubr.bf16.vlgmr.msra.gmra.mrb[0].mxu0 %v2807_v10  ;;  %1949 = vmatpush1.bf16.msra.mxu1 %v2804_v9  ;;  %v2900_v9 = vld [vmem:[%s4015_s1 + $0x6f0] ss:$8 sps:$4 sm:$0xff]   ;;  %v2908_v10 = vld [vmem:[%s4015_s1 + $0x304] ss:$8 sps:$4 sm:$0xff]  }
  0x84   :  { %2121 = vmatpush1.bf16.msra.mxu0 %v2810_v11  ;;  %1950 = vmatprep.subr.bf16.mxu1 %v2815_v12  ;;  %v2914_v11 = vld [vmem:[%s4015_s1 + $0x704] ss:$8 sps:$4 sm:$0xff]   ;;  %v2903_v12 = vld [vmem:[%s4016_s0 + $0x10] ss:$72 sps:$4 sm:$0xff]  }
  0x85   :  { %2122 = vmatprep.subr.bf16.mxu0 %v2818_v13  ;;  %1980 = vmatprep.mubr.bf16.mxu1 %v2905_v19  ;;  %v2906_v13 = vld [vmem:[%s4015_s1 + $0x300] ss:$8 sps:$4 sm:$0xff]   ;;  %v3010_v19 = vld [vmem:[%s4016_s0 + $0x3c] ss:$72 sps:$4 sm:$0xff]  }
  0x86   :  { %2152 = vmatprep.mubr.bf16.mxu0 %v2911_v23  ;;  %v2926_v23 = vld [vmem:[%s4015_s1 + $0x724] ss:$8 sps:$4 sm:$0xff]  }
  0x87   :  { %1951 = vmatpush1.bf16.msra.mxu1 %v2813_v14  ;;  %v2909_v14 = vld [vmem:[%s4016_s0 + $0x30] ss:$72 sps:$4 sm:$0xff]  }
  0x88   :  { %2123 = vmatpush1.bf16.msra.mxu0 %v2816_v15  ;;  %1952 = vmatprep.subr.bf16.mxu1 %v2821_v16  ;;  %v2912_v15 = vld [vmem:[%s4015_s1 + $0x700] ss:$8 sps:$4 sm:$0xff]   ;;  %v2917_v16 = vld [vmem:[%s4015_s1 + $0x314] ss:$8 sps:$4 sm:$0xff]  }
  0x89   :  { %2124 = vmatprep.subr.bf16.mxu0 %v2824_v17  ;;  %v2920_v17 = vld [vmem:[%s4015_s1 + $0x714] ss:$8 sps:$4 sm:$0xff]  }
  0x8b   :  { %1953 = vmatpush1.bf16.msra.mxu1 %v2819_v18  ;;  %v3007_v18 = vld [vmem:[%s4016_s0 + $0x1c] ss:$72 sps:$4 sm:$0xff]  }
  0x8c   :  { %2125 = vmatpush1.bf16.msra.mxu0 %v2822_v20  ;;  %1954 = vmatprep.subr.bf16.mxu1 %v2827_v21  ;;  %v2915_v20 = vld [vmem:[%s4015_s1 + $0x310] ss:$8 sps:$4 sm:$0xff]  }
  0x8d   :  { %2126 = vmatprep.subr.bf16.mxu0 %v2830_v22  ;;  %v2918_v21 = vld [vmem:[%s4015_s1 + $0x710] ss:$8 sps:$4 sm:$0xff]   ;;  %v2923_v22 = vld [vmem:[%s4015_s1 + $0x324] ss:$8 sps:$4 sm:$0xff]  }
  0x8f   :  { %1955 = vmatpush1.bf16.msra.mxu1 %v2825_v24  ;;  %v2921_v24 = vld [vmem:[%s4015_s1 + $0x320] ss:$8 sps:$4 sm:$0xff]  }
  0x90   :  { %2127 = vmatpush1.bf16.msra.mxu0 %v2828_v25  ;;  %1956 = vmatprep.subr.bf16.mxu1 %v2833_v26  ;;  %v2924_v25 = vld [vmem:[%s4015_s1 + $0x720] ss:$8 sps:$4 sm:$0xff]   ;;  %v2929_v26 = vld [vmem:[%s4015_s1 + $0x334] ss:$8 sps:$4 sm:$0xff]  }
  0x91   :  { %2128 = vmatprep.subr.bf16.mxu0 %v2836_v27  ;;  %v2932_v27 = vld [vmem:[%s4015_s1 + $0x734] ss:$8 sps:$4 sm:$0xff]  }
  0x93   :  { %1957 = vmatpush1.bf16.msra.mxu1 %v2831_v28  ;;  %v2927_v28 = vld [vmem:[%s4015_s1 + $0x330] ss:$8 sps:$4 sm:$0xff]  }
  0x94   :  { %2129 = vmatpush1.bf16.msra.mxu0 %v2834_v29  ;;  %1958 = vmatprep.subr.bf16.mxu1 %v2839_v30  ;;  %v2930_v29 = vld [vmem:[%s4015_s1 + $0x730] ss:$8 sps:$4 sm:$0xff]   ;;  %v2935_v30 = vld [vmem:[%s4015_s1 + $0x344] ss:$8 sps:$4 sm:$0xff]  }
  0x95   :  { %2130 = vmatprep.subr.bf16.mxu0 %v2842_v31  ;;  %v2938_v31 = vld [vmem:[%s4015_s1 + $0x744] ss:$8 sps:$4 sm:$0xff]  }
  0x97   :  { %1959 = vmatpush1.bf16.msra.mxu1 %v2837_v32  ;;  %v2933_v32 = vld [vmem:[%s4015_s1 + $0x340] ss:$8 sps:$4 sm:$0xff]  }
  0x98   :  { %2131 = vmatpush1.bf16.msra.mxu0 %v2840_v33  ;;  %1960 = vmatprep.subr.bf16.mxu1 %v2845_v34  ;;  %v2936_v33 = vld [vmem:[%s4015_s1 + $0x740] ss:$8 sps:$4 sm:$0xff]   ;;  %v2941_v34 = vld [vmem:[%s4015_s1 + $0x354] ss:$8 sps:$4 sm:$0xff]  }
  0x99   :  { %2132 = vmatprep.subr.bf16.mxu0 %v2848_v35  ;;  %v2944_v35 = vld [vmem:[%s4015_s1 + $0x754] ss:$8 sps:$4 sm:$0xff]  }
  0x9b   :  { %1961 = vmatpush1.bf16.msra.mxu1 %v2843_v36  ;;  %v2939_v36 = vld [vmem:[%s4015_s1 + $0x350] ss:$8 sps:$4 sm:$0xff]  }
  0x9c   :  { %2133 = vmatpush1.bf16.msra.mxu0 %v2846_v37  ;;  %1962 = vmatprep.subr.bf16.mxu1 %v2851_v38  ;;  %v2942_v37 = vld [vmem:[%s4015_s1 + $0x750] ss:$8 sps:$4 sm:$0xff]   ;;  %v2947_v38 = vld [vmem:[%s4015_s1 + $0x364] ss:$8 sps:$4 sm:$0xff]  }
  0x9d   :  { %2134 = vmatprep.subr.bf16.mxu0 %v2854_v39  ;;  %v2950_v39 = vld [vmem:[%s4015_s1 + $0x764] ss:$8 sps:$4 sm:$0xff]  }
  0x9f   :  { %1963 = vmatpush1.bf16.msra.mxu1 %v2849_v40  ;;  %v2945_v40 = vld [vmem:[%s4015_s1 + $0x360] ss:$8 sps:$4 sm:$0xff]  }
  0xa0   :  { %2135 = vmatpush1.bf16.msra.mxu0 %v2852_v41  ;;  %1964 = vmatprep.subr.bf16.mxu1 %v2857_v42  ;;  %v2948_v41 = vld [vmem:[%s4015_s1 + $0x760] ss:$8 sps:$4 sm:$0xff]   ;;  %v2953_v42 = vld [vmem:[%s4015_s1 + $0x374] ss:$8 sps:$4 sm:$0xff]  }
  0xa1   :  { %2136 = vmatprep.subr.bf16.mxu0 %v2860_v43  ;;  %v2956_v43 = vld [vmem:[%s4015_s1 + $0x774] ss:$8 sps:$4 sm:$0xff]  }
  0xa3   :  { %1965 = vmatpush1.bf16.msra.mxu1 %v2855_v44  ;;  %v2951_v44 = vld [vmem:[%s4015_s1 + $0x370] ss:$8 sps:$4 sm:$0xff]  }
  0xa4   :  { %2137 = vmatpush1.bf16.msra.mxu0 %v2858_v45  ;;  %1966 = vmatprep.subr.bf16.mxu1 %v2863_v46  ;;  %v2954_v45 = vld [vmem:[%s4015_s1 + $0x770] ss:$8 sps:$4 sm:$0xff]   ;;  %v2959_v46 = vld [vmem:[%s4015_s1 + $0x384] ss:$8 sps:$4 sm:$0xff]  }
  0xa5   :  { %2138 = vmatprep.subr.bf16.mxu0 %v2866_v47  ;;  %v2962_v47 = vld [vmem:[%s4015_s1 + $0x784] ss:$8 sps:$4 sm:$0xff]  }
  0xa7   :  { %1967 = vmatpush1.bf16.msra.mxu1 %v2861_v48  ;;  %v2957_v48 = vld [vmem:[%s4015_s1 + $0x380] ss:$8 sps:$4 sm:$0xff]  }
  0xa8   :  { %2139 = vmatpush1.bf16.msra.mxu0 %v2864_v49  ;;  %1968 = vmatprep.subr.bf16.mxu1 %v2869_v50  ;;  %v2960_v49 = vld [vmem:[%s4015_s1 + $0x780] ss:$8 sps:$4 sm:$0xff]   ;;  %v2965_v50 = vld [vmem:[%s4015_s1 + $0x394] ss:$8 sps:$4 sm:$0xff]  }
  0xa9   :  { %2140 = vmatprep.subr.bf16.mxu0 %v2872_v51  ;;  %v2968_v51 = vld [vmem:[%s4015_s1 + $0x794] ss:$8 sps:$4 sm:$0xff]  }
  0xab   :  { %1969 = vmatpush1.bf16.msra.mxu1 %v2867_v52  ;;  %v2963_v52 = vld [vmem:[%s4015_s1 + $0x390] ss:$8 sps:$4 sm:$0xff]  }
  0xac   :  { %2141 = vmatpush1.bf16.msra.mxu0 %v2870_v53  ;;  %1970 = vmatprep.subr.bf16.mxu1 %v2875_v54  ;;  %v2966_v53 = vld [vmem:[%s4015_s1 + $0x790] ss:$8 sps:$4 sm:$0xff]   ;;  %v2971_v54 = vld [vmem:[%s4015_s1 + $0x3a4] ss:$8 sps:$4 sm:$0xff]  }
  0xad   :  { %2142 = vmatprep.subr.bf16.mxu0 %v2878_v55  ;;  %v2974_v55 = vld [vmem:[%s4015_s1 + $0x7a4] ss:$8 sps:$4 sm:$0xff]  }
  0xaf   :  { %1971 = vmatpush1.bf16.msra.mxu1 %v2873_v56  ;;  %v2969_v56 = vld [vmem:[%s4015_s1 + $0x3a0] ss:$8 sps:$4 sm:$0xff]  }
  0xb0   :  { %2143 = vmatpush1.bf16.msra.mxu0 %v2876_v57  ;;  %1972 = vmatprep.subr.bf16.mxu1 %v2881_v58  ;;  %v2972_v57 = vld [vmem:[%s4015_s1 + $0x7a0] ss:$8 sps:$4 sm:$0xff]   ;;  %v2977_v58 = vld [vmem:[%s4015_s1 + $0x3b4] ss:$8 sps:$4 sm:$0xff]  }
  0xb1   :  { %2144 = vmatprep.subr.bf16.mxu0 %v2884_v59  ;;  %v2980_v59 = vld [vmem:[%s4015_s1 + $0x7b4] ss:$8 sps:$4 sm:$0xff]  }
  0xb3   :  { %1973 = vmatpush1.bf16.msra.mxu1 %v2879_v60  ;;  %v2975_v60 = vld [vmem:[%s4015_s1 + $0x3b0] ss:$8 sps:$4 sm:$0xff]  }
  0xb4   :  { %2145 = vmatpush1.bf16.msra.mxu0 %v2882_v61  ;;  %1974 = vmatprep.subr.bf16.mxu1 %v2887_v62  ;;  %v2978_v61 = vld [vmem:[%s4015_s1 + $0x7b0] ss:$8 sps:$4 sm:$0xff]   ;;  %v2983_v62 = vld [vmem:[%s4015_s1 + $0x3c4] ss:$8 sps:$4 sm:$0xff]  }
  0xb5   :  { %2146 = vmatprep.subr.bf16.mxu0 %v2890_v63  ;;  %v2986_v63 = vld [vmem:[%s4015_s1 + $0x7c4] ss:$8 sps:$4 sm:$0xff]  }
  0xb7   :  { %1975 = vmatpush1.bf16.msra.mxu1 %v2885_v0  ;;  %v2981_v0 = vld [vmem:[%s4015_s1 + $0x3c0] ss:$8 sps:$4 sm:$0xff]  }
  0xb8   :  { %2147 = vmatpush1.bf16.msra.mxu0 %v2888_v1  ;;  %1976 = vmatprep.subr.bf16.mxu1 %v2893_v2  ;;  %v2984_v1 = vld [vmem:[%s4015_s1 + $0x7c0] ss:$8 sps:$4 sm:$0xff]   ;;  %v2989_v2 = vld [vmem:[%s4015_s1 + $0x3d4] ss:$8 sps:$4 sm:$0xff]  }
  0xb9   :  { %2148 = vmatprep.subr.bf16.mxu0 %v2896_v3  ;;  %v2992_v3 = vld [vmem:[%s4015_s1 + $0x7d4] ss:$8 sps:$4 sm:$0xff]  }
  0xbb   :  { %1977 = vmatpush1.bf16.msra.mxu1 %v2891_v4  ;;  %v2987_v4 = vld [vmem:[%s4015_s1 + $0x3d0] ss:$8 sps:$4 sm:$0xff]  }
  0xbc   :  { %2149 = vmatpush1.bf16.msra.mxu0 %v2894_v5  ;;  %1978 = vmatprep.subr.bf16.mxu1 %v2899_v6  ;;  %v2990_v5 = vld [vmem:[%s4015_s1 + $0x7d0] ss:$8 sps:$4 sm:$0xff]   ;;  %v2995_v6 = vld [vmem:[%s4015_s1 + $0x3e4] ss:$8 sps:$4 sm:$0xff]  }
  0xbd   :  { %2150 = vmatprep.subr.bf16.mxu0 %v2902_v7  ;;  %v2998_v7 = vld [vmem:[%s4015_s1 + $0x7e4] ss:$8 sps:$4 sm:$0xff]  }
  0xbf   :  { %1979 = vmatpush1.bf16.msra.mxu1 %v2897_v8  ;;  %v2993_v8 = vld [vmem:[%s4015_s1 + $0x3e0] ss:$8 sps:$4 sm:$0xff]  }
  0xc0   :  { %2151 = vmatpush1.bf16.msra.mxu0 %v2900_v9  ;;  %1991 = vmatprep.subr.bf16.mxu1 %v2908_v10  ;;  %v2996_v9 = vld [vmem:[%s4015_s1 + $0x7e0] ss:$8 sps:$4 sm:$0xff]   ;;  %v3001_v10 = vld [vmem:[%s4015_s1 + $0x3f4] ss:$8 sps:$4 sm:$0xff]  }
  0xc1   :  { %2163 = vmatprep.subr.bf16.mxu0 %v2914_v11  ;;  %v3004_v11 = vld [vmem:[%s4015_s1 + $0x7f4] ss:$8 sps:$4 sm:$0xff]  }
  0xc2   :  { %1981 = vmatmul.mubr.bf16.vlgmr.msra.gmra.mrb[0].mxu1 %v2903_v12  ;;  %v2999_v12 = vld [vmem:[%s4015_s1 + $0x3f0] ss:$8 sps:$4 sm:$0xff]  }
  0xc3   :  { %2153 = vmatmul.mubr.bf16.vlgmr.msra.gmra.mrb[0].mxu0 %v2909_v14  ;;  %1992 = vmatpush1.bf16.msra.mxu1 %v2906_v13  ;;  %v3002_v13 = vld [vmem:[%s4015_s1 + $0x7f0] ss:$8 sps:$4 sm:$0xff]   ;;  %v3013_v14 = vld [vmem:[%s4015_s1 + $0x804] ss:$8 sps:$4 sm:$0xff]  }
  0xc4   :  { %2164 = vmatpush1.bf16.msra.mxu0 %v2912_v15  ;;  %1993 = vmatprep.subr.bf16.mxu1 %v2917_v16  ;;  %v3005_v15 = vld [vmem:[%s4016_s0 + $0x18] ss:$72 sps:$4 sm:$0xff]  }
  0xc5   :  { %2165 = vmatprep.subr.bf16.mxu0 %v2920_v17  ;;  %2023 = vmatprep.mubr.bf16.mxu1 %v3007_v18  ;;  %v3008_v16 = vld [vmem:[%s4016_s0 + $0x38] ss:$72 sps:$4 sm:$0xff]   ;;  %v3061_v18 = vld [vmem:[%s4016_s0 + $0x44] ss:$72 sps:$4 sm:$0xff]  }
  0xc6   :  { %2195 = vmatprep.mubr.bf16.mxu0 %v3010_v19  ;;  %v3011_v17 = vld [vmem:[%s4015_s1 + $0x800] ss:$8 sps:$4 sm:$0xff]   ;;  %v3016_v19 = vld [vmem:[%s4015_s1 + $0x814] ss:$8 sps:$4 sm:$0xff]  }
  0xc7   :  { %1994 = vmatpush1.bf16.msra.mxu1 %v2915_v20  ;;  %v3014_v20 = vld [vmem:[%s4015_s1 + $0x810] ss:$8 sps:$4 sm:$0xff]  }
  0xc8   :  { %2166 = vmatpush1.bf16.msra.mxu0 %v2918_v21  ;;  %1995 = vmatprep.subr.bf16.mxu1 %v2923_v22  ;;  %v3019_v21 = vld [vmem:[%s4015_s1 + $0x824] ss:$8 sps:$4 sm:$0xff]   ;;  %v3017_v22 = vld [vmem:[%s4015_s1 + $0x820] ss:$8 sps:$4 sm:$0xff]  }
  0xc9   :  { %2167 = vmatprep.subr.bf16.mxu0 %v2926_v23  ;;  %v3022_v23 = vld [vmem:[%s4015_s1 + $0x834] ss:$8 sps:$4 sm:$0xff]  }
  0xcb   :  { %1996 = vmatpush1.bf16.msra.mxu1 %v2921_v24  ;;  %v3020_v24 = vld [vmem:[%s4015_s1 + $0x830] ss:$8 sps:$4 sm:$0xff]  }
  0xcc   :  { %2168 = vmatpush1.bf16.msra.mxu0 %v2924_v25  ;;  %1997 = vmatprep.subr.bf16.mxu1 %v2929_v26  ;;  %v3025_v25 = vld [vmem:[%s4015_s1 + $0x844] ss:$8 sps:$4 sm:$0xff]   ;;  %v3023_v26 = vld [vmem:[%s4015_s1 + $0x840] ss:$8 sps:$4 sm:$0xff]  }
  0xcd   :  { %2169 = vmatprep.subr.bf16.mxu0 %v2932_v27  ;;  %v3028_v27 = vld [vmem:[%s4015_s1 + $0x854] ss:$8 sps:$4 sm:$0xff]  }
  0xcf   :  { %1998 = vmatpush1.bf16.msra.mxu1 %v2927_v28  ;;  %v3026_v28 = vld [vmem:[%s4015_s1 + $0x850] ss:$8 sps:$4 sm:$0xff]  }
  0xd0   :  { %2170 = vmatpush1.bf16.msra.mxu0 %v2930_v29  ;;  %1999 = vmatprep.subr.bf16.mxu1 %v2935_v30  ;;  %v3031_v29 = vld [vmem:[%s4015_s1 + $0x864] ss:$8 sps:$4 sm:$0xff]   ;;  %v3029_v30 = vld [vmem:[%s4015_s1 + $0x860] ss:$8 sps:$4 sm:$0xff]  }
  0xd1   :  { %2171 = vmatprep.subr.bf16.mxu0 %v2938_v31  ;;  %v3034_v31 = vld [vmem:[%s4015_s1 + $0x874] ss:$8 sps:$4 sm:$0xff]  }
  0xd3   :  { %2000 = vmatpush1.bf16.msra.mxu1 %v2933_v32  ;;  %v3032_v32 = vld [vmem:[%s4015_s1 + $0x870] ss:$8 sps:$4 sm:$0xff]  }
  0xd4   :  { %2172 = vmatpush1.bf16.msra.mxu0 %v2936_v33  ;;  %2001 = vmatprep.subr.bf16.mxu1 %v2941_v34  ;;  %v3037_v33 = vld [vmem:[%s4015_s1 + $0x884] ss:$8 sps:$4 sm:$0xff]   ;;  %v3035_v34 = vld [vmem:[%s4015_s1 + $0x880] ss:$8 sps:$4 sm:$0xff]  }
  0xd5   :  { %2173 = vmatprep.subr.bf16.mxu0 %v2944_v35  ;;  %v3040_v35 = vld [vmem:[%s4015_s1 + $0x894] ss:$8 sps:$4 sm:$0xff]  }
  0xd7   :  { %2002 = vmatpush1.bf16.msra.mxu1 %v2939_v36  ;;  %v3038_v36 = vld [vmem:[%s4015_s1 + $0x890] ss:$8 sps:$4 sm:$0xff]  }
  0xd8   :  { %2174 = vmatpush1.bf16.msra.mxu0 %v2942_v37  ;;  %2003 = vmatprep.subr.bf16.mxu1 %v2947_v38  ;;  %v3043_v37 = vld [vmem:[%s4015_s1 + $0x8a4] ss:$8 sps:$4 sm:$0xff]   ;;  %v3041_v38 = vld [vmem:[%s4015_s1 + $0x8a0] ss:$8 sps:$4 sm:$0xff]  }
  0xd9   :  { %2175 = vmatprep.subr.bf16.mxu0 %v2950_v39  ;;  %v3046_v39 = vld [vmem:[%s4015_s1 + $0x8b4] ss:$8 sps:$4 sm:$0xff]  }
  0xdb   :  { %2004 = vmatpush1.bf16.msra.mxu1 %v2945_v40  ;;  %v3044_v40 = vld [vmem:[%s4015_s1 + $0x8b0] ss:$8 sps:$4 sm:$0xff]  }
  0xdc   :  { %2176 = vmatpush1.bf16.msra.mxu0 %v2948_v41  ;;  %2005 = vmatprep.subr.bf16.mxu1 %v2953_v42  ;;  %v3049_v41 = vld [vmem:[%s4015_s1 + $0x8c4] ss:$8 sps:$4 sm:$0xff]   ;;  %v3047_v42 = vld [vmem:[%s4015_s1 + $0x8c0] ss:$8 sps:$4 sm:$0xff]  }
  0xdd   :  { %2177 = vmatprep.subr.bf16.mxu0 %v2956_v43  ;;  %v3052_v43 = vld [vmem:[%s4015_s1 + $0x8d4] ss:$8 sps:$4 sm:$0xff]  }
  0xdf   :  { %2006 = vmatpush1.bf16.msra.mxu1 %v2951_v44  ;;  %v3050_v44 = vld [vmem:[%s4015_s1 + $0x8d0] ss:$8 sps:$4 sm:$0xff]  }
  0xe0   :  { %2178 = vmatpush1.bf16.msra.mxu0 %v2954_v45  ;;  %2007 = vmatprep.subr.bf16.mxu1 %v2959_v46  ;;  %v3055_v45 = vld [vmem:[%s4015_s1 + $0x8e4] ss:$8 sps:$4 sm:$0xff]   ;;  %v3053_v46 = vld [vmem:[%s4015_s1 + $0x8e0] ss:$8 sps:$4 sm:$0xff]  }
  0xe1   :  { %2179 = vmatprep.subr.bf16.mxu0 %v2962_v47  ;;  %v3058_v47 = vld [vmem:[%s4015_s1 + $0x8f4] ss:$8 sps:$4 sm:$0xff]  }
  0xe3   :  { %2008 = vmatpush1.bf16.msra.mxu1 %v2957_v48  ;;  %v3056_v48 = vld [vmem:[%s4015_s1 + $0x8f0] ss:$8 sps:$4 sm:$0xff]  }
  0xe4   :  { %2180 = vmatpush1.bf16.msra.mxu0 %v2960_v49  ;;  %2009 = vmatprep.subr.bf16.mxu1 %v2965_v50  ;;  %v3059_v49 = vld [vmem:[%s4016_s0 + $0x40] ss:$72 sps:$4 sm:$0xff]  }
  0xe5   :  { %2181 = vmatprep.subr.bf16.mxu0 %v2968_v51 }
  0xe7   :  { %2010 = vmatpush1.bf16.msra.mxu1 %v2963_v52 }
  0xe8   :  { %2182 = vmatpush1.bf16.msra.mxu0 %v2966_v53  ;;  %2011 = vmatprep.subr.bf16.mxu1 %v2971_v54  ;;  %v322_v54 = vlaneseq }
  0xe9   :  { %2183 = vmatprep.subr.bf16.mxu0 %v2974_v55 }
  0xea   :  { %v323_v55 = vshrl.u32 %v322_v54, 7 }
  0xeb   :  { %2012 = vmatpush1.bf16.msra.mxu1 %v2969_v56 }
  0xec   :  { %2184 = vmatpush1.bf16.msra.mxu0 %v2972_v57  ;;  %2013 = vmatprep.subr.bf16.mxu1 %v2977_v58  ;;  %v324_v56 = vsub.s32 0, %v323_v55  ;;  %v320_v57 = vld [vmem:[%s4017_s2] sm:$0x3]  ;;  %v328_v58 = vsub.s32 1, %v323_v55 }
  0xed   :  { %2185 = vmatprep.subr.bf16.mxu0 %v2980_v59 }
  0xee   :  { %v325_v59 = vrot.slane %v320_v57, %v324_v56 }
  0xef   :  { %2014 = vmatpush1.bf16.msra.mxu1 %v2975_v60  ;;  %v329_v60 = vrot.slane %v320_v57, %v328_v58 }
  0xf0   :  { %2186 = vmatpush1.bf16.msra.mxu0 %v2978_v61  ;;  %2015 = vmatprep.subr.bf16.mxu1 %v2983_v62 }
  0xf1   :  { %2187 = vmatprep.subr.bf16.mxu0 %v2986_v63 }
  0xf3   :  { %2016 = vmatpush1.bf16.msra.mxu1 %v2981_v0 }
  0xf4   :  { %2188 = vmatpush1.bf16.msra.mxu0 %v2984_v1  ;;  %2017 = vmatprep.subr.bf16.mxu1 %v2989_v2 }
  0xf5   :  { %2189 = vmatprep.subr.bf16.mxu0 %v2992_v3 }
  0xf7   :  { %2018 = vmatpush1.bf16.msra.mxu1 %v2987_v4 }
  0xf8   :  { %2190 = vmatpush1.bf16.msra.mxu0 %v2990_v5  ;;  %2019 = vmatprep.subr.bf16.mxu1 %v2995_v6 }
  0xf9   :  { %2191 = vmatprep.subr.bf16.mxu0 %v2998_v7 }
  0xfb   :  { %2020 = vmatpush1.bf16.msra.mxu1 %v2993_v8 }
  0xfc   :  { %2192 = vmatpush1.bf16.msra.mxu0 %v2996_v9  ;;  %2021 = vmatprep.subr.bf16.mxu1 %v3001_v10 }
  0xfd   :  { %2193 = vmatprep.subr.bf16.mxu0 %v3004_v11 }
  0xff   :  { %2022 = vmatpush1.bf16.msra.mxu1 %v2999_v12 }
 0x100   :  { %2194 = vmatpush1.bf16.msra.mxu0 %v3002_v13 }
 0x101   :  { %2206 = vmatprep.subr.bf16.mxu0 %v3013_v14 }
 0x102   :  { %2024 = vmatmul.mubr.bf16.vlgmr.msra.gmra.mrb[0].mxu1 %v3005_v15 }
 0x103   :  { %2196 = vmatmul.mubr.bf16.vlgmr.msra.gmra.mrb[0].mxu0 %v3008_v16 }
 0x104   :  { %2207 = vmatpush1.bf16.msra.mxu0 %v3011_v17  ;;  %2238 = vmatprep.mubr.bf16.mxu0 %v3061_v18 }
 0x105   :  { %2208 = vmatprep.subr.bf16.mxu0 %v3016_v19 }
 0x108   :  { %2209 = vmatpush1.bf16.msra.mxu0 %v3014_v20 }
 0x109   :  { %2210 = vmatprep.subr.bf16.mxu0 %v3019_v21 }
 0x10c   :  { %2211 = vmatpush1.bf16.msra.mxu0 %v3017_v22 }
 0x10d   :  { %2212 = vmatprep.subr.bf16.mxu0 %v3022_v23 }
 0x110   :  { %2213 = vmatpush1.bf16.msra.mxu0 %v3020_v24 }
 0x111   :  { %2214 = vmatprep.subr.bf16.mxu0 %v3025_v25 }
 0x114   :  { %2215 = vmatpush1.bf16.msra.mxu0 %v3023_v26 }
 0x115   :  { %2216 = vmatprep.subr.bf16.mxu0 %v3028_v27 }
 0x118   :  { %2217 = vmatpush1.bf16.msra.mxu0 %v3026_v28 }
 0x119   :  { %2218 = vmatprep.subr.bf16.mxu0 %v3031_v29 }
 0x11c   :  { %2219 = vmatpush1.bf16.msra.mxu0 %v3029_v30 }
 0x11d   :  { %2220 = vmatprep.subr.bf16.mxu0 %v3034_v31 }
 0x120   :  { %2221 = vmatpush1.bf16.msra.mxu0 %v3032_v32 }
 0x121   :  { %2222 = vmatprep.subr.bf16.mxu0 %v3037_v33 }
 0x124   :  { %2223 = vmatpush1.bf16.msra.mxu0 %v3035_v34 }
 0x125   :  { %2224 = vmatprep.subr.bf16.mxu0 %v3040_v35 }
 0x128   :  { %2225 = vmatpush1.bf16.msra.mxu0 %v3038_v36 }
 0x129   :  { %2226 = vmatprep.subr.bf16.mxu0 %v3043_v37 }
 0x12c   :  { %2227 = vmatpush1.bf16.msra.mxu0 %v3041_v38 }
 0x12d   :  { %2228 = vmatprep.subr.bf16.mxu0 %v3046_v39 }
 0x130   :  { %2229 = vmatpush1.bf16.msra.mxu0 %v3044_v40 }
 0x131   :  { %2230 = vmatprep.subr.bf16.mxu0 %v3049_v41 }
 0x134   :  { %2231 = vmatpush1.bf16.msra.mxu0 %v3047_v42 }
 0x135   :  { %2232 = vmatprep.subr.bf16.mxu0 %v3052_v43 }
 0x138   :  { %2233 = vmatpush1.bf16.msra.mxu0 %v3050_v44 }
 0x139   :  { %2234 = vmatprep.subr.bf16.mxu0 %v3055_v45 }
 0x13c   :  { %2235 = vmatpush1.bf16.msra.mxu0 %v3053_v46 }
 0x13d   :  { %2236 = vmatprep.subr.bf16.mxu0 %v3058_v47 }
 0x140   :  { %2237 = vmatpush1.bf16.msra.mxu0 %v3056_v48 }
 0x143   :  { %2239 = vmatmul.mubr.bf16.vlgmr.msra.gmra.mrb[0].mxu0 %v3059_v49 }
 0x1d5   :  { %v2025_v50 = vpop.f32.mrb[0].mxu1 }
 0x1d6   :  { %v2027_v51 = vpop.f32.mrb[1].mxu1  ;;  %v2567_v61 = vadd.f32 %v2025_v50, %v325_v59 }
 0x1d7   :  { %v2029_v52 = vpop.f32.mrb[2].mxu1  ;;  %v2569_v62 = vadd.f32 %v2027_v51, %v329_v60 }
 0x1d8   :  { %v2031_v53 = vpop.f32.mrb[3].mxu1  ;;  %v2571_v0 = vadd.f32 %v2029_v52, %v325_v59 }
 0x1d9   :  { %v2573_v3 = vadd.f32 %v2031_v53, %v329_v60 }
 0x216   :  { %v2240_v63 = vpop.f32.mrb[0].mxu0 }
 0x217   :  { %v2568_v1 = vadd.f32 %v2567_v61, %v2240_v63  ;;  %v2242_v2 = vpop.f32.mrb[1].mxu0 }
 0x218   :  { %v2570_v4 = vadd.f32 %v2569_v62, %v2242_v2  ;;  %v2244_v5 = vpop.f32.mrb[2].mxu0 }
 0x219   :  { %v2249_v6 = vmax.f32 %v2568_v1, 0.0  ;;  %v2572_v7 = vadd.f32 %v2571_v0, %v2244_v5  ;;  %v2246_v8 = vpop.f32.mrb[3].mxu0 }
 0x21a   :  { %v2250_v9 = vmax.f32 %v2570_v4, 0.0  ;;  %v2574_v10 = vadd.f32 %v2573_v3, %v2246_v8 }
 0x21b   :  { %2253 = vst [vmem:[%s4018_s3] sm:$0xff] %v2249_v6  ;;  %v2251_v11 = vmax.f32 %v2572_v7, 0.0 }
 0x21c   :  { %2254 = vst [vmem:[%s4018_s3 + $0x8] sm:$0xff] %v2250_v9  ;;  %v2252_v12 = vmax.f32 %v2574_v10, 0.0 }
 0x21d   :  { %2255 = vst [vmem:[%s4018_s3 + $0x10] sm:$0xff] %v2251_v11 }
 0x21e   :  { %2256 = vst [vmem:[%s4018_s3 + $0x18] sm:$0xff] %v2252_v12 }

// kernel: resnet34_forward.34
= control target key start
LH: loop header
LB: loop body
LE: loop exit
PB: predicated region body
PF: predicated region fallthrough
CT: control target
= control target key end

     0   :  { %s46_s0 = inlined_call_operand.vmem [shape: f32[2,1,512], index: 0, kind: input, shape index: {}]   ;;  %s47_s1 = inlined_call_operand.vmem [shape: f32[2,512], index: 1, kind: output, shape index: {}]  }
   0x1   :  { %v29_v0 = vld [vmem:[%s46_s0] sm:$0xff]  }
   0x2   :  { %28 = vst.sshfl [vmem:[%s47_s1] sm:$0xff pattern:$0x75316420] %v29_v0 }

// kernel: resnet34_forward.31
= control target key start
LH: loop header
LB: loop body
LE: loop exit
PB: predicated region body
PF: predicated region fallthrough
CT: control target
= control target key end

     0   :  { %s4700_s12 = smov 0   ;;  %s4702_s13 = smov 0   ;;  %s5704_s0 = inlined_call_operand.vmem [shape: bf16[16,2304], index: 0, kind: input, shape index: {}]   ;;  %s5705_s1 = inlined_call_operand.vmem [shape: bf16[2304,512], index: 1, kind: input, shape index: {}]   ;;  %s5706_s2 = inlined_call_operand.vmem [shape: f32[1,512], index: 2, kind: input, shape index: {}]   ;;  %s5707_s3 = inlined_call_operand.vmem [shape: f32[16,512], index: 3, kind: output, shape index: {}]  }
   0x1   :  { %s4704_s14 = smov 0   ;;  %s4706_s15 = smov 0  }
   0x2   :  { %s4708_s16 = smov 0  }
   0x3 LB: > { %s22_s17 = sadd.s32 1, %s4674_s15  ;;  %s3780_s18 = sadd.s32 4294967295, %s4678_s16   ;;  %s4678_s16 = sphi %s4708_s16, %s13_s16   ;;  %s4674_s15 = sphi %s4706_s15, %s5712_s15   ;;  %s4670_s14 = sphi %s4704_s14, %s5711_s14   ;;  %s4666_s13 = sphi %s4702_s13, %s5710_s13   ;;  %s4662_s12 = sphi %s4700_s12, %s5709_s12  }
   0x4   : > { %p23_p0 = scmp.ge.s32.totalorder %s22_s17, 2  ;;  %p65_p1 = scmp.ne.s32.totalorder %s4666_s13, %s4662_s12 }
   0x5   : > { %p66_p2 = scmp.eq.s32.totalorder %s4678_s16, 0  ;;  %p123_p4 = scmp.eq.s32.totalorder %s3780_s18, 1 }
   0x6   : > { %s5714_s17 = smov (%p23_p0, %s22_s17), 0  ;;  %s58_s20 = sadd.s32 1, %s4666_s13 }
   0x7   : > { %p67_p3 = por %p66_p2, %p65_p1  ;;  %s55_s19 = ssub.s32 %s4674_s15, %s5714_s17 }
   0x8   : > { %p56_p5 = scmp.eq.s32.totalorder %s55_s19, 0  ;;  %p4735_p6 = por %p123_p4, %p65_p1 }
   0x9   : > { %p3784_p7 = scmp.ge.s32.totalorder %s4678_s16, 2 }
   0xa   : > { %s4740_s22 = scalar_select %p56_p5, %s4666_s13, %s58_s20  }
   0xb   : > { %155 = sbr.rel (%p3784_p7) target bundleno = 166 (0xa6), region = 20 }
  0x12   : > { %158 = sbr.rel (!%p67_p3) target bundleno = 166 (0xa6), region = 24  ;;  %s160_s23 = sand.u32 (%p67_p3), 1, %s4666_s13  }
  0x13   : > { %s4101_s24 = sshll.u32 (%p67_p3), %s4674_s15, 3  ;;  %s4139_s25 = smul.u32 (%p67_p3), 2304, %s160_s23 }
  0x14   : > { %s4748_s28 = scalar_lea.vmem (%p67_p3), %s5705_s1, %s4101_s24 }
  0x15   : > { %v767_v0 = vld [vmem:[%s4748_s28] sm:$0xff] (%p67_p3)  ;;  %v769_v1 = vld [vmem:[%s4748_s28 + $0x10] sm:$0xff] (%p67_p3)  ;;  %s4756_s29 = scalar_lea.vmem (%p67_p3), [#allocation2], %s4139_s25 }
  0x16   : > { %v771_v2 = vld [vmem:[%s4748_s28 + $0x20] sm:$0xff] (%p67_p3)  ;;  %v773_v3 = vld [vmem:[%s4748_s28 + $0x30] sm:$0xff] (%p67_p3)  ;;  %768 = vst [vmem:[%s4756_s29] sm:$0xff] (%p67_p3), %v767_v0  ;;  %770 = vst [vmem:[%s4756_s29 + $0x8] sm:$0xff] (%p67_p3), %v769_v1 }
  0x17   : > { %v775_v4 = vld [vmem:[%s4748_s28 + $0x40] sm:$0xff] (%p67_p3)  ;;  %v777_v5 = vld [vmem:[%s4748_s28 + $0x50] sm:$0xff] (%p67_p3)  ;;  %772 = vst [vmem:[%s4756_s29 + $0x10] sm:$0xff] (%p67_p3), %v771_v2  ;;  %774 = vst [vmem:[%s4756_s29 + $0x18] sm:$0xff] (%p67_p3), %v773_v3 }
  0x18   : > { %776 = vst [vmem:[%s4756_s29 + $0x20] sm:$0xff] (%p67_p3), %v775_v4  ;;  %778 = vst [vmem:[%s4756_s29 + $0x28] sm:$0xff] (%p67_p3), %v777_v5  ;;  %v779_v6 = vld [vmem:[%s4748_s28 + $0x60] sm:$0xff] (%p67_p3)  ;;  %v781_v7 = vld [vmem:[%s4748_s28 + $0x70] sm:$0xff] (%p67_p3) }
  0x19   : > { %v783_v8 = vld [vmem:[%s4748_s28 + $0x80] sm:$0xff]  ;;  %780 = vst [vmem:[%s4756_s29 + $0x30] sm:$0xff] %v779_v6  ;;  %782 = vst [vmem:[%s4756_s29 + $0x38] sm:$0xff] %v781_v7  ;;  %v785_v9 = vld [vmem:[%s4748_s28 + $0x90] sm:$0xff] }
  0x1a   : > { %784 = vst [vmem:[%s4756_s29 + $0x40] sm:$0xff] %v783_v8  ;;  %v787_v10 = vld [vmem:[%s4748_s28 + $0xa0] sm:$0xff]  ;;  %v789_v11 = vld [vmem:[%s4748_s28 + $0xb0] sm:$0xff]  ;;  %786 = vst [vmem:[%s4756_s29 + $0x48] sm:$0xff] %v785_v9 }
  0x1b   : > { %788 = vst [vmem:[%s4756_s29 + $0x50] sm:$0xff] %v787_v10  ;;  %790 = vst [vmem:[%s4756_s29 + $0x58] sm:$0xff] %v789_v11  ;;  %v791_v12 = vld [vmem:[%s4748_s28 + $0xc0] sm:$0xff]  ;;  %v793_v13 = vld [vmem:[%s4748_s28 + $0xd0] sm:$0xff] }
  0x1c   : > { %v795_v14 = vld [vmem:[%s4748_s28 + $0xe0] sm:$0xff]  ;;  %792 = vst [vmem:[%s4756_s29 + $0x60] sm:$0xff] %v791_v12  ;;  %794 = vst [vmem:[%s4756_s29 + $0x68] sm:$0xff] %v793_v13  ;;  %v797_v15 = vld [vmem:[%s4748_s28 + $0xf0] sm:$0xff] }
  0x1d   : > { %796 = vst [vmem:[%s4756_s29 + $0x70] sm:$0xff] %v795_v14  ;;  %v799_v16 = vld [vmem:[%s4748_s28 + $0x100] sm:$0xff]  ;;  %v801_v17 = vld [vmem:[%s4748_s28 + $0x110] sm:$0xff]  ;;  %798 = vst [vmem:[%s4756_s29 + $0x78] sm:$0xff] %v797_v15 }
  0x1e   : > { %800 = vst [vmem:[%s4756_s29 + $0x80] sm:$0xff] %v799_v16  ;;  %802 = vst [vmem:[%s4756_s29 + $0x88] sm:$0xff] %v801_v17  ;;  %v803_v18 = vld [vmem:[%s4748_s28 + $0x120] sm:$0xff]  ;;  %v805_v19 = vld [vmem:[%s4748_s28 + $0x130] sm:$0xff] }
  0x1f   : > { %v807_v20 = vld [vmem:[%s4748_s28 + $0x140] sm:$0xff]  ;;  %804 = vst [vmem:[%s4756_s29 + $0x90] sm:$0xff] %v803_v18  ;;  %806 = vst [vmem:[%s4756_s29 + $0x98] sm:$0xff] %v805_v19  ;;  %v809_v21 = vld [vmem:[%s4748_s28 + $0x150] sm:$0xff] }
  0x20   : > { %808 = vst [vmem:[%s4756_s29 + $0xa0] sm:$0xff] %v807_v20  ;;  %v811_v22 = vld [vmem:[%s4748_s28 + $0x160] sm:$0xff]  ;;  %v813_v23 = vld [vmem:[%s4748_s28 + $0x170] sm:$0xff]  ;;  %810 = vst [vmem:[%s4756_s29 + $0xa8] sm:$0xff] %v809_v21 }
  0x21   : > { %812 = vst [vmem:[%s4756_s29 + $0xb0] sm:$0xff] %v811_v22  ;;  %814 = vst [vmem:[%s4756_s29 + $0xb8] sm:$0xff] %v813_v23  ;;  %v815_v24 = vld [vmem:[%s4748_s28 + $0x180] sm:$0xff]  ;;  %v817_v25 = vld [vmem:[%s4748_s28 + $0x190] sm:$0xff] }
  0x22   : > { %v819_v26 = vld [vmem:[%s4748_s28 + $0x1a0] sm:$0xff]  ;;  %816 = vst [vmem:[%s4756_s29 + $0xc0] sm:$0xff] %v815_v24  ;;  %818 = vst [vmem:[%s4756_s29 + $0xc8] sm:$0xff] %v817_v25  ;;  %v821_v27 = vld [vmem:[%s4748_s28 + $0x1b0] sm:$0xff] }
  0x23   : > { %820 = vst [vmem:[%s4756_s29 + $0xd0] sm:$0xff] %v819_v26  ;;  %v823_v28 = vld [vmem:[%s4748_s28 + $0x1c0] sm:$0xff]  ;;  %v825_v29 = vld [vmem:[%s4748_s28 + $0x1d0] sm:$0xff]  ;;  %822 = vst [vmem:[%s4756_s29 + $0xd8] sm:$0xff] %v821_v27 }
  0x24   : > { %824 = vst [vmem:[%s4756_s29 + $0xe0] sm:$0xff] %v823_v28  ;;  %826 = vst [vmem:[%s4756_s29 + $0xe8] sm:$0xff] %v825_v29  ;;  %v827_v30 = vld [vmem:[%s4748_s28 + $0x1e0] sm:$0xff]  ;;  %v829_v31 = vld [vmem:[%s4748_s28 + $0x1f0] sm:$0xff] }
  0x25   : > { %v831_v32 = vld [vmem:[%s4748_s28 + $0x200] sm:$0xff]  ;;  %828 = vst [vmem:[%s4756_s29 + $0xf0] sm:$0xff] %v827_v30  ;;  %830 = vst [vmem:[%s4756_s29 + $0xf8] sm:$0xff] %v829_v31  ;;  %v833_v33 = vld [vmem:[%s4748_s28 + $0x210] sm:$0xff] }
  0x26   : > { %832 = vst [vmem:[%s4756_s29 + $0x100] sm:$0xff] %v831_v32  ;;  %v835_v34 = vld [vmem:[%s4748_s28 + $0x220] sm:$0xff]  ;;  %v837_v35 = vld [vmem:[%s4748_s28 + $0x230] sm:$0xff]  ;;  %834 = vst [vmem:[%s4756_s29 + $0x108] sm:$0xff] %v833_v33 }
  0x27   : > { %836 = vst [vmem:[%s4756_s29 + $0x110] sm:$0xff] %v835_v34  ;;  %838 = vst [vmem:[%s4756_s29 + $0x118] sm:$0xff] %v837_v35  ;;  %v839_v36 = vld [vmem:[%s4748_s28 + $0x240] sm:$0xff]  ;;  %v841_v37 = vld [vmem:[%s4748_s28 + $0x250] sm:$0xff] }
  0x28   : > { %v843_v38 = vld [vmem:[%s4748_s28 + $0x260] sm:$0xff]  ;;  %840 = vst [vmem:[%s4756_s29 + $0x120] sm:$0xff] %v839_v36  ;;  %842 = vst [vmem:[%s4756_s29 + $0x128] sm:$0xff] %v841_v37  ;;  %v845_v39 = vld [vmem:[%s4748_s28 + $0x270] sm:$0xff] }
  0x29   : > { %844 = vst [vmem:[%s4756_s29 + $0x130] sm:$0xff] %v843_v38  ;;  %v847_v40 = vld [vmem:[%s4748_s28 + $0x280] sm:$0xff]  ;;  %v849_v41 = vld [vmem:[%s4748_s28 + $0x290] sm:$0xff]  ;;  %846 = vst [vmem:[%s4756_s29 + $0x138] sm:$0xff] %v845_v39 }
  0x2a   : > { %848 = vst [vmem:[%s4756_s29 + $0x140] sm:$0xff] %v847_v40  ;;  %850 = vst [vmem:[%s4756_s29 + $0x148] sm:$0xff] %v849_v41  ;;  %v851_v42 = vld [vmem:[%s4748_s28 + $0x2a0] sm:$0xff]  ;;  %v853_v43 = vld [vmem:[%s4748_s28 + $0x2b0] sm:$0xff] }
  0x2b   : > { %v855_v44 = vld [vmem:[%s4748_s28 + $0x2c0] sm:$0xff]  ;;  %852 = vst [vmem:[%s4756_s29 + $0x150] sm:$0xff] %v851_v42  ;;  %854 = vst [vmem:[%s4756_s29 + $0x158] sm:$0xff] %v853_v43  ;;  %v857_v45 = vld [vmem:[%s4748_s28 + $0x2d0] sm:$0xff] }
  0x2c   : > { %856 = vst [vmem:[%s4756_s29 + $0x160] sm:$0xff] %v855_v44  ;;  %v859_v46 = vld [vmem:[%s4748_s28 + $0x2e0] sm:$0xff]  ;;  %v861_v47 = vld [vmem:[%s4748_s28 + $0x2f0] sm:$0xff]  ;;  %858 = vst [vmem:[%s4756_s29 + $0x168] sm:$0xff] %v857_v45 }
  0x2d   : > { %860 = vst [vmem:[%s4756_s29 + $0x170] sm:$0xff] %v859_v46  ;;  %862 = vst [vmem:[%s4756_s29 + $0x178] sm:$0xff] %v861_v47  ;;  %v863_v48 = vld [vmem:[%s4748_s28 + $0x300] sm:$0xff]  ;;  %v865_v49 = vld [vmem:[%s4748_s28 + $0x310] sm:$0xff] }
  0x2e   : > { %v867_v50 = vld [vmem:[%s4748_s28 + $0x320] sm:$0xff]  ;;  %864 = vst [vmem:[%s4756_s29 + $0x180] sm:$0xff] %v863_v48  ;;  %866 = vst [vmem:[%s4756_s29 + $0x188] sm:$0xff] %v865_v49  ;;  %v869_v51 = vld [vmem:[%s4748_s28 + $0x330] sm:$0xff] }
  0x2f   : > { %868 = vst [vmem:[%s4756_s29 + $0x190] sm:$0xff] %v867_v50  ;;  %v871_v52 = vld [vmem:[%s4748_s28 + $0x340] sm:$0xff]  ;;  %v873_v53 = vld [vmem:[%s4748_s28 + $0x350] sm:$0xff]  ;;  %870 = vst [vmem:[%s4756_s29 + $0x198] sm:$0xff] %v869_v51 }
  0x30   : > { %872 = vst [vmem:[%s4756_s29 + $0x1a0] sm:$0xff] %v871_v52  ;;  %874 = vst [vmem:[%s4756_s29 + $0x1a8] sm:$0xff] %v873_v53  ;;  %v875_v54 = vld [vmem:[%s4748_s28 + $0x360] sm:$0xff]  ;;  %v877_v55 = vld [vmem:[%s4748_s28 + $0x370] sm:$0xff] }
  0x31   : > { %v879_v56 = vld [vmem:[%s4748_s28 + $0x380] sm:$0xff]  ;;  %876 = vst [vmem:[%s4756_s29 + $0x1b0] sm:$0xff] %v875_v54  ;;  %878 = vst [vmem:[%s4756_s29 + $0x1b8] sm:$0xff] %v877_v55  ;;  %v881_v57 = vld [vmem:[%s4748_s28 + $0x390] sm:$0xff] }
  0x32   : > { %880 = vst [vmem:[%s4756_s29 + $0x1c0] sm:$0xff] %v879_v56  ;;  %v883_v58 = vld [vmem:[%s4748_s28 + $0x3a0] sm:$0xff]  ;;  %v885_v59 = vld [vmem:[%s4748_s28 + $0x3b0] sm:$0xff]  ;;  %882 = vst [vmem:[%s4756_s29 + $0x1c8] sm:$0xff] %v881_v57 }
  0x33   : > { %884 = vst [vmem:[%s4756_s29 + $0x1d0] sm:$0xff] %v883_v58  ;;  %886 = vst [vmem:[%s4756_s29 + $0x1d8] sm:$0xff] %v885_v59  ;;  %v887_v60 = vld [vmem:[%s4748_s28 + $0x3c0] sm:$0xff]  ;;  %v889_v61 = vld [vmem:[%s4748_s28 + $0x3d0] sm:$0xff] }
  0x34   : > { %v891_v62 = vld [vmem:[%s4748_s28 + $0x3e0] sm:$0xff]  ;;  %888 = vst [vmem:[%s4756_s29 + $0x1e0] sm:$0xff] %v887_v60  ;;  %890 = vst [vmem:[%s4756_s29 + $0x1e8] sm:$0xff] %v889_v61  ;;  %v893_v63 = vld [vmem:[%s4748_s28 + $0x3f0] sm:$0xff] }
  0x35   : > { %892 = vst [vmem:[%s4756_s29 + $0x1f0] sm:$0xff] %v891_v62  ;;  %v895_v0 = vld [vmem:[%s4748_s28 + $0x400] sm:$0xff]  ;;  %v897_v1 = vld [vmem:[%s4748_s28 + $0x410] sm:$0xff]  ;;  %894 = vst [vmem:[%s4756_s29 + $0x1f8] sm:$0xff] %v893_v63 }
  0x36   : > { %896 = vst [vmem:[%s4756_s29 + $0x200] sm:$0xff] %v895_v0  ;;  %898 = vst [vmem:[%s4756_s29 + $0x208] sm:$0xff] %v897_v1  ;;  %v899_v2 = vld [vmem:[%s4748_s28 + $0x420] sm:$0xff]  ;;  %v901_v3 = vld [vmem:[%s4748_s28 + $0x430] sm:$0xff] }
  0x37   : > { %v903_v4 = vld [vmem:[%s4748_s28 + $0x440] sm:$0xff]  ;;  %900 = vst [vmem:[%s4756_s29 + $0x210] sm:$0xff] %v899_v2  ;;  %902 = vst [vmem:[%s4756_s29 + $0x218] sm:$0xff] %v901_v3  ;;  %v905_v5 = vld [vmem:[%s4748_s28 + $0x450] sm:$0xff] }
  0x38   : > { %904 = vst [vmem:[%s4756_s29 + $0x220] sm:$0xff] %v903_v4  ;;  %v907_v6 = vld [vmem:[%s4748_s28 + $0x460] sm:$0xff]  ;;  %v909_v7 = vld [vmem:[%s4748_s28 + $0x470] sm:$0xff]  ;;  %906 = vst [vmem:[%s4756_s29 + $0x228] sm:$0xff] %v905_v5 }
  0x39   : > { %908 = vst [vmem:[%s4756_s29 + $0x230] sm:$0xff] %v907_v6  ;;  %910 = vst [vmem:[%s4756_s29 + $0x238] sm:$0xff] %v909_v7  ;;  %v911_v8 = vld [vmem:[%s4748_s28 + $0x480] sm:$0xff]  ;;  %v913_v9 = vld [vmem:[%s4748_s28 + $0x490] sm:$0xff] }
  0x3a   : > { %v915_v10 = vld [vmem:[%s4748_s28 + $0x4a0] sm:$0xff]  ;;  %912 = vst [vmem:[%s4756_s29 + $0x240] sm:$0xff] %v911_v8  ;;  %914 = vst [vmem:[%s4756_s29 + $0x248] sm:$0xff] %v913_v9  ;;  %v917_v11 = vld [vmem:[%s4748_s28 + $0x4b0] sm:$0xff] }
  0x3b   : > { %916 = vst [vmem:[%s4756_s29 + $0x250] sm:$0xff] %v915_v10  ;;  %v919_v12 = vld [vmem:[%s4748_s28 + $0x4c0] sm:$0xff]  ;;  %v921_v13 = vld [vmem:[%s4748_s28 + $0x4d0] sm:$0xff]  ;;  %918 = vst [vmem:[%s4756_s29 + $0x258] sm:$0xff] %v917_v11 }
  0x3c   : > { %920 = vst [vmem:[%s4756_s29 + $0x260] sm:$0xff] %v919_v12  ;;  %922 = vst [vmem:[%s4756_s29 + $0x268] sm:$0xff] %v921_v13  ;;  %v923_v14 = vld [vmem:[%s4748_s28 + $0x4e0] sm:$0xff]  ;;  %v925_v15 = vld [vmem:[%s4748_s28 + $0x4f0] sm:$0xff] }
  0x3d   : > { %v927_v16 = vld [vmem:[%s4748_s28 + $0x500] sm:$0xff]  ;;  %924 = vst [vmem:[%s4756_s29 + $0x270] sm:$0xff] %v923_v14  ;;  %926 = vst [vmem:[%s4756_s29 + $0x278] sm:$0xff] %v925_v15  ;;  %v929_v17 = vld [vmem:[%s4748_s28 + $0x510] sm:$0xff] }
  0x3e   : > { %928 = vst [vmem:[%s4756_s29 + $0x280] sm:$0xff] %v927_v16  ;;  %v931_v18 = vld [vmem:[%s4748_s28 + $0x520] sm:$0xff]  ;;  %v933_v19 = vld [vmem:[%s4748_s28 + $0x530] sm:$0xff]  ;;  %930 = vst [vmem:[%s4756_s29 + $0x288] sm:$0xff] %v929_v17 }
  0x3f   : > { %932 = vst [vmem:[%s4756_s29 + $0x290] sm:$0xff] %v931_v18  ;;  %934 = vst [vmem:[%s4756_s29 + $0x298] sm:$0xff] %v933_v19  ;;  %v935_v20 = vld [vmem:[%s4748_s28 + $0x540] sm:$0xff]  ;;  %v937_v21 = vld [vmem:[%s4748_s28 + $0x550] sm:$0xff] }
  0x40   : > { %v939_v22 = vld [vmem:[%s4748_s28 + $0x560] sm:$0xff]  ;;  %936 = vst [vmem:[%s4756_s29 + $0x2a0] sm:$0xff] %v935_v20  ;;  %938 = vst [vmem:[%s4756_s29 + $0x2a8] sm:$0xff] %v937_v21  ;;  %v941_v23 = vld [vmem:[%s4748_s28 + $0x570] sm:$0xff] }
  0x41   : > { %940 = vst [vmem:[%s4756_s29 + $0x2b0] sm:$0xff] %v939_v22  ;;  %v943_v24 = vld [vmem:[%s4748_s28 + $0x580] sm:$0xff]  ;;  %v945_v25 = vld [vmem:[%s4748_s28 + $0x590] sm:$0xff]  ;;  %942 = vst [vmem:[%s4756_s29 + $0x2b8] sm:$0xff] %v941_v23 }
  0x42   : > { %944 = vst [vmem:[%s4756_s29 + $0x2c0] sm:$0xff] %v943_v24  ;;  %946 = vst [vmem:[%s4756_s29 + $0x2c8] sm:$0xff] %v945_v25  ;;  %v947_v26 = vld [vmem:[%s4748_s28 + $0x5a0] sm:$0xff]  ;;  %v949_v27 = vld [vmem:[%s4748_s28 + $0x5b0] sm:$0xff] }
  0x43   : > { %v951_v28 = vld [vmem:[%s4748_s28 + $0x5c0] sm:$0xff]  ;;  %948 = vst [vmem:[%s4756_s29 + $0x2d0] sm:$0xff] %v947_v26  ;;  %950 = vst [vmem:[%s4756_s29 + $0x2d8] sm:$0xff] %v949_v27  ;;  %v953_v29 = vld [vmem:[%s4748_s28 + $0x5d0] sm:$0xff] }
  0x44   : > { %952 = vst [vmem:[%s4756_s29 + $0x2e0] sm:$0xff] %v951_v28  ;;  %v955_v30 = vld [vmem:[%s4748_s28 + $0x5e0] sm:$0xff]  ;;  %v957_v31 = vld [vmem:[%s4748_s28 + $0x5f0] sm:$0xff]  ;;  %954 = vst [vmem:[%s4756_s29 + $0x2e8] sm:$0xff] %v953_v29 }
  0x45   : > { %956 = vst [vmem:[%s4756_s29 + $0x2f0] sm:$0xff] %v955_v30  ;;  %958 = vst [vmem:[%s4756_s29 + $0x2f8] sm:$0xff] %v957_v31  ;;  %v959_v32 = vld [vmem:[%s4748_s28 + $0x600] sm:$0xff]  ;;  %v961_v33 = vld [vmem:[%s4748_s28 + $0x610] sm:$0xff] }
  0x46   : > { %v963_v34 = vld [vmem:[%s4748_s28 + $0x620] sm:$0xff]  ;;  %960 = vst [vmem:[%s4756_s29 + $0x300] sm:$0xff] %v959_v32  ;;  %962 = vst [vmem:[%s4756_s29 + $0x308] sm:$0xff] %v961_v33  ;;  %v965_v35 = vld [vmem:[%s4748_s28 + $0x630] sm:$0xff] }
  0x47   : > { %964 = vst [vmem:[%s4756_s29 + $0x310] sm:$0xff] %v963_v34  ;;  %v967_v36 = vld [vmem:[%s4748_s28 + $0x640] sm:$0xff]  ;;  %v969_v37 = vld [vmem:[%s4748_s28 + $0x650] sm:$0xff]  ;;  %966 = vst [vmem:[%s4756_s29 + $0x318] sm:$0xff] %v965_v35 }
  0x48   : > { %968 = vst [vmem:[%s4756_s29 + $0x320] sm:$0xff] %v967_v36  ;;  %970 = vst [vmem:[%s4756_s29 + $0x328] sm:$0xff] %v969_v37  ;;  %v971_v38 = vld [vmem:[%s4748_s28 + $0x660] sm:$0xff]  ;;  %v973_v39 = vld [vmem:[%s4748_s28 + $0x670] sm:$0xff] }
  0x49   : > { %v975_v40 = vld [vmem:[%s4748_s28 + $0x680] sm:$0xff]  ;;  %972 = vst [vmem:[%s4756_s29 + $0x330] sm:$0xff] %v971_v38  ;;  %974 = vst [vmem:[%s4756_s29 + $0x338] sm:$0xff] %v973_v39  ;;  %v977_v41 = vld [vmem:[%s4748_s28 + $0x690] sm:$0xff] }
  0x4a   : > { %976 = vst [vmem:[%s4756_s29 + $0x340] sm:$0xff] %v975_v40  ;;  %v979_v42 = vld [vmem:[%s4748_s28 + $0x6a0] sm:$0xff]  ;;  %v981_v43 = vld [vmem:[%s4748_s28 + $0x6b0] sm:$0xff]  ;;  %978 = vst [vmem:[%s4756_s29 + $0x348] sm:$0xff] %v977_v41 }
  0x4b   : > { %980 = vst [vmem:[%s4756_s29 + $0x350] sm:$0xff] %v979_v42  ;;  %982 = vst [vmem:[%s4756_s29 + $0x358] sm:$0xff] %v981_v43  ;;  %v983_v44 = vld [vmem:[%s4748_s28 + $0x6c0] sm:$0xff]  ;;  %v985_v45 = vld [vmem:[%s4748_s28 + $0x6d0] sm:$0xff] }
  0x4c   : > { %v987_v46 = vld [vmem:[%s4748_s28 + $0x6e0] sm:$0xff]  ;;  %984 = vst [vmem:[%s4756_s29 + $0x360] sm:$0xff] %v983_v44  ;;  %986 = vst [vmem:[%s4756_s29 + $0x368] sm:$0xff] %v985_v45  ;;  %v989_v47 = vld [vmem:[%s4748_s28 + $0x6f0] sm:$0xff] }
  0x4d   : > { %988 = vst [vmem:[%s4756_s29 + $0x370] sm:$0xff] %v987_v46  ;;  %v991_v48 = vld [vmem:[%s4748_s28 + $0x700] sm:$0xff]  ;;  %v993_v49 = vld [vmem:[%s4748_s28 + $0x710] sm:$0xff]  ;;  %990 = vst [vmem:[%s4756_s29 + $0x378] sm:$0xff] %v989_v47 }
  0x4e   : > { %992 = vst [vmem:[%s4756_s29 + $0x380] sm:$0xff] %v991_v48  ;;  %994 = vst [vmem:[%s4756_s29 + $0x388] sm:$0xff] %v993_v49  ;;  %v995_v50 = vld [vmem:[%s4748_s28 + $0x720] sm:$0xff]  ;;  %v997_v51 = vld [vmem:[%s4748_s28 + $0x730] sm:$0xff] }
  0x4f   : > { %v999_v52 = vld [vmem:[%s4748_s28 + $0x740] sm:$0xff]  ;;  %996 = vst [vmem:[%s4756_s29 + $0x390] sm:$0xff] %v995_v50  ;;  %998 = vst [vmem:[%s4756_s29 + $0x398] sm:$0xff] %v997_v51  ;;  %v1001_v53 = vld [vmem:[%s4748_s28 + $0x750] sm:$0xff] }
  0x50   : > { %1000 = vst [vmem:[%s4756_s29 + $0x3a0] sm:$0xff] %v999_v52  ;;  %v1003_v54 = vld [vmem:[%s4748_s28 + $0x760] sm:$0xff]  ;;  %v1005_v55 = vld [vmem:[%s4748_s28 + $0x770] sm:$0xff]  ;;  %1002 = vst [vmem:[%s4756_s29 + $0x3a8] sm:$0xff] %v1001_v53 }
  0x51   : > { %1004 = vst [vmem:[%s4756_s29 + $0x3b0] sm:$0xff] %v1003_v54  ;;  %1006 = vst [vmem:[%s4756_s29 + $0x3b8] sm:$0xff] %v1005_v55  ;;  %v1007_v56 = vld [vmem:[%s4748_s28 + $0x780] sm:$0xff]  ;;  %v1009_v57 = vld [vmem:[%s4748_s28 + $0x790] sm:$0xff] }
  0x52   : > { %v1011_v58 = vld [vmem:[%s4748_s28 + $0x7a0] sm:$0xff]  ;;  %1008 = vst [vmem:[%s4756_s29 + $0x3c0] sm:$0xff] %v1007_v56  ;;  %1010 = vst [vmem:[%s4756_s29 + $0x3c8] sm:$0xff] %v1009_v57  ;;  %v1013_v59 = vld [vmem:[%s4748_s28 + $0x7b0] sm:$0xff] }
  0x53   : > { %1012 = vst [vmem:[%s4756_s29 + $0x3d0] sm:$0xff] %v1011_v58  ;;  %v1015_v60 = vld [vmem:[%s4748_s28 + $0x7c0] sm:$0xff]  ;;  %v1017_v61 = vld [vmem:[%s4748_s28 + $0x7d0] sm:$0xff]  ;;  %1014 = vst [vmem:[%s4756_s29 + $0x3d8] sm:$0xff] %v1013_v59 }
  0x54   : > { %1016 = vst [vmem:[%s4756_s29 + $0x3e0] sm:$0xff] %v1015_v60  ;;  %1018 = vst [vmem:[%s4756_s29 + $0x3e8] sm:$0xff] %v1017_v61  ;;  %v1019_v62 = vld [vmem:[%s4748_s28 + $0x7e0] sm:$0xff]  ;;  %v1021_v63 = vld [vmem:[%s4748_s28 + $0x7f0] sm:$0xff] }
  0x55   : > { %v1023_v0 = vld [vmem:[%s4748_s28 + $0x800] sm:$0xff]  ;;  %1020 = vst [vmem:[%s4756_s29 + $0x3f0] sm:$0xff] %v1019_v62  ;;  %1022 = vst [vmem:[%s4756_s29 + $0x3f8] sm:$0xff] %v1021_v63  ;;  %v1025_v1 = vld [vmem:[%s4748_s28 + $0x810] sm:$0xff] }
  0x56   : > { %1024 = vst [vmem:[%s4756_s29 + $0x400] sm:$0xff] %v1023_v0  ;;  %v1027_v2 = vld [vmem:[%s4748_s28 + $0x820] sm:$0xff]  ;;  %v1029_v3 = vld [vmem:[%s4748_s28 + $0x830] sm:$0xff]  ;;  %1026 = vst [vmem:[%s4756_s29 + $0x408] sm:$0xff] %v1025_v1 }
  0x57   : > { %1028 = vst [vmem:[%s4756_s29 + $0x410] sm:$0xff] %v1027_v2  ;;  %1030 = vst [vmem:[%s4756_s29 + $0x418] sm:$0xff] %v1029_v3  ;;  %v1031_v4 = vld [vmem:[%s4748_s28 + $0x840] sm:$0xff]  ;;  %v1033_v5 = vld [vmem:[%s4748_s28 + $0x850] sm:$0xff] }
  0x58   : > { %v1035_v6 = vld [vmem:[%s4748_s28 + $0x860] sm:$0xff]  ;;  %1032 = vst [vmem:[%s4756_s29 + $0x420] sm:$0xff] %v1031_v4  ;;  %1034 = vst [vmem:[%s4756_s29 + $0x428] sm:$0xff] %v1033_v5  ;;  %v1037_v7 = vld [vmem:[%s4748_s28 + $0x870] sm:$0xff] }
  0x59   : > { %1036 = vst [vmem:[%s4756_s29 + $0x430] sm:$0xff] %v1035_v6  ;;  %v1039_v8 = vld [vmem:[%s4748_s28 + $0x880] sm:$0xff]  ;;  %v1041_v9 = vld [vmem:[%s4748_s28 + $0x890] sm:$0xff]  ;;  %1038 = vst [vmem:[%s4756_s29 + $0x438] sm:$0xff] %v1037_v7 }
  0x5a   : > { %1040 = vst [vmem:[%s4756_s29 + $0x440] sm:$0xff] %v1039_v8  ;;  %1042 = vst [vmem:[%s4756_s29 + $0x448] sm:$0xff] %v1041_v9  ;;  %v1043_v10 = vld [vmem:[%s4748_s28 + $0x8a0] sm:$0xff]  ;;  %v1045_v11 = vld [vmem:[%s4748_s28 + $0x8b0] sm:$0xff] }
  0x5b   : > { %v1047_v12 = vld [vmem:[%s4748_s28 + $0x8c0] sm:$0xff]  ;;  %1044 = vst [vmem:[%s4756_s29 + $0x450] sm:$0xff] %v1043_v10  ;;  %1046 = vst [vmem:[%s4756_s29 + $0x458] sm:$0xff] %v1045_v11  ;;  %v1049_v13 = vld [vmem:[%s4748_s28 + $0x8d0] sm:$0xff] }
  0x5c   : > { %1048 = vst [vmem:[%s4756_s29 + $0x460] sm:$0xff] %v1047_v12  ;;  %v1051_v14 = vld [vmem:[%s4748_s28 + $0x8e0] sm:$0xff]  ;;  %v1053_v15 = vld [vmem:[%s4748_s28 + $0x8f0] sm:$0xff]  ;;  %1050 = vst [vmem:[%s4756_s29 + $0x468] sm:$0xff] %v1049_v13 }
  0x5d   : > { %1052 = vst [vmem:[%s4756_s29 + $0x470] sm:$0xff] %v1051_v14  ;;  %1054 = vst [vmem:[%s4756_s29 + $0x478] sm:$0xff] %v1053_v15  ;;  %v1055_v16 = vld [vmem:[%s4748_s28 + $0x900] sm:$0xff]  ;;  %v1057_v17 = vld [vmem:[%s4748_s28 + $0x910] sm:$0xff] }
  0x5e   : > { %v1059_v18 = vld [vmem:[%s4748_s28 + $0x920] sm:$0xff]  ;;  %1056 = vst [vmem:[%s4756_s29 + $0x480] sm:$0xff] %v1055_v16  ;;  %1058 = vst [vmem:[%s4756_s29 + $0x488] sm:$0xff] %v1057_v17  ;;  %v1061_v19 = vld [vmem:[%s4748_s28 + $0x930] sm:$0xff] }
  0x5f   : > { %1060 = vst [vmem:[%s4756_s29 + $0x490] sm:$0xff] %v1059_v18  ;;  %v1063_v20 = vld [vmem:[%s4748_s28 + $0x940] sm:$0xff]  ;;  %v1065_v21 = vld [vmem:[%s4748_s28 + $0x950] sm:$0xff]  ;;  %1062 = vst [vmem:[%s4756_s29 + $0x498] sm:$0xff] %v1061_v19 }
  0x60   : > { %1064 = vst [vmem:[%s4756_s29 + $0x4a0] sm:$0xff] %v1063_v20  ;;  %1066 = vst [vmem:[%s4756_s29 + $0x4a8] sm:$0xff] %v1065_v21  ;;  %v1067_v22 = vld [vmem:[%s4748_s28 + $0x960] sm:$0xff]  ;;  %v1069_v23 = vld [vmem:[%s4748_s28 + $0x970] sm:$0xff] }
  0x61   : > { %v1071_v24 = vld [vmem:[%s4748_s28 + $0x980] sm:$0xff]  ;;  %1068 = vst [vmem:[%s4756_s29 + $0x4b0] sm:$0xff] %v1067_v22  ;;  %1070 = vst [vmem:[%s4756_s29 + $0x4b8] sm:$0xff] %v1069_v23  ;;  %v1073_v25 = vld [vmem:[%s4748_s28 + $0x990] sm:$0xff] }
  0x62   : > { %1072 = vst [vmem:[%s4756_s29 + $0x4c0] sm:$0xff] %v1071_v24  ;;  %v1075_v26 = vld [vmem:[%s4748_s28 + $0x9a0] sm:$0xff]  ;;  %v1077_v27 = vld [vmem:[%s4748_s28 + $0x9b0] sm:$0xff]  ;;  %1074 = vst [vmem:[%s4756_s29 + $0x4c8] sm:$0xff] %v1073_v25 }
  0x63   : > { %1076 = vst [vmem:[%s4756_s29 + $0x4d0] sm:$0xff] %v1075_v26  ;;  %1078 = vst [vmem:[%s4756_s29 + $0x4d8] sm:$0xff] %v1077_v27  ;;  %v1079_v28 = vld [vmem:[%s4748_s28 + $0x9c0] sm:$0xff]  ;;  %v1081_v29 = vld [vmem:[%s4748_s28 + $0x9d0] sm:$0xff] }
  0x64   : > { %v1083_v30 = vld [vmem:[%s4748_s28 + $0x9e0] sm:$0xff]  ;;  %1080 = vst [vmem:[%s4756_s29 + $0x4e0] sm:$0xff] %v1079_v28  ;;  %1082 = vst [vmem:[%s4756_s29 + $0x4e8] sm:$0xff] %v1081_v29  ;;  %v1085_v31 = vld [vmem:[%s4748_s28 + $0x9f0] sm:$0xff] }
  0x65   : > { %1084 = vst [vmem:[%s4756_s29 + $0x4f0] sm:$0xff] %v1083_v30  ;;  %v1087_v32 = vld [vmem:[%s4748_s28 + $0xa00] sm:$0xff]  ;;  %v1089_v33 = vld [vmem:[%s4748_s28 + $0xa10] sm:$0xff]  ;;  %1086 = vst [vmem:[%s4756_s29 + $0x4f8] sm:$0xff] %v1085_v31 }
  0x66   : > { %1088 = vst [vmem:[%s4756_s29 + $0x500] sm:$0xff] %v1087_v32  ;;  %1090 = vst [vmem:[%s4756_s29 + $0x508] sm:$0xff] %v1089_v33  ;;  %v1091_v34 = vld [vmem:[%s4748_s28 + $0xa20] sm:$0xff]  ;;  %v1093_v35 = vld [vmem:[%s4748_s28 + $0xa30] sm:$0xff] }
  0x67   : > { %v1095_v36 = vld [vmem:[%s4748_s28 + $0xa40] sm:$0xff]  ;;  %1092 = vst [vmem:[%s4756_s29 + $0x510] sm:$0xff] %v1091_v34  ;;  %1094 = vst [vmem:[%s4756_s29 + $0x518] sm:$0xff] %v1093_v35  ;;  %v1097_v37 = vld [vmem:[%s4748_s28 + $0xa50] sm:$0xff] }
  0x68   : > { %1096 = vst [vmem:[%s4756_s29 + $0x520] sm:$0xff] %v1095_v36  ;;  %v1099_v38 = vld [vmem:[%s4748_s28 + $0xa60] sm:$0xff]  ;;  %v1101_v39 = vld [vmem:[%s4748_s28 + $0xa70] sm:$0xff]  ;;  %1098 = vst [vmem:[%s4756_s29 + $0x528] sm:$0xff] %v1097_v37 }
  0x69   : > { %1100 = vst [vmem:[%s4756_s29 + $0x530] sm:$0xff] %v1099_v38  ;;  %1102 = vst [vmem:[%s4756_s29 + $0x538] sm:$0xff] %v1101_v39  ;;  %v1103_v40 = vld [vmem:[%s4748_s28 + $0xa80] sm:$0xff]  ;;  %v1105_v41 = vld [vmem:[%s4748_s28 + $0xa90] sm:$0xff] }
  0x6a   : > { %v1107_v42 = vld [vmem:[%s4748_s28 + $0xaa0] sm:$0xff]  ;;  %1104 = vst [vmem:[%s4756_s29 + $0x540] sm:$0xff] %v1103_v40  ;;  %1106 = vst [vmem:[%s4756_s29 + $0x548] sm:$0xff] %v1105_v41  ;;  %v1109_v43 = vld [vmem:[%s4748_s28 + $0xab0] sm:$0xff] }
  0x6b   : > { %1108 = vst [vmem:[%s4756_s29 + $0x550] sm:$0xff] %v1107_v42  ;;  %v1111_v44 = vld [vmem:[%s4748_s28 + $0xac0] sm:$0xff]  ;;  %v1113_v45 = vld [vmem:[%s4748_s28 + $0xad0] sm:$0xff]  ;;  %1110 = vst [vmem:[%s4756_s29 + $0x558] sm:$0xff] %v1109_v43 }
  0x6c   : > { %1112 = vst [vmem:[%s4756_s29 + $0x560] sm:$0xff] %v1111_v44  ;;  %1114 = vst [vmem:[%s4756_s29 + $0x568] sm:$0xff] %v1113_v45  ;;  %v1115_v46 = vld [vmem:[%s4748_s28 + $0xae0] sm:$0xff]  ;;  %v1117_v47 = vld [vmem:[%s4748_s28 + $0xaf0] sm:$0xff] }
  0x6d   : > { %v1119_v48 = vld [vmem:[%s4748_s28 + $0xb00] sm:$0xff]  ;;  %1116 = vst [vmem:[%s4756_s29 + $0x570] sm:$0xff] %v1115_v46  ;;  %1118 = vst [vmem:[%s4756_s29 + $0x578] sm:$0xff] %v1117_v47  ;;  %v1121_v49 = vld [vmem:[%s4748_s28 + $0xb10] sm:$0xff] }
  0x6e   : > { %1120 = vst [vmem:[%s4756_s29 + $0x580] sm:$0xff] %v1119_v48  ;;  %v1123_v50 = vld [vmem:[%s4748_s28 + $0xb20] sm:$0xff]  ;;  %v1125_v51 = vld [vmem:[%s4748_s28 + $0xb30] sm:$0xff]  ;;  %1122 = vst [vmem:[%s4756_s29 + $0x588] sm:$0xff] %v1121_v49 }
  0x6f   : > { %1124 = vst [vmem:[%s4756_s29 + $0x590] sm:$0xff] %v1123_v50  ;;  %1126 = vst [vmem:[%s4756_s29 + $0x598] sm:$0xff] %v1125_v51  ;;  %v1127_v52 = vld [vmem:[%s4748_s28 + $0xb40] sm:$0xff]  ;;  %v1129_v53 = vld [vmem:[%s4748_s28 + $0xb50] sm:$0xff] }
  0x70   : > { %v1131_v54 = vld [vmem:[%s4748_s28 + $0xb60] sm:$0xff]  ;;  %1128 = vst [vmem:[%s4756_s29 + $0x5a0] sm:$0xff] %v1127_v52  ;;  %1130 = vst [vmem:[%s4756_s29 + $0x5a8] sm:$0xff] %v1129_v53  ;;  %v1133_v55 = vld [vmem:[%s4748_s28 + $0xb70] sm:$0xff] }
  0x71   : > { %1132 = vst [vmem:[%s4756_s29 + $0x5b0] sm:$0xff] %v1131_v54  ;;  %v1135_v56 = vld [vmem:[%s4748_s28 + $0xb80] sm:$0xff]  ;;  %v1137_v57 = vld [vmem:[%s4748_s28 + $0xb90] sm:$0xff]  ;;  %1134 = vst [vmem:[%s4756_s29 + $0x5b8] sm:$0xff] %v1133_v55 }
  0x72   : > { %1136 = vst [vmem:[%s4756_s29 + $0x5c0] sm:$0xff] %v1135_v56  ;;  %1138 = vst [vmem:[%s4756_s29 + $0x5c8] sm:$0xff] %v1137_v57  ;;  %v1139_v58 = vld [vmem:[%s4748_s28 + $0xba0] sm:$0xff]  ;;  %v1141_v59 = vld [vmem:[%s4748_s28 + $0xbb0] sm:$0xff] }
  0x73   : > { %v1143_v60 = vld [vmem:[%s4748_s28 + $0xbc0] sm:$0xff]  ;;  %1140 = vst [vmem:[%s4756_s29 + $0x5d0] sm:$0xff] %v1139_v58  ;;  %1142 = vst [vmem:[%s4756_s29 + $0x5d8] sm:$0xff] %v1141_v59  ;;  %v1145_v61 = vld [vmem:[%s4748_s28 + $0xbd0] sm:$0xff] }
  0x74   : > { %1144 = vst [vmem:[%s4756_s29 + $0x5e0] sm:$0xff] %v1143_v60  ;;  %v1147_v62 = vld [vmem:[%s4748_s28 + $0xbe0] sm:$0xff]  ;;  %v1149_v63 = vld [vmem:[%s4748_s28 + $0xbf0] sm:$0xff]  ;;  %1146 = vst [vmem:[%s4756_s29 + $0x5e8] sm:$0xff] %v1145_v61 }
  0x75   : > { %1148 = vst [vmem:[%s4756_s29 + $0x5f0] sm:$0xff] %v1147_v62  ;;  %1150 = vst [vmem:[%s4756_s29 + $0x5f8] sm:$0xff] %v1149_v63  ;;  %v1151_v0 = vld [vmem:[%s4748_s28 + $0xc00] sm:$0xff]  ;;  %v1153_v1 = vld [vmem:[%s4748_s28 + $0xc10] sm:$0xff] }
  0x76   : > { %v1155_v2 = vld [vmem:[%s4748_s28 + $0xc20] sm:$0xff]  ;;  %1152 = vst [vmem:[%s4756_s29 + $0x600] sm:$0xff] %v1151_v0  ;;  %1154 = vst [vmem:[%s4756_s29 + $0x608] sm:$0xff] %v1153_v1  ;;  %v1157_v3 = vld [vmem:[%s4748_s28 + $0xc30] sm:$0xff] }
  0x77   : > { %1156 = vst [vmem:[%s4756_s29 + $0x610] sm:$0xff] %v1155_v2  ;;  %v1159_v4 = vld [vmem:[%s4748_s28 + $0xc40] sm:$0xff]  ;;  %v1161_v5 = vld [vmem:[%s4748_s28 + $0xc50] sm:$0xff]  ;;  %1158 = vst [vmem:[%s4756_s29 + $0x618] sm:$0xff] %v1157_v3 }
  0x78   : > { %1160 = vst [vmem:[%s4756_s29 + $0x620] sm:$0xff] %v1159_v4  ;;  %1162 = vst [vmem:[%s4756_s29 + $0x628] sm:$0xff] %v1161_v5  ;;  %v1163_v6 = vld [vmem:[%s4748_s28 + $0xc60] sm:$0xff]  ;;  %v1165_v7 = vld [vmem:[%s4748_s28 + $0xc70] sm:$0xff] }
  0x79   : > { %v1167_v8 = vld [vmem:[%s4748_s28 + $0xc80] sm:$0xff]  ;;  %1164 = vst [vmem:[%s4756_s29 + $0x630] sm:$0xff] %v1163_v6  ;;  %1166 = vst [vmem:[%s4756_s29 + $0x638] sm:$0xff] %v1165_v7  ;;  %v1169_v9 = vld [vmem:[%s4748_s28 + $0xc90] sm:$0xff] }
  0x7a   : > { %1168 = vst [vmem:[%s4756_s29 + $0x640] sm:$0xff] %v1167_v8  ;;  %v1171_v10 = vld [vmem:[%s4748_s28 + $0xca0] sm:$0xff]  ;;  %v1173_v11 = vld [vmem:[%s4748_s28 + $0xcb0] sm:$0xff]  ;;  %1170 = vst [vmem:[%s4756_s29 + $0x648] sm:$0xff] %v1169_v9 }
  0x7b   : > { %1172 = vst [vmem:[%s4756_s29 + $0x650] sm:$0xff] %v1171_v10  ;;  %1174 = vst [vmem:[%s4756_s29 + $0x658] sm:$0xff] %v1173_v11  ;;  %v1175_v12 = vld [vmem:[%s4748_s28 + $0xcc0] sm:$0xff]  ;;  %v1177_v13 = vld [vmem:[%s4748_s28 + $0xcd0] sm:$0xff] }
  0x7c   : > { %v1179_v14 = vld [vmem:[%s4748_s28 + $0xce0] sm:$0xff]  ;;  %1176 = vst [vmem:[%s4756_s29 + $0x660] sm:$0xff] %v1175_v12  ;;  %1178 = vst [vmem:[%s4756_s29 + $0x668] sm:$0xff] %v1177_v13  ;;  %v1181_v15 = vld [vmem:[%s4748_s28 + $0xcf0] sm:$0xff] }
  0x7d   : > { %1180 = vst [vmem:[%s4756_s29 + $0x670] sm:$0xff] %v1179_v14  ;;  %v1183_v16 = vld [vmem:[%s4748_s28 + $0xd00] sm:$0xff]  ;;  %v1185_v17 = vld [vmem:[%s4748_s28 + $0xd10] sm:$0xff]  ;;  %1182 = vst [vmem:[%s4756_s29 + $0x678] sm:$0xff] %v1181_v15 }
  0x7e   : > { %1184 = vst [vmem:[%s4756_s29 + $0x680] sm:$0xff] %v1183_v16  ;;  %1186 = vst [vmem:[%s4756_s29 + $0x688] sm:$0xff] %v1185_v17  ;;  %v1187_v18 = vld [vmem:[%s4748_s28 + $0xd20] sm:$0xff]  ;;  %v1189_v19 = vld [vmem:[%s4748_s28 + $0xd30] sm:$0xff] }
  0x7f   : > { %v1191_v20 = vld [vmem:[%s4748_s28 + $0xd40] sm:$0xff]  ;;  %1188 = vst [vmem:[%s4756_s29 + $0x690] sm:$0xff] %v1187_v18  ;;  %1190 = vst [vmem:[%s4756_s29 + $0x698] sm:$0xff] %v1189_v19  ;;  %v1193_v21 = vld [vmem:[%s4748_s28 + $0xd50] sm:$0xff] }
  0x80   : > { %1192 = vst [vmem:[%s4756_s29 + $0x6a0] sm:$0xff] %v1191_v20  ;;  %v1195_v22 = vld [vmem:[%s4748_s28 + $0xd60] sm:$0xff]  ;;  %v1197_v23 = vld [vmem:[%s4748_s28 + $0xd70] sm:$0xff]  ;;  %1194 = vst [vmem:[%s4756_s29 + $0x6a8] sm:$0xff] %v1193_v21 }
  0x81   : > { %1196 = vst [vmem:[%s4756_s29 + $0x6b0] sm:$0xff] %v1195_v22  ;;  %1198 = vst [vmem:[%s4756_s29 + $0x6b8] sm:$0xff] %v1197_v23  ;;  %v1199_v24 = vld [vmem:[%s4748_s28 + $0xd80] sm:$0xff]  ;;  %v1201_v25 = vld [vmem:[%s4748_s28 + $0xd90] sm:$0xff] }
  0x82   : > { %v1203_v26 = vld [vmem:[%s4748_s28 + $0xda0] sm:$0xff]  ;;  %1200 = vst [vmem:[%s4756_s29 + $0x6c0] sm:$0xff] %v1199_v24  ;;  %1202 = vst [vmem:[%s4756_s29 + $0x6c8] sm:$0xff] %v1201_v25  ;;  %v1205_v27 = vld [vmem:[%s4748_s28 + $0xdb0] sm:$0xff] }
  0x83   : > { %1204 = vst [vmem:[%s4756_s29 + $0x6d0] sm:$0xff] %v1203_v26  ;;  %v1207_v28 = vld [vmem:[%s4748_s28 + $0xdc0] sm:$0xff]  ;;  %v1209_v29 = vld [vmem:[%s4748_s28 + $0xdd0] sm:$0xff]  ;;  %1206 = vst [vmem:[%s4756_s29 + $0x6d8] sm:$0xff] %v1205_v27 }
  0x84   : > { %1208 = vst [vmem:[%s4756_s29 + $0x6e0] sm:$0xff] %v1207_v28  ;;  %1210 = vst [vmem:[%s4756_s29 + $0x6e8] sm:$0xff] %v1209_v29  ;;  %v1211_v30 = vld [vmem:[%s4748_s28 + $0xde0] sm:$0xff]  ;;  %v1213_v31 = vld [vmem:[%s4748_s28 + $0xdf0] sm:$0xff] }
  0x85   : > { %v1215_v32 = vld [vmem:[%s4748_s28 + $0xe00] sm:$0xff]  ;;  %1212 = vst [vmem:[%s4756_s29 + $0x6f0] sm:$0xff] %v1211_v30  ;;  %1214 = vst [vmem:[%s4756_s29 + $0x6f8] sm:$0xff] %v1213_v31  ;;  %v1217_v33 = vld [vmem:[%s4748_s28 + $0xe10] sm:$0xff] }
  0x86   : > { %1216 = vst [vmem:[%s4756_s29 + $0x700] sm:$0xff] %v1215_v32  ;;  %v1219_v34 = vld [vmem:[%s4748_s28 + $0xe20] sm:$0xff]  ;;  %v1221_v35 = vld [vmem:[%s4748_s28 + $0xe30] sm:$0xff]  ;;  %1218 = vst [vmem:[%s4756_s29 + $0x708] sm:$0xff] %v1217_v33 }
  0x87   : > { %1220 = vst [vmem:[%s4756_s29 + $0x710] sm:$0xff] %v1219_v34  ;;  %1222 = vst [vmem:[%s4756_s29 + $0x718] sm:$0xff] %v1221_v35  ;;  %v1223_v36 = vld [vmem:[%s4748_s28 + $0xe40] sm:$0xff]  ;;  %v1225_v37 = vld [vmem:[%s4748_s28 + $0xe50] sm:$0xff] }
  0x88   : > { %v1227_v38 = vld [vmem:[%s4748_s28 + $0xe60] sm:$0xff]  ;;  %1224 = vst [vmem:[%s4756_s29 + $0x720] sm:$0xff] %v1223_v36  ;;  %1226 = vst [vmem:[%s4756_s29 + $0x728] sm:$0xff] %v1225_v37  ;;  %v1229_v39 = vld [vmem:[%s4748_s28 + $0xe70] sm:$0xff] }
  0x89   : > { %1228 = vst [vmem:[%s4756_s29 + $0x730] sm:$0xff] %v1227_v38  ;;  %v1231_v40 = vld [vmem:[%s4748_s28 + $0xe80] sm:$0xff]  ;;  %v1233_v41 = vld [vmem:[%s4748_s28 + $0xe90] sm:$0xff]  ;;  %1230 = vst [vmem:[%s4756_s29 + $0x738] sm:$0xff] %v1229_v39 }
  0x8a   : > { %1232 = vst [vmem:[%s4756_s29 + $0x740] sm:$0xff] %v1231_v40  ;;  %1234 = vst [vmem:[%s4756_s29 + $0x748] sm:$0xff] %v1233_v41  ;;  %v1235_v42 = vld [vmem:[%s4748_s28 + $0xea0] sm:$0xff]  ;;  %v1237_v43 = vld [vmem:[%s4748_s28 + $0xeb0] sm:$0xff] }
  0x8b   : > { %v1239_v44 = vld [vmem:[%s4748_s28 + $0xec0] sm:$0xff]  ;;  %1236 = vst [vmem:[%s4756_s29 + $0x750] sm:$0xff] %v1235_v42  ;;  %1238 = vst [vmem:[%s4756_s29 + $0x758] sm:$0xff] %v1237_v43  ;;  %v1241_v45 = vld [vmem:[%s4748_s28 + $0xed0] sm:$0xff] }
  0x8c   : > { %1240 = vst [vmem:[%s4756_s29 + $0x760] sm:$0xff] %v1239_v44  ;;  %v1243_v46 = vld [vmem:[%s4748_s28 + $0xee0] sm:$0xff]  ;;  %v1245_v47 = vld [vmem:[%s4748_s28 + $0xef0] sm:$0xff]  ;;  %1242 = vst [vmem:[%s4756_s29 + $0x768] sm:$0xff] %v1241_v45 }
  0x8d   : > { %1244 = vst [vmem:[%s4756_s29 + $0x770] sm:$0xff] %v1243_v46  ;;  %1246 = vst [vmem:[%s4756_s29 + $0x778] sm:$0xff] %v1245_v47  ;;  %v1247_v48 = vld [vmem:[%s4748_s28 + $0xf00] sm:$0xff]  ;;  %v1249_v49 = vld [vmem:[%s4748_s28 + $0xf10] sm:$0xff] }
  0x8e   : > { %v1251_v50 = vld [vmem:[%s4748_s28 + $0xf20] sm:$0xff]  ;;  %1248 = vst [vmem:[%s4756_s29 + $0x780] sm:$0xff] %v1247_v48  ;;  %1250 = vst [vmem:[%s4756_s29 + $0x788] sm:$0xff] %v1249_v49  ;;  %v1253_v51 = vld [vmem:[%s4748_s28 + $0xf30] sm:$0xff] }
  0x8f   : > { %1252 = vst [vmem:[%s4756_s29 + $0x790] sm:$0xff] %v1251_v50  ;;  %v1255_v52 = vld [vmem:[%s4748_s28 + $0xf40] sm:$0xff]  ;;  %v1257_v53 = vld [vmem:[%s4748_s28 + $0xf50] sm:$0xff]  ;;  %1254 = vst [vmem:[%s4756_s29 + $0x798] sm:$0xff] %v1253_v51 }
  0x90   : > { %1256 = vst [vmem:[%s4756_s29 + $0x7a0] sm:$0xff] %v1255_v52  ;;  %1258 = vst [vmem:[%s4756_s29 + $0x7a8] sm:$0xff] %v1257_v53  ;;  %v1259_v54 = vld [vmem:[%s4748_s28 + $0xf60] sm:$0xff]  ;;  %v1261_v55 = vld [vmem:[%s4748_s28 + $0xf70] sm:$0xff] }
  0x91   : > { %v1263_v56 = vld [vmem:[%s4748_s28 + $0xf80] sm:$0xff]  ;;  %1260 = vst [vmem:[%s4756_s29 + $0x7b0] sm:$0xff] %v1259_v54  ;;  %1262 = vst [vmem:[%s4756_s29 + $0x7b8] sm:$0xff] %v1261_v55  ;;  %v1265_v57 = vld [vmem:[%s4748_s28 + $0xf90] sm:$0xff] }
  0x92   : > { %1264 = vst [vmem:[%s4756_s29 + $0x7c0] sm:$0xff] %v1263_v56  ;;  %v1267_v58 = vld [vmem:[%s4748_s28 + $0xfa0] sm:$0xff]  ;;  %v1269_v59 = vld [vmem:[%s4748_s28 + $0xfb0] sm:$0xff]  ;;  %1266 = vst [vmem:[%s4756_s29 + $0x7c8] sm:$0xff] %v1265_v57 }
  0x93   : > { %1268 = vst [vmem:[%s4756_s29 + $0x7d0] sm:$0xff] %v1267_v58  ;;  %1270 = vst [vmem:[%s4756_s29 + $0x7d8] sm:$0xff] %v1269_v59  ;;  %v1271_v60 = vld [vmem:[%s4748_s28 + $0xfc0] sm:$0xff]  ;;  %v1273_v61 = vld [vmem:[%s4748_s28 + $0xfd0] sm:$0xff] }
  0x94   : > { %v1275_v62 = vld [vmem:[%s4748_s28 + $0xfe0] sm:$0xff]  ;;  %1272 = vst [vmem:[%s4756_s29 + $0x7e0] sm:$0xff] %v1271_v60  ;;  %1274 = vst [vmem:[%s4756_s29 + $0x7e8] sm:$0xff] %v1273_v61  ;;  %v1277_v63 = vld [vmem:[%s4748_s28 + $0xff0] sm:$0xff] }
  0x95   : > { %1276 = vst [vmem:[%s4756_s29 + $0x7f0] sm:$0xff] %v1275_v62  ;;  %v1279_v0 = vld [vmem:[%s4748_s28 + $0x1000] sm:$0xff]  ;;  %v1281_v1 = vld [vmem:[%s4748_s28 + $0x1010] sm:$0xff]  ;;  %1278 = vst [vmem:[%s4756_s29 + $0x7f8] sm:$0xff] %v1277_v63 }
  0x96   : > { %1280 = vst [vmem:[%s4756_s29 + $0x800] sm:$0xff] %v1279_v0  ;;  %1282 = vst [vmem:[%s4756_s29 + $0x808] sm:$0xff] %v1281_v1  ;;  %v1283_v2 = vld [vmem:[%s4748_s28 + $0x1020] sm:$0xff]  ;;  %v1285_v3 = vld [vmem:[%s4748_s28 + $0x1030] sm:$0xff] }
  0x97   : > { %v1287_v4 = vld [vmem:[%s4748_s28 + $0x1040] sm:$0xff]  ;;  %1284 = vst [vmem:[%s4756_s29 + $0x810] sm:$0xff] %v1283_v2  ;;  %1286 = vst [vmem:[%s4756_s29 + $0x818] sm:$0xff] %v1285_v3  ;;  %v1289_v5 = vld [vmem:[%s4748_s28 + $0x1050] sm:$0xff] }
  0x98   : > { %1288 = vst [vmem:[%s4756_s29 + $0x820] sm:$0xff] %v1287_v4  ;;  %v1291_v6 = vld [vmem:[%s4748_s28 + $0x1060] sm:$0xff]  ;;  %v1293_v7 = vld [vmem:[%s4748_s28 + $0x1070] sm:$0xff]  ;;  %1290 = vst [vmem:[%s4756_s29 + $0x828] sm:$0xff] %v1289_v5 }
  0x99   : > { %1292 = vst [vmem:[%s4756_s29 + $0x830] sm:$0xff] %v1291_v6  ;;  %1294 = vst [vmem:[%s4756_s29 + $0x838] sm:$0xff] %v1293_v7  ;;  %v1295_v8 = vld [vmem:[%s4748_s28 + $0x1080] sm:$0xff]  ;;  %v1297_v9 = vld [vmem:[%s4748_s28 + $0x1090] sm:$0xff] }
  0x9a   : > { %v1299_v10 = vld [vmem:[%s4748_s28 + $0x10a0] sm:$0xff]  ;;  %1296 = vst [vmem:[%s4756_s29 + $0x840] sm:$0xff] %v1295_v8  ;;  %1298 = vst [vmem:[%s4756_s29 + $0x848] sm:$0xff] %v1297_v9  ;;  %v1301_v11 = vld [vmem:[%s4748_s28 + $0x10b0] sm:$0xff] }
  0x9b   : > { %1300 = vst [vmem:[%s4756_s29 + $0x850] sm:$0xff] %v1299_v10  ;;  %v1303_v12 = vld [vmem:[%s4748_s28 + $0x10c0] sm:$0xff]  ;;  %v1305_v13 = vld [vmem:[%s4748_s28 + $0x10d0] sm:$0xff]  ;;  %1302 = vst [vmem:[%s4756_s29 + $0x858] sm:$0xff] %v1301_v11 }
  0x9c   : > { %1304 = vst [vmem:[%s4756_s29 + $0x860] sm:$0xff] %v1303_v12  ;;  %1306 = vst [vmem:[%s4756_s29 + $0x868] sm:$0xff] %v1305_v13  ;;  %v1307_v14 = vld [vmem:[%s4748_s28 + $0x10e0] sm:$0xff]  ;;  %v1309_v15 = vld [vmem:[%s4748_s28 + $0x10f0] sm:$0xff] }
  0x9d   : > { %v1311_v16 = vld [vmem:[%s4748_s28 + $0x1100] sm:$0xff]  ;;  %1308 = vst [vmem:[%s4756_s29 + $0x870] sm:$0xff] %v1307_v14  ;;  %1310 = vst [vmem:[%s4756_s29 + $0x878] sm:$0xff] %v1309_v15  ;;  %v1313_v17 = vld [vmem:[%s4748_s28 + $0x1110] sm:$0xff] }
  0x9e   : > { %1312 = vst [vmem:[%s4756_s29 + $0x880] sm:$0xff] %v1311_v16  ;;  %v1315_v18 = vld [vmem:[%s4748_s28 + $0x1120] sm:$0xff]  ;;  %v1317_v19 = vld [vmem:[%s4748_s28 + $0x1130] sm:$0xff]  ;;  %1314 = vst [vmem:[%s4756_s29 + $0x888] sm:$0xff] %v1313_v17 }
  0x9f   : > { %1316 = vst [vmem:[%s4756_s29 + $0x890] sm:$0xff] %v1315_v18  ;;  %1318 = vst [vmem:[%s4756_s29 + $0x898] sm:$0xff] %v1317_v19  ;;  %v1319_v20 = vld [vmem:[%s4748_s28 + $0x1140] sm:$0xff]  ;;  %v1321_v21 = vld [vmem:[%s4748_s28 + $0x1150] sm:$0xff] }
  0xa0   : > { %v1323_v22 = vld [vmem:[%s4748_s28 + $0x1160] sm:$0xff]  ;;  %1320 = vst [vmem:[%s4756_s29 + $0x8a0] sm:$0xff] %v1319_v20  ;;  %1322 = vst [vmem:[%s4756_s29 + $0x8a8] sm:$0xff] %v1321_v21  ;;  %v1325_v23 = vld [vmem:[%s4748_s28 + $0x1170] sm:$0xff] }
  0xa1   : > { %1324 = vst [vmem:[%s4756_s29 + $0x8b0] sm:$0xff] %v1323_v22  ;;  %v1327_v24 = vld [vmem:[%s4748_s28 + $0x1180] sm:$0xff]  ;;  %v1329_v25 = vld [vmem:[%s4748_s28 + $0x1190] sm:$0xff]  ;;  %1326 = vst [vmem:[%s4756_s29 + $0x8b8] sm:$0xff] %v1325_v23 }
  0xa2   : > { %1328 = vst [vmem:[%s4756_s29 + $0x8c0] sm:$0xff] %v1327_v24  ;;  %1330 = vst [vmem:[%s4756_s29 + $0x8c8] sm:$0xff] %v1329_v25  ;;  %v1331_v26 = vld [vmem:[%s4748_s28 + $0x11a0] sm:$0xff]  ;;  %v1333_v27 = vld [vmem:[%s4748_s28 + $0x11b0] sm:$0xff] }
  0xa3   : > { %v1335_v28 = vld [vmem:[%s4748_s28 + $0x11c0] sm:$0xff]  ;;  %1332 = vst [vmem:[%s4756_s29 + $0x8d0] sm:$0xff] %v1331_v26  ;;  %1334 = vst [vmem:[%s4756_s29 + $0x8d8] sm:$0xff] %v1333_v27  ;;  %v1337_v29 = vld [vmem:[%s4748_s28 + $0x11d0] sm:$0xff] }
  0xa4   : > { %1336 = vst [vmem:[%s4756_s29 + $0x8e0] sm:$0xff] %v1335_v28  ;;  %v1339_v30 = vld [vmem:[%s4748_s28 + $0x11e0] sm:$0xff]  ;;  %v1341_v31 = vld [vmem:[%s4748_s28 + $0x11f0] sm:$0xff]  ;;  %1338 = vst [vmem:[%s4756_s29 + $0x8e8] sm:$0xff] %v1337_v29 }
  0xa5   : > { %1340 = vst [vmem:[%s4756_s29 + $0x8f0] sm:$0xff] %v1339_v30  ;;  %1342 = vst [vmem:[%s4756_s29 + $0x8f8] sm:$0xff] %v1341_v31 }
  0xa6 PF: > { %p3787_p8 = scmp.ge.s32.totalorder %s4678_s16, 1  ;;  %p1355_p9 = scmp.lt.s32.totalorder %s4678_s16, 3 }
  0xa8   : > { %p1356_p10 = pnand %p3787_p8, %p1355_p9 }
  0xa9   : > { %s1362_s30 = sand.u32 (!%p1356_p10), 1, %s4662_s12   ;;  %v4279_v32 = vld [vmem:[%s5704_s0 + $0x4] ss:$72 sps:$4 sm:$0xff] (!%p1356_p10)   ;;  %s3789_s7 = sshll.u32 (!%p1356_p10), %s4670_s14, 1 }
  0xaa   : > { %1359 = sbr.rel (%p1356_p10) target bundleno = 724 (0x2d4), region = 66  ;;  %v4285_v33 = vld [vmem:[%s5704_s0 + $0x24] ss:$72 sps:$4 sm:$0xff] (!%p1356_p10)   ;;  %3289 = vmatprep.mubr.bf16.mxu1 (!%p1356_p10), %v4279_v32  ;;  %p1403_p11 = scmp.lt.s32.totalorder (!%p1356_p10), %s3789_s7, 3 }
  0xab   : > { %s4140_s4 = smul.u32 (!%p1356_p10), 2304, %s1362_s30  ;;  %3461 = vmatprep.mubr.bf16.mxu0 (!%p1356_p10), %v4285_v33  ;;  %s3788_s11 = sshll.u32 (!%p1356_p10), %s1362_s30, 5 }
  0xac   : > { %s1393_s18 = scalar_lea.vmem (!%p1356_p10), [#allocation3], %s3788_s11 }
  0xad   : > { %s5339_s9 = scalar_lea.vmem (!%p1356_p10), [#allocation2], %s4140_s4 }
  0xae   : > { %v4181_v34 = vld [vmem:[%s5339_s9 + $0x4] ss:$8 sps:$4 sm:$0xff] (!%p1356_p10)   ;;  %v4185_v36 = vld [vmem:[%s5339_s9] ss:$8 sps:$4 sm:$0xff] (!%p1356_p10)   ;;  %v4187_v38 = vld [vmem:[%s5339_s9 + $0x14] ss:$8 sps:$4 sm:$0xff] (!%p1356_p10)  }
  0xaf   : > { %v4183_v35 = vld [vmem:[%s5339_s9 + $0x404] ss:$8 sps:$4 sm:$0xff] (!%p1356_p10)   ;;  %3257 = vmatprep.subr.bf16.mxu1 (!%p1356_p10), %v4181_v34  ;;  %v4186_v37 = vld [vmem:[%s5339_s9 + $0x400] ss:$8 sps:$4 sm:$0xff] (!%p1356_p10)   ;;  %v4189_v39 = vld [vmem:[%s5339_s9 + $0x414] ss:$8 sps:$4 sm:$0xff] (!%p1356_p10)  }
  0xb0   : > { %3429 = vmatprep.subr.bf16.mxu0 (!%p1356_p10), %v4183_v35  ;;  %3258 = vmatpush1.bf16.msra.mxu1 (!%p1356_p10), %v4185_v36  ;;  %v4191_v40 = vld [vmem:[%s5339_s9 + $0x10] ss:$8 sps:$4 sm:$0xff] (!%p1356_p10)   ;;  %v4193_v42 = vld [vmem:[%s5339_s9 + $0x24] ss:$8 sps:$4 sm:$0xff] (!%p1356_p10)   ;;  %v4197_v44 = vld [vmem:[%s5339_s9 + $0x20] ss:$8 sps:$4 sm:$0xff] (!%p1356_p10)  }
  0xb1   : > { %3430 = vmatpush1.bf16.msra.mxu0 %v4186_v37  ;;  %3259 = vmatprep.subr.bf16.mxu1 %v4187_v38  ;;  %v4192_v41 = vld [vmem:[%s5339_s9 + $0x410] ss:$8 sps:$4 sm:$0xff]   ;;  %v4195_v43 = vld [vmem:[%s5339_s9 + $0x424] ss:$8 sps:$4 sm:$0xff]   ;;  %v4198_v45 = vld [vmem:[%s5339_s9 + $0x420] ss:$8 sps:$4 sm:$0xff]  }
  0xb2   : > { %3431 = vmatprep.subr.bf16.mxu0 %v4189_v39  ;;  %v4199_v46 = vld [vmem:[%s5339_s9 + $0x34] ss:$8 sps:$4 sm:$0xff]   ;;  %v4203_v48 = vld [vmem:[%s5339_s9 + $0x30] ss:$8 sps:$4 sm:$0xff]   ;;  %v4205_v50 = vld [vmem:[%s5339_s9 + $0x44] ss:$8 sps:$4 sm:$0xff]  }
  0xb3   : > { %v4201_v47 = vld [vmem:[%s5339_s9 + $0x434] ss:$8 sps:$4 sm:$0xff]   ;;  %v4204_v49 = vld [vmem:[%s5339_s9 + $0x430] ss:$8 sps:$4 sm:$0xff]   ;;  %v4207_v51 = vld [vmem:[%s5339_s9 + $0x444] ss:$8 sps:$4 sm:$0xff]  }
  0xb4   : > { %3260 = vmatpush1.bf16.msra.mxu1 %v4191_v40  ;;  %v4209_v52 = vld [vmem:[%s5339_s9 + $0x40] ss:$8 sps:$4 sm:$0xff]   ;;  %v4211_v54 = vld [vmem:[%s5339_s9 + $0x54] ss:$8 sps:$4 sm:$0xff]   ;;  %v4215_v56 = vld [vmem:[%s5339_s9 + $0x50] ss:$8 sps:$4 sm:$0xff]  }
  0xb5   : > { %3432 = vmatpush1.bf16.msra.mxu0 %v4192_v41  ;;  %3261 = vmatprep.subr.bf16.mxu1 %v4193_v42  ;;  %v4210_v53 = vld [vmem:[%s5339_s9 + $0x440] ss:$8 sps:$4 sm:$0xff]   ;;  %v4213_v55 = vld [vmem:[%s5339_s9 + $0x454] ss:$8 sps:$4 sm:$0xff]   ;;  %v4216_v57 = vld [vmem:[%s5339_s9 + $0x450] ss:$8 sps:$4 sm:$0xff]  }
  0xb6   : > { %3433 = vmatprep.subr.bf16.mxu0 %v4195_v43  ;;  %v4217_v58 = vld [vmem:[%s5339_s9 + $0x64] ss:$8 sps:$4 sm:$0xff]   ;;  %v4221_v60 = vld [vmem:[%s5339_s9 + $0x60] ss:$8 sps:$4 sm:$0xff]   ;;  %v4223_v62 = vld [vmem:[%s5339_s9 + $0x74] ss:$8 sps:$4 sm:$0xff]  }
  0xb7   : > { %v4219_v59 = vld [vmem:[%s5339_s9 + $0x464] ss:$8 sps:$4 sm:$0xff]   ;;  %v4222_v61 = vld [vmem:[%s5339_s9 + $0x460] ss:$8 sps:$4 sm:$0xff]   ;;  %v4225_v63 = vld [vmem:[%s5339_s9 + $0x474] ss:$8 sps:$4 sm:$0xff]  }
  0xb8   : > { %3262 = vmatpush1.bf16.msra.mxu1 %v4197_v44  ;;  %v4227_v0 = vld [vmem:[%s5339_s9 + $0x70] ss:$8 sps:$4 sm:$0xff]   ;;  %v4229_v2 = vld [vmem:[%s5339_s9 + $0x84] ss:$8 sps:$4 sm:$0xff]   ;;  %v4233_v4 = vld [vmem:[%s5339_s9 + $0x80] ss:$8 sps:$4 sm:$0xff]  }
  0xb9   : > { %3434 = vmatpush1.bf16.msra.mxu0 %v4198_v45  ;;  %3263 = vmatprep.subr.bf16.mxu1 %v4199_v46  ;;  %v4228_v1 = vld [vmem:[%s5339_s9 + $0x470] ss:$8 sps:$4 sm:$0xff]   ;;  %v4231_v3 = vld [vmem:[%s5339_s9 + $0x484] ss:$8 sps:$4 sm:$0xff]   ;;  %v4234_v5 = vld [vmem:[%s5339_s9 + $0x480] ss:$8 sps:$4 sm:$0xff]  }
  0xba   : > { %3435 = vmatprep.subr.bf16.mxu0 %v4201_v47  ;;  %v4235_v6 = vld [vmem:[%s5339_s9 + $0x94] ss:$8 sps:$4 sm:$0xff]   ;;  %v4239_v8 = vld [vmem:[%s5339_s9 + $0x90] ss:$8 sps:$4 sm:$0xff]   ;;  %v4241_v10 = vld [vmem:[%s5339_s9 + $0xa4] ss:$8 sps:$4 sm:$0xff]  }
  0xbb   : > { %v4237_v7 = vld [vmem:[%s5339_s9 + $0x494] ss:$8 sps:$4 sm:$0xff]   ;;  %v4240_v9 = vld [vmem:[%s5339_s9 + $0x490] ss:$8 sps:$4 sm:$0xff]   ;;  %v4243_v11 = vld [vmem:[%s5339_s9 + $0x4a4] ss:$8 sps:$4 sm:$0xff]  }
  0xbc   : > { %3264 = vmatpush1.bf16.msra.mxu1 %v4203_v48  ;;  %v4245_v12 = vld [vmem:[%s5339_s9 + $0xa0] ss:$8 sps:$4 sm:$0xff]   ;;  %v4247_v14 = vld [vmem:[%s5339_s9 + $0xb4] ss:$8 sps:$4 sm:$0xff]   ;;  %v4251_v16 = vld [vmem:[%s5339_s9 + $0xb0] ss:$8 sps:$4 sm:$0xff]  }
  0xbd   : > { %3436 = vmatpush1.bf16.msra.mxu0 %v4204_v49  ;;  %3265 = vmatprep.subr.bf16.mxu1 %v4205_v50  ;;  %v4246_v13 = vld [vmem:[%s5339_s9 + $0x4a0] ss:$8 sps:$4 sm:$0xff]   ;;  %v4249_v15 = vld [vmem:[%s5339_s9 + $0x4b4] ss:$8 sps:$4 sm:$0xff]   ;;  %v4252_v17 = vld [vmem:[%s5339_s9 + $0x4b0] ss:$8 sps:$4 sm:$0xff]  }
  0xbe   : > { %3437 = vmatprep.subr.bf16.mxu0 %v4207_v51  ;;  %v4253_v18 = vld [vmem:[%s5339_s9 + $0xc4] ss:$8 sps:$4 sm:$0xff]   ;;  %v4257_v20 = vld [vmem:[%s5339_s9 + $0xc0] ss:$8 sps:$4 sm:$0xff]   ;;  %v4259_v22 = vld [vmem:[%s5339_s9 + $0xd4] ss:$8 sps:$4 sm:$0xff]  }
  0xbf   : > { %v4255_v19 = vld [vmem:[%s5339_s9 + $0x4c4] ss:$8 sps:$4 sm:$0xff]   ;;  %v4258_v21 = vld [vmem:[%s5339_s9 + $0x4c0] ss:$8 sps:$4 sm:$0xff]   ;;  %v4261_v23 = vld [vmem:[%s5339_s9 + $0x4d4] ss:$8 sps:$4 sm:$0xff]  }
  0xc0   : > { %3266 = vmatpush1.bf16.msra.mxu1 %v4209_v52  ;;  %v4263_v24 = vld [vmem:[%s5339_s9 + $0xd0] ss:$8 sps:$4 sm:$0xff]   ;;  %v4265_v26 = vld [vmem:[%s5339_s9 + $0xe4] ss:$8 sps:$4 sm:$0xff]   ;;  %v4269_v28 = vld [vmem:[%s5339_s9 + $0xe0] ss:$8 sps:$4 sm:$0xff]  }
  0xc1   : > { %3438 = vmatpush1.bf16.msra.mxu0 %v4210_v53  ;;  %3267 = vmatprep.subr.bf16.mxu1 %v4211_v54  ;;  %v4264_v25 = vld [vmem:[%s5339_s9 + $0x4d0] ss:$8 sps:$4 sm:$0xff]   ;;  %v4267_v27 = vld [vmem:[%s5339_s9 + $0x4e4] ss:$8 sps:$4 sm:$0xff]   ;;  %v4270_v29 = vld [vmem:[%s5339_s9 + $0x4e0] ss:$8 sps:$4 sm:$0xff]  }
  0xc2   : > { %3439 = vmatprep.subr.bf16.mxu0 %v4213_v55  ;;  %v4271_v30 = vld [vmem:[%s5339_s9 + $0xf4] ss:$8 sps:$4 sm:$0xff]   ;;  %v4275_v32 = vld [vmem:[%s5339_s9 + $0xf0] ss:$8 sps:$4 sm:$0xff]   ;;  %v4282_v34 = vld [vmem:[%s5339_s9 + $0x104] ss:$8 sps:$4 sm:$0xff]  }
  0xc3   : > { %v4273_v31 = vld [vmem:[%s5339_s9 + $0x4f4] ss:$8 sps:$4 sm:$0xff]   ;;  %v4276_v33 = vld [vmem:[%s5339_s9 + $0x4f0] ss:$8 sps:$4 sm:$0xff]   ;;  %v4288_v35 = vld [vmem:[%s5339_s9 + $0x504] ss:$8 sps:$4 sm:$0xff]  }
  0xc4   : > { %3268 = vmatpush1.bf16.msra.mxu1 %v4215_v56  ;;  %v4277_v36 = vld [vmem:[%s5704_s0] ss:$72 sps:$4 sm:$0xff]   ;;  %v4291_v40 = vld [vmem:[%s5339_s9 + $0x114] ss:$8 sps:$4 sm:$0xff]   ;;  %v4289_v42 = vld [vmem:[%s5339_s9 + $0x110] ss:$8 sps:$4 sm:$0xff]  }
  0xc5   : > { %3440 = vmatpush1.bf16.msra.mxu0 %v4216_v57  ;;  %3269 = vmatprep.subr.bf16.mxu1 %v4217_v58  ;;  %v4283_v37 = vld [vmem:[%s5704_s0 + $0x20] ss:$72 sps:$4 sm:$0xff]   ;;  %v4294_v41 = vld [vmem:[%s5339_s9 + $0x514] ss:$8 sps:$4 sm:$0xff]   ;;  %v4292_v43 = vld [vmem:[%s5339_s9 + $0x510] ss:$8 sps:$4 sm:$0xff]  }
  0xc6   : > { %3441 = vmatprep.subr.bf16.mxu0 %v4219_v59  ;;  %v4280_v38 = vld [vmem:[%s5339_s9 + $0x100] ss:$8 sps:$4 sm:$0xff]   ;;  %v4297_v44 = vld [vmem:[%s5339_s9 + $0x124] ss:$8 sps:$4 sm:$0xff]   ;;  %v4303_v48 = vld [vmem:[%s5339_s9 + $0x134] ss:$8 sps:$4 sm:$0xff]  }
  0xc7   : > { %v4286_v39 = vld [vmem:[%s5339_s9 + $0x500] ss:$8 sps:$4 sm:$0xff]   ;;  %v4300_v45 = vld [vmem:[%s5339_s9 + $0x524] ss:$8 sps:$4 sm:$0xff]   ;;  %v4306_v49 = vld [vmem:[%s5339_s9 + $0x534] ss:$8 sps:$4 sm:$0xff]  }
  0xc8   : > { %3270 = vmatpush1.bf16.msra.mxu1 %v4221_v60  ;;  %v4295_v46 = vld [vmem:[%s5339_s9 + $0x120] ss:$8 sps:$4 sm:$0xff]   ;;  %v4301_v50 = vld [vmem:[%s5339_s9 + $0x130] ss:$8 sps:$4 sm:$0xff]   ;;  %v4309_v52 = vld [vmem:[%s5339_s9 + $0x144] ss:$8 sps:$4 sm:$0xff]  }
  0xc9   : > { %3442 = vmatpush1.bf16.msra.mxu0 %v4222_v61  ;;  %3271 = vmatprep.subr.bf16.mxu1 %v4223_v62  ;;  %v4298_v47 = vld [vmem:[%s5339_s9 + $0x520] ss:$8 sps:$4 sm:$0xff]   ;;  %v4304_v51 = vld [vmem:[%s5339_s9 + $0x530] ss:$8 sps:$4 sm:$0xff]   ;;  %v4312_v53 = vld [vmem:[%s5339_s9 + $0x544] ss:$8 sps:$4 sm:$0xff]  }
  0xca   : > { %3443 = vmatprep.subr.bf16.mxu0 %v4225_v63  ;;  %v4307_v54 = vld [vmem:[%s5339_s9 + $0x140] ss:$8 sps:$4 sm:$0xff]   ;;  %v4315_v56 = vld [vmem:[%s5339_s9 + $0x154] ss:$8 sps:$4 sm:$0xff]   ;;  %v4313_v58 = vld [vmem:[%s5339_s9 + $0x150] ss:$8 sps:$4 sm:$0xff]  }
  0xcb   : > { %v4310_v55 = vld [vmem:[%s5339_s9 + $0x540] ss:$8 sps:$4 sm:$0xff]   ;;  %v4318_v57 = vld [vmem:[%s5339_s9 + $0x554] ss:$8 sps:$4 sm:$0xff]   ;;  %v4316_v59 = vld [vmem:[%s5339_s9 + $0x550] ss:$8 sps:$4 sm:$0xff]  }
  0xcc   : > { %3272 = vmatpush1.bf16.msra.mxu1 %v4227_v0  ;;  %v4321_v60 = vld [vmem:[%s5339_s9 + $0x164] ss:$8 sps:$4 sm:$0xff]   ;;  %v4319_v63 = vld [vmem:[%s5339_s9 + $0x160] ss:$8 sps:$4 sm:$0xff]   ;;  %s5716_s7 = smov (!%p1403_p11, %s3789_s7), 3  ;;  %s4102_s12 = sshll.u32 (%p4735_p6), %s4670_s14, 4 }
  0xcd   : > { %3444 = vmatpush1.bf16.msra.mxu0 %v4228_v1  ;;  %3273 = vmatprep.subr.bf16.mxu1 %v4229_v2  ;;  %v4324_v61 = vld [vmem:[%s5339_s9 + $0x564] ss:$8 sps:$4 sm:$0xff]   ;;  %v4322_v0 = vld [vmem:[%s5339_s9 + $0x560] ss:$8 sps:$4 sm:$0xff]   ;;  %v4327_v2 = vld [vmem:[%s5339_s9 + $0x174] ss:$8 sps:$4 sm:$0xff]   ;;  %s3664_s20 = scalar_lea.vmem (%p4735_p6), %s5707_s3, %s4102_s12 }
  0xce   : > { %3445 = vmatprep.subr.bf16.mxu0 %v4231_v3  ;;  %v4381_v62 = vld [vmem:[%s5704_s0 + $0xc] ss:$72 sps:$4 sm:$0xff]  }
  0xcf   : > { %v4387_v1 = vld [vmem:[%s5704_s0 + $0x2c] ss:$72 sps:$4 sm:$0xff]  }
  0xd0   : > { %3274 = vmatpush1.bf16.msra.mxu1 %v4233_v4  ;;  %v4330_v3 = vld [vmem:[%s5339_s9 + $0x574] ss:$8 sps:$4 sm:$0xff]   ;;  %v4325_v4 = vld [vmem:[%s5339_s9 + $0x170] ss:$8 sps:$4 sm:$0xff]  }
  0xd1   : > { %3446 = vmatpush1.bf16.msra.mxu0 %v4234_v5  ;;  %3275 = vmatprep.subr.bf16.mxu1 %v4235_v6  ;;  %v4328_v5 = vld [vmem:[%s5339_s9 + $0x570] ss:$8 sps:$4 sm:$0xff]   ;;  %v4333_v6 = vld [vmem:[%s5339_s9 + $0x184] ss:$8 sps:$4 sm:$0xff]  }
  0xd2   : > { %3447 = vmatprep.subr.bf16.mxu0 %v4237_v7  ;;  %v4336_v7 = vld [vmem:[%s5339_s9 + $0x584] ss:$8 sps:$4 sm:$0xff]  }
  0xd4   : > { %3276 = vmatpush1.bf16.msra.mxu1 %v4239_v8  ;;  %v4331_v8 = vld [vmem:[%s5339_s9 + $0x180] ss:$8 sps:$4 sm:$0xff]  }
  0xd5   : > { %3448 = vmatpush1.bf16.msra.mxu0 %v4240_v9  ;;  %3277 = vmatprep.subr.bf16.mxu1 %v4241_v10  ;;  %v4334_v9 = vld [vmem:[%s5339_s9 + $0x580] ss:$8 sps:$4 sm:$0xff]   ;;  %v4339_v10 = vld [vmem:[%s5339_s9 + $0x194] ss:$8 sps:$4 sm:$0xff]  }
  0xd6   : > { %3449 = vmatprep.subr.bf16.mxu0 %v4243_v11  ;;  %v4342_v11 = vld [vmem:[%s5339_s9 + $0x594] ss:$8 sps:$4 sm:$0xff]  }
  0xd8   : > { %3278 = vmatpush1.bf16.msra.mxu1 %v4245_v12  ;;  %v4337_v12 = vld [vmem:[%s5339_s9 + $0x190] ss:$8 sps:$4 sm:$0xff]  }
  0xd9   : > { %3450 = vmatpush1.bf16.msra.mxu0 %v4246_v13  ;;  %3279 = vmatprep.subr.bf16.mxu1 %v4247_v14  ;;  %v4340_v13 = vld [vmem:[%s5339_s9 + $0x590] ss:$8 sps:$4 sm:$0xff]   ;;  %v4345_v14 = vld [vmem:[%s5339_s9 + $0x1a4] ss:$8 sps:$4 sm:$0xff]  }
  0xda   : > { %3451 = vmatprep.subr.bf16.mxu0 %v4249_v15  ;;  %v4348_v15 = vld [vmem:[%s5339_s9 + $0x5a4] ss:$8 sps:$4 sm:$0xff]  }
  0xdc   : > { %3280 = vmatpush1.bf16.msra.mxu1 %v4251_v16  ;;  %v4343_v16 = vld [vmem:[%s5339_s9 + $0x1a0] ss:$8 sps:$4 sm:$0xff]  }
  0xdd   : > { %3452 = vmatpush1.bf16.msra.mxu0 %v4252_v17  ;;  %3281 = vmatprep.subr.bf16.mxu1 %v4253_v18  ;;  %v4346_v17 = vld [vmem:[%s5339_s9 + $0x5a0] ss:$8 sps:$4 sm:$0xff]   ;;  %v4351_v18 = vld [vmem:[%s5339_s9 + $0x1b4] ss:$8 sps:$4 sm:$0xff]  }
  0xde   : > { %3453 = vmatprep.subr.bf16.mxu0 %v4255_v19  ;;  %v4354_v19 = vld [vmem:[%s5339_s9 + $0x5b4] ss:$8 sps:$4 sm:$0xff]  }
  0xe0   : > { %3282 = vmatpush1.bf16.msra.mxu1 %v4257_v20  ;;  %v4349_v20 = vld [vmem:[%s5339_s9 + $0x1b0] ss:$8 sps:$4 sm:$0xff]  }
  0xe1   : > { %3454 = vmatpush1.bf16.msra.mxu0 %v4258_v21  ;;  %3283 = vmatprep.subr.bf16.mxu1 %v4259_v22  ;;  %v4352_v21 = vld [vmem:[%s5339_s9 + $0x5b0] ss:$8 sps:$4 sm:$0xff]   ;;  %v4357_v22 = vld [vmem:[%s5339_s9 + $0x1c4] ss:$8 sps:$4 sm:$0xff]  }
  0xe2   : > { %3455 = vmatprep.subr.bf16.mxu0 %v4261_v23  ;;  %v4360_v23 = vld [vmem:[%s5339_s9 + $0x5c4] ss:$8 sps:$4 sm:$0xff]  }
  0xe4   : > { %3284 = vmatpush1.bf16.msra.mxu1 %v4263_v24  ;;  %v4355_v24 = vld [vmem:[%s5339_s9 + $0x1c0] ss:$8 sps:$4 sm:$0xff]  }
  0xe5   : > { %3456 = vmatpush1.bf16.msra.mxu0 %v4264_v25  ;;  %3285 = vmatprep.subr.bf16.mxu1 %v4265_v26  ;;  %v4358_v25 = vld [vmem:[%s5339_s9 + $0x5c0] ss:$8 sps:$4 sm:$0xff]   ;;  %v4363_v26 = vld [vmem:[%s5339_s9 + $0x1d4] ss:$8 sps:$4 sm:$0xff]  }
  0xe6   : > { %3457 = vmatprep.subr.bf16.mxu0 %v4267_v27  ;;  %v4366_v27 = vld [vmem:[%s5339_s9 + $0x5d4] ss:$8 sps:$4 sm:$0xff]  }
  0xe8   : > { %3286 = vmatpush1.bf16.msra.mxu1 %v4269_v28  ;;  %v4361_v28 = vld [vmem:[%s5339_s9 + $0x1d0] ss:$8 sps:$4 sm:$0xff]  }
  0xe9   : > { %3458 = vmatpush1.bf16.msra.mxu0 %v4270_v29  ;;  %3287 = vmatprep.subr.bf16.mxu1 %v4271_v30  ;;  %v4364_v29 = vld [vmem:[%s5339_s9 + $0x5d0] ss:$8 sps:$4 sm:$0xff]   ;;  %v4369_v30 = vld [vmem:[%s5339_s9 + $0x1e4] ss:$8 sps:$4 sm:$0xff]  }
  0xea   : > { %3459 = vmatprep.subr.bf16.mxu0 %v4273_v31  ;;  %v4372_v31 = vld [vmem:[%s5339_s9 + $0x5e4] ss:$8 sps:$4 sm:$0xff]  }
  0xec   : > { %3288 = vmatpush1.bf16.msra.mxu1 %v4275_v32  ;;  %v4367_v32 = vld [vmem:[%s5339_s9 + $0x1e0] ss:$8 sps:$4 sm:$0xff]  }
  0xed   : > { %3460 = vmatpush1.bf16.msra.mxu0 %v4276_v33  ;;  %3300 = vmatprep.subr.bf16.mxu1 %v4282_v34  ;;  %v4370_v33 = vld [vmem:[%s5339_s9 + $0x5e0] ss:$8 sps:$4 sm:$0xff]   ;;  %v4375_v34 = vld [vmem:[%s5339_s9 + $0x1f4] ss:$8 sps:$4 sm:$0xff]  }
  0xee   : > { %3472 = vmatprep.subr.bf16.mxu0 %v4288_v35  ;;  %v4378_v35 = vld [vmem:[%s5339_s9 + $0x5f4] ss:$8 sps:$4 sm:$0xff]  }
  0xef   : > { %3290 = vmatmul.mubr.bf16.vlgmr.msra.gmra.mrb[0].mxu1 %v4277_v36  ;;  %v4373_v36 = vld [vmem:[%s5339_s9 + $0x1f0] ss:$8 sps:$4 sm:$0xff]  }
  0xf0   : > { %3462 = vmatmul.mubr.bf16.vlgmr.msra.gmra.mrb[0].mxu0 %v4283_v37  ;;  %3301 = vmatpush1.bf16.msra.mxu1 %v4280_v38  ;;  %v4376_v37 = vld [vmem:[%s5339_s9 + $0x5f0] ss:$8 sps:$4 sm:$0xff]   ;;  %v4384_v38 = vld [vmem:[%s5339_s9 + $0x204] ss:$8 sps:$4 sm:$0xff]  }
  0xf1   : > { %3473 = vmatpush1.bf16.msra.mxu0 %v4286_v39  ;;  %3302 = vmatprep.subr.bf16.mxu1 %v4291_v40  ;;  %v4390_v39 = vld [vmem:[%s5339_s9 + $0x604] ss:$8 sps:$4 sm:$0xff]   ;;  %v4379_v40 = vld [vmem:[%s5704_s0 + $0x8] ss:$72 sps:$4 sm:$0xff]  }
  0xf2   : > { %3474 = vmatprep.subr.bf16.mxu0 %v4294_v41  ;;  %3332 = vmatprep.mubr.bf16.mxu1 %v4381_v62  ;;  %v4382_v41 = vld [vmem:[%s5339_s9 + $0x200] ss:$8 sps:$4 sm:$0xff]   ;;  %v4417_v62 = vld [vmem:[%s5339_s9 + $0x254] ss:$8 sps:$4 sm:$0xff]  }
  0xf3   : > { %3504 = vmatprep.mubr.bf16.mxu0 %v4387_v1  ;;  %v4418_v1 = vld [vmem:[%s5339_s9 + $0x650] ss:$8 sps:$4 sm:$0xff]  }
  0xf4   : > { %3303 = vmatpush1.bf16.msra.mxu1 %v4289_v42  ;;  %v4385_v42 = vld [vmem:[%s5704_s0 + $0x28] ss:$72 sps:$4 sm:$0xff]  }
  0xf5   : > { %3475 = vmatpush1.bf16.msra.mxu0 %v4292_v43  ;;  %3304 = vmatprep.subr.bf16.mxu1 %v4297_v44  ;;  %v4388_v43 = vld [vmem:[%s5339_s9 + $0x600] ss:$8 sps:$4 sm:$0xff]   ;;  %v4393_v44 = vld [vmem:[%s5339_s9 + $0x214] ss:$8 sps:$4 sm:$0xff]  }
  0xf6   : > { %3476 = vmatprep.subr.bf16.mxu0 %v4300_v45  ;;  %v4396_v45 = vld [vmem:[%s5339_s9 + $0x614] ss:$8 sps:$4 sm:$0xff]  }
  0xf8   : > { %3305 = vmatpush1.bf16.msra.mxu1 %v4295_v46  ;;  %v4391_v46 = vld [vmem:[%s5339_s9 + $0x210] ss:$8 sps:$4 sm:$0xff]  }
  0xf9   : > { %3477 = vmatpush1.bf16.msra.mxu0 %v4298_v47  ;;  %3306 = vmatprep.subr.bf16.mxu1 %v4303_v48  ;;  %v4483_v47 = vld [vmem:[%s5704_s0 + $0x14] ss:$72 sps:$4 sm:$0xff]   ;;  %v4394_v48 = vld [vmem:[%s5339_s9 + $0x610] ss:$8 sps:$4 sm:$0xff]  }
  0xfa   : > { %3478 = vmatprep.subr.bf16.mxu0 %v4306_v49  ;;  %v4399_v49 = vld [vmem:[%s5339_s9 + $0x224] ss:$8 sps:$4 sm:$0xff]  }
  0xfc   : > { %3307 = vmatpush1.bf16.msra.mxu1 %v4301_v50  ;;  %v4402_v50 = vld [vmem:[%s5339_s9 + $0x624] ss:$8 sps:$4 sm:$0xff]  }
  0xfd   : > { %3479 = vmatpush1.bf16.msra.mxu0 %v4304_v51  ;;  %3308 = vmatprep.subr.bf16.mxu1 %v4309_v52  ;;  %v4489_v51 = vld [vmem:[%s5704_s0 + $0x34] ss:$72 sps:$4 sm:$0xff]   ;;  %v4397_v52 = vld [vmem:[%s5339_s9 + $0x220] ss:$8 sps:$4 sm:$0xff]  }
  0xfe   : > { %3480 = vmatprep.subr.bf16.mxu0 %v4312_v53  ;;  %v4400_v53 = vld [vmem:[%s5339_s9 + $0x620] ss:$8 sps:$4 sm:$0xff]  }
 0x100   : > { %3309 = vmatpush1.bf16.msra.mxu1 %v4307_v54  ;;  %v4405_v54 = vld [vmem:[%s5339_s9 + $0x234] ss:$8 sps:$4 sm:$0xff]  }
 0x101   : > { %3481 = vmatpush1.bf16.msra.mxu0 %v4310_v55  ;;  %3310 = vmatprep.subr.bf16.mxu1 %v4315_v56  ;;  %v4408_v55 = vld [vmem:[%s5339_s9 + $0x634] ss:$8 sps:$4 sm:$0xff]   ;;  %v4403_v56 = vld [vmem:[%s5339_s9 + $0x230] ss:$8 sps:$4 sm:$0xff]  }
 0x102   : > { %3482 = vmatprep.subr.bf16.mxu0 %v4318_v57  ;;  %v4406_v57 = vld [vmem:[%s5339_s9 + $0x630] ss:$8 sps:$4 sm:$0xff]  }
 0x104   : > { %3311 = vmatpush1.bf16.msra.mxu1 %v4313_v58  ;;  %v4411_v58 = vld [vmem:[%s5339_s9 + $0x244] ss:$8 sps:$4 sm:$0xff]  }
 0x105   : > { %3483 = vmatpush1.bf16.msra.mxu0 %v4316_v59  ;;  %3312 = vmatprep.subr.bf16.mxu1 %v4321_v60  ;;  %v4414_v59 = vld [vmem:[%s5339_s9 + $0x644] ss:$8 sps:$4 sm:$0xff]   ;;  %v4409_v60 = vld [vmem:[%s5339_s9 + $0x240] ss:$8 sps:$4 sm:$0xff]  }
 0x106   : > { %3484 = vmatprep.subr.bf16.mxu0 %v4324_v61  ;;  %v4412_v61 = vld [vmem:[%s5339_s9 + $0x640] ss:$8 sps:$4 sm:$0xff]  }
 0x108   : > { %3313 = vmatpush1.bf16.msra.mxu1 %v4319_v63  ;;  %v4420_v63 = vld [vmem:[%s5339_s9 + $0x654] ss:$8 sps:$4 sm:$0xff]  }
 0x109   : > { %3485 = vmatpush1.bf16.msra.mxu0 %v4322_v0  ;;  %3314 = vmatprep.subr.bf16.mxu1 %v4327_v2  ;;  %v4415_v0 = vld [vmem:[%s5339_s9 + $0x250] ss:$8 sps:$4 sm:$0xff]   ;;  %v4423_v2 = vld [vmem:[%s5339_s9 + $0x264] ss:$8 sps:$4 sm:$0xff]  }
 0x10a   : > { %3486 = vmatprep.subr.bf16.mxu0 %v4330_v3  ;;  %v4426_v3 = vld [vmem:[%s5339_s9 + $0x664] ss:$8 sps:$4 sm:$0xff]  }
 0x10c   : > { %3315 = vmatpush1.bf16.msra.mxu1 %v4325_v4  ;;  %v4421_v4 = vld [vmem:[%s5339_s9 + $0x260] ss:$8 sps:$4 sm:$0xff]  }
 0x10d   : > { %3487 = vmatpush1.bf16.msra.mxu0 %v4328_v5  ;;  %3316 = vmatprep.subr.bf16.mxu1 %v4333_v6  ;;  %v4424_v5 = vld [vmem:[%s5339_s9 + $0x660] ss:$8 sps:$4 sm:$0xff]   ;;  %v4429_v6 = vld [vmem:[%s5339_s9 + $0x274] ss:$8 sps:$4 sm:$0xff]  }
 0x10e   : > { %3488 = vmatprep.subr.bf16.mxu0 %v4336_v7  ;;  %v4432_v7 = vld [vmem:[%s5339_s9 + $0x674] ss:$8 sps:$4 sm:$0xff]  }
 0x110   : > { %3317 = vmatpush1.bf16.msra.mxu1 %v4331_v8  ;;  %v4427_v8 = vld [vmem:[%s5339_s9 + $0x270] ss:$8 sps:$4 sm:$0xff]  }
 0x111   : > { %3489 = vmatpush1.bf16.msra.mxu0 %v4334_v9  ;;  %3318 = vmatprep.subr.bf16.mxu1 %v4339_v10  ;;  %v4430_v9 = vld [vmem:[%s5339_s9 + $0x670] ss:$8 sps:$4 sm:$0xff]   ;;  %v4435_v10 = vld [vmem:[%s5339_s9 + $0x284] ss:$8 sps:$4 sm:$0xff]  }
 0x112   : > { %3490 = vmatprep.subr.bf16.mxu0 %v4342_v11  ;;  %v4438_v11 = vld [vmem:[%s5339_s9 + $0x684] ss:$8 sps:$4 sm:$0xff]  }
 0x114   : > { %3319 = vmatpush1.bf16.msra.mxu1 %v4337_v12  ;;  %v4433_v12 = vld [vmem:[%s5339_s9 + $0x280] ss:$8 sps:$4 sm:$0xff]  }
 0x115   : > { %3491 = vmatpush1.bf16.msra.mxu0 %v4340_v13  ;;  %3320 = vmatprep.subr.bf16.mxu1 %v4345_v14  ;;  %v4436_v13 = vld [vmem:[%s5339_s9 + $0x680] ss:$8 sps:$4 sm:$0xff]   ;;  %v4441_v14 = vld [vmem:[%s5339_s9 + $0x294] ss:$8 sps:$4 sm:$0xff]  }
 0x116   : > { %3492 = vmatprep.subr.bf16.mxu0 %v4348_v15  ;;  %v4444_v15 = vld [vmem:[%s5339_s9 + $0x694] ss:$8 sps:$4 sm:$0xff]  }
 0x118   : > { %3321 = vmatpush1.bf16.msra.mxu1 %v4343_v16  ;;  %v4439_v16 = vld [vmem:[%s5339_s9 + $0x290] ss:$8 sps:$4 sm:$0xff]  }
 0x119   : > { %3493 = vmatpush1.bf16.msra.mxu0 %v4346_v17  ;;  %3322 = vmatprep.subr.bf16.mxu1 %v4351_v18  ;;  %v4442_v17 = vld [vmem:[%s5339_s9 + $0x690] ss:$8 sps:$4 sm:$0xff]   ;;  %v4447_v18 = vld [vmem:[%s5339_s9 + $0x2a4] ss:$8 sps:$4 sm:$0xff]  }
 0x11a   : > { %3494 = vmatprep.subr.bf16.mxu0 %v4354_v19  ;;  %v4450_v19 = vld [vmem:[%s5339_s9 + $0x6a4] ss:$8 sps:$4 sm:$0xff]  }
 0x11c   : > { %3323 = vmatpush1.bf16.msra.mxu1 %v4349_v20  ;;  %v4445_v20 = vld [vmem:[%s5339_s9 + $0x2a0] ss:$8 sps:$4 sm:$0xff]  }
 0x11d   : > { %3495 = vmatpush1.bf16.msra.mxu0 %v4352_v21  ;;  %3324 = vmatprep.subr.bf16.mxu1 %v4357_v22  ;;  %v4448_v21 = vld [vmem:[%s5339_s9 + $0x6a0] ss:$8 sps:$4 sm:$0xff]   ;;  %v4453_v22 = vld [vmem:[%s5339_s9 + $0x2b4] ss:$8 sps:$4 sm:$0xff]  }
 0x11e   : > { %3496 = vmatprep.subr.bf16.mxu0 %v4360_v23  ;;  %v4456_v23 = vld [vmem:[%s5339_s9 + $0x6b4] ss:$8 sps:$4 sm:$0xff]  }
 0x120   : > { %3325 = vmatpush1.bf16.msra.mxu1 %v4355_v24  ;;  %v4451_v24 = vld [vmem:[%s5339_s9 + $0x2b0] ss:$8 sps:$4 sm:$0xff]  }
 0x121   : > { %3497 = vmatpush1.bf16.msra.mxu0 %v4358_v25  ;;  %3326 = vmatprep.subr.bf16.mxu1 %v4363_v26  ;;  %v4454_v25 = vld [vmem:[%s5339_s9 + $0x6b0] ss:$8 sps:$4 sm:$0xff]   ;;  %v4459_v26 = vld [vmem:[%s5339_s9 + $0x2c4] ss:$8 sps:$4 sm:$0xff]  }
 0x122   : > { %3498 = vmatprep.subr.bf16.mxu0 %v4366_v27  ;;  %v4462_v27 = vld [vmem:[%s5339_s9 + $0x6c4] ss:$8 sps:$4 sm:$0xff]  }
 0x124   : > { %3327 = vmatpush1.bf16.msra.mxu1 %v4361_v28  ;;  %v4457_v28 = vld [vmem:[%s5339_s9 + $0x2c0] ss:$8 sps:$4 sm:$0xff]  }
 0x125   : > { %3499 = vmatpush1.bf16.msra.mxu0 %v4364_v29  ;;  %3328 = vmatprep.subr.bf16.mxu1 %v4369_v30  ;;  %v4460_v29 = vld [vmem:[%s5339_s9 + $0x6c0] ss:$8 sps:$4 sm:$0xff]   ;;  %v4465_v30 = vld [vmem:[%s5339_s9 + $0x2d4] ss:$8 sps:$4 sm:$0xff]  }
 0x126   : > { %3500 = vmatprep.subr.bf16.mxu0 %v4372_v31  ;;  %v4468_v31 = vld [vmem:[%s5339_s9 + $0x6d4] ss:$8 sps:$4 sm:$0xff]  }
 0x128   : > { %3329 = vmatpush1.bf16.msra.mxu1 %v4367_v32  ;;  %v4463_v32 = vld [vmem:[%s5339_s9 + $0x2d0] ss:$8 sps:$4 sm:$0xff]  }
 0x129   : > { %3501 = vmatpush1.bf16.msra.mxu0 %v4370_v33  ;;  %3330 = vmatprep.subr.bf16.mxu1 %v4375_v34  ;;  %v4466_v33 = vld [vmem:[%s5339_s9 + $0x6d0] ss:$8 sps:$4 sm:$0xff]   ;;  %v4471_v34 = vld [vmem:[%s5339_s9 + $0x2e4] ss:$8 sps:$4 sm:$0xff]  }
 0x12a   : > { %3502 = vmatprep.subr.bf16.mxu0 %v4378_v35  ;;  %v4474_v35 = vld [vmem:[%s5339_s9 + $0x6e4] ss:$8 sps:$4 sm:$0xff]  }
 0x12c   : > { %3331 = vmatpush1.bf16.msra.mxu1 %v4373_v36  ;;  %v4469_v36 = vld [vmem:[%s5339_s9 + $0x2e0] ss:$8 sps:$4 sm:$0xff]  }
 0x12d   : > { %3503 = vmatpush1.bf16.msra.mxu0 %v4376_v37  ;;  %3343 = vmatprep.subr.bf16.mxu1 %v4384_v38  ;;  %v4472_v37 = vld [vmem:[%s5339_s9 + $0x6e0] ss:$8 sps:$4 sm:$0xff]   ;;  %v4477_v38 = vld [vmem:[%s5339_s9 + $0x2f4] ss:$8 sps:$4 sm:$0xff]  }
 0x12e   : > { %3515 = vmatprep.subr.bf16.mxu0 %v4390_v39  ;;  %v4480_v39 = vld [vmem:[%s5339_s9 + $0x6f4] ss:$8 sps:$4 sm:$0xff]  }
 0x12f   : > { %3333 = vmatmul.mubr.bf16.vlgmr.msra.gmra.mrb[0].mxu1 %v4379_v40  ;;  %v4475_v40 = vld [vmem:[%s5339_s9 + $0x2f0] ss:$8 sps:$4 sm:$0xff]  }
 0x130   : > { %3505 = vmatmul.mubr.bf16.vlgmr.msra.gmra.mrb[0].mxu0 %v4385_v42  ;;  %3344 = vmatpush1.bf16.msra.mxu1 %v4382_v41  ;;  %v4478_v41 = vld [vmem:[%s5339_s9 + $0x6f0] ss:$8 sps:$4 sm:$0xff]   ;;  %v4486_v42 = vld [vmem:[%s5339_s9 + $0x304] ss:$8 sps:$4 sm:$0xff]  }
 0x131   : > { %3516 = vmatpush1.bf16.msra.mxu0 %v4388_v43  ;;  %3345 = vmatprep.subr.bf16.mxu1 %v4393_v44  ;;  %v4492_v43 = vld [vmem:[%s5339_s9 + $0x704] ss:$8 sps:$4 sm:$0xff]   ;;  %v4481_v44 = vld [vmem:[%s5704_s0 + $0x10] ss:$72 sps:$4 sm:$0xff]  }
 0x132   : > { %3517 = vmatprep.subr.bf16.mxu0 %v4396_v45  ;;  %3375 = vmatprep.mubr.bf16.mxu1 %v4483_v47  ;;  %v4484_v45 = vld [vmem:[%s5339_s9 + $0x300] ss:$8 sps:$4 sm:$0xff]  }
 0x133   : > { %3547 = vmatprep.mubr.bf16.mxu0 %v4489_v51  ;;  %v4490_v47 = vld [vmem:[%s5339_s9 + $0x700] ss:$8 sps:$4 sm:$0xff]   ;;  %v4588_v51 = vld [vmem:[%s5704_s0 + $0x3c] ss:$72 sps:$4 sm:$0xff]  }
 0x134   : > { %3346 = vmatpush1.bf16.msra.mxu1 %v4391_v46  ;;  %v4487_v46 = vld [vmem:[%s5704_s0 + $0x30] ss:$72 sps:$4 sm:$0xff]  }
 0x135   : > { %3518 = vmatpush1.bf16.msra.mxu0 %v4394_v48  ;;  %3347 = vmatprep.subr.bf16.mxu1 %v4399_v49  ;;  %v4495_v48 = vld [vmem:[%s5339_s9 + $0x314] ss:$8 sps:$4 sm:$0xff]  }
 0x136   : > { %3519 = vmatprep.subr.bf16.mxu0 %v4402_v50  ;;  %v4498_v49 = vld [vmem:[%s5339_s9 + $0x714] ss:$8 sps:$4 sm:$0xff]  }
 0x137   : > { %v4585_v50 = vld [vmem:[%s5704_s0 + $0x1c] ss:$72 sps:$4 sm:$0xff]  }
 0x138   : > { %3348 = vmatpush1.bf16.msra.mxu1 %v4397_v52  ;;  %v4493_v52 = vld [vmem:[%s5339_s9 + $0x310] ss:$8 sps:$4 sm:$0xff]  }
 0x139   : > { %3520 = vmatpush1.bf16.msra.mxu0 %v4400_v53  ;;  %3349 = vmatprep.subr.bf16.mxu1 %v4405_v54  ;;  %v4496_v53 = vld [vmem:[%s5339_s9 + $0x710] ss:$8 sps:$4 sm:$0xff]   ;;  %v4501_v54 = vld [vmem:[%s5339_s9 + $0x324] ss:$8 sps:$4 sm:$0xff]  }
 0x13a   : > { %3521 = vmatprep.subr.bf16.mxu0 %v4408_v55  ;;  %v4504_v55 = vld [vmem:[%s5339_s9 + $0x724] ss:$8 sps:$4 sm:$0xff]  }
 0x13c   : > { %3350 = vmatpush1.bf16.msra.mxu1 %v4403_v56  ;;  %v4499_v56 = vld [vmem:[%s5339_s9 + $0x320] ss:$8 sps:$4 sm:$0xff]  }
 0x13d   : > { %3522 = vmatpush1.bf16.msra.mxu0 %v4406_v57  ;;  %3351 = vmatprep.subr.bf16.mxu1 %v4411_v58  ;;  %v4502_v57 = vld [vmem:[%s5339_s9 + $0x720] ss:$8 sps:$4 sm:$0xff]   ;;  %v4507_v58 = vld [vmem:[%s5339_s9 + $0x334] ss:$8 sps:$4 sm:$0xff]  }
 0x13e   : > { %3523 = vmatprep.subr.bf16.mxu0 %v4414_v59  ;;  %v4510_v59 = vld [vmem:[%s5339_s9 + $0x734] ss:$8 sps:$4 sm:$0xff]  }
 0x140   : > { %3352 = vmatpush1.bf16.msra.mxu1 %v4409_v60  ;;  %v4505_v60 = vld [vmem:[%s5339_s9 + $0x330] ss:$8 sps:$4 sm:$0xff]  }
 0x141   : > { %3524 = vmatpush1.bf16.msra.mxu0 %v4412_v61  ;;  %3353 = vmatprep.subr.bf16.mxu1 %v4417_v62  ;;  %v4508_v61 = vld [vmem:[%s5339_s9 + $0x730] ss:$8 sps:$4 sm:$0xff]   ;;  %v4513_v62 = vld [vmem:[%s5339_s9 + $0x344] ss:$8 sps:$4 sm:$0xff]  }
 0x142   : > { %3525 = vmatprep.subr.bf16.mxu0 %v4420_v63  ;;  %v4516_v63 = vld [vmem:[%s5339_s9 + $0x744] ss:$8 sps:$4 sm:$0xff]  }
 0x144   : > { %3354 = vmatpush1.bf16.msra.mxu1 %v4415_v0  ;;  %v4511_v0 = vld [vmem:[%s5339_s9 + $0x340] ss:$8 sps:$4 sm:$0xff]  }
 0x145   : > { %3526 = vmatpush1.bf16.msra.mxu0 %v4418_v1  ;;  %3355 = vmatprep.subr.bf16.mxu1 %v4423_v2  ;;  %v4514_v1 = vld [vmem:[%s5339_s9 + $0x740] ss:$8 sps:$4 sm:$0xff]   ;;  %v4519_v2 = vld [vmem:[%s5339_s9 + $0x354] ss:$8 sps:$4 sm:$0xff]  }
 0x146   : > { %3527 = vmatprep.subr.bf16.mxu0 %v4426_v3  ;;  %v4522_v3 = vld [vmem:[%s5339_s9 + $0x754] ss:$8 sps:$4 sm:$0xff]  }
 0x148   : > { %3356 = vmatpush1.bf16.msra.mxu1 %v4421_v4  ;;  %v4517_v4 = vld [vmem:[%s5339_s9 + $0x350] ss:$8 sps:$4 sm:$0xff]  }
 0x149   : > { %3528 = vmatpush1.bf16.msra.mxu0 %v4424_v5  ;;  %3357 = vmatprep.subr.bf16.mxu1 %v4429_v6  ;;  %v4520_v5 = vld [vmem:[%s5339_s9 + $0x750] ss:$8 sps:$4 sm:$0xff]   ;;  %v4525_v6 = vld [vmem:[%s5339_s9 + $0x364] ss:$8 sps:$4 sm:$0xff]  }
 0x14a   : > { %3529 = vmatprep.subr.bf16.mxu0 %v4432_v7  ;;  %v4528_v7 = vld [vmem:[%s5339_s9 + $0x764] ss:$8 sps:$4 sm:$0xff]  }
 0x14c   : > { %3358 = vmatpush1.bf16.msra.mxu1 %v4427_v8  ;;  %v4523_v8 = vld [vmem:[%s5339_s9 + $0x360] ss:$8 sps:$4 sm:$0xff]  }
 0x14d   : > { %3530 = vmatpush1.bf16.msra.mxu0 %v4430_v9  ;;  %3359 = vmatprep.subr.bf16.mxu1 %v4435_v10  ;;  %v4526_v9 = vld [vmem:[%s5339_s9 + $0x760] ss:$8 sps:$4 sm:$0xff]   ;;  %v4531_v10 = vld [vmem:[%s5339_s9 + $0x374] ss:$8 sps:$4 sm:$0xff]  }
 0x14e   : > { %3531 = vmatprep.subr.bf16.mxu0 %v4438_v11  ;;  %v4534_v11 = vld [vmem:[%s5339_s9 + $0x774] ss:$8 sps:$4 sm:$0xff]  }
 0x150   : > { %3360 = vmatpush1.bf16.msra.mxu1 %v4433_v12  ;;  %v4529_v12 = vld [vmem:[%s5339_s9 + $0x370] ss:$8 sps:$4 sm:$0xff]  }
 0x151   : > { %3532 = vmatpush1.bf16.msra.mxu0 %v4436_v13  ;;  %3361 = vmatprep.subr.bf16.mxu1 %v4441_v14  ;;  %v4532_v13 = vld [vmem:[%s5339_s9 + $0x770] ss:$8 sps:$4 sm:$0xff]   ;;  %v4537_v14 = vld [vmem:[%s5339_s9 + $0x384] ss:$8 sps:$4 sm:$0xff]  }
 0x152   : > { %3533 = vmatprep.subr.bf16.mxu0 %v4444_v15  ;;  %v4540_v15 = vld [vmem:[%s5339_s9 + $0x784] ss:$8 sps:$4 sm:$0xff]  }
 0x154   : > { %3362 = vmatpush1.bf16.msra.mxu1 %v4439_v16  ;;  %v4535_v16 = vld [vmem:[%s5339_s9 + $0x380] ss:$8 sps:$4 sm:$0xff]  }
 0x155   : > { %3534 = vmatpush1.bf16.msra.mxu0 %v4442_v17  ;;  %3363 = vmatprep.subr.bf16.mxu1 %v4447_v18  ;;  %v4538_v17 = vld [vmem:[%s5339_s9 + $0x780] ss:$8 sps:$4 sm:$0xff]   ;;  %v4543_v18 = vld [vmem:[%s5339_s9 + $0x394] ss:$8 sps:$4 sm:$0xff]  }
 0x156   : > { %3535 = vmatprep.subr.bf16.mxu0 %v4450_v19  ;;  %v4546_v19 = vld [vmem:[%s5339_s9 + $0x794] ss:$8 sps:$4 sm:$0xff]  }
 0x158   : > { %3364 = vmatpush1.bf16.msra.mxu1 %v4445_v20  ;;  %v4541_v20 = vld [vmem:[%s5339_s9 + $0x390] ss:$8 sps:$4 sm:$0xff]  }
 0x159   : > { %3536 = vmatpush1.bf16.msra.mxu0 %v4448_v21  ;;  %3365 = vmatprep.subr.bf16.mxu1 %v4453_v22  ;;  %v4544_v21 = vld [vmem:[%s5339_s9 + $0x790] ss:$8 sps:$4 sm:$0xff]   ;;  %v4549_v22 = vld [vmem:[%s5339_s9 + $0x3a4] ss:$8 sps:$4 sm:$0xff]  }
 0x15a   : > { %3537 = vmatprep.subr.bf16.mxu0 %v4456_v23  ;;  %v4552_v23 = vld [vmem:[%s5339_s9 + $0x7a4] ss:$8 sps:$4 sm:$0xff]  }
 0x15c   : > { %3366 = vmatpush1.bf16.msra.mxu1 %v4451_v24  ;;  %v4547_v24 = vld [vmem:[%s5339_s9 + $0x3a0] ss:$8 sps:$4 sm:$0xff]  }
 0x15d   : > { %3538 = vmatpush1.bf16.msra.mxu0 %v4454_v25  ;;  %3367 = vmatprep.subr.bf16.mxu1 %v4459_v26  ;;  %v4550_v25 = vld [vmem:[%s5339_s9 + $0x7a0] ss:$8 sps:$4 sm:$0xff]   ;;  %v4555_v26 = vld [vmem:[%s5339_s9 + $0x3b4] ss:$8 sps:$4 sm:$0xff]  }
 0x15e   : > { %3539 = vmatprep.subr.bf16.mxu0 %v4462_v27  ;;  %v4558_v27 = vld [vmem:[%s5339_s9 + $0x7b4] ss:$8 sps:$4 sm:$0xff]  }
 0x160   : > { %3368 = vmatpush1.bf16.msra.mxu1 %v4457_v28  ;;  %v4553_v28 = vld [vmem:[%s5339_s9 + $0x3b0] ss:$8 sps:$4 sm:$0xff]  }
 0x161   : > { %3540 = vmatpush1.bf16.msra.mxu0 %v4460_v29  ;;  %3369 = vmatprep.subr.bf16.mxu1 %v4465_v30  ;;  %v4556_v29 = vld [vmem:[%s5339_s9 + $0x7b0] ss:$8 sps:$4 sm:$0xff]   ;;  %v4561_v30 = vld [vmem:[%s5339_s9 + $0x3c4] ss:$8 sps:$4 sm:$0xff]  }
 0x162   : > { %3541 = vmatprep.subr.bf16.mxu0 %v4468_v31  ;;  %v4564_v31 = vld [vmem:[%s5339_s9 + $0x7c4] ss:$8 sps:$4 sm:$0xff]  }
 0x164   : > { %3370 = vmatpush1.bf16.msra.mxu1 %v4463_v32  ;;  %v4559_v32 = vld [vmem:[%s5339_s9 + $0x3c0] ss:$8 sps:$4 sm:$0xff]  }
 0x165   : > { %3542 = vmatpush1.bf16.msra.mxu0 %v4466_v33  ;;  %3371 = vmatprep.subr.bf16.mxu1 %v4471_v34  ;;  %v4562_v33 = vld [vmem:[%s5339_s9 + $0x7c0] ss:$8 sps:$4 sm:$0xff]   ;;  %v4567_v34 = vld [vmem:[%s5339_s9 + $0x3d4] ss:$8 sps:$4 sm:$0xff]  }
 0x166   : > { %3543 = vmatprep.subr.bf16.mxu0 %v4474_v35  ;;  %v4570_v35 = vld [vmem:[%s5339_s9 + $0x7d4] ss:$8 sps:$4 sm:$0xff]  }
 0x168   : > { %3372 = vmatpush1.bf16.msra.mxu1 %v4469_v36  ;;  %v4565_v36 = vld [vmem:[%s5339_s9 + $0x3d0] ss:$8 sps:$4 sm:$0xff]  }
 0x169   : > { %3544 = vmatpush1.bf16.msra.mxu0 %v4472_v37  ;;  %3373 = vmatprep.subr.bf16.mxu1 %v4477_v38  ;;  %v4568_v37 = vld [vmem:[%s5339_s9 + $0x7d0] ss:$8 sps:$4 sm:$0xff]   ;;  %v4573_v38 = vld [vmem:[%s5339_s9 + $0x3e4] ss:$8 sps:$4 sm:$0xff]  }
 0x16a   : > { %3545 = vmatprep.subr.bf16.mxu0 %v4480_v39  ;;  %v4576_v39 = vld [vmem:[%s5339_s9 + $0x7e4] ss:$8 sps:$4 sm:$0xff]  }
 0x16c   : > { %3374 = vmatpush1.bf16.msra.mxu1 %v4475_v40  ;;  %v4571_v40 = vld [vmem:[%s5339_s9 + $0x3e0] ss:$8 sps:$4 sm:$0xff]  }
 0x16d   : > { %3546 = vmatpush1.bf16.msra.mxu0 %v4478_v41  ;;  %3386 = vmatprep.subr.bf16.mxu1 %v4486_v42  ;;  %v4574_v41 = vld [vmem:[%s5339_s9 + $0x7e0] ss:$8 sps:$4 sm:$0xff]   ;;  %v4579_v42 = vld [vmem:[%s5339_s9 + $0x3f4] ss:$8 sps:$4 sm:$0xff]  }
 0x16e   : > { %3558 = vmatprep.subr.bf16.mxu0 %v4492_v43  ;;  %v4582_v43 = vld [vmem:[%s5339_s9 + $0x7f4] ss:$8 sps:$4 sm:$0xff]  }
 0x16f   : > { %3376 = vmatmul.mubr.bf16.vlgmr.msra.gmra.mrb[0].mxu1 %v4481_v44  ;;  %v4577_v44 = vld [vmem:[%s5339_s9 + $0x3f0] ss:$8 sps:$4 sm:$0xff]  }
 0x170   : > { %3548 = vmatmul.mubr.bf16.vlgmr.msra.gmra.mrb[0].mxu0 %v4487_v46  ;;  %3387 = vmatpush1.bf16.msra.mxu1 %v4484_v45  ;;  %v4580_v45 = vld [vmem:[%s5339_s9 + $0x7f0] ss:$8 sps:$4 sm:$0xff]   ;;  %v4591_v46 = vld [vmem:[%s5339_s9 + $0x804] ss:$8 sps:$4 sm:$0xff]  }
 0x171   : > { %3559 = vmatpush1.bf16.msra.mxu0 %v4490_v47  ;;  %3388 = vmatprep.subr.bf16.mxu1 %v4495_v48  ;;  %v4583_v47 = vld [vmem:[%s5704_s0 + $0x18] ss:$72 sps:$4 sm:$0xff]  }
 0x172   : > { %3560 = vmatprep.subr.bf16.mxu0 %v4498_v49  ;;  %3418 = vmatprep.mubr.bf16.mxu1 %v4585_v50  ;;  %v4586_v48 = vld [vmem:[%s5704_s0 + $0x38] ss:$72 sps:$4 sm:$0xff]   ;;  %v4639_v50 = vld [vmem:[%s5704_s0 + $0x44] ss:$72 sps:$4 sm:$0xff]  }
 0x173   : > { %3590 = vmatprep.mubr.bf16.mxu0 %v4588_v51  ;;  %v4589_v49 = vld [vmem:[%s5339_s9 + $0x800] ss:$8 sps:$4 sm:$0xff]   ;;  %v4594_v51 = vld [vmem:[%s5339_s9 + $0x814] ss:$8 sps:$4 sm:$0xff]  }
 0x174   : > { %3389 = vmatpush1.bf16.msra.mxu1 %v4493_v52  ;;  %v4592_v52 = vld [vmem:[%s5339_s9 + $0x810] ss:$8 sps:$4 sm:$0xff]  }
 0x175   : > { %3561 = vmatpush1.bf16.msra.mxu0 %v4496_v53  ;;  %3390 = vmatprep.subr.bf16.mxu1 %v4501_v54  ;;  %v4597_v53 = vld [vmem:[%s5339_s9 + $0x824] ss:$8 sps:$4 sm:$0xff]   ;;  %v4595_v54 = vld [vmem:[%s5339_s9 + $0x820] ss:$8 sps:$4 sm:$0xff]  }
 0x176   : > { %3562 = vmatprep.subr.bf16.mxu0 %v4504_v55  ;;  %v4600_v55 = vld [vmem:[%s5339_s9 + $0x834] ss:$8 sps:$4 sm:$0xff]  }
 0x178   : > { %3391 = vmatpush1.bf16.msra.mxu1 %v4499_v56  ;;  %v4598_v56 = vld [vmem:[%s5339_s9 + $0x830] ss:$8 sps:$4 sm:$0xff]  }
 0x179   : > { %3563 = vmatpush1.bf16.msra.mxu0 %v4502_v57  ;;  %3392 = vmatprep.subr.bf16.mxu1 %v4507_v58  ;;  %v4603_v57 = vld [vmem:[%s5339_s9 + $0x844] ss:$8 sps:$4 sm:$0xff]   ;;  %v4601_v58 = vld [vmem:[%s5339_s9 + $0x840] ss:$8 sps:$4 sm:$0xff]  }
 0x17a   : > { %3564 = vmatprep.subr.bf16.mxu0 %v4510_v59  ;;  %v4606_v59 = vld [vmem:[%s5339_s9 + $0x854] ss:$8 sps:$4 sm:$0xff]  }
 0x17c   : > { %3393 = vmatpush1.bf16.msra.mxu1 %v4505_v60  ;;  %v4604_v60 = vld [vmem:[%s5339_s9 + $0x850] ss:$8 sps:$4 sm:$0xff]  }
 0x17d   : > { %3565 = vmatpush1.bf16.msra.mxu0 %v4508_v61  ;;  %3394 = vmatprep.subr.bf16.mxu1 %v4513_v62  ;;  %v4609_v61 = vld [vmem:[%s5339_s9 + $0x864] ss:$8 sps:$4 sm:$0xff]   ;;  %v4607_v62 = vld [vmem:[%s5339_s9 + $0x860] ss:$8 sps:$4 sm:$0xff]  }
 0x17e   : > { %3566 = vmatprep.subr.bf16.mxu0 %v4516_v63  ;;  %v4612_v63 = vld [vmem:[%s5339_s9 + $0x874] ss:$8 sps:$4 sm:$0xff]  }
 0x180   : > { %3395 = vmatpush1.bf16.msra.mxu1 %v4511_v0  ;;  %v4610_v0 = vld [vmem:[%s5339_s9 + $0x870] ss:$8 sps:$4 sm:$0xff]  }
 0x181   : > { %3567 = vmatpush1.bf16.msra.mxu0 %v4514_v1  ;;  %3396 = vmatprep.subr.bf16.mxu1 %v4519_v2  ;;  %v4615_v1 = vld [vmem:[%s5339_s9 + $0x884] ss:$8 sps:$4 sm:$0xff]   ;;  %v4613_v2 = vld [vmem:[%s5339_s9 + $0x880] ss:$8 sps:$4 sm:$0xff]  }
 0x182   : > { %3568 = vmatprep.subr.bf16.mxu0 %v4522_v3  ;;  %v4618_v3 = vld [vmem:[%s5339_s9 + $0x894] ss:$8 sps:$4 sm:$0xff]  }
 0x184   : > { %3397 = vmatpush1.bf16.msra.mxu1 %v4517_v4  ;;  %v4616_v4 = vld [vmem:[%s5339_s9 + $0x890] ss:$8 sps:$4 sm:$0xff]  }
 0x185   : > { %3569 = vmatpush1.bf16.msra.mxu0 %v4520_v5  ;;  %3398 = vmatprep.subr.bf16.mxu1 %v4525_v6  ;;  %v4621_v5 = vld [vmem:[%s5339_s9 + $0x8a4] ss:$8 sps:$4 sm:$0xff]   ;;  %v4619_v6 = vld [vmem:[%s5339_s9 + $0x8a0] ss:$8 sps:$4 sm:$0xff]  }
 0x186   : > { %3570 = vmatprep.subr.bf16.mxu0 %v4528_v7  ;;  %v4624_v7 = vld [vmem:[%s5339_s9 + $0x8b4] ss:$8 sps:$4 sm:$0xff]  }
 0x188   : > { %3399 = vmatpush1.bf16.msra.mxu1 %v4523_v8  ;;  %v4622_v8 = vld [vmem:[%s5339_s9 + $0x8b0] ss:$8 sps:$4 sm:$0xff]  }
 0x189   : > { %3571 = vmatpush1.bf16.msra.mxu0 %v4526_v9  ;;  %3400 = vmatprep.subr.bf16.mxu1 %v4531_v10  ;;  %v4627_v9 = vld [vmem:[%s5339_s9 + $0x8c4] ss:$8 sps:$4 sm:$0xff]   ;;  %v4625_v10 = vld [vmem:[%s5339_s9 + $0x8c0] ss:$8 sps:$4 sm:$0xff]  }
 0x18a   : > { %3572 = vmatprep.subr.bf16.mxu0 %v4534_v11  ;;  %v4630_v11 = vld [vmem:[%s5339_s9 + $0x8d4] ss:$8 sps:$4 sm:$0xff]  }
 0x18c   : > { %3401 = vmatpush1.bf16.msra.mxu1 %v4529_v12  ;;  %v4628_v12 = vld [vmem:[%s5339_s9 + $0x8d0] ss:$8 sps:$4 sm:$0xff]  }
 0x18d   : > { %3573 = vmatpush1.bf16.msra.mxu0 %v4532_v13  ;;  %3402 = vmatprep.subr.bf16.mxu1 %v4537_v14  ;;  %v4633_v13 = vld [vmem:[%s5339_s9 + $0x8e4] ss:$8 sps:$4 sm:$0xff]   ;;  %v4631_v14 = vld [vmem:[%s5339_s9 + $0x8e0] ss:$8 sps:$4 sm:$0xff]  }
 0x18e   : > { %3574 = vmatprep.subr.bf16.mxu0 %v4540_v15  ;;  %v4636_v15 = vld [vmem:[%s5339_s9 + $0x8f4] ss:$8 sps:$4 sm:$0xff]  }
 0x190   : > { %3403 = vmatpush1.bf16.msra.mxu1 %v4535_v16  ;;  %v4634_v16 = vld [vmem:[%s5339_s9 + $0x8f0] ss:$8 sps:$4 sm:$0xff]   ;;  %s1405_s9 = scalar_lea.vmem %s5706_s2, %s5716_s7 }
 0x191   : > { %3575 = vmatpush1.bf16.msra.mxu0 %v4538_v17  ;;  %3404 = vmatprep.subr.bf16.mxu1 %v4543_v18  ;;  %v4637_v17 = vld [vmem:[%s5704_s0 + $0x40] ss:$72 sps:$4 sm:$0xff]  }
 0x192   : > { %3576 = vmatprep.subr.bf16.mxu0 %v4546_v19 }
 0x194   : > { %3405 = vmatpush1.bf16.msra.mxu1 %v4541_v20 }
 0x195   : > { %3577 = vmatpush1.bf16.msra.mxu0 %v4544_v21  ;;  %3406 = vmatprep.subr.bf16.mxu1 %v4549_v22  ;;  %v1717_v22 = vlaneseq }
 0x196   : > { %3578 = vmatprep.subr.bf16.mxu0 %v4552_v23 }
 0x197   : > { %v1718_v23 = vshrl.u32 %v1717_v22, 7 }
 0x198   : > { %3407 = vmatpush1.bf16.msra.mxu1 %v4547_v24 }
 0x199   : > { %3579 = vmatpush1.bf16.msra.mxu0 %v4550_v25  ;;  %3408 = vmatprep.subr.bf16.mxu1 %v4555_v26  ;;  %v1719_v24 = vsub.s32 0, %v1718_v23  ;;  %v1715_v25 = vld [vmem:[%s1405_s9] sm:$0x3]  ;;  %v1723_v26 = vsub.s32 1, %v1718_v23 }
 0x19a   : > { %3580 = vmatprep.subr.bf16.mxu0 %v4558_v27 }
 0x19b   : > { %v1720_v27 = vrot.slane %v1715_v25, %v1719_v24 }
 0x19c   : > { %3409 = vmatpush1.bf16.msra.mxu1 %v4553_v28  ;;  %v1724_v28 = vrot.slane %v1715_v25, %v1723_v26 }
 0x19d   : > { %3581 = vmatpush1.bf16.msra.mxu0 %v4556_v29  ;;  %3410 = vmatprep.subr.bf16.mxu1 %v4561_v30 }
 0x19e   : > { %3582 = vmatprep.subr.bf16.mxu0 %v4564_v31 }
 0x1a0   : > { %3411 = vmatpush1.bf16.msra.mxu1 %v4559_v32 }
 0x1a1   : > { %3583 = vmatpush1.bf16.msra.mxu0 %v4562_v33  ;;  %3412 = vmatprep.subr.bf16.mxu1 %v4567_v34 }
 0x1a2   : > { %3584 = vmatprep.subr.bf16.mxu0 %v4570_v35 }
 0x1a4   : > { %3413 = vmatpush1.bf16.msra.mxu1 %v4565_v36 }
 0x1a5   : > { %3585 = vmatpush1.bf16.msra.mxu0 %v4568_v37  ;;  %3414 = vmatprep.subr.bf16.mxu1 %v4573_v38 }
 0x1a6   : > { %3586 = vmatprep.subr.bf16.mxu0 %v4576_v39 }
 0x1a8   : > { %3415 = vmatpush1.bf16.msra.mxu1 %v4571_v40 }
 0x1a9   : > { %3587 = vmatpush1.bf16.msra.mxu0 %v4574_v41  ;;  %3416 = vmatprep.subr.bf16.mxu1 %v4579_v42 }
 0x1aa   : > { %3588 = vmatprep.subr.bf16.mxu0 %v4582_v43 }
 0x1ac   : > { %3417 = vmatpush1.bf16.msra.mxu1 %v4577_v44 }
 0x1ad   : > { %3589 = vmatpush1.bf16.msra.mxu0 %v4580_v45 }
 0x1ae   : > { %3601 = vmatprep.subr.bf16.mxu0 %v4591_v46 }
 0x1af   : > { %3419 = vmatmul.mubr.bf16.vlgmr.msra.gmra.mrb[0].mxu1 %v4583_v47 }
 0x1b0   : > { %3591 = vmatmul.mubr.bf16.vlgmr.msra.gmra.mrb[0].mxu0 %v4586_v48 }
 0x1b1   : > { %3602 = vmatpush1.bf16.msra.mxu0 %v4589_v49  ;;  %3633 = vmatprep.mubr.bf16.mxu0 %v4639_v50 }
 0x1b2   : > { %3603 = vmatprep.subr.bf16.mxu0 %v4594_v51 }
 0x1b5   : > { %3604 = vmatpush1.bf16.msra.mxu0 %v4592_v52 }
 0x1b6   : > { %3605 = vmatprep.subr.bf16.mxu0 %v4597_v53 }
 0x1b9   : > { %3606 = vmatpush1.bf16.msra.mxu0 %v4595_v54 }
 0x1ba   : > { %3607 = vmatprep.subr.bf16.mxu0 %v4600_v55 }
 0x1bd   : > { %3608 = vmatpush1.bf16.msra.mxu0 %v4598_v56 }
 0x1be   : > { %3609 = vmatprep.subr.bf16.mxu0 %v4603_v57 }
 0x1c1   : > { %3610 = vmatpush1.bf16.msra.mxu0 %v4601_v58 }
 0x1c2   : > { %3611 = vmatprep.subr.bf16.mxu0 %v4606_v59 }
 0x1c5   : > { %3612 = vmatpush1.bf16.msra.mxu0 %v4604_v60 }
 0x1c6   : > { %3613 = vmatprep.subr.bf16.mxu0 %v4609_v61 }
 0x1c9   : > { %3614 = vmatpush1.bf16.msra.mxu0 %v4607_v62 }
 0x1ca   : > { %3615 = vmatprep.subr.bf16.mxu0 %v4612_v63 }
 0x1cd   : > { %3616 = vmatpush1.bf16.msra.mxu0 %v4610_v0 }
 0x1ce   : > { %3617 = vmatprep.subr.bf16.mxu0 %v4615_v1 }
 0x1d1   : > { %3618 = vmatpush1.bf16.msra.mxu0 %v4613_v2 }
 0x1d2   : > { %3619 = vmatprep.subr.bf16.mxu0 %v4618_v3 }
 0x1d5   : > { %3620 = vmatpush1.bf16.msra.mxu0 %v4616_v4 }
 0x1d6   : > { %3621 = vmatprep.subr.bf16.mxu0 %v4621_v5 }
 0x1d9   : > { %3622 = vmatpush1.bf16.msra.mxu0 %v4619_v6 }
 0x1da   : > { %3623 = vmatprep.subr.bf16.mxu0 %v4624_v7 }
 0x1dd   : > { %3624 = vmatpush1.bf16.msra.mxu0 %v4622_v8 }
 0x1de   : > { %3625 = vmatprep.subr.bf16.mxu0 %v4627_v9 }
 0x1e1   : > { %3626 = vmatpush1.bf16.msra.mxu0 %v4625_v10 }
 0x1e2   : > { %3627 = vmatprep.subr.bf16.mxu0 %v4630_v11 }
 0x1e5   : > { %3628 = vmatpush1.bf16.msra.mxu0 %v4628_v12 }
 0x1e6   : > { %3629 = vmatprep.subr.bf16.mxu0 %v4633_v13 }
 0x1e9   : > { %3630 = vmatpush1.bf16.msra.mxu0 %v4631_v14 }
 0x1ea   : > { %3631 = vmatprep.subr.bf16.mxu0 %v4636_v15 }
 0x1ed   : > { %3632 = vmatpush1.bf16.msra.mxu0 %v4634_v16 }
 0x1f0   : > { %3634 = vmatmul.mubr.bf16.vlgmr.msra.gmra.mrb[0].mxu0 %v4637_v17 }
 0x282   : > { %v3420_v18 = vpop.f32.mrb[0].mxu1 }
 0x283   : > { %v3422_v19 = vpop.f32.mrb[1].mxu1  ;;  %v4103_v29 = vadd.f32 %v3420_v18, %v1720_v27 }
 0x284   : > { %v3424_v20 = vpop.f32.mrb[2].mxu1  ;;  %v4105_v30 = vadd.f32 %v3422_v19, %v1724_v28 }
 0x285   : > { %v3426_v21 = vpop.f32.mrb[3].mxu1  ;;  %v4107_v32 = vadd.f32 %v3424_v20, %v1720_v27 }
 0x286   : > { %v4109_v35 = vadd.f32 %v3426_v21, %v1724_v28 }
 0x2c3   : > { %v3635_v31 = vpop.f32.mrb[0].mxu0 }
 0x2c4   : > { %v4104_v33 = vadd.f32 %v4103_v29, %v3635_v31  ;;  %v3637_v34 = vpop.f32.mrb[1].mxu0 }
 0x2c5   : > { %v4106_v36 = vadd.f32 %v4105_v30, %v3637_v34  ;;  %v3639_v37 = vpop.f32.mrb[2].mxu0  ;;  %3658 = sbr.rel (!%p4735_p6) target bundleno = 724 (0x2d4), region = 74 }
 0x2c6   : > { %v3644_v38 = vmax.f32 %v4104_v33, 0.0  ;;  %v4108_v39 = vadd.f32 %v4107_v32, %v3639_v37  ;;  %v3641_v40 = vpop.f32.mrb[3].mxu0 }
 0x2c7   : > { %v3645_v41 = vmax.f32 %v4106_v36, 0.0  ;;  %v4110_v42 = vadd.f32 %v4109_v35, %v3641_v40 }
 0x2c8   : > { %3648 = vst [vmem:[%s1393_s18] sm:$0xff] %v3644_v38  ;;  %v3646_v43 = vmax.f32 %v4108_v39, 0.0 }
 0x2c9   : > { %3649 = vst [vmem:[%s1393_s18 + $0x8] sm:$0xff] %v3645_v41  ;;  %v3647_v44 = vmax.f32 %v4110_v42, 0.0 }
 0x2ca   : > { %3650 = vst [vmem:[%s1393_s18 + $0x10] sm:$0xff] %v3646_v43 }
 0x2cb   : > { %3651 = vst [vmem:[%s1393_s18 + $0x18] sm:$0xff] %v3647_v44 }
 0x2cf   : > { %v3677_v45 = vld [vmem:[%s1393_s18] sm:$0xff] }
 0x2d0   : > { %v3679_v46 = vld [vmem:[%s1393_s18 + $0x8] sm:$0xff]  ;;  %3678 = vst [vmem:[%s3664_s20] sm:$0xff] %v3677_v45 }
 0x2d1   : > { %v3681_v47 = vld [vmem:[%s1393_s18 + $0x10] sm:$0xff]  ;;  %3680 = vst [vmem:[%s3664_s20 + $0x8] sm:$0xff] %v3679_v46 }
 0x2d2   : > { %v3683_v48 = vld [vmem:[%s1393_s18 + $0x18] sm:$0xff]  ;;  %3682 = vst [vmem:[%s3664_s20 + $0x20] sm:$0xff] %v3681_v47 }
 0x2d3   : > { %3684 = vst [vmem:[%s3664_s20 + $0x28] sm:$0xff] %v3683_v48 }
 0x2d4 PF: > { %s13_s16 = sadd.s32 1, %s4678_s16   ;;  %s5709_s12 = smov %s4666_s13 }
 0x2d5   : > { %p10_p12 = scmp.ge.s32.totalorder %s13_s16, 4   ;;  %s5710_s13 = smov %s4740_s22 }
 0x2d6   : > { %s5711_s14 = smov %s4674_s15  ;;  %s5712_s15 = smov %s5714_s17 }
 0x2d7   :  { %12 = sbr.rel (!%p10_p12) target bundleno = 3 (0x3), region = 134 }

// kernel: resnet34_forward.35
= control target key start
LH: loop header
LB: loop body
LE: loop exit
PB: predicated region body
PF: predicated region fallthrough
CT: control target
= control target key end

     0   :  { %s646_s1 = inlined_call_operand.vmem [shape: bf16[512,128], index: 1, kind: input, shape index: {}]   ;;  %s647_s0 = inlined_call_operand.vmem [shape: bf16[16,512], index: 0, kind: input, shape index: {}]   ;;  %s648_s2 = inlined_call_operand.vmem [shape: f32[1,128], index: 2, kind: input, shape index: {}]   ;;  %s649_s3 = inlined_call_operand.vmem [shape: f32[16,128], index: 3, kind: output, shape index: {}]  }
   0x1   :  { %v471_v0 = vld [vmem:[%s646_s1 + $0x40] sm:$0xff]   ;;  %v475_v4 = vld [vmem:[%s646_s1 + $0x48] sm:$0xff]   ;;  %v479_v8 = vld [vmem:[%s646_s1 + $0x50] sm:$0xff]  }
   0x2   :  { %v472_v1 = vld [vmem:[%s646_s1 + $0xc0] sm:$0xff]   ;;  %427 = vmatprep.subr.bf16.mxu0 %v471_v0  ;;  %v476_v5 = vld [vmem:[%s646_s1 + $0xc8] sm:$0xff]   ;;  %v480_v9 = vld [vmem:[%s646_s1 + $0xd0] sm:$0xff]  }
   0x3   :  { %v473_v2 = vld [vmem:[%s646_s1] sm:$0xff]   ;;  %449 = vmatprep.subr.bf16.mxu1 %v472_v1  ;;  %v477_v6 = vld [vmem:[%s646_s1 + $0x8] sm:$0xff]   ;;  %v481_v10 = vld [vmem:[%s646_s1 + $0x10] sm:$0xff]  }
   0x4   :  { %v474_v3 = vld [vmem:[%s646_s1 + $0x80] sm:$0xff]   ;;  %428 = vmatpush3.bf16.msra.mxu0 %v473_v2  ;;  %v478_v7 = vld [vmem:[%s646_s1 + $0x88] sm:$0xff]   ;;  %v482_v11 = vld [vmem:[%s646_s1 + $0x90] sm:$0xff]  }
   0x5   :  { %450 = vmatpush3.bf16.msra.mxu1 %v474_v3  ;;  %429 = vmatprep.subr.bf16.mxu0 %v475_v4  ;;  %v483_v12 = vld [vmem:[%s646_s1 + $0x58] sm:$0xff]   ;;  %v487_v16 = vld [vmem:[%s646_s1 + $0x60] sm:$0xff]   ;;  %v491_v20 = vld [vmem:[%s646_s1 + $0x68] sm:$0xff]  }
   0x6   :  { %451 = vmatprep.subr.bf16.mxu1 %v476_v5  ;;  %v484_v13 = vld [vmem:[%s646_s1 + $0xd8] sm:$0xff]   ;;  %v488_v17 = vld [vmem:[%s646_s1 + $0xe0] sm:$0xff]   ;;  %v492_v21 = vld [vmem:[%s646_s1 + $0xe8] sm:$0xff]  }
   0x7   :  { %v485_v14 = vld [vmem:[%s646_s1 + $0x18] sm:$0xff]   ;;  %v489_v18 = vld [vmem:[%s646_s1 + $0x20] sm:$0xff]   ;;  %v493_v22 = vld [vmem:[%s646_s1 + $0x28] sm:$0xff]  }
   0x8   :  { %430 = vmatpush3.bf16.msra.mxu0 %v477_v6  ;;  %v486_v15 = vld [vmem:[%s646_s1 + $0x98] sm:$0xff]   ;;  %v490_v19 = vld [vmem:[%s646_s1 + $0xa0] sm:$0xff]   ;;  %v494_v23 = vld [vmem:[%s646_s1 + $0xa8] sm:$0xff]  }
   0x9   :  { %452 = vmatpush3.bf16.msra.mxu1 %v478_v7  ;;  %431 = vmatprep.subr.bf16.mxu0 %v479_v8  ;;  %v495_v24 = vld [vmem:[%s646_s1 + $0x70] sm:$0xff]   ;;  %v499_v28 = vld [vmem:[%s646_s1 + $0x78] sm:$0xff]   ;;  %v390_v38 = vld [vmem:[%s648_s2] ss:$0 sm:$0xff] }
   0xa   :  { %453 = vmatprep.subr.bf16.mxu1 %v480_v9  ;;  %v496_v25 = vld [vmem:[%s646_s1 + $0xf0] sm:$0xff]   ;;  %v500_v29 = vld [vmem:[%s646_s1 + $0xf8] sm:$0xff]  }
   0xb   :  { %v497_v26 = vld [vmem:[%s646_s1 + $0x30] sm:$0xff]   ;;  %v501_v30 = vld [vmem:[%s646_s1 + $0x38] sm:$0xff]  }
   0xc   :  { %432 = vmatpush3.bf16.msra.mxu0 %v481_v10  ;;  %v498_v27 = vld [vmem:[%s646_s1 + $0xb0] sm:$0xff]   ;;  %v502_v31 = vld [vmem:[%s646_s1 + $0xb8] sm:$0xff]  }
   0xd   :  { %454 = vmatpush3.bf16.msra.mxu1 %v482_v11  ;;  %433 = vmatprep.subr.bf16.mxu0 %v483_v12  ;;  %v503_v32 = vld [vmem:[%s647_s0] ss:$16 sps:$4 sm:$0xff]   ;;  %v505_v33 = vld [vmem:[%s647_s0 + $0x4] ss:$16 sps:$4 sm:$0xff]   ;;  %v506_v34 = vld [vmem:[%s647_s0 + $0x8] ss:$16 sps:$4 sm:$0xff]  }
   0xe   :  { %455 = vmatprep.subr.bf16.mxu1 %v484_v13  ;;  %v508_v35 = vld [vmem:[%s647_s0 + $0xc] ss:$16 sps:$4 sm:$0xff]   ;;  %334 = vmatprep.mubr.bf16.mxu0 %v505_v33 }
   0xf   :  { %375 = vmatprep.mubr.bf16.mxu1 %v508_v35 }
  0x10   :  { %434 = vmatpush3.bf16.msra.mxu0 %v485_v14 }
  0x11   :  { %456 = vmatpush3.bf16.msra.mxu1 %v486_v15  ;;  %435 = vmatprep.subr.bf16.mxu0 %v487_v16 }
  0x12   :  { %457 = vmatprep.subr.bf16.mxu1 %v488_v17 }
  0x14   :  { %436 = vmatpush3.bf16.msra.mxu0 %v489_v18 }
  0x15   :  { %458 = vmatpush3.bf16.msra.mxu1 %v490_v19  ;;  %437 = vmatprep.subr.bf16.mxu0 %v491_v20 }
  0x16   :  { %459 = vmatprep.subr.bf16.mxu1 %v492_v21 }
  0x18   :  { %438 = vmatpush3.bf16.msra.mxu0 %v493_v22 }
  0x19   :  { %460 = vmatpush3.bf16.msra.mxu1 %v494_v23  ;;  %439 = vmatprep.subr.bf16.mxu0 %v495_v24 }
  0x1a   :  { %461 = vmatprep.subr.bf16.mxu1 %v496_v25 }
  0x1c   :  { %440 = vmatpush3.bf16.msra.mxu0 %v497_v26 }
  0x1d   :  { %462 = vmatpush3.bf16.msra.mxu1 %v498_v27  ;;  %441 = vmatprep.subr.bf16.mxu0 %v499_v28 }
  0x1e   :  { %463 = vmatprep.subr.bf16.mxu1 %v500_v29 }
  0x20   :  { %442 = vmatpush3.bf16.msra.mxu0 %v501_v30 }
  0x21   :  { %464 = vmatpush3.bf16.msra.mxu1 %v502_v31 }
  0x23   :  { %335 = vmatmul.mubr.bf16.vlgmr.msra.gmra.mrb[0].mxu0 %v503_v32 }
  0x24   :  { %376 = vmatmul.mubr.bf16.vlgmr.msra.gmra.mrb[0].mxu1 %v506_v34 }
  0xf6   :  { %v443_v36 = vpop.f32.mrb[0].mxu0 }
  0xf7   :  { %v465_v37 = vpop.f32.mrb[0].mxu1  ;;  %v444_v39 = vpop.f32.mrb[1].mxu0 }
  0xf8   :  { %v445_v40 = vadd.f32 %v444_v39, %v443_v36  ;;  %v466_v41 = vpop.f32.mrb[1].mxu1  ;;  %v446_v42 = vpop.f32.mrb[2].mxu0 }
  0xf9   :  { %v467_v43 = vadd.f32 %v466_v41, %v465_v37  ;;  %v468_v44 = vpop.f32.mrb[2].mxu1  ;;  %v447_v45 = vpop.f32.mrb[3].mxu0 }
  0xfa   :  { %v337_v46 = vadd.f32 %v445_v40, %v390_v38  ;;  %v448_v47 = vadd.f32 %v447_v45, %v446_v42  ;;  %v469_v48 = vpop.f32.mrb[3].mxu1 }
  0xfb   :  { %v470_v49 = vadd.f32 %v469_v48, %v468_v44 }
  0xfc   :  { %v378_v50 = vadd.f32 %v467_v43, %v337_v46  ;;  %v340_v51 = vadd.f32 %v448_v47, %v390_v38 }
  0xfe   :  { %384 = vst [vmem:[%s649_s3] sm:$0xff] %v378_v50  ;;  %v381_v52 = vadd.f32 %v470_v49, %v340_v51 }
 0x100   :  { %385 = vst [vmem:[%s649_s3 + $0x8] sm:$0xff] %v381_v52 }

// kernel: resnet34_forward.32
= control target key start
LH: loop header
LB: loop body
LE: loop exit
PB: predicated region body
PF: predicated region fallthrough
CT: control target
= control target key end

     0   :  { %s11228_s12 = smov 0   ;;  %s11230_s13 = smov 0   ;;  %s13150_s0 = inlined_call_operand.vmem [shape: bf16[16,4608], index: 0, kind: input, shape index: {}]   ;;  %s13151_s1 = inlined_call_operand.vmem [shape: bf16[4608,512], index: 1, kind: input, shape index: {}]   ;;  %s13152_s2 = inlined_call_operand.vmem [shape: f32[1,512], index: 2, kind: input, shape index: {}]   ;;  %s13153_s3 = inlined_call_operand.vmem [shape: f32[16,512], index: 3, kind: output, shape index: {}]  }
   0x1   :  { %s11232_s14 = smov 0   ;;  %s11234_s15 = smov 0  }
   0x2   :  { %s11236_s16 = smov 0  }
   0x3 LB: > { %s22_s17 = sadd.s32 1, %s11202_s15  ;;  %s9507_s18 = sadd.s32 4294967295, %s11206_s16   ;;  %s11206_s16 = sphi %s11236_s16, %s13_s16   ;;  %s11202_s15 = sphi %s11234_s15, %s13158_s15   ;;  %s11198_s14 = sphi %s11232_s14, %s13157_s14   ;;  %s11194_s13 = sphi %s11230_s13, %s13156_s13   ;;  %s11190_s12 = sphi %s11228_s12, %s13155_s12  }
   0x4   : > { %p23_p0 = scmp.ge.s32.totalorder %s22_s17, 2  ;;  %p65_p1 = scmp.ne.s32.totalorder %s11194_s13, %s11190_s12 }
   0x5   : > { %p66_p2 = scmp.eq.s32.totalorder %s11206_s16, 0  ;;  %p123_p4 = scmp.eq.s32.totalorder %s9507_s18, 1 }
   0x6   : > { %s13160_s17 = smov (%p23_p0, %s22_s17), 0  ;;  %s58_s20 = sadd.s32 1, %s11194_s13 }
   0x7   : > { %p67_p3 = por %p66_p2, %p65_p1  ;;  %s55_s19 = ssub.s32 %s11202_s15, %s13160_s17 }
   0x8   : > { %p56_p5 = scmp.eq.s32.totalorder %s55_s19, 0  ;;  %p11263_p6 = por %p123_p4, %p65_p1 }
   0x9   : > { %p9511_p7 = scmp.ge.s32.totalorder %s11206_s16, 2 }
   0xa   : > { %s11268_s22 = scalar_select %p56_p5, %s11194_s13, %s58_s20  }
   0xb   : > { %155 = sbr.rel (%p9511_p7) target bundleno = 310 (0x136), region = 20 }
  0x12   : > { %158 = sbr.rel (!%p67_p3) target bundleno = 310 (0x136), region = 24  ;;  %s160_s23 = sand.u32 (%p67_p3), 1, %s11194_s13  }
  0x13   : > { %s10134_s24 = sshll.u32 (%p67_p3), %s11202_s15, 3  ;;  %s10208_s25 = smul.u32 (%p67_p3), 4608, %s160_s23 }
  0x14   : > { %s11276_s28 = scalar_lea.vmem (%p67_p3), %s13151_s1, %s10134_s24 }
  0x15   : > { %v1346_v0 = vld [vmem:[%s11276_s28] sm:$0xff] (%p67_p3)  ;;  %v1348_v1 = vld [vmem:[%s11276_s28 + $0x10] sm:$0xff] (%p67_p3)  ;;  %s11284_s29 = scalar_lea.vmem (%p67_p3), [#allocation2], %s10208_s25 }
  0x16   : > { %v1350_v2 = vld [vmem:[%s11276_s28 + $0x20] sm:$0xff] (%p67_p3)  ;;  %v1352_v3 = vld [vmem:[%s11276_s28 + $0x30] sm:$0xff] (%p67_p3)  ;;  %1347 = vst [vmem:[%s11284_s29] sm:$0xff] (%p67_p3), %v1346_v0  ;;  %1349 = vst [vmem:[%s11284_s29 + $0x8] sm:$0xff] (%p67_p3), %v1348_v1 }
  0x17   : > { %v1354_v4 = vld [vmem:[%s11276_s28 + $0x40] sm:$0xff] (%p67_p3)  ;;  %v1356_v5 = vld [vmem:[%s11276_s28 + $0x50] sm:$0xff] (%p67_p3)  ;;  %1351 = vst [vmem:[%s11284_s29 + $0x10] sm:$0xff] (%p67_p3), %v1350_v2  ;;  %1353 = vst [vmem:[%s11284_s29 + $0x18] sm:$0xff] (%p67_p3), %v1352_v3 }
  0x18   : > { %1355 = vst [vmem:[%s11284_s29 + $0x20] sm:$0xff] (%p67_p3), %v1354_v4  ;;  %1357 = vst [vmem:[%s11284_s29 + $0x28] sm:$0xff] (%p67_p3), %v1356_v5  ;;  %v1358_v6 = vld [vmem:[%s11276_s28 + $0x60] sm:$0xff] (%p67_p3)  ;;  %v1360_v7 = vld [vmem:[%s11276_s28 + $0x70] sm:$0xff] (%p67_p3) }
  0x19   : > { %v1362_v8 = vld [vmem:[%s11276_s28 + $0x80] sm:$0xff]  ;;  %1359 = vst [vmem:[%s11284_s29 + $0x30] sm:$0xff] %v1358_v6  ;;  %1361 = vst [vmem:[%s11284_s29 + $0x38] sm:$0xff] %v1360_v7  ;;  %v1364_v9 = vld [vmem:[%s11276_s28 + $0x90] sm:$0xff] }
  0x1a   : > { %1363 = vst [vmem:[%s11284_s29 + $0x40] sm:$0xff] %v1362_v8  ;;  %v1366_v10 = vld [vmem:[%s11276_s28 + $0xa0] sm:$0xff]  ;;  %v1368_v11 = vld [vmem:[%s11276_s28 + $0xb0] sm:$0xff]  ;;  %1365 = vst [vmem:[%s11284_s29 + $0x48] sm:$0xff] %v1364_v9 }
  0x1b   : > { %1367 = vst [vmem:[%s11284_s29 + $0x50] sm:$0xff] %v1366_v10  ;;  %1369 = vst [vmem:[%s11284_s29 + $0x58] sm:$0xff] %v1368_v11  ;;  %v1370_v12 = vld [vmem:[%s11276_s28 + $0xc0] sm:$0xff]  ;;  %v1372_v13 = vld [vmem:[%s11276_s28 + $0xd0] sm:$0xff] }
  0x1c   : > { %v1374_v14 = vld [vmem:[%s11276_s28 + $0xe0] sm:$0xff]  ;;  %1371 = vst [vmem:[%s11284_s29 + $0x60] sm:$0xff] %v1370_v12  ;;  %1373 = vst [vmem:[%s11284_s29 + $0x68] sm:$0xff] %v1372_v13  ;;  %v1376_v15 = vld [vmem:[%s11276_s28 + $0xf0] sm:$0xff] }
  0x1d   : > { %1375 = vst [vmem:[%s11284_s29 + $0x70] sm:$0xff] %v1374_v14  ;;  %v1378_v16 = vld [vmem:[%s11276_s28 + $0x100] sm:$0xff]  ;;  %v1380_v17 = vld [vmem:[%s11276_s28 + $0x110] sm:$0xff]  ;;  %1377 = vst [vmem:[%s11284_s29 + $0x78] sm:$0xff] %v1376_v15 }
  0x1e   : > { %1379 = vst [vmem:[%s11284_s29 + $0x80] sm:$0xff] %v1378_v16  ;;  %1381 = vst [vmem:[%s11284_s29 + $0x88] sm:$0xff] %v1380_v17  ;;  %v1382_v18 = vld [vmem:[%s11276_s28 + $0x120] sm:$0xff]  ;;  %v1384_v19 = vld [vmem:[%s11276_s28 + $0x130] sm:$0xff] }
  0x1f   : > { %v1386_v20 = vld [vmem:[%s11276_s28 + $0x140] sm:$0xff]  ;;  %1383 = vst [vmem:[%s11284_s29 + $0x90] sm:$0xff] %v1382_v18  ;;  %1385 = vst [vmem:[%s11284_s29 + $0x98] sm:$0xff] %v1384_v19  ;;  %v1388_v21 = vld [vmem:[%s11276_s28 + $0x150] sm:$0xff] }
  0x20   : > { %1387 = vst [vmem:[%s11284_s29 + $0xa0] sm:$0xff] %v1386_v20  ;;  %v1390_v22 = vld [vmem:[%s11276_s28 + $0x160] sm:$0xff]  ;;  %v1392_v23 = vld [vmem:[%s11276_s28 + $0x170] sm:$0xff]  ;;  %1389 = vst [vmem:[%s11284_s29 + $0xa8] sm:$0xff] %v1388_v21 }
  0x21   : > { %1391 = vst [vmem:[%s11284_s29 + $0xb0] sm:$0xff] %v1390_v22  ;;  %1393 = vst [vmem:[%s11284_s29 + $0xb8] sm:$0xff] %v1392_v23  ;;  %v1394_v24 = vld [vmem:[%s11276_s28 + $0x180] sm:$0xff]  ;;  %v1396_v25 = vld [vmem:[%s11276_s28 + $0x190] sm:$0xff] }
  0x22   : > { %v1398_v26 = vld [vmem:[%s11276_s28 + $0x1a0] sm:$0xff]  ;;  %1395 = vst [vmem:[%s11284_s29 + $0xc0] sm:$0xff] %v1394_v24  ;;  %1397 = vst [vmem:[%s11284_s29 + $0xc8] sm:$0xff] %v1396_v25  ;;  %v1400_v27 = vld [vmem:[%s11276_s28 + $0x1b0] sm:$0xff] }
  0x23   : > { %1399 = vst [vmem:[%s11284_s29 + $0xd0] sm:$0xff] %v1398_v26  ;;  %v1402_v28 = vld [vmem:[%s11276_s28 + $0x1c0] sm:$0xff]  ;;  %v1404_v29 = vld [vmem:[%s11276_s28 + $0x1d0] sm:$0xff]  ;;  %1401 = vst [vmem:[%s11284_s29 + $0xd8] sm:$0xff] %v1400_v27 }
  0x24   : > { %1403 = vst [vmem:[%s11284_s29 + $0xe0] sm:$0xff] %v1402_v28  ;;  %1405 = vst [vmem:[%s11284_s29 + $0xe8] sm:$0xff] %v1404_v29  ;;  %v1406_v30 = vld [vmem:[%s11276_s28 + $0x1e0] sm:$0xff]  ;;  %v1408_v31 = vld [vmem:[%s11276_s28 + $0x1f0] sm:$0xff] }
  0x25   : > { %v1410_v32 = vld [vmem:[%s11276_s28 + $0x200] sm:$0xff]  ;;  %1407 = vst [vmem:[%s11284_s29 + $0xf0] sm:$0xff] %v1406_v30  ;;  %1409 = vst [vmem:[%s11284_s29 + $0xf8] sm:$0xff] %v1408_v31  ;;  %v1412_v33 = vld [vmem:[%s11276_s28 + $0x210] sm:$0xff] }
  0x26   : > { %1411 = vst [vmem:[%s11284_s29 + $0x100] sm:$0xff] %v1410_v32  ;;  %v1414_v34 = vld [vmem:[%s11276_s28 + $0x220] sm:$0xff]  ;;  %v1416_v35 = vld [vmem:[%s11276_s28 + $0x230] sm:$0xff]  ;;  %1413 = vst [vmem:[%s11284_s29 + $0x108] sm:$0xff] %v1412_v33 }
  0x27   : > { %1415 = vst [vmem:[%s11284_s29 + $0x110] sm:$0xff] %v1414_v34  ;;  %1417 = vst [vmem:[%s11284_s29 + $0x118] sm:$0xff] %v1416_v35  ;;  %v1418_v36 = vld [vmem:[%s11276_s28 + $0x240] sm:$0xff]  ;;  %v1420_v37 = vld [vmem:[%s11276_s28 + $0x250] sm:$0xff] }
  0x28   : > { %v1422_v38 = vld [vmem:[%s11276_s28 + $0x260] sm:$0xff]  ;;  %1419 = vst [vmem:[%s11284_s29 + $0x120] sm:$0xff] %v1418_v36  ;;  %1421 = vst [vmem:[%s11284_s29 + $0x128] sm:$0xff] %v1420_v37  ;;  %v1424_v39 = vld [vmem:[%s11276_s28 + $0x270] sm:$0xff] }
  0x29   : > { %1423 = vst [vmem:[%s11284_s29 + $0x130] sm:$0xff] %v1422_v38  ;;  %v1426_v40 = vld [vmem:[%s11276_s28 + $0x280] sm:$0xff]  ;;  %v1428_v41 = vld [vmem:[%s11276_s28 + $0x290] sm:$0xff]  ;;  %1425 = vst [vmem:[%s11284_s29 + $0x138] sm:$0xff] %v1424_v39 }
  0x2a   : > { %1427 = vst [vmem:[%s11284_s29 + $0x140] sm:$0xff] %v1426_v40  ;;  %1429 = vst [vmem:[%s11284_s29 + $0x148] sm:$0xff] %v1428_v41  ;;  %v1430_v42 = vld [vmem:[%s11276_s28 + $0x2a0] sm:$0xff]  ;;  %v1432_v43 = vld [vmem:[%s11276_s28 + $0x2b0] sm:$0xff] }
  0x2b   : > { %v1434_v44 = vld [vmem:[%s11276_s28 + $0x2c0] sm:$0xff]  ;;  %1431 = vst [vmem:[%s11284_s29 + $0x150] sm:$0xff] %v1430_v42  ;;  %1433 = vst [vmem:[%s11284_s29 + $0x158] sm:$0xff] %v1432_v43  ;;  %v1436_v45 = vld [vmem:[%s11276_s28 + $0x2d0] sm:$0xff] }
  0x2c   : > { %1435 = vst [vmem:[%s11284_s29 + $0x160] sm:$0xff] %v1434_v44  ;;  %v1438_v46 = vld [vmem:[%s11276_s28 + $0x2e0] sm:$0xff]  ;;  %v1440_v47 = vld [vmem:[%s11276_s28 + $0x2f0] sm:$0xff]  ;;  %1437 = vst [vmem:[%s11284_s29 + $0x168] sm:$0xff] %v1436_v45 }
  0x2d   : > { %1439 = vst [vmem:[%s11284_s29 + $0x170] sm:$0xff] %v1438_v46  ;;  %1441 = vst [vmem:[%s11284_s29 + $0x178] sm:$0xff] %v1440_v47  ;;  %v1442_v48 = vld [vmem:[%s11276_s28 + $0x300] sm:$0xff]  ;;  %v1444_v49 = vld [vmem:[%s11276_s28 + $0x310] sm:$0xff] }
  0x2e   : > { %v1446_v50 = vld [vmem:[%s11276_s28 + $0x320] sm:$0xff]  ;;  %1443 = vst [vmem:[%s11284_s29 + $0x180] sm:$0xff] %v1442_v48  ;;  %1445 = vst [vmem:[%s11284_s29 + $0x188] sm:$0xff] %v1444_v49  ;;  %v1448_v51 = vld [vmem:[%s11276_s28 + $0x330] sm:$0xff] }
  0x2f   : > { %1447 = vst [vmem:[%s11284_s29 + $0x190] sm:$0xff] %v1446_v50  ;;  %v1450_v52 = vld [vmem:[%s11276_s28 + $0x340] sm:$0xff]  ;;  %v1452_v53 = vld [vmem:[%s11276_s28 + $0x350] sm:$0xff]  ;;  %1449 = vst [vmem:[%s11284_s29 + $0x198] sm:$0xff] %v1448_v51 }
  0x30   : > { %1451 = vst [vmem:[%s11284_s29 + $0x1a0] sm:$0xff] %v1450_v52  ;;  %1453 = vst [vmem:[%s11284_s29 + $0x1a8] sm:$0xff] %v1452_v53  ;;  %v1454_v54 = vld [vmem:[%s11276_s28 + $0x360] sm:$0xff]  ;;  %v1456_v55 = vld [vmem:[%s11276_s28 + $0x370] sm:$0xff] }
  0x31   : > { %v1458_v56 = vld [vmem:[%s11276_s28 + $0x380] sm:$0xff]  ;;  %1455 = vst [vmem:[%s11284_s29 + $0x1b0] sm:$0xff] %v1454_v54  ;;  %1457 = vst [vmem:[%s11284_s29 + $0x1b8] sm:$0xff] %v1456_v55  ;;  %v1460_v57 = vld [vmem:[%s11276_s28 + $0x390] sm:$0xff] }
  0x32   : > { %1459 = vst [vmem:[%s11284_s29 + $0x1c0] sm:$0xff] %v1458_v56  ;;  %v1462_v58 = vld [vmem:[%s11276_s28 + $0x3a0] sm:$0xff]  ;;  %v1464_v59 = vld [vmem:[%s11276_s28 + $0x3b0] sm:$0xff]  ;;  %1461 = vst [vmem:[%s11284_s29 + $0x1c8] sm:$0xff] %v1460_v57 }
  0x33   : > { %1463 = vst [vmem:[%s11284_s29 + $0x1d0] sm:$0xff] %v1462_v58  ;;  %1465 = vst [vmem:[%s11284_s29 + $0x1d8] sm:$0xff] %v1464_v59  ;;  %v1466_v60 = vld [vmem:[%s11276_s28 + $0x3c0] sm:$0xff]  ;;  %v1468_v61 = vld [vmem:[%s11276_s28 + $0x3d0] sm:$0xff] }
  0x34   : > { %v1470_v62 = vld [vmem:[%s11276_s28 + $0x3e0] sm:$0xff]  ;;  %1467 = vst [vmem:[%s11284_s29 + $0x1e0] sm:$0xff] %v1466_v60  ;;  %1469 = vst [vmem:[%s11284_s29 + $0x1e8] sm:$0xff] %v1468_v61  ;;  %v1472_v63 = vld [vmem:[%s11276_s28 + $0x3f0] sm:$0xff] }
  0x35   : > { %1471 = vst [vmem:[%s11284_s29 + $0x1f0] sm:$0xff] %v1470_v62  ;;  %v1474_v0 = vld [vmem:[%s11276_s28 + $0x400] sm:$0xff]  ;;  %v1476_v1 = vld [vmem:[%s11276_s28 + $0x410] sm:$0xff]  ;;  %1473 = vst [vmem:[%s11284_s29 + $0x1f8] sm:$0xff] %v1472_v63 }
  0x36   : > { %1475 = vst [vmem:[%s11284_s29 + $0x200] sm:$0xff] %v1474_v0  ;;  %1477 = vst [vmem:[%s11284_s29 + $0x208] sm:$0xff] %v1476_v1  ;;  %v1478_v2 = vld [vmem:[%s11276_s28 + $0x420] sm:$0xff]  ;;  %v1480_v3 = vld [vmem:[%s11276_s28 + $0x430] sm:$0xff] }
  0x37   : > { %v1482_v4 = vld [vmem:[%s11276_s28 + $0x440] sm:$0xff]  ;;  %1479 = vst [vmem:[%s11284_s29 + $0x210] sm:$0xff] %v1478_v2  ;;  %1481 = vst [vmem:[%s11284_s29 + $0x218] sm:$0xff] %v1480_v3  ;;  %v1484_v5 = vld [vmem:[%s11276_s28 + $0x450] sm:$0xff] }
  0x38   : > { %1483 = vst [vmem:[%s11284_s29 + $0x220] sm:$0xff] %v1482_v4  ;;  %v1486_v6 = vld [vmem:[%s11276_s28 + $0x460] sm:$0xff]  ;;  %v1488_v7 = vld [vmem:[%s11276_s28 + $0x470] sm:$0xff]  ;;  %1485 = vst [vmem:[%s11284_s29 + $0x228] sm:$0xff] %v1484_v5 }
  0x39   : > { %1487 = vst [vmem:[%s11284_s29 + $0x230] sm:$0xff] %v1486_v6  ;;  %1489 = vst [vmem:[%s11284_s29 + $0x238] sm:$0xff] %v1488_v7  ;;  %v1490_v8 = vld [vmem:[%s11276_s28 + $0x480] sm:$0xff]  ;;  %v1492_v9 = vld [vmem:[%s11276_s28 + $0x490] sm:$0xff] }
  0x3a   : > { %v1494_v10 = vld [vmem:[%s11276_s28 + $0x4a0] sm:$0xff]  ;;  %1491 = vst [vmem:[%s11284_s29 + $0x240] sm:$0xff] %v1490_v8  ;;  %1493 = vst [vmem:[%s11284_s29 + $0x248] sm:$0xff] %v1492_v9  ;;  %v1496_v11 = vld [vmem:[%s11276_s28 + $0x4b0] sm:$0xff] }
  0x3b   : > { %1495 = vst [vmem:[%s11284_s29 + $0x250] sm:$0xff] %v1494_v10  ;;  %v1498_v12 = vld [vmem:[%s11276_s28 + $0x4c0] sm:$0xff]  ;;  %v1500_v13 = vld [vmem:[%s11276_s28 + $0x4d0] sm:$0xff]  ;;  %1497 = vst [vmem:[%s11284_s29 + $0x258] sm:$0xff] %v1496_v11 }
  0x3c   : > { %1499 = vst [vmem:[%s11284_s29 + $0x260] sm:$0xff] %v1498_v12  ;;  %1501 = vst [vmem:[%s11284_s29 + $0x268] sm:$0xff] %v1500_v13  ;;  %v1502_v14 = vld [vmem:[%s11276_s28 + $0x4e0] sm:$0xff]  ;;  %v1504_v15 = vld [vmem:[%s11276_s28 + $0x4f0] sm:$0xff] }
  0x3d   : > { %v1506_v16 = vld [vmem:[%s11276_s28 + $0x500] sm:$0xff]  ;;  %1503 = vst [vmem:[%s11284_s29 + $0x270] sm:$0xff] %v1502_v14  ;;  %1505 = vst [vmem:[%s11284_s29 + $0x278] sm:$0xff] %v1504_v15  ;;  %v1508_v17 = vld [vmem:[%s11276_s28 + $0x510] sm:$0xff] }
  0x3e   : > { %1507 = vst [vmem:[%s11284_s29 + $0x280] sm:$0xff] %v1506_v16  ;;  %v1510_v18 = vld [vmem:[%s11276_s28 + $0x520] sm:$0xff]  ;;  %v1512_v19 = vld [vmem:[%s11276_s28 + $0x530] sm:$0xff]  ;;  %1509 = vst [vmem:[%s11284_s29 + $0x288] sm:$0xff] %v1508_v17 }
  0x3f   : > { %1511 = vst [vmem:[%s11284_s29 + $0x290] sm:$0xff] %v1510_v18  ;;  %1513 = vst [vmem:[%s11284_s29 + $0x298] sm:$0xff] %v1512_v19  ;;  %v1514_v20 = vld [vmem:[%s11276_s28 + $0x540] sm:$0xff]  ;;  %v1516_v21 = vld [vmem:[%s11276_s28 + $0x550] sm:$0xff] }
  0x40   : > { %v1518_v22 = vld [vmem:[%s11276_s28 + $0x560] sm:$0xff]  ;;  %1515 = vst [vmem:[%s11284_s29 + $0x2a0] sm:$0xff] %v1514_v20  ;;  %1517 = vst [vmem:[%s11284_s29 + $0x2a8] sm:$0xff] %v1516_v21  ;;  %v1520_v23 = vld [vmem:[%s11276_s28 + $0x570] sm:$0xff] }
  0x41   : > { %1519 = vst [vmem:[%s11284_s29 + $0x2b0] sm:$0xff] %v1518_v22  ;;  %v1522_v24 = vld [vmem:[%s11276_s28 + $0x580] sm:$0xff]  ;;  %v1524_v25 = vld [vmem:[%s11276_s28 + $0x590] sm:$0xff]  ;;  %1521 = vst [vmem:[%s11284_s29 + $0x2b8] sm:$0xff] %v1520_v23 }
  0x42   : > { %1523 = vst [vmem:[%s11284_s29 + $0x2c0] sm:$0xff] %v1522_v24  ;;  %1525 = vst [vmem:[%s11284_s29 + $0x2c8] sm:$0xff] %v1524_v25  ;;  %v1526_v26 = vld [vmem:[%s11276_s28 + $0x5a0] sm:$0xff]  ;;  %v1528_v27 = vld [vmem:[%s11276_s28 + $0x5b0] sm:$0xff] }
  0x43   : > { %v1530_v28 = vld [vmem:[%s11276_s28 + $0x5c0] sm:$0xff]  ;;  %1527 = vst [vmem:[%s11284_s29 + $0x2d0] sm:$0xff] %v1526_v26  ;;  %1529 = vst [vmem:[%s11284_s29 + $0x2d8] sm:$0xff] %v1528_v27  ;;  %v1532_v29 = vld [vmem:[%s11276_s28 + $0x5d0] sm:$0xff] }
  0x44   : > { %1531 = vst [vmem:[%s11284_s29 + $0x2e0] sm:$0xff] %v1530_v28  ;;  %v1534_v30 = vld [vmem:[%s11276_s28 + $0x5e0] sm:$0xff]  ;;  %v1536_v31 = vld [vmem:[%s11276_s28 + $0x5f0] sm:$0xff]  ;;  %1533 = vst [vmem:[%s11284_s29 + $0x2e8] sm:$0xff] %v1532_v29 }
  0x45   : > { %1535 = vst [vmem:[%s11284_s29 + $0x2f0] sm:$0xff] %v1534_v30  ;;  %1537 = vst [vmem:[%s11284_s29 + $0x2f8] sm:$0xff] %v1536_v31  ;;  %v1538_v32 = vld [vmem:[%s11276_s28 + $0x600] sm:$0xff]  ;;  %v1540_v33 = vld [vmem:[%s11276_s28 + $0x610] sm:$0xff] }
  0x46   : > { %v1542_v34 = vld [vmem:[%s11276_s28 + $0x620] sm:$0xff]  ;;  %1539 = vst [vmem:[%s11284_s29 + $0x300] sm:$0xff] %v1538_v32  ;;  %1541 = vst [vmem:[%s11284_s29 + $0x308] sm:$0xff] %v1540_v33  ;;  %v1544_v35 = vld [vmem:[%s11276_s28 + $0x630] sm:$0xff] }
  0x47   : > { %1543 = vst [vmem:[%s11284_s29 + $0x310] sm:$0xff] %v1542_v34  ;;  %v1546_v36 = vld [vmem:[%s11276_s28 + $0x640] sm:$0xff]  ;;  %v1548_v37 = vld [vmem:[%s11276_s28 + $0x650] sm:$0xff]  ;;  %1545 = vst [vmem:[%s11284_s29 + $0x318] sm:$0xff] %v1544_v35 }
  0x48   : > { %1547 = vst [vmem:[%s11284_s29 + $0x320] sm:$0xff] %v1546_v36  ;;  %1549 = vst [vmem:[%s11284_s29 + $0x328] sm:$0xff] %v1548_v37  ;;  %v1550_v38 = vld [vmem:[%s11276_s28 + $0x660] sm:$0xff]  ;;  %v1552_v39 = vld [vmem:[%s11276_s28 + $0x670] sm:$0xff] }
  0x49   : > { %v1554_v40 = vld [vmem:[%s11276_s28 + $0x680] sm:$0xff]  ;;  %1551 = vst [vmem:[%s11284_s29 + $0x330] sm:$0xff] %v1550_v38  ;;  %1553 = vst [vmem:[%s11284_s29 + $0x338] sm:$0xff] %v1552_v39  ;;  %v1556_v41 = vld [vmem:[%s11276_s28 + $0x690] sm:$0xff] }
  0x4a   : > { %1555 = vst [vmem:[%s11284_s29 + $0x340] sm:$0xff] %v1554_v40  ;;  %v1558_v42 = vld [vmem:[%s11276_s28 + $0x6a0] sm:$0xff]  ;;  %v1560_v43 = vld [vmem:[%s11276_s28 + $0x6b0] sm:$0xff]  ;;  %1557 = vst [vmem:[%s11284_s29 + $0x348] sm:$0xff] %v1556_v41 }
  0x4b   : > { %1559 = vst [vmem:[%s11284_s29 + $0x350] sm:$0xff] %v1558_v42  ;;  %1561 = vst [vmem:[%s11284_s29 + $0x358] sm:$0xff] %v1560_v43  ;;  %v1562_v44 = vld [vmem:[%s11276_s28 + $0x6c0] sm:$0xff]  ;;  %v1564_v45 = vld [vmem:[%s11276_s28 + $0x6d0] sm:$0xff] }
  0x4c   : > { %v1566_v46 = vld [vmem:[%s11276_s28 + $0x6e0] sm:$0xff]  ;;  %1563 = vst [vmem:[%s11284_s29 + $0x360] sm:$0xff] %v1562_v44  ;;  %1565 = vst [vmem:[%s11284_s29 + $0x368] sm:$0xff] %v1564_v45  ;;  %v1568_v47 = vld [vmem:[%s11276_s28 + $0x6f0] sm:$0xff] }
  0x4d   : > { %1567 = vst [vmem:[%s11284_s29 + $0x370] sm:$0xff] %v1566_v46  ;;  %v1570_v48 = vld [vmem:[%s11276_s28 + $0x700] sm:$0xff]  ;;  %v1572_v49 = vld [vmem:[%s11276_s28 + $0x710] sm:$0xff]  ;;  %1569 = vst [vmem:[%s11284_s29 + $0x378] sm:$0xff] %v1568_v47 }
  0x4e   : > { %1571 = vst [vmem:[%s11284_s29 + $0x380] sm:$0xff] %v1570_v48  ;;  %1573 = vst [vmem:[%s11284_s29 + $0x388] sm:$0xff] %v1572_v49  ;;  %v1574_v50 = vld [vmem:[%s11276_s28 + $0x720] sm:$0xff]  ;;  %v1576_v51 = vld [vmem:[%s11276_s28 + $0x730] sm:$0xff] }
  0x4f   : > { %v1578_v52 = vld [vmem:[%s11276_s28 + $0x740] sm:$0xff]  ;;  %1575 = vst [vmem:[%s11284_s29 + $0x390] sm:$0xff] %v1574_v50  ;;  %1577 = vst [vmem:[%s11284_s29 + $0x398] sm:$0xff] %v1576_v51  ;;  %v1580_v53 = vld [vmem:[%s11276_s28 + $0x750] sm:$0xff] }
  0x50   : > { %1579 = vst [vmem:[%s11284_s29 + $0x3a0] sm:$0xff] %v1578_v52  ;;  %v1582_v54 = vld [vmem:[%s11276_s28 + $0x760] sm:$0xff]  ;;  %v1584_v55 = vld [vmem:[%s11276_s28 + $0x770] sm:$0xff]  ;;  %1581 = vst [vmem:[%s11284_s29 + $0x3a8] sm:$0xff] %v1580_v53 }
  0x51   : > { %1583 = vst [vmem:[%s11284_s29 + $0x3b0] sm:$0xff] %v1582_v54  ;;  %1585 = vst [vmem:[%s11284_s29 + $0x3b8] sm:$0xff] %v1584_v55  ;;  %v1586_v56 = vld [vmem:[%s11276_s28 + $0x780] sm:$0xff]  ;;  %v1588_v57 = vld [vmem:[%s11276_s28 + $0x790] sm:$0xff] }
  0x52   : > { %v1590_v58 = vld [vmem:[%s11276_s28 + $0x7a0] sm:$0xff]  ;;  %1587 = vst [vmem:[%s11284_s29 + $0x3c0] sm:$0xff] %v1586_v56  ;;  %1589 = vst [vmem:[%s11284_s29 + $0x3c8] sm:$0xff] %v1588_v57  ;;  %v1592_v59 = vld [vmem:[%s11276_s28 + $0x7b0] sm:$0xff] }
  0x53   : > { %1591 = vst [vmem:[%s11284_s29 + $0x3d0] sm:$0xff] %v1590_v58  ;;  %v1594_v60 = vld [vmem:[%s11276_s28 + $0x7c0] sm:$0xff]  ;;  %v1596_v61 = vld [vmem:[%s11276_s28 + $0x7d0] sm:$0xff]  ;;  %1593 = vst [vmem:[%s11284_s29 + $0x3d8] sm:$0xff] %v1592_v59 }
  0x54   : > { %1595 = vst [vmem:[%s11284_s29 + $0x3e0] sm:$0xff] %v1594_v60  ;;  %1597 = vst [vmem:[%s11284_s29 + $0x3e8] sm:$0xff] %v1596_v61  ;;  %v1598_v62 = vld [vmem:[%s11276_s28 + $0x7e0] sm:$0xff]  ;;  %v1600_v63 = vld [vmem:[%s11276_s28 + $0x7f0] sm:$0xff] }
  0x55   : > { %v1602_v0 = vld [vmem:[%s11276_s28 + $0x800] sm:$0xff]  ;;  %1599 = vst [vmem:[%s11284_s29 + $0x3f0] sm:$0xff] %v1598_v62  ;;  %1601 = vst [vmem:[%s11284_s29 + $0x3f8] sm:$0xff] %v1600_v63  ;;  %v1604_v1 = vld [vmem:[%s11276_s28 + $0x810] sm:$0xff] }
  0x56   : > { %1603 = vst [vmem:[%s11284_s29 + $0x400] sm:$0xff] %v1602_v0  ;;  %v1606_v2 = vld [vmem:[%s11276_s28 + $0x820] sm:$0xff]  ;;  %v1608_v3 = vld [vmem:[%s11276_s28 + $0x830] sm:$0xff]  ;;  %1605 = vst [vmem:[%s11284_s29 + $0x408] sm:$0xff] %v1604_v1 }
  0x57   : > { %1607 = vst [vmem:[%s11284_s29 + $0x410] sm:$0xff] %v1606_v2  ;;  %1609 = vst [vmem:[%s11284_s29 + $0x418] sm:$0xff] %v1608_v3  ;;  %v1610_v4 = vld [vmem:[%s11276_s28 + $0x840] sm:$0xff]  ;;  %v1612_v5 = vld [vmem:[%s11276_s28 + $0x850] sm:$0xff] }
  0x58   : > { %v1614_v6 = vld [vmem:[%s11276_s28 + $0x860] sm:$0xff]  ;;  %1611 = vst [vmem:[%s11284_s29 + $0x420] sm:$0xff] %v1610_v4  ;;  %1613 = vst [vmem:[%s11284_s29 + $0x428] sm:$0xff] %v1612_v5  ;;  %v1616_v7 = vld [vmem:[%s11276_s28 + $0x870] sm:$0xff] }
  0x59   : > { %1615 = vst [vmem:[%s11284_s29 + $0x430] sm:$0xff] %v1614_v6  ;;  %v1618_v8 = vld [vmem:[%s11276_s28 + $0x880] sm:$0xff]  ;;  %v1620_v9 = vld [vmem:[%s11276_s28 + $0x890] sm:$0xff]  ;;  %1617 = vst [vmem:[%s11284_s29 + $0x438] sm:$0xff] %v1616_v7 }
  0x5a   : > { %1619 = vst [vmem:[%s11284_s29 + $0x440] sm:$0xff] %v1618_v8  ;;  %1621 = vst [vmem:[%s11284_s29 + $0x448] sm:$0xff] %v1620_v9  ;;  %v1622_v10 = vld [vmem:[%s11276_s28 + $0x8a0] sm:$0xff]  ;;  %v1624_v11 = vld [vmem:[%s11276_s28 + $0x8b0] sm:$0xff] }
  0x5b   : > { %v1626_v12 = vld [vmem:[%s11276_s28 + $0x8c0] sm:$0xff]  ;;  %1623 = vst [vmem:[%s11284_s29 + $0x450] sm:$0xff] %v1622_v10  ;;  %1625 = vst [vmem:[%s11284_s29 + $0x458] sm:$0xff] %v1624_v11  ;;  %v1628_v13 = vld [vmem:[%s11276_s28 + $0x8d0] sm:$0xff] }
  0x5c   : > { %1627 = vst [vmem:[%s11284_s29 + $0x460] sm:$0xff] %v1626_v12  ;;  %v1630_v14 = vld [vmem:[%s11276_s28 + $0x8e0] sm:$0xff]  ;;  %v1632_v15 = vld [vmem:[%s11276_s28 + $0x8f0] sm:$0xff]  ;;  %1629 = vst [vmem:[%s11284_s29 + $0x468] sm:$0xff] %v1628_v13 }
  0x5d   : > { %1631 = vst [vmem:[%s11284_s29 + $0x470] sm:$0xff] %v1630_v14  ;;  %1633 = vst [vmem:[%s11284_s29 + $0x478] sm:$0xff] %v1632_v15  ;;  %v1634_v16 = vld [vmem:[%s11276_s28 + $0x900] sm:$0xff]  ;;  %v1636_v17 = vld [vmem:[%s11276_s28 + $0x910] sm:$0xff] }
  0x5e   : > { %v1638_v18 = vld [vmem:[%s11276_s28 + $0x920] sm:$0xff]  ;;  %1635 = vst [vmem:[%s11284_s29 + $0x480] sm:$0xff] %v1634_v16  ;;  %1637 = vst [vmem:[%s11284_s29 + $0x488] sm:$0xff] %v1636_v17  ;;  %v1640_v19 = vld [vmem:[%s11276_s28 + $0x930] sm:$0xff] }
  0x5f   : > { %1639 = vst [vmem:[%s11284_s29 + $0x490] sm:$0xff] %v1638_v18  ;;  %v1642_v20 = vld [vmem:[%s11276_s28 + $0x940] sm:$0xff]  ;;  %v1644_v21 = vld [vmem:[%s11276_s28 + $0x950] sm:$0xff]  ;;  %1641 = vst [vmem:[%s11284_s29 + $0x498] sm:$0xff] %v1640_v19 }
  0x60   : > { %1643 = vst [vmem:[%s11284_s29 + $0x4a0] sm:$0xff] %v1642_v20  ;;  %1645 = vst [vmem:[%s11284_s29 + $0x4a8] sm:$0xff] %v1644_v21  ;;  %v1646_v22 = vld [vmem:[%s11276_s28 + $0x960] sm:$0xff]  ;;  %v1648_v23 = vld [vmem:[%s11276_s28 + $0x970] sm:$0xff] }
  0x61   : > { %v1650_v24 = vld [vmem:[%s11276_s28 + $0x980] sm:$0xff]  ;;  %1647 = vst [vmem:[%s11284_s29 + $0x4b0] sm:$0xff] %v1646_v22  ;;  %1649 = vst [vmem:[%s11284_s29 + $0x4b8] sm:$0xff] %v1648_v23  ;;  %v1652_v25 = vld [vmem:[%s11276_s28 + $0x990] sm:$0xff] }
  0x62   : > { %1651 = vst [vmem:[%s11284_s29 + $0x4c0] sm:$0xff] %v1650_v24  ;;  %v1654_v26 = vld [vmem:[%s11276_s28 + $0x9a0] sm:$0xff]  ;;  %v1656_v27 = vld [vmem:[%s11276_s28 + $0x9b0] sm:$0xff]  ;;  %1653 = vst [vmem:[%s11284_s29 + $0x4c8] sm:$0xff] %v1652_v25 }
  0x63   : > { %1655 = vst [vmem:[%s11284_s29 + $0x4d0] sm:$0xff] %v1654_v26  ;;  %1657 = vst [vmem:[%s11284_s29 + $0x4d8] sm:$0xff] %v1656_v27  ;;  %v1658_v28 = vld [vmem:[%s11276_s28 + $0x9c0] sm:$0xff]  ;;  %v1660_v29 = vld [vmem:[%s11276_s28 + $0x9d0] sm:$0xff] }
  0x64   : > { %v1662_v30 = vld [vmem:[%s11276_s28 + $0x9e0] sm:$0xff]  ;;  %1659 = vst [vmem:[%s11284_s29 + $0x4e0] sm:$0xff] %v1658_v28  ;;  %1661 = vst [vmem:[%s11284_s29 + $0x4e8] sm:$0xff] %v1660_v29  ;;  %v1664_v31 = vld [vmem:[%s11276_s28 + $0x9f0] sm:$0xff] }
  0x65   : > { %1663 = vst [vmem:[%s11284_s29 + $0x4f0] sm:$0xff] %v1662_v30  ;;  %v1666_v32 = vld [vmem:[%s11276_s28 + $0xa00] sm:$0xff]  ;;  %v1668_v33 = vld [vmem:[%s11276_s28 + $0xa10] sm:$0xff]  ;;  %1665 = vst [vmem:[%s11284_s29 + $0x4f8] sm:$0xff] %v1664_v31 }
  0x66   : > { %1667 = vst [vmem:[%s11284_s29 + $0x500] sm:$0xff] %v1666_v32  ;;  %1669 = vst [vmem:[%s11284_s29 + $0x508] sm:$0xff] %v1668_v33  ;;  %v1670_v34 = vld [vmem:[%s11276_s28 + $0xa20] sm:$0xff]  ;;  %v1672_v35 = vld [vmem:[%s11276_s28 + $0xa30] sm:$0xff] }
  0x67   : > { %v1674_v36 = vld [vmem:[%s11276_s28 + $0xa40] sm:$0xff]  ;;  %1671 = vst [vmem:[%s11284_s29 + $0x510] sm:$0xff] %v1670_v34  ;;  %1673 = vst [vmem:[%s11284_s29 + $0x518] sm:$0xff] %v1672_v35  ;;  %v1676_v37 = vld [vmem:[%s11276_s28 + $0xa50] sm:$0xff] }
  0x68   : > { %1675 = vst [vmem:[%s11284_s29 + $0x520] sm:$0xff] %v1674_v36  ;;  %v1678_v38 = vld [vmem:[%s11276_s28 + $0xa60] sm:$0xff]  ;;  %v1680_v39 = vld [vmem:[%s11276_s28 + $0xa70] sm:$0xff]  ;;  %1677 = vst [vmem:[%s11284_s29 + $0x528] sm:$0xff] %v1676_v37 }
  0x69   : > { %1679 = vst [vmem:[%s11284_s29 + $0x530] sm:$0xff] %v1678_v38  ;;  %1681 = vst [vmem:[%s11284_s29 + $0x538] sm:$0xff] %v1680_v39  ;;  %v1682_v40 = vld [vmem:[%s11276_s28 + $0xa80] sm:$0xff]  ;;  %v1684_v41 = vld [vmem:[%s11276_s28 + $0xa90] sm:$0xff] }
  0x6a   : > { %v1686_v42 = vld [vmem:[%s11276_s28 + $0xaa0] sm:$0xff]  ;;  %1683 = vst [vmem:[%s11284_s29 + $0x540] sm:$0xff] %v1682_v40  ;;  %1685 = vst [vmem:[%s11284_s29 + $0x548] sm:$0xff] %v1684_v41  ;;  %v1688_v43 = vld [vmem:[%s11276_s28 + $0xab0] sm:$0xff] }
  0x6b   : > { %1687 = vst [vmem:[%s11284_s29 + $0x550] sm:$0xff] %v1686_v42  ;;  %v1690_v44 = vld [vmem:[%s11276_s28 + $0xac0] sm:$0xff]  ;;  %v1692_v45 = vld [vmem:[%s11276_s28 + $0xad0] sm:$0xff]  ;;  %1689 = vst [vmem:[%s11284_s29 + $0x558] sm:$0xff] %v1688_v43 }
  0x6c   : > { %1691 = vst [vmem:[%s11284_s29 + $0x560] sm:$0xff] %v1690_v44  ;;  %1693 = vst [vmem:[%s11284_s29 + $0x568] sm:$0xff] %v1692_v45  ;;  %v1694_v46 = vld [vmem:[%s11276_s28 + $0xae0] sm:$0xff]  ;;  %v1696_v47 = vld [vmem:[%s11276_s28 + $0xaf0] sm:$0xff] }
  0x6d   : > { %v1698_v48 = vld [vmem:[%s11276_s28 + $0xb00] sm:$0xff]  ;;  %1695 = vst [vmem:[%s11284_s29 + $0x570] sm:$0xff] %v1694_v46  ;;  %1697 = vst [vmem:[%s11284_s29 + $0x578] sm:$0xff] %v1696_v47  ;;  %v1700_v49 = vld [vmem:[%s11276_s28 + $0xb10] sm:$0xff] }
  0x6e   : > { %1699 = vst [vmem:[%s11284_s29 + $0x580] sm:$0xff] %v1698_v48  ;;  %v1702_v50 = vld [vmem:[%s11276_s28 + $0xb20] sm:$0xff]  ;;  %v1704_v51 = vld [vmem:[%s11276_s28 + $0xb30] sm:$0xff]  ;;  %1701 = vst [vmem:[%s11284_s29 + $0x588] sm:$0xff] %v1700_v49 }
  0x6f   : > { %1703 = vst [vmem:[%s11284_s29 + $0x590] sm:$0xff] %v1702_v50  ;;  %1705 = vst [vmem:[%s11284_s29 + $0x598] sm:$0xff] %v1704_v51  ;;  %v1706_v52 = vld [vmem:[%s11276_s28 + $0xb40] sm:$0xff]  ;;  %v1708_v53 = vld [vmem:[%s11276_s28 + $0xb50] sm:$0xff] }
  0x70   : > { %v1710_v54 = vld [vmem:[%s11276_s28 + $0xb60] sm:$0xff]  ;;  %1707 = vst [vmem:[%s11284_s29 + $0x5a0] sm:$0xff] %v1706_v52  ;;  %1709 = vst [vmem:[%s11284_s29 + $0x5a8] sm:$0xff] %v1708_v53  ;;  %v1712_v55 = vld [vmem:[%s11276_s28 + $0xb70] sm:$0xff] }
  0x71   : > { %1711 = vst [vmem:[%s11284_s29 + $0x5b0] sm:$0xff] %v1710_v54  ;;  %v1714_v56 = vld [vmem:[%s11276_s28 + $0xb80] sm:$0xff]  ;;  %v1716_v57 = vld [vmem:[%s11276_s28 + $0xb90] sm:$0xff]  ;;  %1713 = vst [vmem:[%s11284_s29 + $0x5b8] sm:$0xff] %v1712_v55 }
  0x72   : > { %1715 = vst [vmem:[%s11284_s29 + $0x5c0] sm:$0xff] %v1714_v56  ;;  %1717 = vst [vmem:[%s11284_s29 + $0x5c8] sm:$0xff] %v1716_v57  ;;  %v1718_v58 = vld [vmem:[%s11276_s28 + $0xba0] sm:$0xff]  ;;  %v1720_v59 = vld [vmem:[%s11276_s28 + $0xbb0] sm:$0xff] }
  0x73   : > { %v1722_v60 = vld [vmem:[%s11276_s28 + $0xbc0] sm:$0xff]  ;;  %1719 = vst [vmem:[%s11284_s29 + $0x5d0] sm:$0xff] %v1718_v58  ;;  %1721 = vst [vmem:[%s11284_s29 + $0x5d8] sm:$0xff] %v1720_v59  ;;  %v1724_v61 = vld [vmem:[%s11276_s28 + $0xbd0] sm:$0xff] }
  0x74   : > { %1723 = vst [vmem:[%s11284_s29 + $0x5e0] sm:$0xff] %v1722_v60  ;;  %v1726_v62 = vld [vmem:[%s11276_s28 + $0xbe0] sm:$0xff]  ;;  %v1728_v63 = vld [vmem:[%s11276_s28 + $0xbf0] sm:$0xff]  ;;  %1725 = vst [vmem:[%s11284_s29 + $0x5e8] sm:$0xff] %v1724_v61 }
  0x75   : > { %1727 = vst [vmem:[%s11284_s29 + $0x5f0] sm:$0xff] %v1726_v62  ;;  %1729 = vst [vmem:[%s11284_s29 + $0x5f8] sm:$0xff] %v1728_v63  ;;  %v1730_v0 = vld [vmem:[%s11276_s28 + $0xc00] sm:$0xff]  ;;  %v1732_v1 = vld [vmem:[%s11276_s28 + $0xc10] sm:$0xff] }
  0x76   : > { %v1734_v2 = vld [vmem:[%s11276_s28 + $0xc20] sm:$0xff]  ;;  %1731 = vst [vmem:[%s11284_s29 + $0x600] sm:$0xff] %v1730_v0  ;;  %1733 = vst [vmem:[%s11284_s29 + $0x608] sm:$0xff] %v1732_v1  ;;  %v1736_v3 = vld [vmem:[%s11276_s28 + $0xc30] sm:$0xff] }
  0x77   : > { %1735 = vst [vmem:[%s11284_s29 + $0x610] sm:$0xff] %v1734_v2  ;;  %v1738_v4 = vld [vmem:[%s11276_s28 + $0xc40] sm:$0xff]  ;;  %v1740_v5 = vld [vmem:[%s11276_s28 + $0xc50] sm:$0xff]  ;;  %1737 = vst [vmem:[%s11284_s29 + $0x618] sm:$0xff] %v1736_v3 }
  0x78   : > { %1739 = vst [vmem:[%s11284_s29 + $0x620] sm:$0xff] %v1738_v4  ;;  %1741 = vst [vmem:[%s11284_s29 + $0x628] sm:$0xff] %v1740_v5  ;;  %v1742_v6 = vld [vmem:[%s11276_s28 + $0xc60] sm:$0xff]  ;;  %v1744_v7 = vld [vmem:[%s11276_s28 + $0xc70] sm:$0xff] }
  0x79   : > { %v1746_v8 = vld [vmem:[%s11276_s28 + $0xc80] sm:$0xff]  ;;  %1743 = vst [vmem:[%s11284_s29 + $0x630] sm:$0xff] %v1742_v6  ;;  %1745 = vst [vmem:[%s11284_s29 + $0x638] sm:$0xff] %v1744_v7  ;;  %v1748_v9 = vld [vmem:[%s11276_s28 + $0xc90] sm:$0xff] }
  0x7a   : > { %1747 = vst [vmem:[%s11284_s29 + $0x640] sm:$0xff] %v1746_v8  ;;  %v1750_v10 = vld [vmem:[%s11276_s28 + $0xca0] sm:$0xff]  ;;  %v1752_v11 = vld [vmem:[%s11276_s28 + $0xcb0] sm:$0xff]  ;;  %1749 = vst [vmem:[%s11284_s29 + $0x648] sm:$0xff] %v1748_v9 }
  0x7b   : > { %1751 = vst [vmem:[%s11284_s29 + $0x650] sm:$0xff] %v1750_v10  ;;  %1753 = vst [vmem:[%s11284_s29 + $0x658] sm:$0xff] %v1752_v11  ;;  %v1754_v12 = vld [vmem:[%s11276_s28 + $0xcc0] sm:$0xff]  ;;  %v1756_v13 = vld [vmem:[%s11276_s28 + $0xcd0] sm:$0xff] }
  0x7c   : > { %v1758_v14 = vld [vmem:[%s11276_s28 + $0xce0] sm:$0xff]  ;;  %1755 = vst [vmem:[%s11284_s29 + $0x660] sm:$0xff] %v1754_v12  ;;  %1757 = vst [vmem:[%s11284_s29 + $0x668] sm:$0xff] %v1756_v13  ;;  %v1760_v15 = vld [vmem:[%s11276_s28 + $0xcf0] sm:$0xff] }
  0x7d   : > { %1759 = vst [vmem:[%s11284_s29 + $0x670] sm:$0xff] %v1758_v14  ;;  %v1762_v16 = vld [vmem:[%s11276_s28 + $0xd00] sm:$0xff]  ;;  %v1764_v17 = vld [vmem:[%s11276_s28 + $0xd10] sm:$0xff]  ;;  %1761 = vst [vmem:[%s11284_s29 + $0x678] sm:$0xff] %v1760_v15 }
  0x7e   : > { %1763 = vst [vmem:[%s11284_s29 + $0x680] sm:$0xff] %v1762_v16  ;;  %1765 = vst [vmem:[%s11284_s29 + $0x688] sm:$0xff] %v1764_v17  ;;  %v1766_v18 = vld [vmem:[%s11276_s28 + $0xd20] sm:$0xff]  ;;  %v1768_v19 = vld [vmem:[%s11276_s28 + $0xd30] sm:$0xff] }
  0x7f   : > { %v1770_v20 = vld [vmem:[%s11276_s28 + $0xd40] sm:$0xff]  ;;  %1767 = vst [vmem:[%s11284_s29 + $0x690] sm:$0xff] %v1766_v18  ;;  %1769 = vst [vmem:[%s11284_s29 + $0x698] sm:$0xff] %v1768_v19  ;;  %v1772_v21 = vld [vmem:[%s11276_s28 + $0xd50] sm:$0xff] }
  0x80   : > { %1771 = vst [vmem:[%s11284_s29 + $0x6a0] sm:$0xff] %v1770_v20  ;;  %v1774_v22 = vld [vmem:[%s11276_s28 + $0xd60] sm:$0xff]  ;;  %v1776_v23 = vld [vmem:[%s11276_s28 + $0xd70] sm:$0xff]  ;;  %1773 = vst [vmem:[%s11284_s29 + $0x6a8] sm:$0xff] %v1772_v21 }
  0x81   : > { %1775 = vst [vmem:[%s11284_s29 + $0x6b0] sm:$0xff] %v1774_v22  ;;  %1777 = vst [vmem:[%s11284_s29 + $0x6b8] sm:$0xff] %v1776_v23  ;;  %v1778_v24 = vld [vmem:[%s11276_s28 + $0xd80] sm:$0xff]  ;;  %v1780_v25 = vld [vmem:[%s11276_s28 + $0xd90] sm:$0xff] }
  0x82   : > { %v1782_v26 = vld [vmem:[%s11276_s28 + $0xda0] sm:$0xff]  ;;  %1779 = vst [vmem:[%s11284_s29 + $0x6c0] sm:$0xff] %v1778_v24  ;;  %1781 = vst [vmem:[%s11284_s29 + $0x6c8] sm:$0xff] %v1780_v25  ;;  %v1784_v27 = vld [vmem:[%s11276_s28 + $0xdb0] sm:$0xff] }
  0x83   : > { %1783 = vst [vmem:[%s11284_s29 + $0x6d0] sm:$0xff] %v1782_v26  ;;  %v1786_v28 = vld [vmem:[%s11276_s28 + $0xdc0] sm:$0xff]  ;;  %v1788_v29 = vld [vmem:[%s11276_s28 + $0xdd0] sm:$0xff]  ;;  %1785 = vst [vmem:[%s11284_s29 + $0x6d8] sm:$0xff] %v1784_v27 }
  0x84   : > { %1787 = vst [vmem:[%s11284_s29 + $0x6e0] sm:$0xff] %v1786_v28  ;;  %1789 = vst [vmem:[%s11284_s29 + $0x6e8] sm:$0xff] %v1788_v29  ;;  %v1790_v30 = vld [vmem:[%s11276_s28 + $0xde0] sm:$0xff]  ;;  %v1792_v31 = vld [vmem:[%s11276_s28 + $0xdf0] sm:$0xff] }
  0x85   : > { %v1794_v32 = vld [vmem:[%s11276_s28 + $0xe00] sm:$0xff]  ;;  %1791 = vst [vmem:[%s11284_s29 + $0x6f0] sm:$0xff] %v1790_v30  ;;  %1793 = vst [vmem:[%s11284_s29 + $0x6f8] sm:$0xff] %v1792_v31  ;;  %v1796_v33 = vld [vmem:[%s11276_s28 + $0xe10] sm:$0xff] }
  0x86   : > { %1795 = vst [vmem:[%s11284_s29 + $0x700] sm:$0xff] %v1794_v32  ;;  %v1798_v34 = vld [vmem:[%s11276_s28 + $0xe20] sm:$0xff]  ;;  %v1800_v35 = vld [vmem:[%s11276_s28 + $0xe30] sm:$0xff]  ;;  %1797 = vst [vmem:[%s11284_s29 + $0x708] sm:$0xff] %v1796_v33 }
  0x87   : > { %1799 = vst [vmem:[%s11284_s29 + $0x710] sm:$0xff] %v1798_v34  ;;  %1801 = vst [vmem:[%s11284_s29 + $0x718] sm:$0xff] %v1800_v35  ;;  %v1802_v36 = vld [vmem:[%s11276_s28 + $0xe40] sm:$0xff]  ;;  %v1804_v37 = vld [vmem:[%s11276_s28 + $0xe50] sm:$0xff] }
  0x88   : > { %v1806_v38 = vld [vmem:[%s11276_s28 + $0xe60] sm:$0xff]  ;;  %1803 = vst [vmem:[%s11284_s29 + $0x720] sm:$0xff] %v1802_v36  ;;  %1805 = vst [vmem:[%s11284_s29 + $0x728] sm:$0xff] %v1804_v37  ;;  %v1808_v39 = vld [vmem:[%s11276_s28 + $0xe70] sm:$0xff] }
  0x89   : > { %1807 = vst [vmem:[%s11284_s29 + $0x730] sm:$0xff] %v1806_v38  ;;  %v1810_v40 = vld [vmem:[%s11276_s28 + $0xe80] sm:$0xff]  ;;  %v1812_v41 = vld [vmem:[%s11276_s28 + $0xe90] sm:$0xff]  ;;  %1809 = vst [vmem:[%s11284_s29 + $0x738] sm:$0xff] %v1808_v39 }
  0x8a   : > { %1811 = vst [vmem:[%s11284_s29 + $0x740] sm:$0xff] %v1810_v40  ;;  %1813 = vst [vmem:[%s11284_s29 + $0x748] sm:$0xff] %v1812_v41  ;;  %v1814_v42 = vld [vmem:[%s11276_s28 + $0xea0] sm:$0xff]  ;;  %v1816_v43 = vld [vmem:[%s11276_s28 + $0xeb0] sm:$0xff] }
  0x8b   : > { %v1818_v44 = vld [vmem:[%s11276_s28 + $0xec0] sm:$0xff]  ;;  %1815 = vst [vmem:[%s11284_s29 + $0x750] sm:$0xff] %v1814_v42  ;;  %1817 = vst [vmem:[%s11284_s29 + $0x758] sm:$0xff] %v1816_v43  ;;  %v1820_v45 = vld [vmem:[%s11276_s28 + $0xed0] sm:$0xff] }
  0x8c   : > { %1819 = vst [vmem:[%s11284_s29 + $0x760] sm:$0xff] %v1818_v44  ;;  %v1822_v46 = vld [vmem:[%s11276_s28 + $0xee0] sm:$0xff]  ;;  %v1824_v47 = vld [vmem:[%s11276_s28 + $0xef0] sm:$0xff]  ;;  %1821 = vst [vmem:[%s11284_s29 + $0x768] sm:$0xff] %v1820_v45 }
  0x8d   : > { %1823 = vst [vmem:[%s11284_s29 + $0x770] sm:$0xff] %v1822_v46  ;;  %1825 = vst [vmem:[%s11284_s29 + $0x778] sm:$0xff] %v1824_v47  ;;  %v1826_v48 = vld [vmem:[%s11276_s28 + $0xf00] sm:$0xff]  ;;  %v1828_v49 = vld [vmem:[%s11276_s28 + $0xf10] sm:$0xff] }
  0x8e   : > { %v1830_v50 = vld [vmem:[%s11276_s28 + $0xf20] sm:$0xff]  ;;  %1827 = vst [vmem:[%s11284_s29 + $0x780] sm:$0xff] %v1826_v48  ;;  %1829 = vst [vmem:[%s11284_s29 + $0x788] sm:$0xff] %v1828_v49  ;;  %v1832_v51 = vld [vmem:[%s11276_s28 + $0xf30] sm:$0xff] }
  0x8f   : > { %1831 = vst [vmem:[%s11284_s29 + $0x790] sm:$0xff] %v1830_v50  ;;  %v1834_v52 = vld [vmem:[%s11276_s28 + $0xf40] sm:$0xff]  ;;  %v1836_v53 = vld [vmem:[%s11276_s28 + $0xf50] sm:$0xff]  ;;  %1833 = vst [vmem:[%s11284_s29 + $0x798] sm:$0xff] %v1832_v51 }
  0x90   : > { %1835 = vst [vmem:[%s11284_s29 + $0x7a0] sm:$0xff] %v1834_v52  ;;  %1837 = vst [vmem:[%s11284_s29 + $0x7a8] sm:$0xff] %v1836_v53  ;;  %v1838_v54 = vld [vmem:[%s11276_s28 + $0xf60] sm:$0xff]  ;;  %v1840_v55 = vld [vmem:[%s11276_s28 + $0xf70] sm:$0xff] }
  0x91   : > { %v1842_v56 = vld [vmem:[%s11276_s28 + $0xf80] sm:$0xff]  ;;  %1839 = vst [vmem:[%s11284_s29 + $0x7b0] sm:$0xff] %v1838_v54  ;;  %1841 = vst [vmem:[%s11284_s29 + $0x7b8] sm:$0xff] %v1840_v55  ;;  %v1844_v57 = vld [vmem:[%s11276_s28 + $0xf90] sm:$0xff] }
  0x92   : > { %1843 = vst [vmem:[%s11284_s29 + $0x7c0] sm:$0xff] %v1842_v56  ;;  %v1846_v58 = vld [vmem:[%s11276_s28 + $0xfa0] sm:$0xff]  ;;  %v1848_v59 = vld [vmem:[%s11276_s28 + $0xfb0] sm:$0xff]  ;;  %1845 = vst [vmem:[%s11284_s29 + $0x7c8] sm:$0xff] %v1844_v57 }
  0x93   : > { %1847 = vst [vmem:[%s11284_s29 + $0x7d0] sm:$0xff] %v1846_v58  ;;  %1849 = vst [vmem:[%s11284_s29 + $0x7d8] sm:$0xff] %v1848_v59  ;;  %v1850_v60 = vld [vmem:[%s11276_s28 + $0xfc0] sm:$0xff]  ;;  %v1852_v61 = vld [vmem:[%s11276_s28 + $0xfd0] sm:$0xff] }
  0x94   : > { %v1854_v62 = vld [vmem:[%s11276_s28 + $0xfe0] sm:$0xff]  ;;  %1851 = vst [vmem:[%s11284_s29 + $0x7e0] sm:$0xff] %v1850_v60  ;;  %1853 = vst [vmem:[%s11284_s29 + $0x7e8] sm:$0xff] %v1852_v61  ;;  %v1856_v63 = vld [vmem:[%s11276_s28 + $0xff0] sm:$0xff] }
  0x95   : > { %1855 = vst [vmem:[%s11284_s29 + $0x7f0] sm:$0xff] %v1854_v62  ;;  %v1858_v0 = vld [vmem:[%s11276_s28 + $0x1000] sm:$0xff]  ;;  %v1860_v1 = vld [vmem:[%s11276_s28 + $0x1010] sm:$0xff]  ;;  %1857 = vst [vmem:[%s11284_s29 + $0x7f8] sm:$0xff] %v1856_v63 }
  0x96   : > { %1859 = vst [vmem:[%s11284_s29 + $0x800] sm:$0xff] %v1858_v0  ;;  %1861 = vst [vmem:[%s11284_s29 + $0x808] sm:$0xff] %v1860_v1  ;;  %v1862_v2 = vld [vmem:[%s11276_s28 + $0x1020] sm:$0xff]  ;;  %v1864_v3 = vld [vmem:[%s11276_s28 + $0x1030] sm:$0xff] }
  0x97   : > { %v1866_v4 = vld [vmem:[%s11276_s28 + $0x1040] sm:$0xff]  ;;  %1863 = vst [vmem:[%s11284_s29 + $0x810] sm:$0xff] %v1862_v2  ;;  %1865 = vst [vmem:[%s11284_s29 + $0x818] sm:$0xff] %v1864_v3  ;;  %v1868_v5 = vld [vmem:[%s11276_s28 + $0x1050] sm:$0xff] }
  0x98   : > { %1867 = vst [vmem:[%s11284_s29 + $0x820] sm:$0xff] %v1866_v4  ;;  %v1870_v6 = vld [vmem:[%s11276_s28 + $0x1060] sm:$0xff]  ;;  %v1872_v7 = vld [vmem:[%s11276_s28 + $0x1070] sm:$0xff]  ;;  %1869 = vst [vmem:[%s11284_s29 + $0x828] sm:$0xff] %v1868_v5 }
  0x99   : > { %1871 = vst [vmem:[%s11284_s29 + $0x830] sm:$0xff] %v1870_v6  ;;  %1873 = vst [vmem:[%s11284_s29 + $0x838] sm:$0xff] %v1872_v7  ;;  %v1874_v8 = vld [vmem:[%s11276_s28 + $0x1080] sm:$0xff]  ;;  %v1876_v9 = vld [vmem:[%s11276_s28 + $0x1090] sm:$0xff] }
  0x9a   : > { %v1878_v10 = vld [vmem:[%s11276_s28 + $0x10a0] sm:$0xff]  ;;  %1875 = vst [vmem:[%s11284_s29 + $0x840] sm:$0xff] %v1874_v8  ;;  %1877 = vst [vmem:[%s11284_s29 + $0x848] sm:$0xff] %v1876_v9  ;;  %v1880_v11 = vld [vmem:[%s11276_s28 + $0x10b0] sm:$0xff] }
  0x9b   : > { %1879 = vst [vmem:[%s11284_s29 + $0x850] sm:$0xff] %v1878_v10  ;;  %v1882_v12 = vld [vmem:[%s11276_s28 + $0x10c0] sm:$0xff]  ;;  %v1884_v13 = vld [vmem:[%s11276_s28 + $0x10d0] sm:$0xff]  ;;  %1881 = vst [vmem:[%s11284_s29 + $0x858] sm:$0xff] %v1880_v11 }
  0x9c   : > { %1883 = vst [vmem:[%s11284_s29 + $0x860] sm:$0xff] %v1882_v12  ;;  %1885 = vst [vmem:[%s11284_s29 + $0x868] sm:$0xff] %v1884_v13  ;;  %v1886_v14 = vld [vmem:[%s11276_s28 + $0x10e0] sm:$0xff]  ;;  %v1888_v15 = vld [vmem:[%s11276_s28 + $0x10f0] sm:$0xff] }
  0x9d   : > { %v1890_v16 = vld [vmem:[%s11276_s28 + $0x1100] sm:$0xff]  ;;  %1887 = vst [vmem:[%s11284_s29 + $0x870] sm:$0xff] %v1886_v14  ;;  %1889 = vst [vmem:[%s11284_s29 + $0x878] sm:$0xff] %v1888_v15  ;;  %v1892_v17 = vld [vmem:[%s11276_s28 + $0x1110] sm:$0xff] }
  0x9e   : > { %1891 = vst [vmem:[%s11284_s29 + $0x880] sm:$0xff] %v1890_v16  ;;  %v1894_v18 = vld [vmem:[%s11276_s28 + $0x1120] sm:$0xff]  ;;  %v1896_v19 = vld [vmem:[%s11276_s28 + $0x1130] sm:$0xff]  ;;  %1893 = vst [vmem:[%s11284_s29 + $0x888] sm:$0xff] %v1892_v17 }
  0x9f   : > { %1895 = vst [vmem:[%s11284_s29 + $0x890] sm:$0xff] %v1894_v18  ;;  %1897 = vst [vmem:[%s11284_s29 + $0x898] sm:$0xff] %v1896_v19  ;;  %v1898_v20 = vld [vmem:[%s11276_s28 + $0x1140] sm:$0xff]  ;;  %v1900_v21 = vld [vmem:[%s11276_s28 + $0x1150] sm:$0xff] }
  0xa0   : > { %v1902_v22 = vld [vmem:[%s11276_s28 + $0x1160] sm:$0xff]  ;;  %1899 = vst [vmem:[%s11284_s29 + $0x8a0] sm:$0xff] %v1898_v20  ;;  %1901 = vst [vmem:[%s11284_s29 + $0x8a8] sm:$0xff] %v1900_v21  ;;  %v1904_v23 = vld [vmem:[%s11276_s28 + $0x1170] sm:$0xff] }
  0xa1   : > { %1903 = vst [vmem:[%s11284_s29 + $0x8b0] sm:$0xff] %v1902_v22  ;;  %v1906_v24 = vld [vmem:[%s11276_s28 + $0x1180] sm:$0xff]  ;;  %v1908_v25 = vld [vmem:[%s11276_s28 + $0x1190] sm:$0xff]  ;;  %1905 = vst [vmem:[%s11284_s29 + $0x8b8] sm:$0xff] %v1904_v23 }
  0xa2   : > { %1907 = vst [vmem:[%s11284_s29 + $0x8c0] sm:$0xff] %v1906_v24  ;;  %1909 = vst [vmem:[%s11284_s29 + $0x8c8] sm:$0xff] %v1908_v25  ;;  %v1910_v26 = vld [vmem:[%s11276_s28 + $0x11a0] sm:$0xff]  ;;  %v1912_v27 = vld [vmem:[%s11276_s28 + $0x11b0] sm:$0xff] }
  0xa3   : > { %v1914_v28 = vld [vmem:[%s11276_s28 + $0x11c0] sm:$0xff]  ;;  %1911 = vst [vmem:[%s11284_s29 + $0x8d0] sm:$0xff] %v1910_v26  ;;  %1913 = vst [vmem:[%s11284_s29 + $0x8d8] sm:$0xff] %v1912_v27  ;;  %v1916_v29 = vld [vmem:[%s11276_s28 + $0x11d0] sm:$0xff] }
  0xa4   : > { %1915 = vst [vmem:[%s11284_s29 + $0x8e0] sm:$0xff] %v1914_v28  ;;  %v1918_v30 = vld [vmem:[%s11276_s28 + $0x11e0] sm:$0xff]  ;;  %v1920_v31 = vld [vmem:[%s11276_s28 + $0x11f0] sm:$0xff]  ;;  %1917 = vst [vmem:[%s11284_s29 + $0x8e8] sm:$0xff] %v1916_v29 }
  0xa5   : > { %1919 = vst [vmem:[%s11284_s29 + $0x8f0] sm:$0xff] %v1918_v30  ;;  %1921 = vst [vmem:[%s11284_s29 + $0x8f8] sm:$0xff] %v1920_v31  ;;  %v1922_v32 = vld [vmem:[%s11276_s28 + $0x1200] sm:$0xff]  ;;  %v1924_v33 = vld [vmem:[%s11276_s28 + $0x1210] sm:$0xff] }
  0xa6   : > { %v1926_v34 = vld [vmem:[%s11276_s28 + $0x1220] sm:$0xff]  ;;  %1923 = vst [vmem:[%s11284_s29 + $0x900] sm:$0xff] %v1922_v32  ;;  %1925 = vst [vmem:[%s11284_s29 + $0x908] sm:$0xff] %v1924_v33  ;;  %v1928_v35 = vld [vmem:[%s11276_s28 + $0x1230] sm:$0xff] }
  0xa7   : > { %1927 = vst [vmem:[%s11284_s29 + $0x910] sm:$0xff] %v1926_v34  ;;  %v1930_v36 = vld [vmem:[%s11276_s28 + $0x1240] sm:$0xff]  ;;  %v1932_v37 = vld [vmem:[%s11276_s28 + $0x1250] sm:$0xff]  ;;  %1929 = vst [vmem:[%s11284_s29 + $0x918] sm:$0xff] %v1928_v35 }
  0xa8   : > { %1931 = vst [vmem:[%s11284_s29 + $0x920] sm:$0xff] %v1930_v36  ;;  %1933 = vst [vmem:[%s11284_s29 + $0x928] sm:$0xff] %v1932_v37  ;;  %v1934_v38 = vld [vmem:[%s11276_s28 + $0x1260] sm:$0xff]  ;;  %v1936_v39 = vld [vmem:[%s11276_s28 + $0x1270] sm:$0xff] }
  0xa9   : > { %v1938_v40 = vld [vmem:[%s11276_s28 + $0x1280] sm:$0xff]  ;;  %1935 = vst [vmem:[%s11284_s29 + $0x930] sm:$0xff] %v1934_v38  ;;  %1937 = vst [vmem:[%s11284_s29 + $0x938] sm:$0xff] %v1936_v39  ;;  %v1940_v41 = vld [vmem:[%s11276_s28 + $0x1290] sm:$0xff] }
  0xaa   : > { %1939 = vst [vmem:[%s11284_s29 + $0x940] sm:$0xff] %v1938_v40  ;;  %v1942_v42 = vld [vmem:[%s11276_s28 + $0x12a0] sm:$0xff]  ;;  %v1944_v43 = vld [vmem:[%s11276_s28 + $0x12b0] sm:$0xff]  ;;  %1941 = vst [vmem:[%s11284_s29 + $0x948] sm:$0xff] %v1940_v41 }
  0xab   : > { %1943 = vst [vmem:[%s11284_s29 + $0x950] sm:$0xff] %v1942_v42  ;;  %1945 = vst [vmem:[%s11284_s29 + $0x958] sm:$0xff] %v1944_v43  ;;  %v1946_v44 = vld [vmem:[%s11276_s28 + $0x12c0] sm:$0xff]  ;;  %v1948_v45 = vld [vmem:[%s11276_s28 + $0x12d0] sm:$0xff] }
  0xac   : > { %v1950_v46 = vld [vmem:[%s11276_s28 + $0x12e0] sm:$0xff]  ;;  %1947 = vst [vmem:[%s11284_s29 + $0x960] sm:$0xff] %v1946_v44  ;;  %1949 = vst [vmem:[%s11284_s29 + $0x968] sm:$0xff] %v1948_v45  ;;  %v1952_v47 = vld [vmem:[%s11276_s28 + $0x12f0] sm:$0xff] }
  0xad   : > { %1951 = vst [vmem:[%s11284_s29 + $0x970] sm:$0xff] %v1950_v46  ;;  %v1954_v48 = vld [vmem:[%s11276_s28 + $0x1300] sm:$0xff]  ;;  %v1956_v49 = vld [vmem:[%s11276_s28 + $0x1310] sm:$0xff]  ;;  %1953 = vst [vmem:[%s11284_s29 + $0x978] sm:$0xff] %v1952_v47 }
  0xae   : > { %1955 = vst [vmem:[%s11284_s29 + $0x980] sm:$0xff] %v1954_v48  ;;  %1957 = vst [vmem:[%s11284_s29 + $0x988] sm:$0xff] %v1956_v49  ;;  %v1958_v50 = vld [vmem:[%s11276_s28 + $0x1320] sm:$0xff]  ;;  %v1960_v51 = vld [vmem:[%s11276_s28 + $0x1330] sm:$0xff] }
  0xaf   : > { %v1962_v52 = vld [vmem:[%s11276_s28 + $0x1340] sm:$0xff]  ;;  %1959 = vst [vmem:[%s11284_s29 + $0x990] sm:$0xff] %v1958_v50  ;;  %1961 = vst [vmem:[%s11284_s29 + $0x998] sm:$0xff] %v1960_v51  ;;  %v1964_v53 = vld [vmem:[%s11276_s28 + $0x1350] sm:$0xff] }
  0xb0   : > { %1963 = vst [vmem:[%s11284_s29 + $0x9a0] sm:$0xff] %v1962_v52  ;;  %v1966_v54 = vld [vmem:[%s11276_s28 + $0x1360] sm:$0xff]  ;;  %v1968_v55 = vld [vmem:[%s11276_s28 + $0x1370] sm:$0xff]  ;;  %1965 = vst [vmem:[%s11284_s29 + $0x9a8] sm:$0xff] %v1964_v53 }
  0xb1   : > { %1967 = vst [vmem:[%s11284_s29 + $0x9b0] sm:$0xff] %v1966_v54  ;;  %1969 = vst [vmem:[%s11284_s29 + $0x9b8] sm:$0xff] %v1968_v55  ;;  %v1970_v56 = vld [vmem:[%s11276_s28 + $0x1380] sm:$0xff]  ;;  %v1972_v57 = vld [vmem:[%s11276_s28 + $0x1390] sm:$0xff] }
  0xb2   : > { %v1974_v58 = vld [vmem:[%s11276_s28 + $0x13a0] sm:$0xff]  ;;  %1971 = vst [vmem:[%s11284_s29 + $0x9c0] sm:$0xff] %v1970_v56  ;;  %1973 = vst [vmem:[%s11284_s29 + $0x9c8] sm:$0xff] %v1972_v57  ;;  %v1976_v59 = vld [vmem:[%s11276_s28 + $0x13b0] sm:$0xff] }
  0xb3   : > { %1975 = vst [vmem:[%s11284_s29 + $0x9d0] sm:$0xff] %v1974_v58  ;;  %v1978_v60 = vld [vmem:[%s11276_s28 + $0x13c0] sm:$0xff]  ;;  %v1980_v61 = vld [vmem:[%s11276_s28 + $0x13d0] sm:$0xff]  ;;  %1977 = vst [vmem:[%s11284_s29 + $0x9d8] sm:$0xff] %v1976_v59 }
  0xb4   : > { %1979 = vst [vmem:[%s11284_s29 + $0x9e0] sm:$0xff] %v1978_v60  ;;  %1981 = vst [vmem:[%s11284_s29 + $0x9e8] sm:$0xff] %v1980_v61  ;;  %v1982_v62 = vld [vmem:[%s11276_s28 + $0x13e0] sm:$0xff]  ;;  %v1984_v63 = vld [vmem:[%s11276_s28 + $0x13f0] sm:$0xff] }
  0xb5   : > { %v1986_v0 = vld [vmem:[%s11276_s28 + $0x1400] sm:$0xff]  ;;  %1983 = vst [vmem:[%s11284_s29 + $0x9f0] sm:$0xff] %v1982_v62  ;;  %1985 = vst [vmem:[%s11284_s29 + $0x9f8] sm:$0xff] %v1984_v63  ;;  %v1988_v1 = vld [vmem:[%s11276_s28 + $0x1410] sm:$0xff] }
  0xb6   : > { %1987 = vst [vmem:[%s11284_s29 + $0xa00] sm:$0xff] %v1986_v0  ;;  %v1990_v2 = vld [vmem:[%s11276_s28 + $0x1420] sm:$0xff]  ;;  %v1992_v3 = vld [vmem:[%s11276_s28 + $0x1430] sm:$0xff]  ;;  %1989 = vst [vmem:[%s11284_s29 + $0xa08] sm:$0xff] %v1988_v1 }
  0xb7   : > { %1991 = vst [vmem:[%s11284_s29 + $0xa10] sm:$0xff] %v1990_v2  ;;  %1993 = vst [vmem:[%s11284_s29 + $0xa18] sm:$0xff] %v1992_v3  ;;  %v1994_v4 = vld [vmem:[%s11276_s28 + $0x1440] sm:$0xff]  ;;  %v1996_v5 = vld [vmem:[%s11276_s28 + $0x1450] sm:$0xff] }
  0xb8   : > { %v1998_v6 = vld [vmem:[%s11276_s28 + $0x1460] sm:$0xff]  ;;  %1995 = vst [vmem:[%s11284_s29 + $0xa20] sm:$0xff] %v1994_v4  ;;  %1997 = vst [vmem:[%s11284_s29 + $0xa28] sm:$0xff] %v1996_v5  ;;  %v2000_v7 = vld [vmem:[%s11276_s28 + $0x1470] sm:$0xff] }
  0xb9   : > { %1999 = vst [vmem:[%s11284_s29 + $0xa30] sm:$0xff] %v1998_v6  ;;  %v2002_v8 = vld [vmem:[%s11276_s28 + $0x1480] sm:$0xff]  ;;  %v2004_v9 = vld [vmem:[%s11276_s28 + $0x1490] sm:$0xff]  ;;  %2001 = vst [vmem:[%s11284_s29 + $0xa38] sm:$0xff] %v2000_v7 }
  0xba   : > { %2003 = vst [vmem:[%s11284_s29 + $0xa40] sm:$0xff] %v2002_v8  ;;  %2005 = vst [vmem:[%s11284_s29 + $0xa48] sm:$0xff] %v2004_v9  ;;  %v2006_v10 = vld [vmem:[%s11276_s28 + $0x14a0] sm:$0xff]  ;;  %v2008_v11 = vld [vmem:[%s11276_s28 + $0x14b0] sm:$0xff] }
  0xbb   : > { %v2010_v12 = vld [vmem:[%s11276_s28 + $0x14c0] sm:$0xff]  ;;  %2007 = vst [vmem:[%s11284_s29 + $0xa50] sm:$0xff] %v2006_v10  ;;  %2009 = vst [vmem:[%s11284_s29 + $0xa58] sm:$0xff] %v2008_v11  ;;  %v2012_v13 = vld [vmem:[%s11276_s28 + $0x14d0] sm:$0xff] }
  0xbc   : > { %2011 = vst [vmem:[%s11284_s29 + $0xa60] sm:$0xff] %v2010_v12  ;;  %v2014_v14 = vld [vmem:[%s11276_s28 + $0x14e0] sm:$0xff]  ;;  %v2016_v15 = vld [vmem:[%s11276_s28 + $0x14f0] sm:$0xff]  ;;  %2013 = vst [vmem:[%s11284_s29 + $0xa68] sm:$0xff] %v2012_v13 }
  0xbd   : > { %2015 = vst [vmem:[%s11284_s29 + $0xa70] sm:$0xff] %v2014_v14  ;;  %2017 = vst [vmem:[%s11284_s29 + $0xa78] sm:$0xff] %v2016_v15  ;;  %v2018_v16 = vld [vmem:[%s11276_s28 + $0x1500] sm:$0xff]  ;;  %v2020_v17 = vld [vmem:[%s11276_s28 + $0x1510] sm:$0xff] }
  0xbe   : > { %v2022_v18 = vld [vmem:[%s11276_s28 + $0x1520] sm:$0xff]  ;;  %2019 = vst [vmem:[%s11284_s29 + $0xa80] sm:$0xff] %v2018_v16  ;;  %2021 = vst [vmem:[%s11284_s29 + $0xa88] sm:$0xff] %v2020_v17  ;;  %v2024_v19 = vld [vmem:[%s11276_s28 + $0x1530] sm:$0xff] }
  0xbf   : > { %2023 = vst [vmem:[%s11284_s29 + $0xa90] sm:$0xff] %v2022_v18  ;;  %v2026_v20 = vld [vmem:[%s11276_s28 + $0x1540] sm:$0xff]  ;;  %v2028_v21 = vld [vmem:[%s11276_s28 + $0x1550] sm:$0xff]  ;;  %2025 = vst [vmem:[%s11284_s29 + $0xa98] sm:$0xff] %v2024_v19 }
  0xc0   : > { %2027 = vst [vmem:[%s11284_s29 + $0xaa0] sm:$0xff] %v2026_v20  ;;  %2029 = vst [vmem:[%s11284_s29 + $0xaa8] sm:$0xff] %v2028_v21  ;;  %v2030_v22 = vld [vmem:[%s11276_s28 + $0x1560] sm:$0xff]  ;;  %v2032_v23 = vld [vmem:[%s11276_s28 + $0x1570] sm:$0xff] }
  0xc1   : > { %v2034_v24 = vld [vmem:[%s11276_s28 + $0x1580] sm:$0xff]  ;;  %2031 = vst [vmem:[%s11284_s29 + $0xab0] sm:$0xff] %v2030_v22  ;;  %2033 = vst [vmem:[%s11284_s29 + $0xab8] sm:$0xff] %v2032_v23  ;;  %v2036_v25 = vld [vmem:[%s11276_s28 + $0x1590] sm:$0xff] }
  0xc2   : > { %2035 = vst [vmem:[%s11284_s29 + $0xac0] sm:$0xff] %v2034_v24  ;;  %v2038_v26 = vld [vmem:[%s11276_s28 + $0x15a0] sm:$0xff]  ;;  %v2040_v27 = vld [vmem:[%s11276_s28 + $0x15b0] sm:$0xff]  ;;  %2037 = vst [vmem:[%s11284_s29 + $0xac8] sm:$0xff] %v2036_v25 }
  0xc3   : > { %2039 = vst [vmem:[%s11284_s29 + $0xad0] sm:$0xff] %v2038_v26  ;;  %2041 = vst [vmem:[%s11284_s29 + $0xad8] sm:$0xff] %v2040_v27  ;;  %v2042_v28 = vld [vmem:[%s11276_s28 + $0x15c0] sm:$0xff]  ;;  %v2044_v29 = vld [vmem:[%s11276_s28 + $0x15d0] sm:$0xff] }
  0xc4   : > { %v2046_v30 = vld [vmem:[%s11276_s28 + $0x15e0] sm:$0xff]  ;;  %2043 = vst [vmem:[%s11284_s29 + $0xae0] sm:$0xff] %v2042_v28  ;;  %2045 = vst [vmem:[%s11284_s29 + $0xae8] sm:$0xff] %v2044_v29  ;;  %v2048_v31 = vld [vmem:[%s11276_s28 + $0x15f0] sm:$0xff] }
  0xc5   : > { %2047 = vst [vmem:[%s11284_s29 + $0xaf0] sm:$0xff] %v2046_v30  ;;  %v2050_v32 = vld [vmem:[%s11276_s28 + $0x1600] sm:$0xff]  ;;  %v2052_v33 = vld [vmem:[%s11276_s28 + $0x1610] sm:$0xff]  ;;  %2049 = vst [vmem:[%s11284_s29 + $0xaf8] sm:$0xff] %v2048_v31 }
  0xc6   : > { %2051 = vst [vmem:[%s11284_s29 + $0xb00] sm:$0xff] %v2050_v32  ;;  %2053 = vst [vmem:[%s11284_s29 + $0xb08] sm:$0xff] %v2052_v33  ;;  %v2054_v34 = vld [vmem:[%s11276_s28 + $0x1620] sm:$0xff]  ;;  %v2056_v35 = vld [vmem:[%s11276_s28 + $0x1630] sm:$0xff] }
  0xc7   : > { %v2058_v36 = vld [vmem:[%s11276_s28 + $0x1640] sm:$0xff]  ;;  %2055 = vst [vmem:[%s11284_s29 + $0xb10] sm:$0xff] %v2054_v34  ;;  %2057 = vst [vmem:[%s11284_s29 + $0xb18] sm:$0xff] %v2056_v35  ;;  %v2060_v37 = vld [vmem:[%s11276_s28 + $0x1650] sm:$0xff] }
  0xc8   : > { %2059 = vst [vmem:[%s11284_s29 + $0xb20] sm:$0xff] %v2058_v36  ;;  %v2062_v38 = vld [vmem:[%s11276_s28 + $0x1660] sm:$0xff]  ;;  %v2064_v39 = vld [vmem:[%s11276_s28 + $0x1670] sm:$0xff]  ;;  %2061 = vst [vmem:[%s11284_s29 + $0xb28] sm:$0xff] %v2060_v37 }
  0xc9   : > { %2063 = vst [vmem:[%s11284_s29 + $0xb30] sm:$0xff] %v2062_v38  ;;  %2065 = vst [vmem:[%s11284_s29 + $0xb38] sm:$0xff] %v2064_v39  ;;  %v2066_v40 = vld [vmem:[%s11276_s28 + $0x1680] sm:$0xff]  ;;  %v2068_v41 = vld [vmem:[%s11276_s28 + $0x1690] sm:$0xff] }
  0xca   : > { %v2070_v42 = vld [vmem:[%s11276_s28 + $0x16a0] sm:$0xff]  ;;  %2067 = vst [vmem:[%s11284_s29 + $0xb40] sm:$0xff] %v2066_v40  ;;  %2069 = vst [vmem:[%s11284_s29 + $0xb48] sm:$0xff] %v2068_v41  ;;  %v2072_v43 = vld [vmem:[%s11276_s28 + $0x16b0] sm:$0xff] }
  0xcb   : > { %2071 = vst [vmem:[%s11284_s29 + $0xb50] sm:$0xff] %v2070_v42  ;;  %v2074_v44 = vld [vmem:[%s11276_s28 + $0x16c0] sm:$0xff]  ;;  %v2076_v45 = vld [vmem:[%s11276_s28 + $0x16d0] sm:$0xff]  ;;  %2073 = vst [vmem:[%s11284_s29 + $0xb58] sm:$0xff] %v2072_v43 }
  0xcc   : > { %2075 = vst [vmem:[%s11284_s29 + $0xb60] sm:$0xff] %v2074_v44  ;;  %2077 = vst [vmem:[%s11284_s29 + $0xb68] sm:$0xff] %v2076_v45  ;;  %v2078_v46 = vld [vmem:[%s11276_s28 + $0x16e0] sm:$0xff]  ;;  %v2080_v47 = vld [vmem:[%s11276_s28 + $0x16f0] sm:$0xff] }
  0xcd   : > { %v2082_v48 = vld [vmem:[%s11276_s28 + $0x1700] sm:$0xff]  ;;  %2079 = vst [vmem:[%s11284_s29 + $0xb70] sm:$0xff] %v2078_v46  ;;  %2081 = vst [vmem:[%s11284_s29 + $0xb78] sm:$0xff] %v2080_v47  ;;  %v2084_v49 = vld [vmem:[%s11276_s28 + $0x1710] sm:$0xff] }
  0xce   : > { %2083 = vst [vmem:[%s11284_s29 + $0xb80] sm:$0xff] %v2082_v48  ;;  %v2086_v50 = vld [vmem:[%s11276_s28 + $0x1720] sm:$0xff]  ;;  %v2088_v51 = vld [vmem:[%s11276_s28 + $0x1730] sm:$0xff]  ;;  %2085 = vst [vmem:[%s11284_s29 + $0xb88] sm:$0xff] %v2084_v49 }
  0xcf   : > { %2087 = vst [vmem:[%s11284_s29 + $0xb90] sm:$0xff] %v2086_v50  ;;  %2089 = vst [vmem:[%s11284_s29 + $0xb98] sm:$0xff] %v2088_v51  ;;  %v2090_v52 = vld [vmem:[%s11276_s28 + $0x1740] sm:$0xff]  ;;  %v2092_v53 = vld [vmem:[%s11276_s28 + $0x1750] sm:$0xff] }
  0xd0   : > { %v2094_v54 = vld [vmem:[%s11276_s28 + $0x1760] sm:$0xff]  ;;  %2091 = vst [vmem:[%s11284_s29 + $0xba0] sm:$0xff] %v2090_v52  ;;  %2093 = vst [vmem:[%s11284_s29 + $0xba8] sm:$0xff] %v2092_v53  ;;  %v2096_v55 = vld [vmem:[%s11276_s28 + $0x1770] sm:$0xff] }
  0xd1   : > { %2095 = vst [vmem:[%s11284_s29 + $0xbb0] sm:$0xff] %v2094_v54  ;;  %v2098_v56 = vld [vmem:[%s11276_s28 + $0x1780] sm:$0xff]  ;;  %v2100_v57 = vld [vmem:[%s11276_s28 + $0x1790] sm:$0xff]  ;;  %2097 = vst [vmem:[%s11284_s29 + $0xbb8] sm:$0xff] %v2096_v55 }
  0xd2   : > { %2099 = vst [vmem:[%s11284_s29 + $0xbc0] sm:$0xff] %v2098_v56  ;;  %2101 = vst [vmem:[%s11284_s29 + $0xbc8] sm:$0xff] %v2100_v57  ;;  %v2102_v58 = vld [vmem:[%s11276_s28 + $0x17a0] sm:$0xff]  ;;  %v2104_v59 = vld [vmem:[%s11276_s28 + $0x17b0] sm:$0xff] }
  0xd3   : > { %v2106_v60 = vld [vmem:[%s11276_s28 + $0x17c0] sm:$0xff]  ;;  %2103 = vst [vmem:[%s11284_s29 + $0xbd0] sm:$0xff] %v2102_v58  ;;  %2105 = vst [vmem:[%s11284_s29 + $0xbd8] sm:$0xff] %v2104_v59  ;;  %v2108_v61 = vld [vmem:[%s11276_s28 + $0x17d0] sm:$0xff] }
  0xd4   : > { %2107 = vst [vmem:[%s11284_s29 + $0xbe0] sm:$0xff] %v2106_v60  ;;  %v2110_v62 = vld [vmem:[%s11276_s28 + $0x17e0] sm:$0xff]  ;;  %v2112_v63 = vld [vmem:[%s11276_s28 + $0x17f0] sm:$0xff]  ;;  %2109 = vst [vmem:[%s11284_s29 + $0xbe8] sm:$0xff] %v2108_v61 }
  0xd5   : > { %2111 = vst [vmem:[%s11284_s29 + $0xbf0] sm:$0xff] %v2110_v62  ;;  %2113 = vst [vmem:[%s11284_s29 + $0xbf8] sm:$0xff] %v2112_v63  ;;  %v2114_v0 = vld [vmem:[%s11276_s28 + $0x1800] sm:$0xff]  ;;  %v2116_v1 = vld [vmem:[%s11276_s28 + $0x1810] sm:$0xff] }
  0xd6   : > { %v2118_v2 = vld [vmem:[%s11276_s28 + $0x1820] sm:$0xff]  ;;  %2115 = vst [vmem:[%s11284_s29 + $0xc00] sm:$0xff] %v2114_v0  ;;  %2117 = vst [vmem:[%s11284_s29 + $0xc08] sm:$0xff] %v2116_v1  ;;  %v2120_v3 = vld [vmem:[%s11276_s28 + $0x1830] sm:$0xff] }
  0xd7   : > { %2119 = vst [vmem:[%s11284_s29 + $0xc10] sm:$0xff] %v2118_v2  ;;  %v2122_v4 = vld [vmem:[%s11276_s28 + $0x1840] sm:$0xff]  ;;  %v2124_v5 = vld [vmem:[%s11276_s28 + $0x1850] sm:$0xff]  ;;  %2121 = vst [vmem:[%s11284_s29 + $0xc18] sm:$0xff] %v2120_v3 }
  0xd8   : > { %2123 = vst [vmem:[%s11284_s29 + $0xc20] sm:$0xff] %v2122_v4  ;;  %2125 = vst [vmem:[%s11284_s29 + $0xc28] sm:$0xff] %v2124_v5  ;;  %v2126_v6 = vld [vmem:[%s11276_s28 + $0x1860] sm:$0xff]  ;;  %v2128_v7 = vld [vmem:[%s11276_s28 + $0x1870] sm:$0xff] }
  0xd9   : > { %v2130_v8 = vld [vmem:[%s11276_s28 + $0x1880] sm:$0xff]  ;;  %2127 = vst [vmem:[%s11284_s29 + $0xc30] sm:$0xff] %v2126_v6  ;;  %2129 = vst [vmem:[%s11284_s29 + $0xc38] sm:$0xff] %v2128_v7  ;;  %v2132_v9 = vld [vmem:[%s11276_s28 + $0x1890] sm:$0xff] }
  0xda   : > { %2131 = vst [vmem:[%s11284_s29 + $0xc40] sm:$0xff] %v2130_v8  ;;  %v2134_v10 = vld [vmem:[%s11276_s28 + $0x18a0] sm:$0xff]  ;;  %v2136_v11 = vld [vmem:[%s11276_s28 + $0x18b0] sm:$0xff]  ;;  %2133 = vst [vmem:[%s11284_s29 + $0xc48] sm:$0xff] %v2132_v9 }
  0xdb   : > { %2135 = vst [vmem:[%s11284_s29 + $0xc50] sm:$0xff] %v2134_v10  ;;  %2137 = vst [vmem:[%s11284_s29 + $0xc58] sm:$0xff] %v2136_v11  ;;  %v2138_v12 = vld [vmem:[%s11276_s28 + $0x18c0] sm:$0xff]  ;;  %v2140_v13 = vld [vmem:[%s11276_s28 + $0x18d0] sm:$0xff] }
  0xdc   : > { %v2142_v14 = vld [vmem:[%s11276_s28 + $0x18e0] sm:$0xff]  ;;  %2139 = vst [vmem:[%s11284_s29 + $0xc60] sm:$0xff] %v2138_v12  ;;  %2141 = vst [vmem:[%s11284_s29 + $0xc68] sm:$0xff] %v2140_v13  ;;  %v2144_v15 = vld [vmem:[%s11276_s28 + $0x18f0] sm:$0xff] }
  0xdd   : > { %2143 = vst [vmem:[%s11284_s29 + $0xc70] sm:$0xff] %v2142_v14  ;;  %v2146_v16 = vld [vmem:[%s11276_s28 + $0x1900] sm:$0xff]  ;;  %v2148_v17 = vld [vmem:[%s11276_s28 + $0x1910] sm:$0xff]  ;;  %2145 = vst [vmem:[%s11284_s29 + $0xc78] sm:$0xff] %v2144_v15 }
  0xde   : > { %2147 = vst [vmem:[%s11284_s29 + $0xc80] sm:$0xff] %v2146_v16  ;;  %2149 = vst [vmem:[%s11284_s29 + $0xc88] sm:$0xff] %v2148_v17  ;;  %v2150_v18 = vld [vmem:[%s11276_s28 + $0x1920] sm:$0xff]  ;;  %v2152_v19 = vld [vmem:[%s11276_s28 + $0x1930] sm:$0xff] }
  0xdf   : > { %v2154_v20 = vld [vmem:[%s11276_s28 + $0x1940] sm:$0xff]  ;;  %2151 = vst [vmem:[%s11284_s29 + $0xc90] sm:$0xff] %v2150_v18  ;;  %2153 = vst [vmem:[%s11284_s29 + $0xc98] sm:$0xff] %v2152_v19  ;;  %v2156_v21 = vld [vmem:[%s11276_s28 + $0x1950] sm:$0xff] }
  0xe0   : > { %2155 = vst [vmem:[%s11284_s29 + $0xca0] sm:$0xff] %v2154_v20  ;;  %v2158_v22 = vld [vmem:[%s11276_s28 + $0x1960] sm:$0xff]  ;;  %v2160_v23 = vld [vmem:[%s11276_s28 + $0x1970] sm:$0xff]  ;;  %2157 = vst [vmem:[%s11284_s29 + $0xca8] sm:$0xff] %v2156_v21 }
  0xe1   : > { %2159 = vst [vmem:[%s11284_s29 + $0xcb0] sm:$0xff] %v2158_v22  ;;  %2161 = vst [vmem:[%s11284_s29 + $0xcb8] sm:$0xff] %v2160_v23  ;;  %v2162_v24 = vld [vmem:[%s11276_s28 + $0x1980] sm:$0xff]  ;;  %v2164_v25 = vld [vmem:[%s11276_s28 + $0x1990] sm:$0xff] }
  0xe2   : > { %v2166_v26 = vld [vmem:[%s11276_s28 + $0x19a0] sm:$0xff]  ;;  %2163 = vst [vmem:[%s11284_s29 + $0xcc0] sm:$0xff] %v2162_v24  ;;  %2165 = vst [vmem:[%s11284_s29 + $0xcc8] sm:$0xff] %v2164_v25  ;;  %v2168_v27 = vld [vmem:[%s11276_s28 + $0x19b0] sm:$0xff] }
  0xe3   : > { %2167 = vst [vmem:[%s11284_s29 + $0xcd0] sm:$0xff] %v2166_v26  ;;  %v2170_v28 = vld [vmem:[%s11276_s28 + $0x19c0] sm:$0xff]  ;;  %v2172_v29 = vld [vmem:[%s11276_s28 + $0x19d0] sm:$0xff]  ;;  %2169 = vst [vmem:[%s11284_s29 + $0xcd8] sm:$0xff] %v2168_v27 }
  0xe4   : > { %2171 = vst [vmem:[%s11284_s29 + $0xce0] sm:$0xff] %v2170_v28  ;;  %2173 = vst [vmem:[%s11284_s29 + $0xce8] sm:$0xff] %v2172_v29  ;;  %v2174_v30 = vld [vmem:[%s11276_s28 + $0x19e0] sm:$0xff]  ;;  %v2176_v31 = vld [vmem:[%s11276_s28 + $0x19f0] sm:$0xff] }
  0xe5   : > { %v2178_v32 = vld [vmem:[%s11276_s28 + $0x1a00] sm:$0xff]  ;;  %2175 = vst [vmem:[%s11284_s29 + $0xcf0] sm:$0xff] %v2174_v30  ;;  %2177 = vst [vmem:[%s11284_s29 + $0xcf8] sm:$0xff] %v2176_v31  ;;  %v2180_v33 = vld [vmem:[%s11276_s28 + $0x1a10] sm:$0xff] }
  0xe6   : > { %2179 = vst [vmem:[%s11284_s29 + $0xd00] sm:$0xff] %v2178_v32  ;;  %v2182_v34 = vld [vmem:[%s11276_s28 + $0x1a20] sm:$0xff]  ;;  %v2184_v35 = vld [vmem:[%s11276_s28 + $0x1a30] sm:$0xff]  ;;  %2181 = vst [vmem:[%s11284_s29 + $0xd08] sm:$0xff] %v2180_v33 }
  0xe7   : > { %2183 = vst [vmem:[%s11284_s29 + $0xd10] sm:$0xff] %v2182_v34  ;;  %2185 = vst [vmem:[%s11284_s29 + $0xd18] sm:$0xff] %v2184_v35  ;;  %v2186_v36 = vld [vmem:[%s11276_s28 + $0x1a40] sm:$0xff]  ;;  %v2188_v37 = vld [vmem:[%s11276_s28 + $0x1a50] sm:$0xff] }
  0xe8   : > { %v2190_v38 = vld [vmem:[%s11276_s28 + $0x1a60] sm:$0xff]  ;;  %2187 = vst [vmem:[%s11284_s29 + $0xd20] sm:$0xff] %v2186_v36  ;;  %2189 = vst [vmem:[%s11284_s29 + $0xd28] sm:$0xff] %v2188_v37  ;;  %v2192_v39 = vld [vmem:[%s11276_s28 + $0x1a70] sm:$0xff] }
  0xe9   : > { %2191 = vst [vmem:[%s11284_s29 + $0xd30] sm:$0xff] %v2190_v38  ;;  %v2194_v40 = vld [vmem:[%s11276_s28 + $0x1a80] sm:$0xff]  ;;  %v2196_v41 = vld [vmem:[%s11276_s28 + $0x1a90] sm:$0xff]  ;;  %2193 = vst [vmem:[%s11284_s29 + $0xd38] sm:$0xff] %v2192_v39 }
  0xea   : > { %2195 = vst [vmem:[%s11284_s29 + $0xd40] sm:$0xff] %v2194_v40  ;;  %2197 = vst [vmem:[%s11284_s29 + $0xd48] sm:$0xff] %v2196_v41  ;;  %v2198_v42 = vld [vmem:[%s11276_s28 + $0x1aa0] sm:$0xff]  ;;  %v2200_v43 = vld [vmem:[%s11276_s28 + $0x1ab0] sm:$0xff] }
  0xeb   : > { %v2202_v44 = vld [vmem:[%s11276_s28 + $0x1ac0] sm:$0xff]  ;;  %2199 = vst [vmem:[%s11284_s29 + $0xd50] sm:$0xff] %v2198_v42  ;;  %2201 = vst [vmem:[%s11284_s29 + $0xd58] sm:$0xff] %v2200_v43  ;;  %v2204_v45 = vld [vmem:[%s11276_s28 + $0x1ad0] sm:$0xff] }
  0xec   : > { %2203 = vst [vmem:[%s11284_s29 + $0xd60] sm:$0xff] %v2202_v44  ;;  %v2206_v46 = vld [vmem:[%s11276_s28 + $0x1ae0] sm:$0xff]  ;;  %v2208_v47 = vld [vmem:[%s11276_s28 + $0x1af0] sm:$0xff]  ;;  %2205 = vst [vmem:[%s11284_s29 + $0xd68] sm:$0xff] %v2204_v45 }
  0xed   : > { %2207 = vst [vmem:[%s11284_s29 + $0xd70] sm:$0xff] %v2206_v46  ;;  %2209 = vst [vmem:[%s11284_s29 + $0xd78] sm:$0xff] %v2208_v47  ;;  %v2210_v48 = vld [vmem:[%s11276_s28 + $0x1b00] sm:$0xff]  ;;  %v2212_v49 = vld [vmem:[%s11276_s28 + $0x1b10] sm:$0xff] }
  0xee   : > { %v2214_v50 = vld [vmem:[%s11276_s28 + $0x1b20] sm:$0xff]  ;;  %2211 = vst [vmem:[%s11284_s29 + $0xd80] sm:$0xff] %v2210_v48  ;;  %2213 = vst [vmem:[%s11284_s29 + $0xd88] sm:$0xff] %v2212_v49  ;;  %v2216_v51 = vld [vmem:[%s11276_s28 + $0x1b30] sm:$0xff] }
  0xef   : > { %2215 = vst [vmem:[%s11284_s29 + $0xd90] sm:$0xff] %v2214_v50  ;;  %v2218_v52 = vld [vmem:[%s11276_s28 + $0x1b40] sm:$0xff]  ;;  %v2220_v53 = vld [vmem:[%s11276_s28 + $0x1b50] sm:$0xff]  ;;  %2217 = vst [vmem:[%s11284_s29 + $0xd98] sm:$0xff] %v2216_v51 }
  0xf0   : > { %2219 = vst [vmem:[%s11284_s29 + $0xda0] sm:$0xff] %v2218_v52  ;;  %2221 = vst [vmem:[%s11284_s29 + $0xda8] sm:$0xff] %v2220_v53  ;;  %v2222_v54 = vld [vmem:[%s11276_s28 + $0x1b60] sm:$0xff]  ;;  %v2224_v55 = vld [vmem:[%s11276_s28 + $0x1b70] sm:$0xff] }
  0xf1   : > { %v2226_v56 = vld [vmem:[%s11276_s28 + $0x1b80] sm:$0xff]  ;;  %2223 = vst [vmem:[%s11284_s29 + $0xdb0] sm:$0xff] %v2222_v54  ;;  %2225 = vst [vmem:[%s11284_s29 + $0xdb8] sm:$0xff] %v2224_v55  ;;  %v2228_v57 = vld [vmem:[%s11276_s28 + $0x1b90] sm:$0xff] }
  0xf2   : > { %2227 = vst [vmem:[%s11284_s29 + $0xdc0] sm:$0xff] %v2226_v56  ;;  %v2230_v58 = vld [vmem:[%s11276_s28 + $0x1ba0] sm:$0xff]  ;;  %v2232_v59 = vld [vmem:[%s11276_s28 + $0x1bb0] sm:$0xff]  ;;  %2229 = vst [vmem:[%s11284_s29 + $0xdc8] sm:$0xff] %v2228_v57 }
  0xf3   : > { %2231 = vst [vmem:[%s11284_s29 + $0xdd0] sm:$0xff] %v2230_v58  ;;  %2233 = vst [vmem:[%s11284_s29 + $0xdd8] sm:$0xff] %v2232_v59  ;;  %v2234_v60 = vld [vmem:[%s11276_s28 + $0x1bc0] sm:$0xff]  ;;  %v2236_v61 = vld [vmem:[%s11276_s28 + $0x1bd0] sm:$0xff] }
  0xf4   : > { %v2238_v62 = vld [vmem:[%s11276_s28 + $0x1be0] sm:$0xff]  ;;  %2235 = vst [vmem:[%s11284_s29 + $0xde0] sm:$0xff] %v2234_v60  ;;  %2237 = vst [vmem:[%s11284_s29 + $0xde8] sm:$0xff] %v2236_v61  ;;  %v2240_v63 = vld [vmem:[%s11276_s28 + $0x1bf0] sm:$0xff] }
  0xf5   : > { %2239 = vst [vmem:[%s11284_s29 + $0xdf0] sm:$0xff] %v2238_v62  ;;  %v2242_v0 = vld [vmem:[%s11276_s28 + $0x1c00] sm:$0xff]  ;;  %v2244_v1 = vld [vmem:[%s11276_s28 + $0x1c10] sm:$0xff]  ;;  %2241 = vst [vmem:[%s11284_s29 + $0xdf8] sm:$0xff] %v2240_v63 }
  0xf6   : > { %2243 = vst [vmem:[%s11284_s29 + $0xe00] sm:$0xff] %v2242_v0  ;;  %2245 = vst [vmem:[%s11284_s29 + $0xe08] sm:$0xff] %v2244_v1  ;;  %v2246_v2 = vld [vmem:[%s11276_s28 + $0x1c20] sm:$0xff]  ;;  %v2248_v3 = vld [vmem:[%s11276_s28 + $0x1c30] sm:$0xff] }
  0xf7   : > { %v2250_v4 = vld [vmem:[%s11276_s28 + $0x1c40] sm:$0xff]  ;;  %2247 = vst [vmem:[%s11284_s29 + $0xe10] sm:$0xff] %v2246_v2  ;;  %2249 = vst [vmem:[%s11284_s29 + $0xe18] sm:$0xff] %v2248_v3  ;;  %v2252_v5 = vld [vmem:[%s11276_s28 + $0x1c50] sm:$0xff] }
  0xf8   : > { %2251 = vst [vmem:[%s11284_s29 + $0xe20] sm:$0xff] %v2250_v4  ;;  %v2254_v6 = vld [vmem:[%s11276_s28 + $0x1c60] sm:$0xff]  ;;  %v2256_v7 = vld [vmem:[%s11276_s28 + $0x1c70] sm:$0xff]  ;;  %2253 = vst [vmem:[%s11284_s29 + $0xe28] sm:$0xff] %v2252_v5 }
  0xf9   : > { %2255 = vst [vmem:[%s11284_s29 + $0xe30] sm:$0xff] %v2254_v6  ;;  %2257 = vst [vmem:[%s11284_s29 + $0xe38] sm:$0xff] %v2256_v7  ;;  %v2258_v8 = vld [vmem:[%s11276_s28 + $0x1c80] sm:$0xff]  ;;  %v2260_v9 = vld [vmem:[%s11276_s28 + $0x1c90] sm:$0xff] }
  0xfa   : > { %v2262_v10 = vld [vmem:[%s11276_s28 + $0x1ca0] sm:$0xff]  ;;  %2259 = vst [vmem:[%s11284_s29 + $0xe40] sm:$0xff] %v2258_v8  ;;  %2261 = vst [vmem:[%s11284_s29 + $0xe48] sm:$0xff] %v2260_v9  ;;  %v2264_v11 = vld [vmem:[%s11276_s28 + $0x1cb0] sm:$0xff] }
  0xfb   : > { %2263 = vst [vmem:[%s11284_s29 + $0xe50] sm:$0xff] %v2262_v10  ;;  %v2266_v12 = vld [vmem:[%s11276_s28 + $0x1cc0] sm:$0xff]  ;;  %v2268_v13 = vld [vmem:[%s11276_s28 + $0x1cd0] sm:$0xff]  ;;  %2265 = vst [vmem:[%s11284_s29 + $0xe58] sm:$0xff] %v2264_v11 }
  0xfc   : > { %2267 = vst [vmem:[%s11284_s29 + $0xe60] sm:$0xff] %v2266_v12  ;;  %2269 = vst [vmem:[%s11284_s29 + $0xe68] sm:$0xff] %v2268_v13  ;;  %v2270_v14 = vld [vmem:[%s11276_s28 + $0x1ce0] sm:$0xff]  ;;  %v2272_v15 = vld [vmem:[%s11276_s28 + $0x1cf0] sm:$0xff] }
  0xfd   : > { %v2274_v16 = vld [vmem:[%s11276_s28 + $0x1d00] sm:$0xff]  ;;  %2271 = vst [vmem:[%s11284_s29 + $0xe70] sm:$0xff] %v2270_v14  ;;  %2273 = vst [vmem:[%s11284_s29 + $0xe78] sm:$0xff] %v2272_v15  ;;  %v2276_v17 = vld [vmem:[%s11276_s28 + $0x1d10] sm:$0xff] }
  0xfe   : > { %2275 = vst [vmem:[%s11284_s29 + $0xe80] sm:$0xff] %v2274_v16  ;;  %v2278_v18 = vld [vmem:[%s11276_s28 + $0x1d20] sm:$0xff]  ;;  %v2280_v19 = vld [vmem:[%s11276_s28 + $0x1d30] sm:$0xff]  ;;  %2277 = vst [vmem:[%s11284_s29 + $0xe88] sm:$0xff] %v2276_v17 }
  0xff   : > { %2279 = vst [vmem:[%s11284_s29 + $0xe90] sm:$0xff] %v2278_v18  ;;  %2281 = vst [vmem:[%s11284_s29 + $0xe98] sm:$0xff] %v2280_v19  ;;  %v2282_v20 = vld [vmem:[%s11276_s28 + $0x1d40] sm:$0xff]  ;;  %v2284_v21 = vld [vmem:[%s11276_s28 + $0x1d50] sm:$0xff] }
 0x100   : > { %v2286_v22 = vld [vmem:[%s11276_s28 + $0x1d60] sm:$0xff]  ;;  %2283 = vst [vmem:[%s11284_s29 + $0xea0] sm:$0xff] %v2282_v20  ;;  %2285 = vst [vmem:[%s11284_s29 + $0xea8] sm:$0xff] %v2284_v21  ;;  %v2288_v23 = vld [vmem:[%s11276_s28 + $0x1d70] sm:$0xff] }
 0x101   : > { %2287 = vst [vmem:[%s11284_s29 + $0xeb0] sm:$0xff] %v2286_v22  ;;  %v2290_v24 = vld [vmem:[%s11276_s28 + $0x1d80] sm:$0xff]  ;;  %v2292_v25 = vld [vmem:[%s11276_s28 + $0x1d90] sm:$0xff]  ;;  %2289 = vst [vmem:[%s11284_s29 + $0xeb8] sm:$0xff] %v2288_v23 }
 0x102   : > { %2291 = vst [vmem:[%s11284_s29 + $0xec0] sm:$0xff] %v2290_v24  ;;  %2293 = vst [vmem:[%s11284_s29 + $0xec8] sm:$0xff] %v2292_v25  ;;  %v2294_v26 = vld [vmem:[%s11276_s28 + $0x1da0] sm:$0xff]  ;;  %v2296_v27 = vld [vmem:[%s11276_s28 + $0x1db0] sm:$0xff] }
 0x103   : > { %v2298_v28 = vld [vmem:[%s11276_s28 + $0x1dc0] sm:$0xff]  ;;  %2295 = vst [vmem:[%s11284_s29 + $0xed0] sm:$0xff] %v2294_v26  ;;  %2297 = vst [vmem:[%s11284_s29 + $0xed8] sm:$0xff] %v2296_v27  ;;  %v2300_v29 = vld [vmem:[%s11276_s28 + $0x1dd0] sm:$0xff] }
 0x104   : > { %2299 = vst [vmem:[%s11284_s29 + $0xee0] sm:$0xff] %v2298_v28  ;;  %v2302_v30 = vld [vmem:[%s11276_s28 + $0x1de0] sm:$0xff]  ;;  %v2304_v31 = vld [vmem:[%s11276_s28 + $0x1df0] sm:$0xff]  ;;  %2301 = vst [vmem:[%s11284_s29 + $0xee8] sm:$0xff] %v2300_v29 }
 0x105   : > { %2303 = vst [vmem:[%s11284_s29 + $0xef0] sm:$0xff] %v2302_v30  ;;  %2305 = vst [vmem:[%s11284_s29 + $0xef8] sm:$0xff] %v2304_v31  ;;  %v2306_v32 = vld [vmem:[%s11276_s28 + $0x1e00] sm:$0xff]  ;;  %v2308_v33 = vld [vmem:[%s11276_s28 + $0x1e10] sm:$0xff] }
 0x106   : > { %v2310_v34 = vld [vmem:[%s11276_s28 + $0x1e20] sm:$0xff]  ;;  %2307 = vst [vmem:[%s11284_s29 + $0xf00] sm:$0xff] %v2306_v32  ;;  %2309 = vst [vmem:[%s11284_s29 + $0xf08] sm:$0xff] %v2308_v33  ;;  %v2312_v35 = vld [vmem:[%s11276_s28 + $0x1e30] sm:$0xff] }
 0x107   : > { %2311 = vst [vmem:[%s11284_s29 + $0xf10] sm:$0xff] %v2310_v34  ;;  %v2314_v36 = vld [vmem:[%s11276_s28 + $0x1e40] sm:$0xff]  ;;  %v2316_v37 = vld [vmem:[%s11276_s28 + $0x1e50] sm:$0xff]  ;;  %2313 = vst [vmem:[%s11284_s29 + $0xf18] sm:$0xff] %v2312_v35 }
 0x108   : > { %2315 = vst [vmem:[%s11284_s29 + $0xf20] sm:$0xff] %v2314_v36  ;;  %2317 = vst [vmem:[%s11284_s29 + $0xf28] sm:$0xff] %v2316_v37  ;;  %v2318_v38 = vld [vmem:[%s11276_s28 + $0x1e60] sm:$0xff]  ;;  %v2320_v39 = vld [vmem:[%s11276_s28 + $0x1e70] sm:$0xff] }
 0x109   : > { %v2322_v40 = vld [vmem:[%s11276_s28 + $0x1e80] sm:$0xff]  ;;  %2319 = vst [vmem:[%s11284_s29 + $0xf30] sm:$0xff] %v2318_v38  ;;  %2321 = vst [vmem:[%s11284_s29 + $0xf38] sm:$0xff] %v2320_v39  ;;  %v2324_v41 = vld [vmem:[%s11276_s28 + $0x1e90] sm:$0xff] }
 0x10a   : > { %2323 = vst [vmem:[%s11284_s29 + $0xf40] sm:$0xff] %v2322_v40  ;;  %v2326_v42 = vld [vmem:[%s11276_s28 + $0x1ea0] sm:$0xff]  ;;  %v2328_v43 = vld [vmem:[%s11276_s28 + $0x1eb0] sm:$0xff]  ;;  %2325 = vst [vmem:[%s11284_s29 + $0xf48] sm:$0xff] %v2324_v41 }
 0x10b   : > { %2327 = vst [vmem:[%s11284_s29 + $0xf50] sm:$0xff] %v2326_v42  ;;  %2329 = vst [vmem:[%s11284_s29 + $0xf58] sm:$0xff] %v2328_v43  ;;  %v2330_v44 = vld [vmem:[%s11276_s28 + $0x1ec0] sm:$0xff]  ;;  %v2332_v45 = vld [vmem:[%s11276_s28 + $0x1ed0] sm:$0xff] }
 0x10c   : > { %v2334_v46 = vld [vmem:[%s11276_s28 + $0x1ee0] sm:$0xff]  ;;  %2331 = vst [vmem:[%s11284_s29 + $0xf60] sm:$0xff] %v2330_v44  ;;  %2333 = vst [vmem:[%s11284_s29 + $0xf68] sm:$0xff] %v2332_v45  ;;  %v2336_v47 = vld [vmem:[%s11276_s28 + $0x1ef0] sm:$0xff] }
 0x10d   : > { %2335 = vst [vmem:[%s11284_s29 + $0xf70] sm:$0xff] %v2334_v46  ;;  %v2338_v48 = vld [vmem:[%s11276_s28 + $0x1f00] sm:$0xff]  ;;  %v2340_v49 = vld [vmem:[%s11276_s28 + $0x1f10] sm:$0xff]  ;;  %2337 = vst [vmem:[%s11284_s29 + $0xf78] sm:$0xff] %v2336_v47 }
 0x10e   : > { %2339 = vst [vmem:[%s11284_s29 + $0xf80] sm:$0xff] %v2338_v48  ;;  %2341 = vst [vmem:[%s11284_s29 + $0xf88] sm:$0xff] %v2340_v49  ;;  %v2342_v50 = vld [vmem:[%s11276_s28 + $0x1f20] sm:$0xff]  ;;  %v2344_v51 = vld [vmem:[%s11276_s28 + $0x1f30] sm:$0xff] }
 0x10f   : > { %v2346_v52 = vld [vmem:[%s11276_s28 + $0x1f40] sm:$0xff]  ;;  %2343 = vst [vmem:[%s11284_s29 + $0xf90] sm:$0xff] %v2342_v50  ;;  %2345 = vst [vmem:[%s11284_s29 + $0xf98] sm:$0xff] %v2344_v51  ;;  %v2348_v53 = vld [vmem:[%s11276_s28 + $0x1f50] sm:$0xff] }
 0x110   : > { %2347 = vst [vmem:[%s11284_s29 + $0xfa0] sm:$0xff] %v2346_v52  ;;  %v2350_v54 = vld [vmem:[%s11276_s28 + $0x1f60] sm:$0xff]  ;;  %v2352_v55 = vld [vmem:[%s11276_s28 + $0x1f70] sm:$0xff]  ;;  %2349 = vst [vmem:[%s11284_s29 + $0xfa8] sm:$0xff] %v2348_v53 }
 0x111   : > { %2351 = vst [vmem:[%s11284_s29 + $0xfb0] sm:$0xff] %v2350_v54  ;;  %2353 = vst [vmem:[%s11284_s29 + $0xfb8] sm:$0xff] %v2352_v55  ;;  %v2354_v56 = vld [vmem:[%s11276_s28 + $0x1f80] sm:$0xff]  ;;  %v2356_v57 = vld [vmem:[%s11276_s28 + $0x1f90] sm:$0xff] }
 0x112   : > { %v2358_v58 = vld [vmem:[%s11276_s28 + $0x1fa0] sm:$0xff]  ;;  %2355 = vst [vmem:[%s11284_s29 + $0xfc0] sm:$0xff] %v2354_v56  ;;  %2357 = vst [vmem:[%s11284_s29 + $0xfc8] sm:$0xff] %v2356_v57  ;;  %v2360_v59 = vld [vmem:[%s11276_s28 + $0x1fb0] sm:$0xff] }
 0x113   : > { %2359 = vst [vmem:[%s11284_s29 + $0xfd0] sm:$0xff] %v2358_v58  ;;  %v2362_v60 = vld [vmem:[%s11276_s28 + $0x1fc0] sm:$0xff]  ;;  %v2364_v61 = vld [vmem:[%s11276_s28 + $0x1fd0] sm:$0xff]  ;;  %2361 = vst [vmem:[%s11284_s29 + $0xfd8] sm:$0xff] %v2360_v59 }
 0x114   : > { %2363 = vst [vmem:[%s11284_s29 + $0xfe0] sm:$0xff] %v2362_v60  ;;  %2365 = vst [vmem:[%s11284_s29 + $0xfe8] sm:$0xff] %v2364_v61  ;;  %v2366_v62 = vld [vmem:[%s11276_s28 + $0x1fe0] sm:$0xff]  ;;  %v2368_v63 = vld [vmem:[%s11276_s28 + $0x1ff0] sm:$0xff] }
 0x115   : > { %v2370_v0 = vld [vmem:[%s11276_s28 + $0x2000] sm:$0xff]  ;;  %2367 = vst [vmem:[%s11284_s29 + $0xff0] sm:$0xff] %v2366_v62  ;;  %2369 = vst [vmem:[%s11284_s29 + $0xff8] sm:$0xff] %v2368_v63  ;;  %v2372_v1 = vld [vmem:[%s11276_s28 + $0x2010] sm:$0xff] }
 0x116   : > { %2371 = vst [vmem:[%s11284_s29 + $0x1000] sm:$0xff] %v2370_v0  ;;  %v2374_v2 = vld [vmem:[%s11276_s28 + $0x2020] sm:$0xff]  ;;  %v2376_v3 = vld [vmem:[%s11276_s28 + $0x2030] sm:$0xff]  ;;  %2373 = vst [vmem:[%s11284_s29 + $0x1008] sm:$0xff] %v2372_v1 }
 0x117   : > { %2375 = vst [vmem:[%s11284_s29 + $0x1010] sm:$0xff] %v2374_v2  ;;  %2377 = vst [vmem:[%s11284_s29 + $0x1018] sm:$0xff] %v2376_v3  ;;  %v2378_v4 = vld [vmem:[%s11276_s28 + $0x2040] sm:$0xff]  ;;  %v2380_v5 = vld [vmem:[%s11276_s28 + $0x2050] sm:$0xff] }
 0x118   : > { %v2382_v6 = vld [vmem:[%s11276_s28 + $0x2060] sm:$0xff]  ;;  %2379 = vst [vmem:[%s11284_s29 + $0x1020] sm:$0xff] %v2378_v4  ;;  %2381 = vst [vmem:[%s11284_s29 + $0x1028] sm:$0xff] %v2380_v5  ;;  %v2384_v7 = vld [vmem:[%s11276_s28 + $0x2070] sm:$0xff] }
 0x119   : > { %2383 = vst [vmem:[%s11284_s29 + $0x1030] sm:$0xff] %v2382_v6  ;;  %v2386_v8 = vld [vmem:[%s11276_s28 + $0x2080] sm:$0xff]  ;;  %v2388_v9 = vld [vmem:[%s11276_s28 + $0x2090] sm:$0xff]  ;;  %2385 = vst [vmem:[%s11284_s29 + $0x1038] sm:$0xff] %v2384_v7 }
 0x11a   : > { %2387 = vst [vmem:[%s11284_s29 + $0x1040] sm:$0xff] %v2386_v8  ;;  %2389 = vst [vmem:[%s11284_s29 + $0x1048] sm:$0xff] %v2388_v9  ;;  %v2390_v10 = vld [vmem:[%s11276_s28 + $0x20a0] sm:$0xff]  ;;  %v2392_v11 = vld [vmem:[%s11276_s28 + $0x20b0] sm:$0xff] }
 0x11b   : > { %v2394_v12 = vld [vmem:[%s11276_s28 + $0x20c0] sm:$0xff]  ;;  %2391 = vst [vmem:[%s11284_s29 + $0x1050] sm:$0xff] %v2390_v10  ;;  %2393 = vst [vmem:[%s11284_s29 + $0x1058] sm:$0xff] %v2392_v11  ;;  %v2396_v13 = vld [vmem:[%s11276_s28 + $0x20d0] sm:$0xff] }
 0x11c   : > { %2395 = vst [vmem:[%s11284_s29 + $0x1060] sm:$0xff] %v2394_v12  ;;  %v2398_v14 = vld [vmem:[%s11276_s28 + $0x20e0] sm:$0xff]  ;;  %v2400_v15 = vld [vmem:[%s11276_s28 + $0x20f0] sm:$0xff]  ;;  %2397 = vst [vmem:[%s11284_s29 + $0x1068] sm:$0xff] %v2396_v13 }
 0x11d   : > { %2399 = vst [vmem:[%s11284_s29 + $0x1070] sm:$0xff] %v2398_v14  ;;  %2401 = vst [vmem:[%s11284_s29 + $0x1078] sm:$0xff] %v2400_v15  ;;  %v2402_v16 = vld [vmem:[%s11276_s28 + $0x2100] sm:$0xff]  ;;  %v2404_v17 = vld [vmem:[%s11276_s28 + $0x2110] sm:$0xff] }
 0x11e   : > { %v2406_v18 = vld [vmem:[%s11276_s28 + $0x2120] sm:$0xff]  ;;  %2403 = vst [vmem:[%s11284_s29 + $0x1080] sm:$0xff] %v2402_v16  ;;  %2405 = vst [vmem:[%s11284_s29 + $0x1088] sm:$0xff] %v2404_v17  ;;  %v2408_v19 = vld [vmem:[%s11276_s28 + $0x2130] sm:$0xff] }
 0x11f   : > { %2407 = vst [vmem:[%s11284_s29 + $0x1090] sm:$0xff] %v2406_v18  ;;  %v2410_v20 = vld [vmem:[%s11276_s28 + $0x2140] sm:$0xff]  ;;  %v2412_v21 = vld [vmem:[%s11276_s28 + $0x2150] sm:$0xff]  ;;  %2409 = vst [vmem:[%s11284_s29 + $0x1098] sm:$0xff] %v2408_v19 }
 0x120   : > { %2411 = vst [vmem:[%s11284_s29 + $0x10a0] sm:$0xff] %v2410_v20  ;;  %2413 = vst [vmem:[%s11284_s29 + $0x10a8] sm:$0xff] %v2412_v21  ;;  %v2414_v22 = vld [vmem:[%s11276_s28 + $0x2160] sm:$0xff]  ;;  %v2416_v23 = vld [vmem:[%s11276_s28 + $0x2170] sm:$0xff] }
 0x121   : > { %v2418_v24 = vld [vmem:[%s11276_s28 + $0x2180] sm:$0xff]  ;;  %2415 = vst [vmem:[%s11284_s29 + $0x10b0] sm:$0xff] %v2414_v22  ;;  %2417 = vst [vmem:[%s11284_s29 + $0x10b8] sm:$0xff] %v2416_v23  ;;  %v2420_v25 = vld [vmem:[%s11276_s28 + $0x2190] sm:$0xff] }
 0x122   : > { %2419 = vst [vmem:[%s11284_s29 + $0x10c0] sm:$0xff] %v2418_v24  ;;  %v2422_v26 = vld [vmem:[%s11276_s28 + $0x21a0] sm:$0xff]  ;;  %v2424_v27 = vld [vmem:[%s11276_s28 + $0x21b0] sm:$0xff]  ;;  %2421 = vst [vmem:[%s11284_s29 + $0x10c8] sm:$0xff] %v2420_v25 }
 0x123   : > { %2423 = vst [vmem:[%s11284_s29 + $0x10d0] sm:$0xff] %v2422_v26  ;;  %2425 = vst [vmem:[%s11284_s29 + $0x10d8] sm:$0xff] %v2424_v27  ;;  %v2426_v28 = vld [vmem:[%s11276_s28 + $0x21c0] sm:$0xff]  ;;  %v2428_v29 = vld [vmem:[%s11276_s28 + $0x21d0] sm:$0xff] }
 0x124   : > { %v2430_v30 = vld [vmem:[%s11276_s28 + $0x21e0] sm:$0xff]  ;;  %2427 = vst [vmem:[%s11284_s29 + $0x10e0] sm:$0xff] %v2426_v28  ;;  %2429 = vst [vmem:[%s11284_s29 + $0x10e8] sm:$0xff] %v2428_v29  ;;  %v2432_v31 = vld [vmem:[%s11276_s28 + $0x21f0] sm:$0xff] }
 0x125   : > { %2431 = vst [vmem:[%s11284_s29 + $0x10f0] sm:$0xff] %v2430_v30  ;;  %v2434_v32 = vld [vmem:[%s11276_s28 + $0x2200] sm:$0xff]  ;;  %v2436_v33 = vld [vmem:[%s11276_s28 + $0x2210] sm:$0xff]  ;;  %2433 = vst [vmem:[%s11284_s29 + $0x10f8] sm:$0xff] %v2432_v31 }
 0x126   : > { %2435 = vst [vmem:[%s11284_s29 + $0x1100] sm:$0xff] %v2434_v32  ;;  %2437 = vst [vmem:[%s11284_s29 + $0x1108] sm:$0xff] %v2436_v33  ;;  %v2438_v34 = vld [vmem:[%s11276_s28 + $0x2220] sm:$0xff]  ;;  %v2440_v35 = vld [vmem:[%s11276_s28 + $0x2230] sm:$0xff] }
 0x127   : > { %v2442_v36 = vld [vmem:[%s11276_s28 + $0x2240] sm:$0xff]  ;;  %2439 = vst [vmem:[%s11284_s29 + $0x1110] sm:$0xff] %v2438_v34  ;;  %2441 = vst [vmem:[%s11284_s29 + $0x1118] sm:$0xff] %v2440_v35  ;;  %v2444_v37 = vld [vmem:[%s11276_s28 + $0x2250] sm:$0xff] }
 0x128   : > { %2443 = vst [vmem:[%s11284_s29 + $0x1120] sm:$0xff] %v2442_v36  ;;  %v2446_v38 = vld [vmem:[%s11276_s28 + $0x2260] sm:$0xff]  ;;  %v2448_v39 = vld [vmem:[%s11276_s28 + $0x2270] sm:$0xff]  ;;  %2445 = vst [vmem:[%s11284_s29 + $0x1128] sm:$0xff] %v2444_v37 }
 0x129   : > { %2447 = vst [vmem:[%s11284_s29 + $0x1130] sm:$0xff] %v2446_v38  ;;  %2449 = vst [vmem:[%s11284_s29 + $0x1138] sm:$0xff] %v2448_v39  ;;  %v2450_v40 = vld [vmem:[%s11276_s28 + $0x2280] sm:$0xff]  ;;  %v2452_v41 = vld [vmem:[%s11276_s28 + $0x2290] sm:$0xff] }
 0x12a   : > { %v2454_v42 = vld [vmem:[%s11276_s28 + $0x22a0] sm:$0xff]  ;;  %2451 = vst [vmem:[%s11284_s29 + $0x1140] sm:$0xff] %v2450_v40  ;;  %2453 = vst [vmem:[%s11284_s29 + $0x1148] sm:$0xff] %v2452_v41  ;;  %v2456_v43 = vld [vmem:[%s11276_s28 + $0x22b0] sm:$0xff] }
 0x12b   : > { %2455 = vst [vmem:[%s11284_s29 + $0x1150] sm:$0xff] %v2454_v42  ;;  %v2458_v44 = vld [vmem:[%s11276_s28 + $0x22c0] sm:$0xff]  ;;  %v2460_v45 = vld [vmem:[%s11276_s28 + $0x22d0] sm:$0xff]  ;;  %2457 = vst [vmem:[%s11284_s29 + $0x1158] sm:$0xff] %v2456_v43 }
 0x12c   : > { %2459 = vst [vmem:[%s11284_s29 + $0x1160] sm:$0xff] %v2458_v44  ;;  %2461 = vst [vmem:[%s11284_s29 + $0x1168] sm:$0xff] %v2460_v45  ;;  %v2462_v46 = vld [vmem:[%s11276_s28 + $0x22e0] sm:$0xff]  ;;  %v2464_v47 = vld [vmem:[%s11276_s28 + $0x22f0] sm:$0xff] }
 0x12d   : > { %v2466_v48 = vld [vmem:[%s11276_s28 + $0x2300] sm:$0xff]  ;;  %2463 = vst [vmem:[%s11284_s29 + $0x1170] sm:$0xff] %v2462_v46  ;;  %2465 = vst [vmem:[%s11284_s29 + $0x1178] sm:$0xff] %v2464_v47  ;;  %v2468_v49 = vld [vmem:[%s11276_s28 + $0x2310] sm:$0xff] }
 0x12e   : > { %2467 = vst [vmem:[%s11284_s29 + $0x1180] sm:$0xff] %v2466_v48  ;;  %v2470_v50 = vld [vmem:[%s11276_s28 + $0x2320] sm:$0xff]  ;;  %v2472_v51 = vld [vmem:[%s11276_s28 + $0x2330] sm:$0xff]  ;;  %2469 = vst [vmem:[%s11284_s29 + $0x1188] sm:$0xff] %v2468_v49 }
 0x12f   : > { %2471 = vst [vmem:[%s11284_s29 + $0x1190] sm:$0xff] %v2470_v50  ;;  %2473 = vst [vmem:[%s11284_s29 + $0x1198] sm:$0xff] %v2472_v51  ;;  %v2474_v52 = vld [vmem:[%s11276_s28 + $0x2340] sm:$0xff]  ;;  %v2476_v53 = vld [vmem:[%s11276_s28 + $0x2350] sm:$0xff] }
 0x130   : > { %v2478_v54 = vld [vmem:[%s11276_s28 + $0x2360] sm:$0xff]  ;;  %2475 = vst [vmem:[%s11284_s29 + $0x11a0] sm:$0xff] %v2474_v52  ;;  %2477 = vst [vmem:[%s11284_s29 + $0x11a8] sm:$0xff] %v2476_v53  ;;  %v2480_v55 = vld [vmem:[%s11276_s28 + $0x2370] sm:$0xff] }
 0x131   : > { %2479 = vst [vmem:[%s11284_s29 + $0x11b0] sm:$0xff] %v2478_v54  ;;  %v2482_v56 = vld [vmem:[%s11276_s28 + $0x2380] sm:$0xff]  ;;  %v2484_v57 = vld [vmem:[%s11276_s28 + $0x2390] sm:$0xff]  ;;  %2481 = vst [vmem:[%s11284_s29 + $0x11b8] sm:$0xff] %v2480_v55 }
 0x132   : > { %2483 = vst [vmem:[%s11284_s29 + $0x11c0] sm:$0xff] %v2482_v56  ;;  %2485 = vst [vmem:[%s11284_s29 + $0x11c8] sm:$0xff] %v2484_v57  ;;  %v2486_v58 = vld [vmem:[%s11276_s28 + $0x23a0] sm:$0xff]  ;;  %v2488_v59 = vld [vmem:[%s11276_s28 + $0x23b0] sm:$0xff] }
 0x133   : > { %v2490_v60 = vld [vmem:[%s11276_s28 + $0x23c0] sm:$0xff]  ;;  %2487 = vst [vmem:[%s11284_s29 + $0x11d0] sm:$0xff] %v2486_v58  ;;  %2489 = vst [vmem:[%s11284_s29 + $0x11d8] sm:$0xff] %v2488_v59  ;;  %v2492_v61 = vld [vmem:[%s11276_s28 + $0x23d0] sm:$0xff] }
 0x134   : > { %2491 = vst [vmem:[%s11284_s29 + $0x11e0] sm:$0xff] %v2490_v60  ;;  %v2494_v62 = vld [vmem:[%s11276_s28 + $0x23e0] sm:$0xff]  ;;  %v2496_v63 = vld [vmem:[%s11276_s28 + $0x23f0] sm:$0xff]  ;;  %2493 = vst [vmem:[%s11284_s29 + $0x11e8] sm:$0xff] %v2492_v61 }
 0x135   : > { %2495 = vst [vmem:[%s11284_s29 + $0x11f0] sm:$0xff] %v2494_v62  ;;  %2497 = vst [vmem:[%s11284_s29 + $0x11f8] sm:$0xff] %v2496_v63 }
 0x136 PF: > { %p9514_p8 = scmp.ge.s32.totalorder %s11206_s16, 1  ;;  %p4850_p9 = scmp.lt.s32.totalorder %s11206_s16, 3 }
 0x138   : > { %p4851_p10 = pnand %p9514_p8, %p4850_p9 }
 0x139   : > { %s4857_s30 = sand.u32 (!%p4851_p10), 1, %s11190_s12   ;;  %v10348_v0 = vld [vmem:[%s13150_s0 + $0x4] ss:$144 sps:$4 sm:$0xff] (!%p4851_p10)   ;;  %v10354_v1 = vld [vmem:[%s13150_s0 + $0x4c] ss:$144 sps:$4 sm:$0xff] (!%p4851_p10)   ;;  %s9516_s10 = sshll.u32 (!%p4851_p10), %s11198_s14, 1 }
 0x13a   : > { %4854 = sbr.rel (%p4851_p10) target bundleno = 1125 (0x465), region = 80  ;;  %8620 = vmatprep.mubr.bf16.mxu1 (!%p4851_p10), %v10348_v0  ;;  %9007 = vmatprep.mubr.bf16.mxu0 (!%p4851_p10), %v10354_v1  ;;  %p4898_p11 = scmp.lt.s32.totalorder (!%p4851_p10), %s9516_s10, 3 }
 0x13b   : > { %s10209_s4 = smul.u32 (!%p4851_p10), 4608, %s4857_s30  ;;  %s9515_s19 = sshll.u32 (!%p4851_p10), %s4857_s30, 5 }
 0x13c   : > { %s4888_s20 = scalar_lea.vmem (!%p4851_p10), [#allocation3], %s9515_s19 }
 0x13d   : > { %s12443_s9 = scalar_lea.vmem (!%p4851_p10), [#allocation2], %s10209_s4 }
 0x13e   : > { %v10250_v2 = vld [vmem:[%s12443_s9 + $0x4] ss:$8 sps:$4 sm:$0xff] (!%p4851_p10)   ;;  %v10254_v4 = vld [vmem:[%s12443_s9] ss:$8 sps:$4 sm:$0xff] (!%p4851_p10)   ;;  %v10256_v6 = vld [vmem:[%s12443_s9 + $0x14] ss:$8 sps:$4 sm:$0xff] (!%p4851_p10)  }
 0x13f   : > { %v10252_v3 = vld [vmem:[%s12443_s9 + $0x904] ss:$8 sps:$4 sm:$0xff] (!%p4851_p10)   ;;  %8588 = vmatprep.subr.bf16.mxu1 (!%p4851_p10), %v10250_v2  ;;  %v10255_v5 = vld [vmem:[%s12443_s9 + $0x900] ss:$8 sps:$4 sm:$0xff] (!%p4851_p10)   ;;  %v10258_v7 = vld [vmem:[%s12443_s9 + $0x914] ss:$8 sps:$4 sm:$0xff] (!%p4851_p10)  }
 0x140   : > { %8975 = vmatprep.subr.bf16.mxu0 (!%p4851_p10), %v10252_v3  ;;  %8589 = vmatpush1.bf16.msra.mxu1 (!%p4851_p10), %v10254_v4  ;;  %v10260_v8 = vld [vmem:[%s12443_s9 + $0x10] ss:$8 sps:$4 sm:$0xff] (!%p4851_p10)   ;;  %v10262_v10 = vld [vmem:[%s12443_s9 + $0x24] ss:$8 sps:$4 sm:$0xff] (!%p4851_p10)   ;;  %v10266_v12 = vld [vmem:[%s12443_s9 + $0x20] ss:$8 sps:$4 sm:$0xff] (!%p4851_p10)  }
 0x141   : > { %8976 = vmatpush1.bf16.msra.mxu0 %v10255_v5  ;;  %8590 = vmatprep.subr.bf16.mxu1 %v10256_v6  ;;  %v10261_v9 = vld [vmem:[%s12443_s9 + $0x910] ss:$8 sps:$4 sm:$0xff]   ;;  %v10264_v11 = vld [vmem:[%s12443_s9 + $0x924] ss:$8 sps:$4 sm:$0xff]   ;;  %v10267_v13 = vld [vmem:[%s12443_s9 + $0x920] ss:$8 sps:$4 sm:$0xff]  }
 0x142   : > { %8977 = vmatprep.subr.bf16.mxu0 %v10258_v7  ;;  %v10268_v14 = vld [vmem:[%s12443_s9 + $0x34] ss:$8 sps:$4 sm:$0xff]   ;;  %v10272_v16 = vld [vmem:[%s12443_s9 + $0x30] ss:$8 sps:$4 sm:$0xff]   ;;  %v10274_v18 = vld [vmem:[%s12443_s9 + $0x44] ss:$8 sps:$4 sm:$0xff]  }
 0x143   : > { %v10270_v15 = vld [vmem:[%s12443_s9 + $0x934] ss:$8 sps:$4 sm:$0xff]   ;;  %v10273_v17 = vld [vmem:[%s12443_s9 + $0x930] ss:$8 sps:$4 sm:$0xff]   ;;  %v10276_v19 = vld [vmem:[%s12443_s9 + $0x944] ss:$8 sps:$4 sm:$0xff]  }
 0x144   : > { %8591 = vmatpush1.bf16.msra.mxu1 %v10260_v8  ;;  %v10278_v20 = vld [vmem:[%s12443_s9 + $0x40] ss:$8 sps:$4 sm:$0xff]   ;;  %v10280_v22 = vld [vmem:[%s12443_s9 + $0x54] ss:$8 sps:$4 sm:$0xff]   ;;  %v10284_v24 = vld [vmem:[%s12443_s9 + $0x50] ss:$8 sps:$4 sm:$0xff]  }
 0x145   : > { %8978 = vmatpush1.bf16.msra.mxu0 %v10261_v9  ;;  %8592 = vmatprep.subr.bf16.mxu1 %v10262_v10  ;;  %v10279_v21 = vld [vmem:[%s12443_s9 + $0x940] ss:$8 sps:$4 sm:$0xff]   ;;  %v10282_v23 = vld [vmem:[%s12443_s9 + $0x954] ss:$8 sps:$4 sm:$0xff]   ;;  %v10285_v25 = vld [vmem:[%s12443_s9 + $0x950] ss:$8 sps:$4 sm:$0xff]  }
 0x146   : > { %8979 = vmatprep.subr.bf16.mxu0 %v10264_v11  ;;  %v10286_v26 = vld [vmem:[%s12443_s9 + $0x64] ss:$8 sps:$4 sm:$0xff]   ;;  %v10290_v28 = vld [vmem:[%s12443_s9 + $0x60] ss:$8 sps:$4 sm:$0xff]   ;;  %v10292_v30 = vld [vmem:[%s12443_s9 + $0x74] ss:$8 sps:$4 sm:$0xff]  }
 0x147   : > { %v10288_v27 = vld [vmem:[%s12443_s9 + $0x964] ss:$8 sps:$4 sm:$0xff]   ;;  %v10291_v29 = vld [vmem:[%s12443_s9 + $0x960] ss:$8 sps:$4 sm:$0xff]   ;;  %v10294_v31 = vld [vmem:[%s12443_s9 + $0x974] ss:$8 sps:$4 sm:$0xff]  }
 0x148   : > { %8593 = vmatpush1.bf16.msra.mxu1 %v10266_v12  ;;  %v10296_v32 = vld [vmem:[%s12443_s9 + $0x70] ss:$8 sps:$4 sm:$0xff]   ;;  %v10298_v34 = vld [vmem:[%s12443_s9 + $0x84] ss:$8 sps:$4 sm:$0xff]   ;;  %v10302_v36 = vld [vmem:[%s12443_s9 + $0x80] ss:$8 sps:$4 sm:$0xff]  }
 0x149   : > { %8980 = vmatpush1.bf16.msra.mxu0 %v10267_v13  ;;  %8594 = vmatprep.subr.bf16.mxu1 %v10268_v14  ;;  %v10297_v33 = vld [vmem:[%s12443_s9 + $0x970] ss:$8 sps:$4 sm:$0xff]   ;;  %v10300_v35 = vld [vmem:[%s12443_s9 + $0x984] ss:$8 sps:$4 sm:$0xff]   ;;  %v10303_v37 = vld [vmem:[%s12443_s9 + $0x980] ss:$8 sps:$4 sm:$0xff]  }
 0x14a   : > { %8981 = vmatprep.subr.bf16.mxu0 %v10270_v15  ;;  %v10304_v38 = vld [vmem:[%s12443_s9 + $0x94] ss:$8 sps:$4 sm:$0xff]   ;;  %v10308_v40 = vld [vmem:[%s12443_s9 + $0x90] ss:$8 sps:$4 sm:$0xff]   ;;  %v10310_v42 = vld [vmem:[%s12443_s9 + $0xa4] ss:$8 sps:$4 sm:$0xff]  }
 0x14b   : > { %v10306_v39 = vld [vmem:[%s12443_s9 + $0x994] ss:$8 sps:$4 sm:$0xff]   ;;  %v10309_v41 = vld [vmem:[%s12443_s9 + $0x990] ss:$8 sps:$4 sm:$0xff]   ;;  %v10312_v43 = vld [vmem:[%s12443_s9 + $0x9a4] ss:$8 sps:$4 sm:$0xff]  }
 0x14c   : > { %8595 = vmatpush1.bf16.msra.mxu1 %v10272_v16  ;;  %v10314_v44 = vld [vmem:[%s12443_s9 + $0xa0] ss:$8 sps:$4 sm:$0xff]   ;;  %v10316_v46 = vld [vmem:[%s12443_s9 + $0xb4] ss:$8 sps:$4 sm:$0xff]   ;;  %v10320_v48 = vld [vmem:[%s12443_s9 + $0xb0] ss:$8 sps:$4 sm:$0xff]  }
 0x14d   : > { %8982 = vmatpush1.bf16.msra.mxu0 %v10273_v17  ;;  %8596 = vmatprep.subr.bf16.mxu1 %v10274_v18  ;;  %v10315_v45 = vld [vmem:[%s12443_s9 + $0x9a0] ss:$8 sps:$4 sm:$0xff]   ;;  %v10318_v47 = vld [vmem:[%s12443_s9 + $0x9b4] ss:$8 sps:$4 sm:$0xff]   ;;  %v10321_v49 = vld [vmem:[%s12443_s9 + $0x9b0] ss:$8 sps:$4 sm:$0xff]  }
 0x14e   : > { %8983 = vmatprep.subr.bf16.mxu0 %v10276_v19  ;;  %v10322_v50 = vld [vmem:[%s12443_s9 + $0xc4] ss:$8 sps:$4 sm:$0xff]   ;;  %v10326_v52 = vld [vmem:[%s12443_s9 + $0xc0] ss:$8 sps:$4 sm:$0xff]   ;;  %v10328_v54 = vld [vmem:[%s12443_s9 + $0xd4] ss:$8 sps:$4 sm:$0xff]  }
 0x14f   : > { %v10324_v51 = vld [vmem:[%s12443_s9 + $0x9c4] ss:$8 sps:$4 sm:$0xff]   ;;  %v10327_v53 = vld [vmem:[%s12443_s9 + $0x9c0] ss:$8 sps:$4 sm:$0xff]   ;;  %v10330_v55 = vld [vmem:[%s12443_s9 + $0x9d4] ss:$8 sps:$4 sm:$0xff]  }
 0x150   : > { %8597 = vmatpush1.bf16.msra.mxu1 %v10278_v20  ;;  %v10332_v56 = vld [vmem:[%s12443_s9 + $0xd0] ss:$8 sps:$4 sm:$0xff]   ;;  %v10334_v58 = vld [vmem:[%s12443_s9 + $0xe4] ss:$8 sps:$4 sm:$0xff]   ;;  %v10338_v60 = vld [vmem:[%s12443_s9 + $0xe0] ss:$8 sps:$4 sm:$0xff]  }
 0x151   : > { %8984 = vmatpush1.bf16.msra.mxu0 %v10279_v21  ;;  %8598 = vmatprep.subr.bf16.mxu1 %v10280_v22  ;;  %v10333_v57 = vld [vmem:[%s12443_s9 + $0x9d0] ss:$8 sps:$4 sm:$0xff]   ;;  %v10336_v59 = vld [vmem:[%s12443_s9 + $0x9e4] ss:$8 sps:$4 sm:$0xff]   ;;  %v10339_v61 = vld [vmem:[%s12443_s9 + $0x9e0] ss:$8 sps:$4 sm:$0xff]  }
 0x152   : > { %8985 = vmatprep.subr.bf16.mxu0 %v10282_v23  ;;  %v10340_v62 = vld [vmem:[%s12443_s9 + $0xf4] ss:$8 sps:$4 sm:$0xff]   ;;  %v10344_v0 = vld [vmem:[%s12443_s9 + $0xf0] ss:$8 sps:$4 sm:$0xff]   ;;  %v10351_v2 = vld [vmem:[%s12443_s9 + $0x104] ss:$8 sps:$4 sm:$0xff]  }
 0x153   : > { %v10342_v63 = vld [vmem:[%s12443_s9 + $0x9f4] ss:$8 sps:$4 sm:$0xff]   ;;  %v10345_v1 = vld [vmem:[%s12443_s9 + $0x9f0] ss:$8 sps:$4 sm:$0xff]   ;;  %v10357_v3 = vld [vmem:[%s12443_s9 + $0xa04] ss:$8 sps:$4 sm:$0xff]  }
 0x154   : > { %8599 = vmatpush1.bf16.msra.mxu1 %v10284_v24  ;;  %v10346_v4 = vld [vmem:[%s13150_s0] ss:$144 sps:$4 sm:$0xff]   ;;  %v10352_v5 = vld [vmem:[%s13150_s0 + $0x48] ss:$144 sps:$4 sm:$0xff]   ;;  %v10360_v8 = vld [vmem:[%s12443_s9 + $0x114] ss:$8 sps:$4 sm:$0xff]  }
 0x155   : > { %8986 = vmatpush1.bf16.msra.mxu0 %v10285_v25  ;;  %8600 = vmatprep.subr.bf16.mxu1 %v10286_v26  ;;  %v10349_v6 = vld [vmem:[%s12443_s9 + $0x100] ss:$8 sps:$4 sm:$0xff]   ;;  %v10363_v9 = vld [vmem:[%s12443_s9 + $0xa14] ss:$8 sps:$4 sm:$0xff]   ;;  %v10358_v10 = vld [vmem:[%s12443_s9 + $0x110] ss:$8 sps:$4 sm:$0xff]  }
 0x156   : > { %8987 = vmatprep.subr.bf16.mxu0 %v10288_v27  ;;  %v10355_v7 = vld [vmem:[%s12443_s9 + $0xa00] ss:$8 sps:$4 sm:$0xff]   ;;  %v10361_v11 = vld [vmem:[%s12443_s9 + $0xa10] ss:$8 sps:$4 sm:$0xff]   ;;  %v10366_v12 = vld [vmem:[%s12443_s9 + $0x124] ss:$8 sps:$4 sm:$0xff]  }
 0x157   : > { %v10369_v13 = vld [vmem:[%s12443_s9 + $0xa24] ss:$8 sps:$4 sm:$0xff]   ;;  %v10364_v14 = vld [vmem:[%s12443_s9 + $0x120] ss:$8 sps:$4 sm:$0xff]   ;;  %v10372_v16 = vld [vmem:[%s12443_s9 + $0x134] ss:$8 sps:$4 sm:$0xff]  }
 0x158   : > { %8601 = vmatpush1.bf16.msra.mxu1 %v10290_v28  ;;  %v10367_v15 = vld [vmem:[%s12443_s9 + $0xa20] ss:$8 sps:$4 sm:$0xff]   ;;  %v10375_v17 = vld [vmem:[%s12443_s9 + $0xa34] ss:$8 sps:$4 sm:$0xff]   ;;  %v10370_v18 = vld [vmem:[%s12443_s9 + $0x130] ss:$8 sps:$4 sm:$0xff]  }
 0x159   : > { %8988 = vmatpush1.bf16.msra.mxu0 %v10291_v29  ;;  %8602 = vmatprep.subr.bf16.mxu1 %v10292_v30  ;;  %v10373_v19 = vld [vmem:[%s12443_s9 + $0xa30] ss:$8 sps:$4 sm:$0xff]   ;;  %v10378_v20 = vld [vmem:[%s12443_s9 + $0x144] ss:$8 sps:$4 sm:$0xff]   ;;  %v10376_v22 = vld [vmem:[%s12443_s9 + $0x140] ss:$8 sps:$4 sm:$0xff]  }
 0x15a   : > { %8989 = vmatprep.subr.bf16.mxu0 %v10294_v31  ;;  %v10381_v21 = vld [vmem:[%s12443_s9 + $0xa44] ss:$8 sps:$4 sm:$0xff]   ;;  %v10379_v23 = vld [vmem:[%s12443_s9 + $0xa40] ss:$8 sps:$4 sm:$0xff]   ;;  %v10384_v24 = vld [vmem:[%s12443_s9 + $0x154] ss:$8 sps:$4 sm:$0xff]  }
 0x15b   : > { %v10387_v25 = vld [vmem:[%s12443_s9 + $0xa54] ss:$8 sps:$4 sm:$0xff]   ;;  %v10382_v26 = vld [vmem:[%s12443_s9 + $0x150] ss:$8 sps:$4 sm:$0xff]   ;;  %v10390_v28 = vld [vmem:[%s12443_s9 + $0x164] ss:$8 sps:$4 sm:$0xff]  }
 0x15c   : > { %8603 = vmatpush1.bf16.msra.mxu1 %v10296_v32  ;;  %v10385_v27 = vld [vmem:[%s12443_s9 + $0xa50] ss:$8 sps:$4 sm:$0xff]   ;;  %v10393_v29 = vld [vmem:[%s12443_s9 + $0xa64] ss:$8 sps:$4 sm:$0xff]   ;;  %v10388_v31 = vld [vmem:[%s12443_s9 + $0x160] ss:$8 sps:$4 sm:$0xff]  }
 0x15d   : > { %8990 = vmatpush1.bf16.msra.mxu0 %v10297_v33  ;;  %8604 = vmatprep.subr.bf16.mxu1 %v10298_v34  ;;  %v10450_v30 = vld [vmem:[%s13150_s0 + $0xc] ss:$144 sps:$4 sm:$0xff]   ;;  %v10391_v32 = vld [vmem:[%s12443_s9 + $0xa60] ss:$8 sps:$4 sm:$0xff]   ;;  %v10456_v33 = vld [vmem:[%s13150_s0 + $0x54] ss:$144 sps:$4 sm:$0xff]  }
 0x15e   : > { %8991 = vmatprep.subr.bf16.mxu0 %v10300_v35  ;;  %v10396_v34 = vld [vmem:[%s12443_s9 + $0x174] ss:$8 sps:$4 sm:$0xff]   ;;  %s13162_s10 = smov (!%p4898_p11, %s9516_s10), 3  ;;  %s10135_s12 = sshll.u32 (%p11263_p6), %s11198_s14, 4 }
 0x15f   : > { %v10399_v35 = vld [vmem:[%s12443_s9 + $0xa74] ss:$8 sps:$4 sm:$0xff]   ;;  %s4900_s18 = scalar_lea.vmem %s13152_s2, %s13162_s10  ;;  %s9382_s24 = scalar_lea.vmem (%p11263_p6), %s13153_s3, %s10135_s12 }
 0x160   : > { %8605 = vmatpush1.bf16.msra.mxu1 %v10302_v36  ;;  %v10394_v36 = vld [vmem:[%s12443_s9 + $0x170] ss:$8 sps:$4 sm:$0xff]  }
 0x161   : > { %8992 = vmatpush1.bf16.msra.mxu0 %v10303_v37  ;;  %8606 = vmatprep.subr.bf16.mxu1 %v10304_v38  ;;  %v10397_v37 = vld [vmem:[%s12443_s9 + $0xa70] ss:$8 sps:$4 sm:$0xff]   ;;  %v10402_v38 = vld [vmem:[%s12443_s9 + $0x184] ss:$8 sps:$4 sm:$0xff]  }
 0x162   : > { %8993 = vmatprep.subr.bf16.mxu0 %v10306_v39  ;;  %v10405_v39 = vld [vmem:[%s12443_s9 + $0xa84] ss:$8 sps:$4 sm:$0xff]  }
 0x164   : > { %8607 = vmatpush1.bf16.msra.mxu1 %v10308_v40  ;;  %v10400_v40 = vld [vmem:[%s12443_s9 + $0x180] ss:$8 sps:$4 sm:$0xff]  }
 0x165   : > { %8994 = vmatpush1.bf16.msra.mxu0 %v10309_v41  ;;  %8608 = vmatprep.subr.bf16.mxu1 %v10310_v42  ;;  %v10403_v41 = vld [vmem:[%s12443_s9 + $0xa80] ss:$8 sps:$4 sm:$0xff]   ;;  %v10408_v42 = vld [vmem:[%s12443_s9 + $0x194] ss:$8 sps:$4 sm:$0xff]  }
 0x166   : > { %8995 = vmatprep.subr.bf16.mxu0 %v10312_v43  ;;  %v10411_v43 = vld [vmem:[%s12443_s9 + $0xa94] ss:$8 sps:$4 sm:$0xff]  }
 0x168   : > { %8609 = vmatpush1.bf16.msra.mxu1 %v10314_v44  ;;  %v10406_v44 = vld [vmem:[%s12443_s9 + $0x190] ss:$8 sps:$4 sm:$0xff]  }
 0x169   : > { %8996 = vmatpush1.bf16.msra.mxu0 %v10315_v45  ;;  %8610 = vmatprep.subr.bf16.mxu1 %v10316_v46  ;;  %v10409_v45 = vld [vmem:[%s12443_s9 + $0xa90] ss:$8 sps:$4 sm:$0xff]   ;;  %v10414_v46 = vld [vmem:[%s12443_s9 + $0x1a4] ss:$8 sps:$4 sm:$0xff]  }
 0x16a   : > { %8997 = vmatprep.subr.bf16.mxu0 %v10318_v47  ;;  %v10417_v47 = vld [vmem:[%s12443_s9 + $0xaa4] ss:$8 sps:$4 sm:$0xff]  }
 0x16c   : > { %8611 = vmatpush1.bf16.msra.mxu1 %v10320_v48  ;;  %v10412_v48 = vld [vmem:[%s12443_s9 + $0x1a0] ss:$8 sps:$4 sm:$0xff]  }
 0x16d   : > { %8998 = vmatpush1.bf16.msra.mxu0 %v10321_v49  ;;  %8612 = vmatprep.subr.bf16.mxu1 %v10322_v50  ;;  %v10415_v49 = vld [vmem:[%s12443_s9 + $0xaa0] ss:$8 sps:$4 sm:$0xff]   ;;  %v10420_v50 = vld [vmem:[%s12443_s9 + $0x1b4] ss:$8 sps:$4 sm:$0xff]  }
 0x16e   : > { %8999 = vmatprep.subr.bf16.mxu0 %v10324_v51  ;;  %v10423_v51 = vld [vmem:[%s12443_s9 + $0xab4] ss:$8 sps:$4 sm:$0xff]  }
 0x170   : > { %8613 = vmatpush1.bf16.msra.mxu1 %v10326_v52  ;;  %v10418_v52 = vld [vmem:[%s12443_s9 + $0x1b0] ss:$8 sps:$4 sm:$0xff]  }
 0x171   : > { %9000 = vmatpush1.bf16.msra.mxu0 %v10327_v53  ;;  %8614 = vmatprep.subr.bf16.mxu1 %v10328_v54  ;;  %v10421_v53 = vld [vmem:[%s12443_s9 + $0xab0] ss:$8 sps:$4 sm:$0xff]   ;;  %v10426_v54 = vld [vmem:[%s12443_s9 + $0x1c4] ss:$8 sps:$4 sm:$0xff]  }
 0x172   : > { %9001 = vmatprep.subr.bf16.mxu0 %v10330_v55  ;;  %v10429_v55 = vld [vmem:[%s12443_s9 + $0xac4] ss:$8 sps:$4 sm:$0xff]  }
 0x174   : > { %8615 = vmatpush1.bf16.msra.mxu1 %v10332_v56  ;;  %v10424_v56 = vld [vmem:[%s12443_s9 + $0x1c0] ss:$8 sps:$4 sm:$0xff]  }
 0x175   : > { %9002 = vmatpush1.bf16.msra.mxu0 %v10333_v57  ;;  %8616 = vmatprep.subr.bf16.mxu1 %v10334_v58  ;;  %v10427_v57 = vld [vmem:[%s12443_s9 + $0xac0] ss:$8 sps:$4 sm:$0xff]   ;;  %v10432_v58 = vld [vmem:[%s12443_s9 + $0x1d4] ss:$8 sps:$4 sm:$0xff]  }
 0x176   : > { %9003 = vmatprep.subr.bf16.mxu0 %v10336_v59  ;;  %v10435_v59 = vld [vmem:[%s12443_s9 + $0xad4] ss:$8 sps:$4 sm:$0xff]  }
 0x178   : > { %8617 = vmatpush1.bf16.msra.mxu1 %v10338_v60  ;;  %v10430_v60 = vld [vmem:[%s12443_s9 + $0x1d0] ss:$8 sps:$4 sm:$0xff]  }
 0x179   : > { %9004 = vmatpush1.bf16.msra.mxu0 %v10339_v61  ;;  %8618 = vmatprep.subr.bf16.mxu1 %v10340_v62  ;;  %v10433_v61 = vld [vmem:[%s12443_s9 + $0xad0] ss:$8 sps:$4 sm:$0xff]   ;;  %v10438_v62 = vld [vmem:[%s12443_s9 + $0x1e4] ss:$8 sps:$4 sm:$0xff]  }
 0x17a   : > { %9005 = vmatprep.subr.bf16.mxu0 %v10342_v63  ;;  %v10441_v63 = vld [vmem:[%s12443_s9 + $0xae4] ss:$8 sps:$4 sm:$0xff]  }
 0x17c   : > { %8619 = vmatpush1.bf16.msra.mxu1 %v10344_v0  ;;  %v10436_v0 = vld [vmem:[%s12443_s9 + $0x1e0] ss:$8 sps:$4 sm:$0xff]  }
 0x17d   : > { %9006 = vmatpush1.bf16.msra.mxu0 %v10345_v1  ;;  %8631 = vmatprep.subr.bf16.mxu1 %v10351_v2  ;;  %v10439_v1 = vld [vmem:[%s12443_s9 + $0xae0] ss:$8 sps:$4 sm:$0xff]   ;;  %v10444_v2 = vld [vmem:[%s12443_s9 + $0x1f4] ss:$8 sps:$4 sm:$0xff]  }
 0x17e   : > { %9018 = vmatprep.subr.bf16.mxu0 %v10357_v3  ;;  %v10447_v3 = vld [vmem:[%s12443_s9 + $0xaf4] ss:$8 sps:$4 sm:$0xff]  }
 0x17f   : > { %8621 = vmatmul.mubr.bf16.vlgmr.msra.gmra.mrb[0].mxu1 %v10346_v4  ;;  %v10442_v4 = vld [vmem:[%s12443_s9 + $0x1f0] ss:$8 sps:$4 sm:$0xff]  }
 0x180   : > { %9008 = vmatmul.mubr.bf16.vlgmr.msra.gmra.mrb[0].mxu0 %v10352_v5  ;;  %8632 = vmatpush1.bf16.msra.mxu1 %v10349_v6  ;;  %v10445_v5 = vld [vmem:[%s12443_s9 + $0xaf0] ss:$8 sps:$4 sm:$0xff]   ;;  %v10453_v6 = vld [vmem:[%s12443_s9 + $0x204] ss:$8 sps:$4 sm:$0xff]  }
 0x181   : > { %9019 = vmatpush1.bf16.msra.mxu0 %v10355_v7  ;;  %8633 = vmatprep.subr.bf16.mxu1 %v10360_v8  ;;  %v10459_v7 = vld [vmem:[%s12443_s9 + $0xb04] ss:$8 sps:$4 sm:$0xff]   ;;  %v10448_v8 = vld [vmem:[%s13150_s0 + $0x8] ss:$144 sps:$4 sm:$0xff]  }
 0x182   : > { %9020 = vmatprep.subr.bf16.mxu0 %v10363_v9  ;;  %8663 = vmatprep.mubr.bf16.mxu1 %v10450_v30  ;;  %v10451_v9 = vld [vmem:[%s12443_s9 + $0x200] ss:$8 sps:$4 sm:$0xff]   ;;  %v10486_v30 = vld [vmem:[%s12443_s9 + $0x254] ss:$8 sps:$4 sm:$0xff]  }
 0x183   : > { %9050 = vmatprep.mubr.bf16.mxu0 %v10456_v33  ;;  %v10487_v33 = vld [vmem:[%s12443_s9 + $0xb50] ss:$8 sps:$4 sm:$0xff]  }
 0x184   : > { %8634 = vmatpush1.bf16.msra.mxu1 %v10358_v10  ;;  %v10454_v10 = vld [vmem:[%s13150_s0 + $0x50] ss:$144 sps:$4 sm:$0xff]  }
 0x185   : > { %9021 = vmatpush1.bf16.msra.mxu0 %v10361_v11  ;;  %8635 = vmatprep.subr.bf16.mxu1 %v10366_v12  ;;  %v10457_v11 = vld [vmem:[%s12443_s9 + $0xb00] ss:$8 sps:$4 sm:$0xff]   ;;  %v10462_v12 = vld [vmem:[%s12443_s9 + $0x214] ss:$8 sps:$4 sm:$0xff]  }
 0x186   : > { %9022 = vmatprep.subr.bf16.mxu0 %v10369_v13  ;;  %v10465_v13 = vld [vmem:[%s12443_s9 + $0xb14] ss:$8 sps:$4 sm:$0xff]  }
 0x188   : > { %8636 = vmatpush1.bf16.msra.mxu1 %v10364_v14  ;;  %v10460_v14 = vld [vmem:[%s12443_s9 + $0x210] ss:$8 sps:$4 sm:$0xff]  }
 0x189   : > { %9023 = vmatpush1.bf16.msra.mxu0 %v10367_v15  ;;  %8637 = vmatprep.subr.bf16.mxu1 %v10372_v16  ;;  %v10552_v15 = vld [vmem:[%s13150_s0 + $0x14] ss:$144 sps:$4 sm:$0xff]   ;;  %v10463_v16 = vld [vmem:[%s12443_s9 + $0xb10] ss:$8 sps:$4 sm:$0xff]  }
 0x18a   : > { %9024 = vmatprep.subr.bf16.mxu0 %v10375_v17  ;;  %v10468_v17 = vld [vmem:[%s12443_s9 + $0x224] ss:$8 sps:$4 sm:$0xff]  }
 0x18c   : > { %8638 = vmatpush1.bf16.msra.mxu1 %v10370_v18  ;;  %v10471_v18 = vld [vmem:[%s12443_s9 + $0xb24] ss:$8 sps:$4 sm:$0xff]  }
 0x18d   : > { %9025 = vmatpush1.bf16.msra.mxu0 %v10373_v19  ;;  %8639 = vmatprep.subr.bf16.mxu1 %v10378_v20  ;;  %v10558_v19 = vld [vmem:[%s13150_s0 + $0x5c] ss:$144 sps:$4 sm:$0xff]   ;;  %v10466_v20 = vld [vmem:[%s12443_s9 + $0x220] ss:$8 sps:$4 sm:$0xff]  }
 0x18e   : > { %9026 = vmatprep.subr.bf16.mxu0 %v10381_v21  ;;  %v10469_v21 = vld [vmem:[%s12443_s9 + $0xb20] ss:$8 sps:$4 sm:$0xff]  }
 0x190   : > { %8640 = vmatpush1.bf16.msra.mxu1 %v10376_v22  ;;  %v10474_v22 = vld [vmem:[%s12443_s9 + $0x234] ss:$8 sps:$4 sm:$0xff]  }
 0x191   : > { %9027 = vmatpush1.bf16.msra.mxu0 %v10379_v23  ;;  %8641 = vmatprep.subr.bf16.mxu1 %v10384_v24  ;;  %v10477_v23 = vld [vmem:[%s12443_s9 + $0xb34] ss:$8 sps:$4 sm:$0xff]   ;;  %v10472_v24 = vld [vmem:[%s12443_s9 + $0x230] ss:$8 sps:$4 sm:$0xff]  }
 0x192   : > { %9028 = vmatprep.subr.bf16.mxu0 %v10387_v25  ;;  %v10475_v25 = vld [vmem:[%s12443_s9 + $0xb30] ss:$8 sps:$4 sm:$0xff]  }
 0x194   : > { %8642 = vmatpush1.bf16.msra.mxu1 %v10382_v26  ;;  %v10480_v26 = vld [vmem:[%s12443_s9 + $0x244] ss:$8 sps:$4 sm:$0xff]  }
 0x195   : > { %9029 = vmatpush1.bf16.msra.mxu0 %v10385_v27  ;;  %8643 = vmatprep.subr.bf16.mxu1 %v10390_v28  ;;  %v10483_v27 = vld [vmem:[%s12443_s9 + $0xb44] ss:$8 sps:$4 sm:$0xff]   ;;  %v10478_v28 = vld [vmem:[%s12443_s9 + $0x240] ss:$8 sps:$4 sm:$0xff]  }
 0x196   : > { %9030 = vmatprep.subr.bf16.mxu0 %v10393_v29  ;;  %v10481_v29 = vld [vmem:[%s12443_s9 + $0xb40] ss:$8 sps:$4 sm:$0xff]  }
 0x198   : > { %8644 = vmatpush1.bf16.msra.mxu1 %v10388_v31  ;;  %v10489_v31 = vld [vmem:[%s12443_s9 + $0xb54] ss:$8 sps:$4 sm:$0xff]  }
 0x199   : > { %9031 = vmatpush1.bf16.msra.mxu0 %v10391_v32  ;;  %8645 = vmatprep.subr.bf16.mxu1 %v10396_v34  ;;  %v10484_v32 = vld [vmem:[%s12443_s9 + $0x250] ss:$8 sps:$4 sm:$0xff]   ;;  %v10492_v34 = vld [vmem:[%s12443_s9 + $0x264] ss:$8 sps:$4 sm:$0xff]  }
 0x19a   : > { %9032 = vmatprep.subr.bf16.mxu0 %v10399_v35  ;;  %v10495_v35 = vld [vmem:[%s12443_s9 + $0xb64] ss:$8 sps:$4 sm:$0xff]  }
 0x19c   : > { %8646 = vmatpush1.bf16.msra.mxu1 %v10394_v36  ;;  %v10490_v36 = vld [vmem:[%s12443_s9 + $0x260] ss:$8 sps:$4 sm:$0xff]  }
 0x19d   : > { %9033 = vmatpush1.bf16.msra.mxu0 %v10397_v37  ;;  %8647 = vmatprep.subr.bf16.mxu1 %v10402_v38  ;;  %v10493_v37 = vld [vmem:[%s12443_s9 + $0xb60] ss:$8 sps:$4 sm:$0xff]   ;;  %v10498_v38 = vld [vmem:[%s12443_s9 + $0x274] ss:$8 sps:$4 sm:$0xff]  }
 0x19e   : > { %9034 = vmatprep.subr.bf16.mxu0 %v10405_v39  ;;  %v10501_v39 = vld [vmem:[%s12443_s9 + $0xb74] ss:$8 sps:$4 sm:$0xff]  }
 0x1a0   : > { %8648 = vmatpush1.bf16.msra.mxu1 %v10400_v40  ;;  %v10496_v40 = vld [vmem:[%s12443_s9 + $0x270] ss:$8 sps:$4 sm:$0xff]  }
 0x1a1   : > { %9035 = vmatpush1.bf16.msra.mxu0 %v10403_v41  ;;  %8649 = vmatprep.subr.bf16.mxu1 %v10408_v42  ;;  %v10499_v41 = vld [vmem:[%s12443_s9 + $0xb70] ss:$8 sps:$4 sm:$0xff]   ;;  %v10504_v42 = vld [vmem:[%s12443_s9 + $0x284] ss:$8 sps:$4 sm:$0xff]  }
 0x1a2   : > { %9036 = vmatprep.subr.bf16.mxu0 %v10411_v43  ;;  %v10507_v43 = vld [vmem:[%s12443_s9 + $0xb84] ss:$8 sps:$4 sm:$0xff]  }
 0x1a4   : > { %8650 = vmatpush1.bf16.msra.mxu1 %v10406_v44  ;;  %v10502_v44 = vld [vmem:[%s12443_s9 + $0x280] ss:$8 sps:$4 sm:$0xff]  }
 0x1a5   : > { %9037 = vmatpush1.bf16.msra.mxu0 %v10409_v45  ;;  %8651 = vmatprep.subr.bf16.mxu1 %v10414_v46  ;;  %v10505_v45 = vld [vmem:[%s12443_s9 + $0xb80] ss:$8 sps:$4 sm:$0xff]   ;;  %v10510_v46 = vld [vmem:[%s12443_s9 + $0x294] ss:$8 sps:$4 sm:$0xff]  }
 0x1a6   : > { %9038 = vmatprep.subr.bf16.mxu0 %v10417_v47  ;;  %v10513_v47 = vld [vmem:[%s12443_s9 + $0xb94] ss:$8 sps:$4 sm:$0xff]  }
 0x1a8   : > { %8652 = vmatpush1.bf16.msra.mxu1 %v10412_v48  ;;  %v10508_v48 = vld [vmem:[%s12443_s9 + $0x290] ss:$8 sps:$4 sm:$0xff]  }
 0x1a9   : > { %9039 = vmatpush1.bf16.msra.mxu0 %v10415_v49  ;;  %8653 = vmatprep.subr.bf16.mxu1 %v10420_v50  ;;  %v10511_v49 = vld [vmem:[%s12443_s9 + $0xb90] ss:$8 sps:$4 sm:$0xff]   ;;  %v10516_v50 = vld [vmem:[%s12443_s9 + $0x2a4] ss:$8 sps:$4 sm:$0xff]  }
 0x1aa   : > { %9040 = vmatprep.subr.bf16.mxu0 %v10423_v51  ;;  %v10519_v51 = vld [vmem:[%s12443_s9 + $0xba4] ss:$8 sps:$4 sm:$0xff]  }
 0x1ac   : > { %8654 = vmatpush1.bf16.msra.mxu1 %v10418_v52  ;;  %v10514_v52 = vld [vmem:[%s12443_s9 + $0x2a0] ss:$8 sps:$4 sm:$0xff]  }
 0x1ad   : > { %9041 = vmatpush1.bf16.msra.mxu0 %v10421_v53  ;;  %8655 = vmatprep.subr.bf16.mxu1 %v10426_v54  ;;  %v10517_v53 = vld [vmem:[%s12443_s9 + $0xba0] ss:$8 sps:$4 sm:$0xff]   ;;  %v10522_v54 = vld [vmem:[%s12443_s9 + $0x2b4] ss:$8 sps:$4 sm:$0xff]  }
 0x1ae   : > { %9042 = vmatprep.subr.bf16.mxu0 %v10429_v55  ;;  %v10525_v55 = vld [vmem:[%s12443_s9 + $0xbb4] ss:$8 sps:$4 sm:$0xff]  }
 0x1b0   : > { %8656 = vmatpush1.bf16.msra.mxu1 %v10424_v56  ;;  %v10520_v56 = vld [vmem:[%s12443_s9 + $0x2b0] ss:$8 sps:$4 sm:$0xff]  }
 0x1b1   : > { %9043 = vmatpush1.bf16.msra.mxu0 %v10427_v57  ;;  %8657 = vmatprep.subr.bf16.mxu1 %v10432_v58  ;;  %v10523_v57 = vld [vmem:[%s12443_s9 + $0xbb0] ss:$8 sps:$4 sm:$0xff]   ;;  %v10528_v58 = vld [vmem:[%s12443_s9 + $0x2c4] ss:$8 sps:$4 sm:$0xff]  }
 0x1b2   : > { %9044 = vmatprep.subr.bf16.mxu0 %v10435_v59  ;;  %v10531_v59 = vld [vmem:[%s12443_s9 + $0xbc4] ss:$8 sps:$4 sm:$0xff]  }
 0x1b4   : > { %8658 = vmatpush1.bf16.msra.mxu1 %v10430_v60  ;;  %v10526_v60 = vld [vmem:[%s12443_s9 + $0x2c0] ss:$8 sps:$4 sm:$0xff]  }
 0x1b5   : > { %9045 = vmatpush1.bf16.msra.mxu0 %v10433_v61  ;;  %8659 = vmatprep.subr.bf16.mxu1 %v10438_v62  ;;  %v10529_v61 = vld [vmem:[%s12443_s9 + $0xbc0] ss:$8 sps:$4 sm:$0xff]   ;;  %v10534_v62 = vld [vmem:[%s12443_s9 + $0x2d4] ss:$8 sps:$4 sm:$0xff]  }
 0x1b6   : > { %9046 = vmatprep.subr.bf16.mxu0 %v10441_v63  ;;  %v10537_v63 = vld [vmem:[%s12443_s9 + $0xbd4] ss:$8 sps:$4 sm:$0xff]  }
 0x1b8   : > { %8660 = vmatpush1.bf16.msra.mxu1 %v10436_v0  ;;  %v10532_v0 = vld [vmem:[%s12443_s9 + $0x2d0] ss:$8 sps:$4 sm:$0xff]  }
 0x1b9   : > { %9047 = vmatpush1.bf16.msra.mxu0 %v10439_v1  ;;  %8661 = vmatprep.subr.bf16.mxu1 %v10444_v2  ;;  %v10535_v1 = vld [vmem:[%s12443_s9 + $0xbd0] ss:$8 sps:$4 sm:$0xff]   ;;  %v10540_v2 = vld [vmem:[%s12443_s9 + $0x2e4] ss:$8 sps:$4 sm:$0xff]  }
 0x1ba   : > { %9048 = vmatprep.subr.bf16.mxu0 %v10447_v3  ;;  %v10543_v3 = vld [vmem:[%s12443_s9 + $0xbe4] ss:$8 sps:$4 sm:$0xff]  }
 0x1bc   : > { %8662 = vmatpush1.bf16.msra.mxu1 %v10442_v4  ;;  %v10538_v4 = vld [vmem:[%s12443_s9 + $0x2e0] ss:$8 sps:$4 sm:$0xff]  }
 0x1bd   : > { %9049 = vmatpush1.bf16.msra.mxu0 %v10445_v5  ;;  %8674 = vmatprep.subr.bf16.mxu1 %v10453_v6  ;;  %v10541_v5 = vld [vmem:[%s12443_s9 + $0xbe0] ss:$8 sps:$4 sm:$0xff]   ;;  %v10546_v6 = vld [vmem:[%s12443_s9 + $0x2f4] ss:$8 sps:$4 sm:$0xff]  }
 0x1be   : > { %9061 = vmatprep.subr.bf16.mxu0 %v10459_v7  ;;  %v10549_v7 = vld [vmem:[%s12443_s9 + $0xbf4] ss:$8 sps:$4 sm:$0xff]  }
 0x1bf   : > { %8664 = vmatmul.mubr.bf16.vlgmr.msra.gmra.mrb[0].mxu1 %v10448_v8  ;;  %v10544_v8 = vld [vmem:[%s12443_s9 + $0x2f0] ss:$8 sps:$4 sm:$0xff]  }
 0x1c0   : > { %9051 = vmatmul.mubr.bf16.vlgmr.msra.gmra.mrb[0].mxu0 %v10454_v10  ;;  %8675 = vmatpush1.bf16.msra.mxu1 %v10451_v9  ;;  %v10547_v9 = vld [vmem:[%s12443_s9 + $0xbf0] ss:$8 sps:$4 sm:$0xff]   ;;  %v10555_v10 = vld [vmem:[%s12443_s9 + $0x304] ss:$8 sps:$4 sm:$0xff]  }
 0x1c1   : > { %9062 = vmatpush1.bf16.msra.mxu0 %v10457_v11  ;;  %8676 = vmatprep.subr.bf16.mxu1 %v10462_v12  ;;  %v10561_v11 = vld [vmem:[%s12443_s9 + $0xc04] ss:$8 sps:$4 sm:$0xff]   ;;  %v10550_v12 = vld [vmem:[%s13150_s0 + $0x10] ss:$144 sps:$4 sm:$0xff]  }
 0x1c2   : > { %9063 = vmatprep.subr.bf16.mxu0 %v10465_v13  ;;  %8706 = vmatprep.mubr.bf16.mxu1 %v10552_v15  ;;  %v10553_v13 = vld [vmem:[%s12443_s9 + $0x300] ss:$8 sps:$4 sm:$0xff]  }
 0x1c3   : > { %9093 = vmatprep.mubr.bf16.mxu0 %v10558_v19  ;;  %v10559_v15 = vld [vmem:[%s12443_s9 + $0xc00] ss:$8 sps:$4 sm:$0xff]   ;;  %v10660_v19 = vld [vmem:[%s13150_s0 + $0x64] ss:$144 sps:$4 sm:$0xff]  }
 0x1c4   : > { %8677 = vmatpush1.bf16.msra.mxu1 %v10460_v14  ;;  %v10556_v14 = vld [vmem:[%s13150_s0 + $0x58] ss:$144 sps:$4 sm:$0xff]  }
 0x1c5   : > { %9064 = vmatpush1.bf16.msra.mxu0 %v10463_v16  ;;  %8678 = vmatprep.subr.bf16.mxu1 %v10468_v17  ;;  %v10564_v16 = vld [vmem:[%s12443_s9 + $0x314] ss:$8 sps:$4 sm:$0xff]  }
 0x1c6   : > { %9065 = vmatprep.subr.bf16.mxu0 %v10471_v18  ;;  %v10567_v17 = vld [vmem:[%s12443_s9 + $0xc14] ss:$8 sps:$4 sm:$0xff]  }
 0x1c7   : > { %v10654_v18 = vld [vmem:[%s13150_s0 + $0x1c] ss:$144 sps:$4 sm:$0xff]  }
 0x1c8   : > { %8679 = vmatpush1.bf16.msra.mxu1 %v10466_v20  ;;  %v10562_v20 = vld [vmem:[%s12443_s9 + $0x310] ss:$8 sps:$4 sm:$0xff]  }
 0x1c9   : > { %9066 = vmatpush1.bf16.msra.mxu0 %v10469_v21  ;;  %8680 = vmatprep.subr.bf16.mxu1 %v10474_v22  ;;  %v10565_v21 = vld [vmem:[%s12443_s9 + $0xc10] ss:$8 sps:$4 sm:$0xff]   ;;  %v10570_v22 = vld [vmem:[%s12443_s9 + $0x324] ss:$8 sps:$4 sm:$0xff]  }
 0x1ca   : > { %9067 = vmatprep.subr.bf16.mxu0 %v10477_v23  ;;  %v10573_v23 = vld [vmem:[%s12443_s9 + $0xc24] ss:$8 sps:$4 sm:$0xff]  }
 0x1cc   : > { %8681 = vmatpush1.bf16.msra.mxu1 %v10472_v24  ;;  %v10568_v24 = vld [vmem:[%s12443_s9 + $0x320] ss:$8 sps:$4 sm:$0xff]  }
 0x1cd   : > { %9068 = vmatpush1.bf16.msra.mxu0 %v10475_v25  ;;  %8682 = vmatprep.subr.bf16.mxu1 %v10480_v26  ;;  %v10571_v25 = vld [vmem:[%s12443_s9 + $0xc20] ss:$8 sps:$4 sm:$0xff]   ;;  %v10576_v26 = vld [vmem:[%s12443_s9 + $0x334] ss:$8 sps:$4 sm:$0xff]  }
 0x1ce   : > { %9069 = vmatprep.subr.bf16.mxu0 %v10483_v27  ;;  %v10579_v27 = vld [vmem:[%s12443_s9 + $0xc34] ss:$8 sps:$4 sm:$0xff]  }
 0x1d0   : > { %8683 = vmatpush1.bf16.msra.mxu1 %v10478_v28  ;;  %v10574_v28 = vld [vmem:[%s12443_s9 + $0x330] ss:$8 sps:$4 sm:$0xff]  }
 0x1d1   : > { %9070 = vmatpush1.bf16.msra.mxu0 %v10481_v29  ;;  %8684 = vmatprep.subr.bf16.mxu1 %v10486_v30  ;;  %v10577_v29 = vld [vmem:[%s12443_s9 + $0xc30] ss:$8 sps:$4 sm:$0xff]   ;;  %v10582_v30 = vld [vmem:[%s12443_s9 + $0x344] ss:$8 sps:$4 sm:$0xff]  }
 0x1d2   : > { %9071 = vmatprep.subr.bf16.mxu0 %v10489_v31  ;;  %v10585_v31 = vld [vmem:[%s12443_s9 + $0xc44] ss:$8 sps:$4 sm:$0xff]  }
 0x1d4   : > { %8685 = vmatpush1.bf16.msra.mxu1 %v10484_v32  ;;  %v10580_v32 = vld [vmem:[%s12443_s9 + $0x340] ss:$8 sps:$4 sm:$0xff]  }
 0x1d5   : > { %9072 = vmatpush1.bf16.msra.mxu0 %v10487_v33  ;;  %8686 = vmatprep.subr.bf16.mxu1 %v10492_v34  ;;  %v10583_v33 = vld [vmem:[%s12443_s9 + $0xc40] ss:$8 sps:$4 sm:$0xff]   ;;  %v10588_v34 = vld [vmem:[%s12443_s9 + $0x354] ss:$8 sps:$4 sm:$0xff]  }
 0x1d6   : > { %9073 = vmatprep.subr.bf16.mxu0 %v10495_v35  ;;  %v10591_v35 = vld [vmem:[%s12443_s9 + $0xc54] ss:$8 sps:$4 sm:$0xff]  }
 0x1d8   : > { %8687 = vmatpush1.bf16.msra.mxu1 %v10490_v36  ;;  %v10586_v36 = vld [vmem:[%s12443_s9 + $0x350] ss:$8 sps:$4 sm:$0xff]  }
 0x1d9   : > { %9074 = vmatpush1.bf16.msra.mxu0 %v10493_v37  ;;  %8688 = vmatprep.subr.bf16.mxu1 %v10498_v38  ;;  %v10589_v37 = vld [vmem:[%s12443_s9 + $0xc50] ss:$8 sps:$4 sm:$0xff]   ;;  %v10594_v38 = vld [vmem:[%s12443_s9 + $0x364] ss:$8 sps:$4 sm:$0xff]  }
 0x1da   : > { %9075 = vmatprep.subr.bf16.mxu0 %v10501_v39  ;;  %v10597_v39 = vld [vmem:[%s12443_s9 + $0xc64] ss:$8 sps:$4 sm:$0xff]  }
 0x1dc   : > { %8689 = vmatpush1.bf16.msra.mxu1 %v10496_v40  ;;  %v10592_v40 = vld [vmem:[%s12443_s9 + $0x360] ss:$8 sps:$4 sm:$0xff]  }
 0x1dd   : > { %9076 = vmatpush1.bf16.msra.mxu0 %v10499_v41  ;;  %8690 = vmatprep.subr.bf16.mxu1 %v10504_v42  ;;  %v10595_v41 = vld [vmem:[%s12443_s9 + $0xc60] ss:$8 sps:$4 sm:$0xff]   ;;  %v10600_v42 = vld [vmem:[%s12443_s9 + $0x374] ss:$8 sps:$4 sm:$0xff]  }
 0x1de   : > { %9077 = vmatprep.subr.bf16.mxu0 %v10507_v43  ;;  %v10603_v43 = vld [vmem:[%s12443_s9 + $0xc74] ss:$8 sps:$4 sm:$0xff]  }
 0x1e0   : > { %8691 = vmatpush1.bf16.msra.mxu1 %v10502_v44  ;;  %v10598_v44 = vld [vmem:[%s12443_s9 + $0x370] ss:$8 sps:$4 sm:$0xff]  }
 0x1e1   : > { %9078 = vmatpush1.bf16.msra.mxu0 %v10505_v45  ;;  %8692 = vmatprep.subr.bf16.mxu1 %v10510_v46  ;;  %v10601_v45 = vld [vmem:[%s12443_s9 + $0xc70] ss:$8 sps:$4 sm:$0xff]   ;;  %v10606_v46 = vld [vmem:[%s12443_s9 + $0x384] ss:$8 sps:$4 sm:$0xff]  }
 0x1e2   : > { %9079 = vmatprep.subr.bf16.mxu0 %v10513_v47  ;;  %v10609_v47 = vld [vmem:[%s12443_s9 + $0xc84] ss:$8 sps:$4 sm:$0xff]  }
 0x1e4   : > { %8693 = vmatpush1.bf16.msra.mxu1 %v10508_v48  ;;  %v10604_v48 = vld [vmem:[%s12443_s9 + $0x380] ss:$8 sps:$4 sm:$0xff]  }
 0x1e5   : > { %9080 = vmatpush1.bf16.msra.mxu0 %v10511_v49  ;;  %8694 = vmatprep.subr.bf16.mxu1 %v10516_v50  ;;  %v10607_v49 = vld [vmem:[%s12443_s9 + $0xc80] ss:$8 sps:$4 sm:$0xff]   ;;  %v10612_v50 = vld [vmem:[%s12443_s9 + $0x394] ss:$8 sps:$4 sm:$0xff]  }
 0x1e6   : > { %9081 = vmatprep.subr.bf16.mxu0 %v10519_v51  ;;  %v10615_v51 = vld [vmem:[%s12443_s9 + $0xc94] ss:$8 sps:$4 sm:$0xff]  }
 0x1e8   : > { %8695 = vmatpush1.bf16.msra.mxu1 %v10514_v52  ;;  %v10610_v52 = vld [vmem:[%s12443_s9 + $0x390] ss:$8 sps:$4 sm:$0xff]  }
 0x1e9   : > { %9082 = vmatpush1.bf16.msra.mxu0 %v10517_v53  ;;  %8696 = vmatprep.subr.bf16.mxu1 %v10522_v54  ;;  %v10613_v53 = vld [vmem:[%s12443_s9 + $0xc90] ss:$8 sps:$4 sm:$0xff]   ;;  %v10618_v54 = vld [vmem:[%s12443_s9 + $0x3a4] ss:$8 sps:$4 sm:$0xff]  }
 0x1ea   : > { %9083 = vmatprep.subr.bf16.mxu0 %v10525_v55  ;;  %v10621_v55 = vld [vmem:[%s12443_s9 + $0xca4] ss:$8 sps:$4 sm:$0xff]  }
 0x1ec   : > { %8697 = vmatpush1.bf16.msra.mxu1 %v10520_v56  ;;  %v10616_v56 = vld [vmem:[%s12443_s9 + $0x3a0] ss:$8 sps:$4 sm:$0xff]  }
 0x1ed   : > { %9084 = vmatpush1.bf16.msra.mxu0 %v10523_v57  ;;  %8698 = vmatprep.subr.bf16.mxu1 %v10528_v58  ;;  %v10619_v57 = vld [vmem:[%s12443_s9 + $0xca0] ss:$8 sps:$4 sm:$0xff]   ;;  %v10624_v58 = vld [vmem:[%s12443_s9 + $0x3b4] ss:$8 sps:$4 sm:$0xff]  }
 0x1ee   : > { %9085 = vmatprep.subr.bf16.mxu0 %v10531_v59  ;;  %v10627_v59 = vld [vmem:[%s12443_s9 + $0xcb4] ss:$8 sps:$4 sm:$0xff]  }
 0x1f0   : > { %8699 = vmatpush1.bf16.msra.mxu1 %v10526_v60  ;;  %v10622_v60 = vld [vmem:[%s12443_s9 + $0x3b0] ss:$8 sps:$4 sm:$0xff]  }
 0x1f1   : > { %9086 = vmatpush1.bf16.msra.mxu0 %v10529_v61  ;;  %8700 = vmatprep.subr.bf16.mxu1 %v10534_v62  ;;  %v10625_v61 = vld [vmem:[%s12443_s9 + $0xcb0] ss:$8 sps:$4 sm:$0xff]   ;;  %v10630_v62 = vld [vmem:[%s12443_s9 + $0x3c4] ss:$8 sps:$4 sm:$0xff]  }
 0x1f2   : > { %9087 = vmatprep.subr.bf16.mxu0 %v10537_v63  ;;  %v10633_v63 = vld [vmem:[%s12443_s9 + $0xcc4] ss:$8 sps:$4 sm:$0xff]  }
 0x1f4   : > { %8701 = vmatpush1.bf16.msra.mxu1 %v10532_v0  ;;  %v10628_v0 = vld [vmem:[%s12443_s9 + $0x3c0] ss:$8 sps:$4 sm:$0xff]  }
 0x1f5   : > { %9088 = vmatpush1.bf16.msra.mxu0 %v10535_v1  ;;  %8702 = vmatprep.subr.bf16.mxu1 %v10540_v2  ;;  %v10631_v1 = vld [vmem:[%s12443_s9 + $0xcc0] ss:$8 sps:$4 sm:$0xff]   ;;  %v10636_v2 = vld [vmem:[%s12443_s9 + $0x3d4] ss:$8 sps:$4 sm:$0xff]  }
 0x1f6   : > { %9089 = vmatprep.subr.bf16.mxu0 %v10543_v3  ;;  %v10639_v3 = vld [vmem:[%s12443_s9 + $0xcd4] ss:$8 sps:$4 sm:$0xff]  }
 0x1f8   : > { %8703 = vmatpush1.bf16.msra.mxu1 %v10538_v4  ;;  %v10634_v4 = vld [vmem:[%s12443_s9 + $0x3d0] ss:$8 sps:$4 sm:$0xff]  }
 0x1f9   : > { %9090 = vmatpush1.bf16.msra.mxu0 %v10541_v5  ;;  %8704 = vmatprep.subr.bf16.mxu1 %v10546_v6  ;;  %v10637_v5 = vld [vmem:[%s12443_s9 + $0xcd0] ss:$8 sps:$4 sm:$0xff]   ;;  %v10642_v6 = vld [vmem:[%s12443_s9 + $0x3e4] ss:$8 sps:$4 sm:$0xff]  }
 0x1fa   : > { %9091 = vmatprep.subr.bf16.mxu0 %v10549_v7  ;;  %v10645_v7 = vld [vmem:[%s12443_s9 + $0xce4] ss:$8 sps:$4 sm:$0xff]  }
 0x1fc   : > { %8705 = vmatpush1.bf16.msra.mxu1 %v10544_v8  ;;  %v10640_v8 = vld [vmem:[%s12443_s9 + $0x3e0] ss:$8 sps:$4 sm:$0xff]  }
 0x1fd   : > { %9092 = vmatpush1.bf16.msra.mxu0 %v10547_v9  ;;  %8717 = vmatprep.subr.bf16.mxu1 %v10555_v10  ;;  %v10643_v9 = vld [vmem:[%s12443_s9 + $0xce0] ss:$8 sps:$4 sm:$0xff]   ;;  %v10648_v10 = vld [vmem:[%s12443_s9 + $0x3f4] ss:$8 sps:$4 sm:$0xff]  }
 0x1fe   : > { %9104 = vmatprep.subr.bf16.mxu0 %v10561_v11  ;;  %v10651_v11 = vld [vmem:[%s12443_s9 + $0xcf4] ss:$8 sps:$4 sm:$0xff]  }
 0x1ff   : > { %8707 = vmatmul.mubr.bf16.vlgmr.msra.gmra.mrb[0].mxu1 %v10550_v12  ;;  %v10646_v12 = vld [vmem:[%s12443_s9 + $0x3f0] ss:$8 sps:$4 sm:$0xff]  }
 0x200   : > { %9094 = vmatmul.mubr.bf16.vlgmr.msra.gmra.mrb[0].mxu0 %v10556_v14  ;;  %8718 = vmatpush1.bf16.msra.mxu1 %v10553_v13  ;;  %v10649_v13 = vld [vmem:[%s12443_s9 + $0xcf0] ss:$8 sps:$4 sm:$0xff]   ;;  %v10657_v14 = vld [vmem:[%s12443_s9 + $0x404] ss:$8 sps:$4 sm:$0xff]  }
 0x201   : > { %9105 = vmatpush1.bf16.msra.mxu0 %v10559_v15  ;;  %8719 = vmatprep.subr.bf16.mxu1 %v10564_v16  ;;  %v10663_v15 = vld [vmem:[%s12443_s9 + $0xd04] ss:$8 sps:$4 sm:$0xff]   ;;  %v10652_v16 = vld [vmem:[%s13150_s0 + $0x18] ss:$144 sps:$4 sm:$0xff]  }
 0x202   : > { %9106 = vmatprep.subr.bf16.mxu0 %v10567_v17  ;;  %8749 = vmatprep.mubr.bf16.mxu1 %v10654_v18  ;;  %v10655_v17 = vld [vmem:[%s12443_s9 + $0x400] ss:$8 sps:$4 sm:$0xff]  }
 0x203   : > { %9136 = vmatprep.mubr.bf16.mxu0 %v10660_v19  ;;  %v10658_v18 = vld [vmem:[%s13150_s0 + $0x60] ss:$144 sps:$4 sm:$0xff]  }
 0x204   : > { %8720 = vmatpush1.bf16.msra.mxu1 %v10562_v20  ;;  %v10661_v19 = vld [vmem:[%s12443_s9 + $0xd00] ss:$8 sps:$4 sm:$0xff]   ;;  %v10666_v20 = vld [vmem:[%s12443_s9 + $0x414] ss:$8 sps:$4 sm:$0xff]  }
 0x205   : > { %9107 = vmatpush1.bf16.msra.mxu0 %v10565_v21  ;;  %8721 = vmatprep.subr.bf16.mxu1 %v10570_v22  ;;  %v10669_v21 = vld [vmem:[%s12443_s9 + $0xd14] ss:$8 sps:$4 sm:$0xff]  }
 0x206   : > { %9108 = vmatprep.subr.bf16.mxu0 %v10573_v23  ;;  %v10756_v22 = vld [vmem:[%s13150_s0 + $0x24] ss:$144 sps:$4 sm:$0xff]   ;;  %v10762_v23 = vld [vmem:[%s13150_s0 + $0x6c] ss:$144 sps:$4 sm:$0xff]  }
 0x208   : > { %8722 = vmatpush1.bf16.msra.mxu1 %v10568_v24  ;;  %v10664_v24 = vld [vmem:[%s12443_s9 + $0x410] ss:$8 sps:$4 sm:$0xff]  }
 0x209   : > { %9109 = vmatpush1.bf16.msra.mxu0 %v10571_v25  ;;  %8723 = vmatprep.subr.bf16.mxu1 %v10576_v26  ;;  %v10667_v25 = vld [vmem:[%s12443_s9 + $0xd10] ss:$8 sps:$4 sm:$0xff]   ;;  %v10672_v26 = vld [vmem:[%s12443_s9 + $0x424] ss:$8 sps:$4 sm:$0xff]  }
 0x20a   : > { %9110 = vmatprep.subr.bf16.mxu0 %v10579_v27  ;;  %v10675_v27 = vld [vmem:[%s12443_s9 + $0xd24] ss:$8 sps:$4 sm:$0xff]  }
 0x20c   : > { %8724 = vmatpush1.bf16.msra.mxu1 %v10574_v28  ;;  %v10670_v28 = vld [vmem:[%s12443_s9 + $0x420] ss:$8 sps:$4 sm:$0xff]  }
 0x20d   : > { %9111 = vmatpush1.bf16.msra.mxu0 %v10577_v29  ;;  %8725 = vmatprep.subr.bf16.mxu1 %v10582_v30  ;;  %v10673_v29 = vld [vmem:[%s12443_s9 + $0xd20] ss:$8 sps:$4 sm:$0xff]   ;;  %v10678_v30 = vld [vmem:[%s12443_s9 + $0x434] ss:$8 sps:$4 sm:$0xff]  }
 0x20e   : > { %9112 = vmatprep.subr.bf16.mxu0 %v10585_v31  ;;  %v10681_v31 = vld [vmem:[%s12443_s9 + $0xd34] ss:$8 sps:$4 sm:$0xff]  }
 0x210   : > { %8726 = vmatpush1.bf16.msra.mxu1 %v10580_v32  ;;  %v10676_v32 = vld [vmem:[%s12443_s9 + $0x430] ss:$8 sps:$4 sm:$0xff]  }
 0x211   : > { %9113 = vmatpush1.bf16.msra.mxu0 %v10583_v33  ;;  %8727 = vmatprep.subr.bf16.mxu1 %v10588_v34  ;;  %v10679_v33 = vld [vmem:[%s12443_s9 + $0xd30] ss:$8 sps:$4 sm:$0xff]   ;;  %v10684_v34 = vld [vmem:[%s12443_s9 + $0x444] ss:$8 sps:$4 sm:$0xff]  }
 0x212   : > { %9114 = vmatprep.subr.bf16.mxu0 %v10591_v35  ;;  %v10687_v35 = vld [vmem:[%s12443_s9 + $0xd44] ss:$8 sps:$4 sm:$0xff]  }
 0x214   : > { %8728 = vmatpush1.bf16.msra.mxu1 %v10586_v36  ;;  %v10682_v36 = vld [vmem:[%s12443_s9 + $0x440] ss:$8 sps:$4 sm:$0xff]  }
 0x215   : > { %9115 = vmatpush1.bf16.msra.mxu0 %v10589_v37  ;;  %8729 = vmatprep.subr.bf16.mxu1 %v10594_v38  ;;  %v10685_v37 = vld [vmem:[%s12443_s9 + $0xd40] ss:$8 sps:$4 sm:$0xff]   ;;  %v10690_v38 = vld [vmem:[%s12443_s9 + $0x454] ss:$8 sps:$4 sm:$0xff]  }
 0x216   : > { %9116 = vmatprep.subr.bf16.mxu0 %v10597_v39  ;;  %v10693_v39 = vld [vmem:[%s12443_s9 + $0xd54] ss:$8 sps:$4 sm:$0xff]  }
 0x218   : > { %8730 = vmatpush1.bf16.msra.mxu1 %v10592_v40  ;;  %v10688_v40 = vld [vmem:[%s12443_s9 + $0x450] ss:$8 sps:$4 sm:$0xff]  }
 0x219   : > { %9117 = vmatpush1.bf16.msra.mxu0 %v10595_v41  ;;  %8731 = vmatprep.subr.bf16.mxu1 %v10600_v42  ;;  %v10691_v41 = vld [vmem:[%s12443_s9 + $0xd50] ss:$8 sps:$4 sm:$0xff]   ;;  %v10696_v42 = vld [vmem:[%s12443_s9 + $0x464] ss:$8 sps:$4 sm:$0xff]  }
 0x21a   : > { %9118 = vmatprep.subr.bf16.mxu0 %v10603_v43  ;;  %v10699_v43 = vld [vmem:[%s12443_s9 + $0xd64] ss:$8 sps:$4 sm:$0xff]  }
 0x21c   : > { %8732 = vmatpush1.bf16.msra.mxu1 %v10598_v44  ;;  %v10694_v44 = vld [vmem:[%s12443_s9 + $0x460] ss:$8 sps:$4 sm:$0xff]  }
 0x21d   : > { %9119 = vmatpush1.bf16.msra.mxu0 %v10601_v45  ;;  %8733 = vmatprep.subr.bf16.mxu1 %v10606_v46  ;;  %v10697_v45 = vld [vmem:[%s12443_s9 + $0xd60] ss:$8 sps:$4 sm:$0xff]   ;;  %v10702_v46 = vld [vmem:[%s12443_s9 + $0x474] ss:$8 sps:$4 sm:$0xff]  }
 0x21e   : > { %9120 = vmatprep.subr.bf16.mxu0 %v10609_v47  ;;  %v10705_v47 = vld [vmem:[%s12443_s9 + $0xd74] ss:$8 sps:$4 sm:$0xff]  }
 0x220   : > { %8734 = vmatpush1.bf16.msra.mxu1 %v10604_v48  ;;  %v10700_v48 = vld [vmem:[%s12443_s9 + $0x470] ss:$8 sps:$4 sm:$0xff]  }
 0x221   : > { %9121 = vmatpush1.bf16.msra.mxu0 %v10607_v49  ;;  %8735 = vmatprep.subr.bf16.mxu1 %v10612_v50  ;;  %v10703_v49 = vld [vmem:[%s12443_s9 + $0xd70] ss:$8 sps:$4 sm:$0xff]   ;;  %v10708_v50 = vld [vmem:[%s12443_s9 + $0x484] ss:$8 sps:$4 sm:$0xff]  }
 0x222   : > { %9122 = vmatprep.subr.bf16.mxu0 %v10615_v51  ;;  %v10711_v51 = vld [vmem:[%s12443_s9 + $0xd84] ss:$8 sps:$4 sm:$0xff]  }
 0x224   : > { %8736 = vmatpush1.bf16.msra.mxu1 %v10610_v52  ;;  %v10706_v52 = vld [vmem:[%s12443_s9 + $0x480] ss:$8 sps:$4 sm:$0xff]  }
 0x225   : > { %9123 = vmatpush1.bf16.msra.mxu0 %v10613_v53  ;;  %8737 = vmatprep.subr.bf16.mxu1 %v10618_v54  ;;  %v10709_v53 = vld [vmem:[%s12443_s9 + $0xd80] ss:$8 sps:$4 sm:$0xff]   ;;  %v10714_v54 = vld [vmem:[%s12443_s9 + $0x494] ss:$8 sps:$4 sm:$0xff]  }
 0x226   : > { %9124 = vmatprep.subr.bf16.mxu0 %v10621_v55  ;;  %v10717_v55 = vld [vmem:[%s12443_s9 + $0xd94] ss:$8 sps:$4 sm:$0xff]  }
 0x228   : > { %8738 = vmatpush1.bf16.msra.mxu1 %v10616_v56  ;;  %v10712_v56 = vld [vmem:[%s12443_s9 + $0x490] ss:$8 sps:$4 sm:$0xff]  }
 0x229   : > { %9125 = vmatpush1.bf16.msra.mxu0 %v10619_v57  ;;  %8739 = vmatprep.subr.bf16.mxu1 %v10624_v58  ;;  %v10715_v57 = vld [vmem:[%s12443_s9 + $0xd90] ss:$8 sps:$4 sm:$0xff]   ;;  %v10720_v58 = vld [vmem:[%s12443_s9 + $0x4a4] ss:$8 sps:$4 sm:$0xff]  }
 0x22a   : > { %9126 = vmatprep.subr.bf16.mxu0 %v10627_v59  ;;  %v10723_v59 = vld [vmem:[%s12443_s9 + $0xda4] ss:$8 sps:$4 sm:$0xff]  }
 0x22c   : > { %8740 = vmatpush1.bf16.msra.mxu1 %v10622_v60  ;;  %v10718_v60 = vld [vmem:[%s12443_s9 + $0x4a0] ss:$8 sps:$4 sm:$0xff]  }
 0x22d   : > { %9127 = vmatpush1.bf16.msra.mxu0 %v10625_v61  ;;  %8741 = vmatprep.subr.bf16.mxu1 %v10630_v62  ;;  %v10721_v61 = vld [vmem:[%s12443_s9 + $0xda0] ss:$8 sps:$4 sm:$0xff]   ;;  %v10726_v62 = vld [vmem:[%s12443_s9 + $0x4b4] ss:$8 sps:$4 sm:$0xff]  }
 0x22e   : > { %9128 = vmatprep.subr.bf16.mxu0 %v10633_v63  ;;  %v10729_v63 = vld [vmem:[%s12443_s9 + $0xdb4] ss:$8 sps:$4 sm:$0xff]  }
 0x230   : > { %8742 = vmatpush1.bf16.msra.mxu1 %v10628_v0  ;;  %v10724_v0 = vld [vmem:[%s12443_s9 + $0x4b0] ss:$8 sps:$4 sm:$0xff]  }
 0x231   : > { %9129 = vmatpush1.bf16.msra.mxu0 %v10631_v1  ;;  %8743 = vmatprep.subr.bf16.mxu1 %v10636_v2  ;;  %v10727_v1 = vld [vmem:[%s12443_s9 + $0xdb0] ss:$8 sps:$4 sm:$0xff]   ;;  %v10732_v2 = vld [vmem:[%s12443_s9 + $0x4c4] ss:$8 sps:$4 sm:$0xff]  }
 0x232   : > { %9130 = vmatprep.subr.bf16.mxu0 %v10639_v3  ;;  %v10735_v3 = vld [vmem:[%s12443_s9 + $0xdc4] ss:$8 sps:$4 sm:$0xff]  }
 0x234   : > { %8744 = vmatpush1.bf16.msra.mxu1 %v10634_v4  ;;  %v10730_v4 = vld [vmem:[%s12443_s9 + $0x4c0] ss:$8 sps:$4 sm:$0xff]  }
 0x235   : > { %9131 = vmatpush1.bf16.msra.mxu0 %v10637_v5  ;;  %8745 = vmatprep.subr.bf16.mxu1 %v10642_v6  ;;  %v10733_v5 = vld [vmem:[%s12443_s9 + $0xdc0] ss:$8 sps:$4 sm:$0xff]   ;;  %v10738_v6 = vld [vmem:[%s12443_s9 + $0x4d4] ss:$8 sps:$4 sm:$0xff]  }
 0x236   : > { %9132 = vmatprep.subr.bf16.mxu0 %v10645_v7  ;;  %v10741_v7 = vld [vmem:[%s12443_s9 + $0xdd4] ss:$8 sps:$4 sm:$0xff]  }
 0x238   : > { %8746 = vmatpush1.bf16.msra.mxu1 %v10640_v8  ;;  %v10736_v8 = vld [vmem:[%s12443_s9 + $0x4d0] ss:$8 sps:$4 sm:$0xff]  }
 0x239   : > { %9133 = vmatpush1.bf16.msra.mxu0 %v10643_v9  ;;  %8747 = vmatprep.subr.bf16.mxu1 %v10648_v10  ;;  %v10739_v9 = vld [vmem:[%s12443_s9 + $0xdd0] ss:$8 sps:$4 sm:$0xff]   ;;  %v10744_v10 = vld [vmem:[%s12443_s9 + $0x4e4] ss:$8 sps:$4 sm:$0xff]  }
 0x23a   : > { %9134 = vmatprep.subr.bf16.mxu0 %v10651_v11  ;;  %v10747_v11 = vld [vmem:[%s12443_s9 + $0xde4] ss:$8 sps:$4 sm:$0xff]  }
 0x23c   : > { %8748 = vmatpush1.bf16.msra.mxu1 %v10646_v12  ;;  %v10742_v12 = vld [vmem:[%s12443_s9 + $0x4e0] ss:$8 sps:$4 sm:$0xff]  }
 0x23d   : > { %9135 = vmatpush1.bf16.msra.mxu0 %v10649_v13  ;;  %8760 = vmatprep.subr.bf16.mxu1 %v10657_v14  ;;  %v10745_v13 = vld [vmem:[%s12443_s9 + $0xde0] ss:$8 sps:$4 sm:$0xff]   ;;  %v10750_v14 = vld [vmem:[%s12443_s9 + $0x4f4] ss:$8 sps:$4 sm:$0xff]  }
 0x23e   : > { %9147 = vmatprep.subr.bf16.mxu0 %v10663_v15  ;;  %v10753_v15 = vld [vmem:[%s12443_s9 + $0xdf4] ss:$8 sps:$4 sm:$0xff]  }
 0x23f   : > { %8750 = vmatmul.mubr.bf16.vlgmr.msra.gmra.mrb[0].mxu1 %v10652_v16  ;;  %v10748_v16 = vld [vmem:[%s12443_s9 + $0x4f0] ss:$8 sps:$4 sm:$0xff]  }
 0x240   : > { %9137 = vmatmul.mubr.bf16.vlgmr.msra.gmra.mrb[0].mxu0 %v10658_v18  ;;  %8761 = vmatpush1.bf16.msra.mxu1 %v10655_v17  ;;  %v10751_v17 = vld [vmem:[%s12443_s9 + $0xdf0] ss:$8 sps:$4 sm:$0xff]   ;;  %v10759_v18 = vld [vmem:[%s12443_s9 + $0x504] ss:$8 sps:$4 sm:$0xff]  }
 0x241   : > { %9148 = vmatpush1.bf16.msra.mxu0 %v10661_v19  ;;  %8762 = vmatprep.subr.bf16.mxu1 %v10666_v20  ;;  %v10754_v19 = vld [vmem:[%s13150_s0 + $0x20] ss:$144 sps:$4 sm:$0xff]   ;;  %v10760_v20 = vld [vmem:[%s13150_s0 + $0x68] ss:$144 sps:$4 sm:$0xff]  }
 0x242   : > { %9149 = vmatprep.subr.bf16.mxu0 %v10669_v21  ;;  %8792 = vmatprep.mubr.bf16.mxu1 %v10756_v22  ;;  %v10765_v21 = vld [vmem:[%s12443_s9 + $0xe04] ss:$8 sps:$4 sm:$0xff]   ;;  %v10757_v22 = vld [vmem:[%s12443_s9 + $0x500] ss:$8 sps:$4 sm:$0xff]  }
 0x243   : > { %9179 = vmatprep.mubr.bf16.mxu0 %v10762_v23  ;;  %v10763_v23 = vld [vmem:[%s12443_s9 + $0xe00] ss:$8 sps:$4 sm:$0xff]  }
 0x244   : > { %8763 = vmatpush1.bf16.msra.mxu1 %v10664_v24  ;;  %v10768_v24 = vld [vmem:[%s12443_s9 + $0x514] ss:$8 sps:$4 sm:$0xff]  }
 0x245   : > { %9150 = vmatpush1.bf16.msra.mxu0 %v10667_v25  ;;  %8764 = vmatprep.subr.bf16.mxu1 %v10672_v26  ;;  %v10771_v25 = vld [vmem:[%s12443_s9 + $0xe14] ss:$8 sps:$4 sm:$0xff]  }
 0x246   : > { %9151 = vmatprep.subr.bf16.mxu0 %v10675_v27  ;;  %v10858_v26 = vld [vmem:[%s13150_s0 + $0x2c] ss:$144 sps:$4 sm:$0xff]   ;;  %v10864_v27 = vld [vmem:[%s13150_s0 + $0x74] ss:$144 sps:$4 sm:$0xff]  }
 0x248   : > { %8765 = vmatpush1.bf16.msra.mxu1 %v10670_v28  ;;  %v10766_v28 = vld [vmem:[%s12443_s9 + $0x510] ss:$8 sps:$4 sm:$0xff]  }
 0x249   : > { %9152 = vmatpush1.bf16.msra.mxu0 %v10673_v29  ;;  %8766 = vmatprep.subr.bf16.mxu1 %v10678_v30  ;;  %v10769_v29 = vld [vmem:[%s12443_s9 + $0xe10] ss:$8 sps:$4 sm:$0xff]   ;;  %v10774_v30 = vld [vmem:[%s12443_s9 + $0x524] ss:$8 sps:$4 sm:$0xff]  }
 0x24a   : > { %9153 = vmatprep.subr.bf16.mxu0 %v10681_v31  ;;  %v10777_v31 = vld [vmem:[%s12443_s9 + $0xe24] ss:$8 sps:$4 sm:$0xff]  }
 0x24c   : > { %8767 = vmatpush1.bf16.msra.mxu1 %v10676_v32  ;;  %v10772_v32 = vld [vmem:[%s12443_s9 + $0x520] ss:$8 sps:$4 sm:$0xff]  }
 0x24d   : > { %9154 = vmatpush1.bf16.msra.mxu0 %v10679_v33  ;;  %8768 = vmatprep.subr.bf16.mxu1 %v10684_v34  ;;  %v10775_v33 = vld [vmem:[%s12443_s9 + $0xe20] ss:$8 sps:$4 sm:$0xff]   ;;  %v10780_v34 = vld [vmem:[%s12443_s9 + $0x534] ss:$8 sps:$4 sm:$0xff]  }
 0x24e   : > { %9155 = vmatprep.subr.bf16.mxu0 %v10687_v35  ;;  %v10783_v35 = vld [vmem:[%s12443_s9 + $0xe34] ss:$8 sps:$4 sm:$0xff]  }
 0x250   : > { %8769 = vmatpush1.bf16.msra.mxu1 %v10682_v36  ;;  %v10778_v36 = vld [vmem:[%s12443_s9 + $0x530] ss:$8 sps:$4 sm:$0xff]  }
 0x251   : > { %9156 = vmatpush1.bf16.msra.mxu0 %v10685_v37  ;;  %8770 = vmatprep.subr.bf16.mxu1 %v10690_v38  ;;  %v10781_v37 = vld [vmem:[%s12443_s9 + $0xe30] ss:$8 sps:$4 sm:$0xff]   ;;  %v10786_v38 = vld [vmem:[%s12443_s9 + $0x544] ss:$8 sps:$4 sm:$0xff]  }
 0x252   : > { %9157 = vmatprep.subr.bf16.mxu0 %v10693_v39  ;;  %v10789_v39 = vld [vmem:[%s12443_s9 + $0xe44] ss:$8 sps:$4 sm:$0xff]  }
 0x254   : > { %8771 = vmatpush1.bf16.msra.mxu1 %v10688_v40  ;;  %v10784_v40 = vld [vmem:[%s12443_s9 + $0x540] ss:$8 sps:$4 sm:$0xff]  }
 0x255   : > { %9158 = vmatpush1.bf16.msra.mxu0 %v10691_v41  ;;  %8772 = vmatprep.subr.bf16.mxu1 %v10696_v42  ;;  %v10787_v41 = vld [vmem:[%s12443_s9 + $0xe40] ss:$8 sps:$4 sm:$0xff]   ;;  %v10792_v42 = vld [vmem:[%s12443_s9 + $0x554] ss:$8 sps:$4 sm:$0xff]  }
 0x256   : > { %9159 = vmatprep.subr.bf16.mxu0 %v10699_v43  ;;  %v10795_v43 = vld [vmem:[%s12443_s9 + $0xe54] ss:$8 sps:$4 sm:$0xff]  }
 0x258   : > { %8773 = vmatpush1.bf16.msra.mxu1 %v10694_v44  ;;  %v10790_v44 = vld [vmem:[%s12443_s9 + $0x550] ss:$8 sps:$4 sm:$0xff]  }
 0x259   : > { %9160 = vmatpush1.bf16.msra.mxu0 %v10697_v45  ;;  %8774 = vmatprep.subr.bf16.mxu1 %v10702_v46  ;;  %v10793_v45 = vld [vmem:[%s12443_s9 + $0xe50] ss:$8 sps:$4 sm:$0xff]   ;;  %v10798_v46 = vld [vmem:[%s12443_s9 + $0x564] ss:$8 sps:$4 sm:$0xff]  }
 0x25a   : > { %9161 = vmatprep.subr.bf16.mxu0 %v10705_v47  ;;  %v10801_v47 = vld [vmem:[%s12443_s9 + $0xe64] ss:$8 sps:$4 sm:$0xff]  }
 0x25c   : > { %8775 = vmatpush1.bf16.msra.mxu1 %v10700_v48  ;;  %v10796_v48 = vld [vmem:[%s12443_s9 + $0x560] ss:$8 sps:$4 sm:$0xff]  }
 0x25d   : > { %9162 = vmatpush1.bf16.msra.mxu0 %v10703_v49  ;;  %8776 = vmatprep.subr.bf16.mxu1 %v10708_v50  ;;  %v10799_v49 = vld [vmem:[%s12443_s9 + $0xe60] ss:$8 sps:$4 sm:$0xff]   ;;  %v10804_v50 = vld [vmem:[%s12443_s9 + $0x574] ss:$8 sps:$4 sm:$0xff]  }
 0x25e   : > { %9163 = vmatprep.subr.bf16.mxu0 %v10711_v51  ;;  %v10807_v51 = vld [vmem:[%s12443_s9 + $0xe74] ss:$8 sps:$4 sm:$0xff]  }
 0x260   : > { %8777 = vmatpush1.bf16.msra.mxu1 %v10706_v52  ;;  %v10802_v52 = vld [vmem:[%s12443_s9 + $0x570] ss:$8 sps:$4 sm:$0xff]  }
 0x261   : > { %9164 = vmatpush1.bf16.msra.mxu0 %v10709_v53  ;;  %8778 = vmatprep.subr.bf16.mxu1 %v10714_v54  ;;  %v10805_v53 = vld [vmem:[%s12443_s9 + $0xe70] ss:$8 sps:$4 sm:$0xff]   ;;  %v10810_v54 = vld [vmem:[%s12443_s9 + $0x584] ss:$8 sps:$4 sm:$0xff]  }
 0x262   : > { %9165 = vmatprep.subr.bf16.mxu0 %v10717_v55  ;;  %v10813_v55 = vld [vmem:[%s12443_s9 + $0xe84] ss:$8 sps:$4 sm:$0xff]  }
 0x264   : > { %8779 = vmatpush1.bf16.msra.mxu1 %v10712_v56  ;;  %v10808_v56 = vld [vmem:[%s12443_s9 + $0x580] ss:$8 sps:$4 sm:$0xff]  }
 0x265   : > { %9166 = vmatpush1.bf16.msra.mxu0 %v10715_v57  ;;  %8780 = vmatprep.subr.bf16.mxu1 %v10720_v58  ;;  %v10811_v57 = vld [vmem:[%s12443_s9 + $0xe80] ss:$8 sps:$4 sm:$0xff]   ;;  %v10816_v58 = vld [vmem:[%s12443_s9 + $0x594] ss:$8 sps:$4 sm:$0xff]  }
 0x266   : > { %9167 = vmatprep.subr.bf16.mxu0 %v10723_v59  ;;  %v10819_v59 = vld [vmem:[%s12443_s9 + $0xe94] ss:$8 sps:$4 sm:$0xff]  }
 0x268   : > { %8781 = vmatpush1.bf16.msra.mxu1 %v10718_v60  ;;  %v10814_v60 = vld [vmem:[%s12443_s9 + $0x590] ss:$8 sps:$4 sm:$0xff]  }
 0x269   : > { %9168 = vmatpush1.bf16.msra.mxu0 %v10721_v61  ;;  %8782 = vmatprep.subr.bf16.mxu1 %v10726_v62  ;;  %v10817_v61 = vld [vmem:[%s12443_s9 + $0xe90] ss:$8 sps:$4 sm:$0xff]   ;;  %v10822_v62 = vld [vmem:[%s12443_s9 + $0x5a4] ss:$8 sps:$4 sm:$0xff]  }
 0x26a   : > { %9169 = vmatprep.subr.bf16.mxu0 %v10729_v63  ;;  %v10825_v63 = vld [vmem:[%s12443_s9 + $0xea4] ss:$8 sps:$4 sm:$0xff]  }
 0x26c   : > { %8783 = vmatpush1.bf16.msra.mxu1 %v10724_v0  ;;  %v10820_v0 = vld [vmem:[%s12443_s9 + $0x5a0] ss:$8 sps:$4 sm:$0xff]  }
 0x26d   : > { %9170 = vmatpush1.bf16.msra.mxu0 %v10727_v1  ;;  %8784 = vmatprep.subr.bf16.mxu1 %v10732_v2  ;;  %v10823_v1 = vld [vmem:[%s12443_s9 + $0xea0] ss:$8 sps:$4 sm:$0xff]   ;;  %v10828_v2 = vld [vmem:[%s12443_s9 + $0x5b4] ss:$8 sps:$4 sm:$0xff]  }
 0x26e   : > { %9171 = vmatprep.subr.bf16.mxu0 %v10735_v3  ;;  %v10831_v3 = vld [vmem:[%s12443_s9 + $0xeb4] ss:$8 sps:$4 sm:$0xff]  }
 0x270   : > { %8785 = vmatpush1.bf16.msra.mxu1 %v10730_v4  ;;  %v10826_v4 = vld [vmem:[%s12443_s9 + $0x5b0] ss:$8 sps:$4 sm:$0xff]  }
 0x271   : > { %9172 = vmatpush1.bf16.msra.mxu0 %v10733_v5  ;;  %8786 = vmatprep.subr.bf16.mxu1 %v10738_v6  ;;  %v10829_v5 = vld [vmem:[%s12443_s9 + $0xeb0] ss:$8 sps:$4 sm:$0xff]   ;;  %v10834_v6 = vld [vmem:[%s12443_s9 + $0x5c4] ss:$8 sps:$4 sm:$0xff]  }
 0x272   : > { %9173 = vmatprep.subr.bf16.mxu0 %v10741_v7  ;;  %v10837_v7 = vld [vmem:[%s12443_s9 + $0xec4] ss:$8 sps:$4 sm:$0xff]  }
 0x274   : > { %8787 = vmatpush1.bf16.msra.mxu1 %v10736_v8  ;;  %v10832_v8 = vld [vmem:[%s12443_s9 + $0x5c0] ss:$8 sps:$4 sm:$0xff]  }
 0x275   : > { %9174 = vmatpush1.bf16.msra.mxu0 %v10739_v9  ;;  %8788 = vmatprep.subr.bf16.mxu1 %v10744_v10  ;;  %v10835_v9 = vld [vmem:[%s12443_s9 + $0xec0] ss:$8 sps:$4 sm:$0xff]   ;;  %v10840_v10 = vld [vmem:[%s12443_s9 + $0x5d4] ss:$8 sps:$4 sm:$0xff]  }
 0x276   : > { %9175 = vmatprep.subr.bf16.mxu0 %v10747_v11  ;;  %v10843_v11 = vld [vmem:[%s12443_s9 + $0xed4] ss:$8 sps:$4 sm:$0xff]  }
 0x278   : > { %8789 = vmatpush1.bf16.msra.mxu1 %v10742_v12  ;;  %v10838_v12 = vld [vmem:[%s12443_s9 + $0x5d0] ss:$8 sps:$4 sm:$0xff]  }
 0x279   : > { %9176 = vmatpush1.bf16.msra.mxu0 %v10745_v13  ;;  %8790 = vmatprep.subr.bf16.mxu1 %v10750_v14  ;;  %v10841_v13 = vld [vmem:[%s12443_s9 + $0xed0] ss:$8 sps:$4 sm:$0xff]   ;;  %v10846_v14 = vld [vmem:[%s12443_s9 + $0x5e4] ss:$8 sps:$4 sm:$0xff]  }
 0x27a   : > { %9177 = vmatprep.subr.bf16.mxu0 %v10753_v15  ;;  %v10849_v15 = vld [vmem:[%s12443_s9 + $0xee4] ss:$8 sps:$4 sm:$0xff]  }
 0x27c   : > { %8791 = vmatpush1.bf16.msra.mxu1 %v10748_v16  ;;  %v10844_v16 = vld [vmem:[%s12443_s9 + $0x5e0] ss:$8 sps:$4 sm:$0xff]  }
 0x27d   : > { %9178 = vmatpush1.bf16.msra.mxu0 %v10751_v17  ;;  %8803 = vmatprep.subr.bf16.mxu1 %v10759_v18  ;;  %v10847_v17 = vld [vmem:[%s12443_s9 + $0xee0] ss:$8 sps:$4 sm:$0xff]   ;;  %v10852_v18 = vld [vmem:[%s12443_s9 + $0x5f4] ss:$8 sps:$4 sm:$0xff]  }
 0x27e   : > { %9190 = vmatprep.subr.bf16.mxu0 %v10765_v21  ;;  %v10853_v21 = vld [vmem:[%s12443_s9 + $0xef0] ss:$8 sps:$4 sm:$0xff]  }
 0x27f   : > { %8793 = vmatmul.mubr.bf16.vlgmr.msra.gmra.mrb[0].mxu1 %v10754_v19  ;;  %v10855_v19 = vld [vmem:[%s12443_s9 + $0xef4] ss:$8 sps:$4 sm:$0xff]  }
 0x280   : > { %9180 = vmatmul.mubr.bf16.vlgmr.msra.gmra.mrb[0].mxu0 %v10760_v20  ;;  %8804 = vmatpush1.bf16.msra.mxu1 %v10757_v22  ;;  %v10850_v20 = vld [vmem:[%s12443_s9 + $0x5f0] ss:$8 sps:$4 sm:$0xff]   ;;  %v10861_v22 = vld [vmem:[%s12443_s9 + $0x604] ss:$8 sps:$4 sm:$0xff]  }
 0x281   : > { %9191 = vmatpush1.bf16.msra.mxu0 %v10763_v23  ;;  %8805 = vmatprep.subr.bf16.mxu1 %v10768_v24  ;;  %v10867_v23 = vld [vmem:[%s12443_s9 + $0xf04] ss:$8 sps:$4 sm:$0xff]   ;;  %v10856_v24 = vld [vmem:[%s13150_s0 + $0x28] ss:$144 sps:$4 sm:$0xff]  }
 0x282   : > { %9192 = vmatprep.subr.bf16.mxu0 %v10771_v25  ;;  %8835 = vmatprep.mubr.bf16.mxu1 %v10858_v26  ;;  %v10862_v25 = vld [vmem:[%s13150_s0 + $0x70] ss:$144 sps:$4 sm:$0xff]  }
 0x283   : > { %9222 = vmatprep.mubr.bf16.mxu0 %v10864_v27  ;;  %v10859_v26 = vld [vmem:[%s12443_s9 + $0x600] ss:$8 sps:$4 sm:$0xff]  }
 0x284   : > { %8806 = vmatpush1.bf16.msra.mxu1 %v10766_v28  ;;  %v10865_v27 = vld [vmem:[%s12443_s9 + $0xf00] ss:$8 sps:$4 sm:$0xff]   ;;  %v10870_v28 = vld [vmem:[%s12443_s9 + $0x614] ss:$8 sps:$4 sm:$0xff]  }
 0x285   : > { %9193 = vmatpush1.bf16.msra.mxu0 %v10769_v29  ;;  %8807 = vmatprep.subr.bf16.mxu1 %v10774_v30  ;;  %v10873_v29 = vld [vmem:[%s12443_s9 + $0xf14] ss:$8 sps:$4 sm:$0xff]  }
 0x286   : > { %9194 = vmatprep.subr.bf16.mxu0 %v10777_v31  ;;  %v10960_v30 = vld [vmem:[%s13150_s0 + $0x34] ss:$144 sps:$4 sm:$0xff]   ;;  %v10966_v31 = vld [vmem:[%s13150_s0 + $0x7c] ss:$144 sps:$4 sm:$0xff]  }
 0x288   : > { %8808 = vmatpush1.bf16.msra.mxu1 %v10772_v32  ;;  %v10868_v32 = vld [vmem:[%s12443_s9 + $0x610] ss:$8 sps:$4 sm:$0xff]  }
 0x289   : > { %9195 = vmatpush1.bf16.msra.mxu0 %v10775_v33  ;;  %8809 = vmatprep.subr.bf16.mxu1 %v10780_v34  ;;  %v10871_v33 = vld [vmem:[%s12443_s9 + $0xf10] ss:$8 sps:$4 sm:$0xff]   ;;  %v10876_v34 = vld [vmem:[%s12443_s9 + $0x624] ss:$8 sps:$4 sm:$0xff]  }
 0x28a   : > { %9196 = vmatprep.subr.bf16.mxu0 %v10783_v35  ;;  %v10879_v35 = vld [vmem:[%s12443_s9 + $0xf24] ss:$8 sps:$4 sm:$0xff]  }
 0x28c   : > { %8810 = vmatpush1.bf16.msra.mxu1 %v10778_v36  ;;  %v10874_v36 = vld [vmem:[%s12443_s9 + $0x620] ss:$8 sps:$4 sm:$0xff]  }
 0x28d   : > { %9197 = vmatpush1.bf16.msra.mxu0 %v10781_v37  ;;  %8811 = vmatprep.subr.bf16.mxu1 %v10786_v38  ;;  %v10877_v37 = vld [vmem:[%s12443_s9 + $0xf20] ss:$8 sps:$4 sm:$0xff]   ;;  %v10882_v38 = vld [vmem:[%s12443_s9 + $0x634] ss:$8 sps:$4 sm:$0xff]  }
 0x28e   : > { %9198 = vmatprep.subr.bf16.mxu0 %v10789_v39  ;;  %v10885_v39 = vld [vmem:[%s12443_s9 + $0xf34] ss:$8 sps:$4 sm:$0xff]  }
 0x290   : > { %8812 = vmatpush1.bf16.msra.mxu1 %v10784_v40  ;;  %v10880_v40 = vld [vmem:[%s12443_s9 + $0x630] ss:$8 sps:$4 sm:$0xff]  }
 0x291   : > { %9199 = vmatpush1.bf16.msra.mxu0 %v10787_v41  ;;  %8813 = vmatprep.subr.bf16.mxu1 %v10792_v42  ;;  %v10883_v41 = vld [vmem:[%s12443_s9 + $0xf30] ss:$8 sps:$4 sm:$0xff]   ;;  %v10888_v42 = vld [vmem:[%s12443_s9 + $0x644] ss:$8 sps:$4 sm:$0xff]  }
 0x292   : > { %9200 = vmatprep.subr.bf16.mxu0 %v10795_v43  ;;  %v10891_v43 = vld [vmem:[%s12443_s9 + $0xf44] ss:$8 sps:$4 sm:$0xff]  }
 0x294   : > { %8814 = vmatpush1.bf16.msra.mxu1 %v10790_v44  ;;  %v10886_v44 = vld [vmem:[%s12443_s9 + $0x640] ss:$8 sps:$4 sm:$0xff]  }
 0x295   : > { %9201 = vmatpush1.bf16.msra.mxu0 %v10793_v45  ;;  %8815 = vmatprep.subr.bf16.mxu1 %v10798_v46  ;;  %v10889_v45 = vld [vmem:[%s12443_s9 + $0xf40] ss:$8 sps:$4 sm:$0xff]   ;;  %v10894_v46 = vld [vmem:[%s12443_s9 + $0x654] ss:$8 sps:$4 sm:$0xff]  }
 0x296   : > { %9202 = vmatprep.subr.bf16.mxu0 %v10801_v47  ;;  %v10897_v47 = vld [vmem:[%s12443_s9 + $0xf54] ss:$8 sps:$4 sm:$0xff]  }
 0x298   : > { %8816 = vmatpush1.bf16.msra.mxu1 %v10796_v48  ;;  %v10892_v48 = vld [vmem:[%s12443_s9 + $0x650] ss:$8 sps:$4 sm:$0xff]  }
 0x299   : > { %9203 = vmatpush1.bf16.msra.mxu0 %v10799_v49  ;;  %8817 = vmatprep.subr.bf16.mxu1 %v10804_v50  ;;  %v10895_v49 = vld [vmem:[%s12443_s9 + $0xf50] ss:$8 sps:$4 sm:$0xff]   ;;  %v10900_v50 = vld [vmem:[%s12443_s9 + $0x664] ss:$8 sps:$4 sm:$0xff]  }
 0x29a   : > { %9204 = vmatprep.subr.bf16.mxu0 %v10807_v51  ;;  %v10903_v51 = vld [vmem:[%s12443_s9 + $0xf64] ss:$8 sps:$4 sm:$0xff]  }
 0x29c   : > { %8818 = vmatpush1.bf16.msra.mxu1 %v10802_v52  ;;  %v10898_v52 = vld [vmem:[%s12443_s9 + $0x660] ss:$8 sps:$4 sm:$0xff]  }
 0x29d   : > { %9205 = vmatpush1.bf16.msra.mxu0 %v10805_v53  ;;  %8819 = vmatprep.subr.bf16.mxu1 %v10810_v54  ;;  %v10901_v53 = vld [vmem:[%s12443_s9 + $0xf60] ss:$8 sps:$4 sm:$0xff]   ;;  %v10906_v54 = vld [vmem:[%s12443_s9 + $0x674] ss:$8 sps:$4 sm:$0xff]  }
 0x29e   : > { %9206 = vmatprep.subr.bf16.mxu0 %v10813_v55  ;;  %v10909_v55 = vld [vmem:[%s12443_s9 + $0xf74] ss:$8 sps:$4 sm:$0xff]  }
 0x2a0   : > { %8820 = vmatpush1.bf16.msra.mxu1 %v10808_v56  ;;  %v10904_v56 = vld [vmem:[%s12443_s9 + $0x670] ss:$8 sps:$4 sm:$0xff]  }
 0x2a1   : > { %9207 = vmatpush1.bf16.msra.mxu0 %v10811_v57  ;;  %8821 = vmatprep.subr.bf16.mxu1 %v10816_v58  ;;  %v10907_v57 = vld [vmem:[%s12443_s9 + $0xf70] ss:$8 sps:$4 sm:$0xff]   ;;  %v10912_v58 = vld [vmem:[%s12443_s9 + $0x684] ss:$8 sps:$4 sm:$0xff]  }
 0x2a2   : > { %9208 = vmatprep.subr.bf16.mxu0 %v10819_v59  ;;  %v10915_v59 = vld [vmem:[%s12443_s9 + $0xf84] ss:$8 sps:$4 sm:$0xff]  }
 0x2a4   : > { %8822 = vmatpush1.bf16.msra.mxu1 %v10814_v60  ;;  %v10910_v60 = vld [vmem:[%s12443_s9 + $0x680] ss:$8 sps:$4 sm:$0xff]  }
 0x2a5   : > { %9209 = vmatpush1.bf16.msra.mxu0 %v10817_v61  ;;  %8823 = vmatprep.subr.bf16.mxu1 %v10822_v62  ;;  %v10913_v61 = vld [vmem:[%s12443_s9 + $0xf80] ss:$8 sps:$4 sm:$0xff]   ;;  %v10918_v62 = vld [vmem:[%s12443_s9 + $0x694] ss:$8 sps:$4 sm:$0xff]  }
 0x2a6   : > { %9210 = vmatprep.subr.bf16.mxu0 %v10825_v63  ;;  %v10921_v63 = vld [vmem:[%s12443_s9 + $0xf94] ss:$8 sps:$4 sm:$0xff]  }
 0x2a8   : > { %8824 = vmatpush1.bf16.msra.mxu1 %v10820_v0  ;;  %v10916_v0 = vld [vmem:[%s12443_s9 + $0x690] ss:$8 sps:$4 sm:$0xff]  }
 0x2a9   : > { %9211 = vmatpush1.bf16.msra.mxu0 %v10823_v1  ;;  %8825 = vmatprep.subr.bf16.mxu1 %v10828_v2  ;;  %v10919_v1 = vld [vmem:[%s12443_s9 + $0xf90] ss:$8 sps:$4 sm:$0xff]   ;;  %v10924_v2 = vld [vmem:[%s12443_s9 + $0x6a4] ss:$8 sps:$4 sm:$0xff]  }
 0x2aa   : > { %9212 = vmatprep.subr.bf16.mxu0 %v10831_v3  ;;  %v10927_v3 = vld [vmem:[%s12443_s9 + $0xfa4] ss:$8 sps:$4 sm:$0xff]  }
 0x2ac   : > { %8826 = vmatpush1.bf16.msra.mxu1 %v10826_v4  ;;  %v10922_v4 = vld [vmem:[%s12443_s9 + $0x6a0] ss:$8 sps:$4 sm:$0xff]  }
 0x2ad   : > { %9213 = vmatpush1.bf16.msra.mxu0 %v10829_v5  ;;  %8827 = vmatprep.subr.bf16.mxu1 %v10834_v6  ;;  %v10925_v5 = vld [vmem:[%s12443_s9 + $0xfa0] ss:$8 sps:$4 sm:$0xff]   ;;  %v10930_v6 = vld [vmem:[%s12443_s9 + $0x6b4] ss:$8 sps:$4 sm:$0xff]  }
 0x2ae   : > { %9214 = vmatprep.subr.bf16.mxu0 %v10837_v7  ;;  %v10933_v7 = vld [vmem:[%s12443_s9 + $0xfb4] ss:$8 sps:$4 sm:$0xff]  }
 0x2b0   : > { %8828 = vmatpush1.bf16.msra.mxu1 %v10832_v8  ;;  %v10928_v8 = vld [vmem:[%s12443_s9 + $0x6b0] ss:$8 sps:$4 sm:$0xff]  }
 0x2b1   : > { %9215 = vmatpush1.bf16.msra.mxu0 %v10835_v9  ;;  %8829 = vmatprep.subr.bf16.mxu1 %v10840_v10  ;;  %v10931_v9 = vld [vmem:[%s12443_s9 + $0xfb0] ss:$8 sps:$4 sm:$0xff]   ;;  %v10936_v10 = vld [vmem:[%s12443_s9 + $0x6c4] ss:$8 sps:$4 sm:$0xff]  }
 0x2b2   : > { %9216 = vmatprep.subr.bf16.mxu0 %v10843_v11  ;;  %v10939_v11 = vld [vmem:[%s12443_s9 + $0xfc4] ss:$8 sps:$4 sm:$0xff]  }
 0x2b4   : > { %8830 = vmatpush1.bf16.msra.mxu1 %v10838_v12  ;;  %v10934_v12 = vld [vmem:[%s12443_s9 + $0x6c0] ss:$8 sps:$4 sm:$0xff]  }
 0x2b5   : > { %9217 = vmatpush1.bf16.msra.mxu0 %v10841_v13  ;;  %8831 = vmatprep.subr.bf16.mxu1 %v10846_v14  ;;  %v10937_v13 = vld [vmem:[%s12443_s9 + $0xfc0] ss:$8 sps:$4 sm:$0xff]   ;;  %v10942_v14 = vld [vmem:[%s12443_s9 + $0x6d4] ss:$8 sps:$4 sm:$0xff]  }
 0x2b6   : > { %9218 = vmatprep.subr.bf16.mxu0 %v10849_v15  ;;  %v10945_v15 = vld [vmem:[%s12443_s9 + $0xfd4] ss:$8 sps:$4 sm:$0xff]  }
 0x2b8   : > { %8832 = vmatpush1.bf16.msra.mxu1 %v10844_v16  ;;  %v10940_v16 = vld [vmem:[%s12443_s9 + $0x6d0] ss:$8 sps:$4 sm:$0xff]  }
 0x2b9   : > { %9219 = vmatpush1.bf16.msra.mxu0 %v10847_v17  ;;  %8833 = vmatprep.subr.bf16.mxu1 %v10852_v18  ;;  %v10943_v17 = vld [vmem:[%s12443_s9 + $0xfd0] ss:$8 sps:$4 sm:$0xff]   ;;  %v10948_v18 = vld [vmem:[%s12443_s9 + $0x6e4] ss:$8 sps:$4 sm:$0xff]  }
 0x2ba   : > { %9220 = vmatprep.subr.bf16.mxu0 %v10855_v19  ;;  %v10951_v19 = vld [vmem:[%s12443_s9 + $0xfe4] ss:$8 sps:$4 sm:$0xff]  }
 0x2bc   : > { %8834 = vmatpush1.bf16.msra.mxu1 %v10850_v20  ;;  %v10946_v20 = vld [vmem:[%s12443_s9 + $0x6e0] ss:$8 sps:$4 sm:$0xff]  }
 0x2bd   : > { %9221 = vmatpush1.bf16.msra.mxu0 %v10853_v21  ;;  %8846 = vmatprep.subr.bf16.mxu1 %v10861_v22  ;;  %v10949_v21 = vld [vmem:[%s12443_s9 + $0xfe0] ss:$8 sps:$4 sm:$0xff]   ;;  %v10954_v22 = vld [vmem:[%s12443_s9 + $0x6f4] ss:$8 sps:$4 sm:$0xff]  }
 0x2be   : > { %9233 = vmatprep.subr.bf16.mxu0 %v10867_v23  ;;  %v10957_v23 = vld [vmem:[%s12443_s9 + $0xff4] ss:$8 sps:$4 sm:$0xff]  }
 0x2bf   : > { %8836 = vmatmul.mubr.bf16.vlgmr.msra.gmra.mrb[0].mxu1 %v10856_v24  ;;  %v10952_v24 = vld [vmem:[%s12443_s9 + $0x6f0] ss:$8 sps:$4 sm:$0xff]  }
 0x2c0   : > { %9223 = vmatmul.mubr.bf16.vlgmr.msra.gmra.mrb[0].mxu0 %v10862_v25  ;;  %8847 = vmatpush1.bf16.msra.mxu1 %v10859_v26  ;;  %v10955_v25 = vld [vmem:[%s12443_s9 + $0xff0] ss:$8 sps:$4 sm:$0xff]   ;;  %v10963_v26 = vld [vmem:[%s12443_s9 + $0x704] ss:$8 sps:$4 sm:$0xff]  }
 0x2c1   : > { %9234 = vmatpush1.bf16.msra.mxu0 %v10865_v27  ;;  %8848 = vmatprep.subr.bf16.mxu1 %v10870_v28  ;;  %v10969_v27 = vld [vmem:[%s12443_s9 + $0x1004] ss:$8 sps:$4 sm:$0xff]   ;;  %v10958_v28 = vld [vmem:[%s13150_s0 + $0x30] ss:$144 sps:$4 sm:$0xff]  }
 0x2c2   : > { %9235 = vmatprep.subr.bf16.mxu0 %v10873_v29  ;;  %8878 = vmatprep.mubr.bf16.mxu1 %v10960_v30  ;;  %v10964_v29 = vld [vmem:[%s13150_s0 + $0x78] ss:$144 sps:$4 sm:$0xff]  }
 0x2c3   : > { %9265 = vmatprep.mubr.bf16.mxu0 %v10966_v31  ;;  %v10961_v30 = vld [vmem:[%s12443_s9 + $0x700] ss:$8 sps:$4 sm:$0xff]  }
 0x2c4   : > { %8849 = vmatpush1.bf16.msra.mxu1 %v10868_v32  ;;  %v10967_v31 = vld [vmem:[%s12443_s9 + $0x1000] ss:$8 sps:$4 sm:$0xff]   ;;  %v10972_v32 = vld [vmem:[%s12443_s9 + $0x714] ss:$8 sps:$4 sm:$0xff]  }
 0x2c5   : > { %9236 = vmatpush1.bf16.msra.mxu0 %v10871_v33  ;;  %8850 = vmatprep.subr.bf16.mxu1 %v10876_v34  ;;  %v10975_v33 = vld [vmem:[%s12443_s9 + $0x1014] ss:$8 sps:$4 sm:$0xff]  }
 0x2c6   : > { %9237 = vmatprep.subr.bf16.mxu0 %v10879_v35  ;;  %v11062_v34 = vld [vmem:[%s13150_s0 + $0x3c] ss:$144 sps:$4 sm:$0xff]   ;;  %v11068_v35 = vld [vmem:[%s13150_s0 + $0x84] ss:$144 sps:$4 sm:$0xff]  }
 0x2c8   : > { %8851 = vmatpush1.bf16.msra.mxu1 %v10874_v36  ;;  %v10970_v36 = vld [vmem:[%s12443_s9 + $0x710] ss:$8 sps:$4 sm:$0xff]  }
 0x2c9   : > { %9238 = vmatpush1.bf16.msra.mxu0 %v10877_v37  ;;  %8852 = vmatprep.subr.bf16.mxu1 %v10882_v38  ;;  %v10973_v37 = vld [vmem:[%s12443_s9 + $0x1010] ss:$8 sps:$4 sm:$0xff]   ;;  %v10978_v38 = vld [vmem:[%s12443_s9 + $0x724] ss:$8 sps:$4 sm:$0xff]  }
 0x2ca   : > { %9239 = vmatprep.subr.bf16.mxu0 %v10885_v39  ;;  %v10981_v39 = vld [vmem:[%s12443_s9 + $0x1024] ss:$8 sps:$4 sm:$0xff]  }
 0x2cc   : > { %8853 = vmatpush1.bf16.msra.mxu1 %v10880_v40  ;;  %v10976_v40 = vld [vmem:[%s12443_s9 + $0x720] ss:$8 sps:$4 sm:$0xff]  }
 0x2cd   : > { %9240 = vmatpush1.bf16.msra.mxu0 %v10883_v41  ;;  %8854 = vmatprep.subr.bf16.mxu1 %v10888_v42  ;;  %v10979_v41 = vld [vmem:[%s12443_s9 + $0x1020] ss:$8 sps:$4 sm:$0xff]   ;;  %v10984_v42 = vld [vmem:[%s12443_s9 + $0x734] ss:$8 sps:$4 sm:$0xff]  }
 0x2ce   : > { %9241 = vmatprep.subr.bf16.mxu0 %v10891_v43  ;;  %v10987_v43 = vld [vmem:[%s12443_s9 + $0x1034] ss:$8 sps:$4 sm:$0xff]  }
 0x2d0   : > { %8855 = vmatpush1.bf16.msra.mxu1 %v10886_v44  ;;  %v10982_v44 = vld [vmem:[%s12443_s9 + $0x730] ss:$8 sps:$4 sm:$0xff]  }
 0x2d1   : > { %9242 = vmatpush1.bf16.msra.mxu0 %v10889_v45  ;;  %8856 = vmatprep.subr.bf16.mxu1 %v10894_v46  ;;  %v10985_v45 = vld [vmem:[%s12443_s9 + $0x1030] ss:$8 sps:$4 sm:$0xff]   ;;  %v10990_v46 = vld [vmem:[%s12443_s9 + $0x744] ss:$8 sps:$4 sm:$0xff]  }
 0x2d2   : > { %9243 = vmatprep.subr.bf16.mxu0 %v10897_v47  ;;  %v10993_v47 = vld [vmem:[%s12443_s9 + $0x1044] ss:$8 sps:$4 sm:$0xff]  }
 0x2d4   : > { %8857 = vmatpush1.bf16.msra.mxu1 %v10892_v48  ;;  %v10988_v48 = vld [vmem:[%s12443_s9 + $0x740] ss:$8 sps:$4 sm:$0xff]  }
 0x2d5   : > { %9244 = vmatpush1.bf16.msra.mxu0 %v10895_v49  ;;  %8858 = vmatprep.subr.bf16.mxu1 %v10900_v50  ;;  %v10991_v49 = vld [vmem:[%s12443_s9 + $0x1040] ss:$8 sps:$4 sm:$0xff]   ;;  %v10996_v50 = vld [vmem:[%s12443_s9 + $0x754] ss:$8 sps:$4 sm:$0xff]  }
 0x2d6   : > { %9245 = vmatprep.subr.bf16.mxu0 %v10903_v51  ;;  %v10999_v51 = vld [vmem:[%s12443_s9 + $0x1054] ss:$8 sps:$4 sm:$0xff]  }
 0x2d8   : > { %8859 = vmatpush1.bf16.msra.mxu1 %v10898_v52  ;;  %v10994_v52 = vld [vmem:[%s12443_s9 + $0x750] ss:$8 sps:$4 sm:$0xff]  }
 0x2d9   : > { %9246 = vmatpush1.bf16.msra.mxu0 %v10901_v53  ;;  %8860 = vmatprep.subr.bf16.mxu1 %v10906_v54  ;;  %v10997_v53 = vld [vmem:[%s12443_s9 + $0x1050] ss:$8 sps:$4 sm:$0xff]   ;;  %v11002_v54 = vld [vmem:[%s12443_s9 + $0x764] ss:$8 sps:$4 sm:$0xff]  }
 0x2da   : > { %9247 = vmatprep.subr.bf16.mxu0 %v10909_v55  ;;  %v11005_v55 = vld [vmem:[%s12443_s9 + $0x1064] ss:$8 sps:$4 sm:$0xff]  }
 0x2dc   : > { %8861 = vmatpush1.bf16.msra.mxu1 %v10904_v56  ;;  %v11000_v56 = vld [vmem:[%s12443_s9 + $0x760] ss:$8 sps:$4 sm:$0xff]  }
 0x2dd   : > { %9248 = vmatpush1.bf16.msra.mxu0 %v10907_v57  ;;  %8862 = vmatprep.subr.bf16.mxu1 %v10912_v58  ;;  %v11003_v57 = vld [vmem:[%s12443_s9 + $0x1060] ss:$8 sps:$4 sm:$0xff]   ;;  %v11008_v58 = vld [vmem:[%s12443_s9 + $0x774] ss:$8 sps:$4 sm:$0xff]  }
 0x2de   : > { %9249 = vmatprep.subr.bf16.mxu0 %v10915_v59  ;;  %v11011_v59 = vld [vmem:[%s12443_s9 + $0x1074] ss:$8 sps:$4 sm:$0xff]  }
 0x2e0   : > { %8863 = vmatpush1.bf16.msra.mxu1 %v10910_v60  ;;  %v11006_v60 = vld [vmem:[%s12443_s9 + $0x770] ss:$8 sps:$4 sm:$0xff]  }
 0x2e1   : > { %9250 = vmatpush1.bf16.msra.mxu0 %v10913_v61  ;;  %8864 = vmatprep.subr.bf16.mxu1 %v10918_v62  ;;  %v11009_v61 = vld [vmem:[%s12443_s9 + $0x1070] ss:$8 sps:$4 sm:$0xff]   ;;  %v11014_v62 = vld [vmem:[%s12443_s9 + $0x784] ss:$8 sps:$4 sm:$0xff]  }
 0x2e2   : > { %9251 = vmatprep.subr.bf16.mxu0 %v10921_v63  ;;  %v11017_v63 = vld [vmem:[%s12443_s9 + $0x1084] ss:$8 sps:$4 sm:$0xff]  }
 0x2e4   : > { %8865 = vmatpush1.bf16.msra.mxu1 %v10916_v0  ;;  %v11012_v0 = vld [vmem:[%s12443_s9 + $0x780] ss:$8 sps:$4 sm:$0xff]  }
 0x2e5   : > { %9252 = vmatpush1.bf16.msra.mxu0 %v10919_v1  ;;  %8866 = vmatprep.subr.bf16.mxu1 %v10924_v2  ;;  %v11015_v1 = vld [vmem:[%s12443_s9 + $0x1080] ss:$8 sps:$4 sm:$0xff]   ;;  %v11020_v2 = vld [vmem:[%s12443_s9 + $0x794] ss:$8 sps:$4 sm:$0xff]  }
 0x2e6   : > { %9253 = vmatprep.subr.bf16.mxu0 %v10927_v3  ;;  %v11023_v3 = vld [vmem:[%s12443_s9 + $0x1094] ss:$8 sps:$4 sm:$0xff]  }
 0x2e8   : > { %8867 = vmatpush1.bf16.msra.mxu1 %v10922_v4  ;;  %v11018_v4 = vld [vmem:[%s12443_s9 + $0x790] ss:$8 sps:$4 sm:$0xff]  }
 0x2e9   : > { %9254 = vmatpush1.bf16.msra.mxu0 %v10925_v5  ;;  %8868 = vmatprep.subr.bf16.mxu1 %v10930_v6  ;;  %v11021_v5 = vld [vmem:[%s12443_s9 + $0x1090] ss:$8 sps:$4 sm:$0xff]   ;;  %v11026_v6 = vld [vmem:[%s12443_s9 + $0x7a4] ss:$8 sps:$4 sm:$0xff]  }
 0x2ea   : > { %9255 = vmatprep.subr.bf16.mxu0 %v10933_v7  ;;  %v11029_v7 = vld [vmem:[%s12443_s9 + $0x10a4] ss:$8 sps:$4 sm:$0xff]  }
 0x2ec   : > { %8869 = vmatpush1.bf16.msra.mxu1 %v10928_v8  ;;  %v11024_v8 = vld [vmem:[%s12443_s9 + $0x7a0] ss:$8 sps:$4 sm:$0xff]  }
 0x2ed   : > { %9256 = vmatpush1.bf16.msra.mxu0 %v10931_v9  ;;  %8870 = vmatprep.subr.bf16.mxu1 %v10936_v10  ;;  %v11027_v9 = vld [vmem:[%s12443_s9 + $0x10a0] ss:$8 sps:$4 sm:$0xff]   ;;  %v11032_v10 = vld [vmem:[%s12443_s9 + $0x7b4] ss:$8 sps:$4 sm:$0xff]  }
 0x2ee   : > { %9257 = vmatprep.subr.bf16.mxu0 %v10939_v11  ;;  %v11035_v11 = vld [vmem:[%s12443_s9 + $0x10b4] ss:$8 sps:$4 sm:$0xff]  }
 0x2f0   : > { %8871 = vmatpush1.bf16.msra.mxu1 %v10934_v12  ;;  %v11030_v12 = vld [vmem:[%s12443_s9 + $0x7b0] ss:$8 sps:$4 sm:$0xff]  }
 0x2f1   : > { %9258 = vmatpush1.bf16.msra.mxu0 %v10937_v13  ;;  %8872 = vmatprep.subr.bf16.mxu1 %v10942_v14  ;;  %v11033_v13 = vld [vmem:[%s12443_s9 + $0x10b0] ss:$8 sps:$4 sm:$0xff]   ;;  %v11038_v14 = vld [vmem:[%s12443_s9 + $0x7c4] ss:$8 sps:$4 sm:$0xff]  }
 0x2f2   : > { %9259 = vmatprep.subr.bf16.mxu0 %v10945_v15  ;;  %v11041_v15 = vld [vmem:[%s12443_s9 + $0x10c4] ss:$8 sps:$4 sm:$0xff]  }
 0x2f4   : > { %8873 = vmatpush1.bf16.msra.mxu1 %v10940_v16  ;;  %v11036_v16 = vld [vmem:[%s12443_s9 + $0x7c0] ss:$8 sps:$4 sm:$0xff]  }
 0x2f5   : > { %9260 = vmatpush1.bf16.msra.mxu0 %v10943_v17  ;;  %8874 = vmatprep.subr.bf16.mxu1 %v10948_v18  ;;  %v11039_v17 = vld [vmem:[%s12443_s9 + $0x10c0] ss:$8 sps:$4 sm:$0xff]   ;;  %v11044_v18 = vld [vmem:[%s12443_s9 + $0x7d4] ss:$8 sps:$4 sm:$0xff]  }
 0x2f6   : > { %9261 = vmatprep.subr.bf16.mxu0 %v10951_v19  ;;  %v11047_v19 = vld [vmem:[%s12443_s9 + $0x10d4] ss:$8 sps:$4 sm:$0xff]  }
 0x2f8   : > { %8875 = vmatpush1.bf16.msra.mxu1 %v10946_v20  ;;  %v11042_v20 = vld [vmem:[%s12443_s9 + $0x7d0] ss:$8 sps:$4 sm:$0xff]  }
 0x2f9   : > { %9262 = vmatpush1.bf16.msra.mxu0 %v10949_v21  ;;  %8876 = vmatprep.subr.bf16.mxu1 %v10954_v22  ;;  %v11045_v21 = vld [vmem:[%s12443_s9 + $0x10d0] ss:$8 sps:$4 sm:$0xff]   ;;  %v11050_v22 = vld [vmem:[%s12443_s9 + $0x7e4] ss:$8 sps:$4 sm:$0xff]  }
 0x2fa   : > { %9263 = vmatprep.subr.bf16.mxu0 %v10957_v23  ;;  %v11053_v23 = vld [vmem:[%s12443_s9 + $0x10e4] ss:$8 sps:$4 sm:$0xff]  }
 0x2fc   : > { %8877 = vmatpush1.bf16.msra.mxu1 %v10952_v24  ;;  %v11048_v24 = vld [vmem:[%s12443_s9 + $0x7e0] ss:$8 sps:$4 sm:$0xff]  }
 0x2fd   : > { %9264 = vmatpush1.bf16.msra.mxu0 %v10955_v25  ;;  %8889 = vmatprep.subr.bf16.mxu1 %v10963_v26  ;;  %v11051_v25 = vld [vmem:[%s12443_s9 + $0x10e0] ss:$8 sps:$4 sm:$0xff]   ;;  %v11056_v26 = vld [vmem:[%s12443_s9 + $0x7f4] ss:$8 sps:$4 sm:$0xff]  }
 0x2fe   : > { %9276 = vmatprep.subr.bf16.mxu0 %v10969_v27  ;;  %v11059_v27 = vld [vmem:[%s12443_s9 + $0x10f4] ss:$8 sps:$4 sm:$0xff]  }
 0x2ff   : > { %8879 = vmatmul.mubr.bf16.vlgmr.msra.gmra.mrb[0].mxu1 %v10958_v28  ;;  %v11054_v28 = vld [vmem:[%s12443_s9 + $0x7f0] ss:$8 sps:$4 sm:$0xff]  }
 0x300   : > { %9266 = vmatmul.mubr.bf16.vlgmr.msra.gmra.mrb[0].mxu0 %v10964_v29  ;;  %8890 = vmatpush1.bf16.msra.mxu1 %v10961_v30  ;;  %v11057_v29 = vld [vmem:[%s12443_s9 + $0x10f0] ss:$8 sps:$4 sm:$0xff]   ;;  %v11065_v30 = vld [vmem:[%s12443_s9 + $0x804] ss:$8 sps:$4 sm:$0xff]  }
 0x301   : > { %9277 = vmatpush1.bf16.msra.mxu0 %v10967_v31  ;;  %8891 = vmatprep.subr.bf16.mxu1 %v10972_v32  ;;  %v11071_v31 = vld [vmem:[%s12443_s9 + $0x1104] ss:$8 sps:$4 sm:$0xff]   ;;  %v11060_v32 = vld [vmem:[%s13150_s0 + $0x38] ss:$144 sps:$4 sm:$0xff]  }
 0x302   : > { %9278 = vmatprep.subr.bf16.mxu0 %v10975_v33  ;;  %8921 = vmatprep.mubr.bf16.mxu1 %v11062_v34  ;;  %v11066_v33 = vld [vmem:[%s13150_s0 + $0x80] ss:$144 sps:$4 sm:$0xff]  }
 0x303   : > { %9308 = vmatprep.mubr.bf16.mxu0 %v11068_v35  ;;  %v11063_v34 = vld [vmem:[%s12443_s9 + $0x800] ss:$8 sps:$4 sm:$0xff]  }
 0x304   : > { %8892 = vmatpush1.bf16.msra.mxu1 %v10970_v36  ;;  %v11069_v35 = vld [vmem:[%s12443_s9 + $0x1100] ss:$8 sps:$4 sm:$0xff]   ;;  %v11074_v36 = vld [vmem:[%s12443_s9 + $0x814] ss:$8 sps:$4 sm:$0xff]  }
 0x305   : > { %9279 = vmatpush1.bf16.msra.mxu0 %v10973_v37  ;;  %8893 = vmatprep.subr.bf16.mxu1 %v10978_v38  ;;  %v11077_v37 = vld [vmem:[%s12443_s9 + $0x1114] ss:$8 sps:$4 sm:$0xff]  }
 0x306   : > { %9280 = vmatprep.subr.bf16.mxu0 %v10981_v39  ;;  %v11164_v38 = vld [vmem:[%s13150_s0 + $0x44] ss:$144 sps:$4 sm:$0xff]   ;;  %v11167_v39 = vld [vmem:[%s13150_s0 + $0x8c] ss:$144 sps:$4 sm:$0xff]  }
 0x308   : > { %8894 = vmatpush1.bf16.msra.mxu1 %v10976_v40  ;;  %v11072_v40 = vld [vmem:[%s12443_s9 + $0x810] ss:$8 sps:$4 sm:$0xff]  }
 0x309   : > { %9281 = vmatpush1.bf16.msra.mxu0 %v10979_v41  ;;  %8895 = vmatprep.subr.bf16.mxu1 %v10984_v42  ;;  %v11075_v41 = vld [vmem:[%s12443_s9 + $0x1110] ss:$8 sps:$4 sm:$0xff]   ;;  %v11080_v42 = vld [vmem:[%s12443_s9 + $0x824] ss:$8 sps:$4 sm:$0xff]  }
 0x30a   : > { %9282 = vmatprep.subr.bf16.mxu0 %v10987_v43  ;;  %v11083_v43 = vld [vmem:[%s12443_s9 + $0x1124] ss:$8 sps:$4 sm:$0xff]  }
 0x30c   : > { %8896 = vmatpush1.bf16.msra.mxu1 %v10982_v44  ;;  %v11078_v44 = vld [vmem:[%s12443_s9 + $0x820] ss:$8 sps:$4 sm:$0xff]  }
 0x30d   : > { %9283 = vmatpush1.bf16.msra.mxu0 %v10985_v45  ;;  %8897 = vmatprep.subr.bf16.mxu1 %v10990_v46  ;;  %v11081_v45 = vld [vmem:[%s12443_s9 + $0x1120] ss:$8 sps:$4 sm:$0xff]   ;;  %v11086_v46 = vld [vmem:[%s12443_s9 + $0x834] ss:$8 sps:$4 sm:$0xff]  }
 0x30e   : > { %9284 = vmatprep.subr.bf16.mxu0 %v10993_v47  ;;  %v11089_v47 = vld [vmem:[%s12443_s9 + $0x1134] ss:$8 sps:$4 sm:$0xff]  }
 0x310   : > { %8898 = vmatpush1.bf16.msra.mxu1 %v10988_v48  ;;  %v11084_v48 = vld [vmem:[%s12443_s9 + $0x830] ss:$8 sps:$4 sm:$0xff]  }
 0x311   : > { %9285 = vmatpush1.bf16.msra.mxu0 %v10991_v49  ;;  %8899 = vmatprep.subr.bf16.mxu1 %v10996_v50  ;;  %v11087_v49 = vld [vmem:[%s12443_s9 + $0x1130] ss:$8 sps:$4 sm:$0xff]   ;;  %v11092_v50 = vld [vmem:[%s12443_s9 + $0x844] ss:$8 sps:$4 sm:$0xff]  }
 0x312   : > { %9286 = vmatprep.subr.bf16.mxu0 %v10999_v51  ;;  %v11095_v51 = vld [vmem:[%s12443_s9 + $0x1144] ss:$8 sps:$4 sm:$0xff]  }
 0x314   : > { %8900 = vmatpush1.bf16.msra.mxu1 %v10994_v52  ;;  %v11090_v52 = vld [vmem:[%s12443_s9 + $0x840] ss:$8 sps:$4 sm:$0xff]  }
 0x315   : > { %9287 = vmatpush1.bf16.msra.mxu0 %v10997_v53  ;;  %8901 = vmatprep.subr.bf16.mxu1 %v11002_v54  ;;  %v11093_v53 = vld [vmem:[%s12443_s9 + $0x1140] ss:$8 sps:$4 sm:$0xff]   ;;  %v11098_v54 = vld [vmem:[%s12443_s9 + $0x854] ss:$8 sps:$4 sm:$0xff]  }
 0x316   : > { %9288 = vmatprep.subr.bf16.mxu0 %v11005_v55  ;;  %v11101_v55 = vld [vmem:[%s12443_s9 + $0x1154] ss:$8 sps:$4 sm:$0xff]  }
 0x318   : > { %8902 = vmatpush1.bf16.msra.mxu1 %v11000_v56  ;;  %v11096_v56 = vld [vmem:[%s12443_s9 + $0x850] ss:$8 sps:$4 sm:$0xff]  }
 0x319   : > { %9289 = vmatpush1.bf16.msra.mxu0 %v11003_v57  ;;  %8903 = vmatprep.subr.bf16.mxu1 %v11008_v58  ;;  %v11099_v57 = vld [vmem:[%s12443_s9 + $0x1150] ss:$8 sps:$4 sm:$0xff]   ;;  %v11104_v58 = vld [vmem:[%s12443_s9 + $0x864] ss:$8 sps:$4 sm:$0xff]  }
 0x31a   : > { %9290 = vmatprep.subr.bf16.mxu0 %v11011_v59  ;;  %v11107_v59 = vld [vmem:[%s12443_s9 + $0x1164] ss:$8 sps:$4 sm:$0xff]  }
 0x31c   : > { %8904 = vmatpush1.bf16.msra.mxu1 %v11006_v60  ;;  %v11102_v60 = vld [vmem:[%s12443_s9 + $0x860] ss:$8 sps:$4 sm:$0xff]  }
 0x31d   : > { %9291 = vmatpush1.bf16.msra.mxu0 %v11009_v61  ;;  %8905 = vmatprep.subr.bf16.mxu1 %v11014_v62  ;;  %v11105_v61 = vld [vmem:[%s12443_s9 + $0x1160] ss:$8 sps:$4 sm:$0xff]   ;;  %v11110_v62 = vld [vmem:[%s12443_s9 + $0x874] ss:$8 sps:$4 sm:$0xff]  }
 0x31e   : > { %9292 = vmatprep.subr.bf16.mxu0 %v11017_v63  ;;  %v11113_v63 = vld [vmem:[%s12443_s9 + $0x1174] ss:$8 sps:$4 sm:$0xff]  }
 0x320   : > { %8906 = vmatpush1.bf16.msra.mxu1 %v11012_v0  ;;  %v11108_v0 = vld [vmem:[%s12443_s9 + $0x870] ss:$8 sps:$4 sm:$0xff]  }
 0x321   : > { %9293 = vmatpush1.bf16.msra.mxu0 %v11015_v1  ;;  %8907 = vmatprep.subr.bf16.mxu1 %v11020_v2  ;;  %v11111_v1 = vld [vmem:[%s12443_s9 + $0x1170] ss:$8 sps:$4 sm:$0xff]   ;;  %v11116_v2 = vld [vmem:[%s12443_s9 + $0x884] ss:$8 sps:$4 sm:$0xff]  }
 0x322   : > { %9294 = vmatprep.subr.bf16.mxu0 %v11023_v3  ;;  %v11119_v3 = vld [vmem:[%s12443_s9 + $0x1184] ss:$8 sps:$4 sm:$0xff]  }
 0x324   : > { %8908 = vmatpush1.bf16.msra.mxu1 %v11018_v4  ;;  %v11114_v4 = vld [vmem:[%s12443_s9 + $0x880] ss:$8 sps:$4 sm:$0xff]  }
 0x325   : > { %9295 = vmatpush1.bf16.msra.mxu0 %v11021_v5  ;;  %8909 = vmatprep.subr.bf16.mxu1 %v11026_v6  ;;  %v11117_v5 = vld [vmem:[%s12443_s9 + $0x1180] ss:$8 sps:$4 sm:$0xff]   ;;  %v11122_v6 = vld [vmem:[%s12443_s9 + $0x894] ss:$8 sps:$4 sm:$0xff]  }
 0x326   : > { %9296 = vmatprep.subr.bf16.mxu0 %v11029_v7  ;;  %v11125_v7 = vld [vmem:[%s12443_s9 + $0x1194] ss:$8 sps:$4 sm:$0xff]  }
 0x328   : > { %8910 = vmatpush1.bf16.msra.mxu1 %v11024_v8  ;;  %v11120_v8 = vld [vmem:[%s12443_s9 + $0x890] ss:$8 sps:$4 sm:$0xff]  }
 0x329   : > { %9297 = vmatpush1.bf16.msra.mxu0 %v11027_v9  ;;  %8911 = vmatprep.subr.bf16.mxu1 %v11032_v10  ;;  %v11123_v9 = vld [vmem:[%s12443_s9 + $0x1190] ss:$8 sps:$4 sm:$0xff]   ;;  %v11128_v10 = vld [vmem:[%s12443_s9 + $0x8a4] ss:$8 sps:$4 sm:$0xff]  }
 0x32a   : > { %9298 = vmatprep.subr.bf16.mxu0 %v11035_v11  ;;  %v11131_v11 = vld [vmem:[%s12443_s9 + $0x11a4] ss:$8 sps:$4 sm:$0xff]  }
 0x32c   : > { %8912 = vmatpush1.bf16.msra.mxu1 %v11030_v12  ;;  %v11126_v12 = vld [vmem:[%s12443_s9 + $0x8a0] ss:$8 sps:$4 sm:$0xff]  }
 0x32d   : > { %9299 = vmatpush1.bf16.msra.mxu0 %v11033_v13  ;;  %8913 = vmatprep.subr.bf16.mxu1 %v11038_v14  ;;  %v11129_v13 = vld [vmem:[%s12443_s9 + $0x11a0] ss:$8 sps:$4 sm:$0xff]   ;;  %v11134_v14 = vld [vmem:[%s12443_s9 + $0x8b4] ss:$8 sps:$4 sm:$0xff]  }
 0x32e   : > { %9300 = vmatprep.subr.bf16.mxu0 %v11041_v15  ;;  %v11137_v15 = vld [vmem:[%s12443_s9 + $0x11b4] ss:$8 sps:$4 sm:$0xff]  }
 0x330   : > { %8914 = vmatpush1.bf16.msra.mxu1 %v11036_v16  ;;  %v11132_v16 = vld [vmem:[%s12443_s9 + $0x8b0] ss:$8 sps:$4 sm:$0xff]  }
 0x331   : > { %9301 = vmatpush1.bf16.msra.mxu0 %v11039_v17  ;;  %8915 = vmatprep.subr.bf16.mxu1 %v11044_v18  ;;  %v11135_v17 = vld [vmem:[%s12443_s9 + $0x11b0] ss:$8 sps:$4 sm:$0xff]   ;;  %v11140_v18 = vld [vmem:[%s12443_s9 + $0x8c4] ss:$8 sps:$4 sm:$0xff]  }
 0x332   : > { %9302 = vmatprep.subr.bf16.mxu0 %v11047_v19  ;;  %v11143_v19 = vld [vmem:[%s12443_s9 + $0x11c4] ss:$8 sps:$4 sm:$0xff]  }
 0x334   : > { %8916 = vmatpush1.bf16.msra.mxu1 %v11042_v20  ;;  %v11138_v20 = vld [vmem:[%s12443_s9 + $0x8c0] ss:$8 sps:$4 sm:$0xff]  }
 0x335   : > { %9303 = vmatpush1.bf16.msra.mxu0 %v11045_v21  ;;  %8917 = vmatprep.subr.bf16.mxu1 %v11050_v22  ;;  %v11141_v21 = vld [vmem:[%s12443_s9 + $0x11c0] ss:$8 sps:$4 sm:$0xff]   ;;  %v11146_v22 = vld [vmem:[%s12443_s9 + $0x8d4] ss:$8 sps:$4 sm:$0xff]  }
 0x336   : > { %9304 = vmatprep.subr.bf16.mxu0 %v11053_v23  ;;  %v11149_v23 = vld [vmem:[%s12443_s9 + $0x11d4] ss:$8 sps:$4 sm:$0xff]  }
 0x338   : > { %8918 = vmatpush1.bf16.msra.mxu1 %v11048_v24  ;;  %v11144_v24 = vld [vmem:[%s12443_s9 + $0x8d0] ss:$8 sps:$4 sm:$0xff]  }
 0x339   : > { %9305 = vmatpush1.bf16.msra.mxu0 %v11051_v25  ;;  %8919 = vmatprep.subr.bf16.mxu1 %v11056_v26  ;;  %v11147_v25 = vld [vmem:[%s12443_s9 + $0x11d0] ss:$8 sps:$4 sm:$0xff]   ;;  %v11152_v26 = vld [vmem:[%s12443_s9 + $0x8e4] ss:$8 sps:$4 sm:$0xff]  }
 0x33a   : > { %9306 = vmatprep.subr.bf16.mxu0 %v11059_v27  ;;  %v11155_v27 = vld [vmem:[%s12443_s9 + $0x11e4] ss:$8 sps:$4 sm:$0xff]  }
 0x33c   : > { %8920 = vmatpush1.bf16.msra.mxu1 %v11054_v28  ;;  %v11150_v28 = vld [vmem:[%s12443_s9 + $0x8e0] ss:$8 sps:$4 sm:$0xff]  }
 0x33d   : > { %9307 = vmatpush1.bf16.msra.mxu0 %v11057_v29  ;;  %8932 = vmatprep.subr.bf16.mxu1 %v11065_v30  ;;  %v11153_v29 = vld [vmem:[%s12443_s9 + $0x11e0] ss:$8 sps:$4 sm:$0xff]   ;;  %v11158_v30 = vld [vmem:[%s12443_s9 + $0x8f4] ss:$8 sps:$4 sm:$0xff]  }
 0x33e   : > { %9319 = vmatprep.subr.bf16.mxu0 %v11071_v31  ;;  %v11161_v31 = vld [vmem:[%s12443_s9 + $0x11f4] ss:$8 sps:$4 sm:$0xff]  }
 0x33f   : > { %8922 = vmatmul.mubr.bf16.vlgmr.msra.gmra.mrb[0].mxu1 %v11060_v32  ;;  %v11156_v32 = vld [vmem:[%s12443_s9 + $0x8f0] ss:$8 sps:$4 sm:$0xff]  }
 0x340   : > { %9309 = vmatmul.mubr.bf16.vlgmr.msra.gmra.mrb[0].mxu0 %v11066_v33  ;;  %8933 = vmatpush1.bf16.msra.mxu1 %v11063_v34  ;;  %v11159_v33 = vld [vmem:[%s12443_s9 + $0x11f0] ss:$8 sps:$4 sm:$0xff]  }
 0x341   : > { %9320 = vmatpush1.bf16.msra.mxu0 %v11069_v35  ;;  %8934 = vmatprep.subr.bf16.mxu1 %v11074_v36  ;;  %v11162_v34 = vld [vmem:[%s13150_s0 + $0x40] ss:$144 sps:$4 sm:$0xff]   ;;  %v11165_v35 = vld [vmem:[%s13150_s0 + $0x88] ss:$144 sps:$4 sm:$0xff]   ;;  %v5518_v36 = vlaneseq }
 0x342   : > { %9321 = vmatprep.subr.bf16.mxu0 %v11077_v37  ;;  %8964 = vmatprep.mubr.bf16.mxu1 %v11164_v38 }
 0x343   : > { %9351 = vmatprep.mubr.bf16.mxu0 %v11167_v39  ;;  %v5519_v37 = vshrl.u32 %v5518_v36, 7  ;;  %v5516_v39 = vld [vmem:[%s4900_s18] sm:$0x3] }
 0x344   : > { %8935 = vmatpush1.bf16.msra.mxu1 %v11072_v40 }
 0x345   : > { %9322 = vmatpush1.bf16.msra.mxu0 %v11075_v41  ;;  %8936 = vmatprep.subr.bf16.mxu1 %v11080_v42  ;;  %v5520_v38 = vsub.s32 0, %v5519_v37  ;;  %v5524_v40 = vsub.s32 1, %v5519_v37 }
 0x346   : > { %9323 = vmatprep.subr.bf16.mxu0 %v11083_v43 }
 0x347   : > { %v5521_v41 = vrot.slane %v5516_v39, %v5520_v38  ;;  %v5525_v42 = vrot.slane %v5516_v39, %v5524_v40 }
 0x348   : > { %8937 = vmatpush1.bf16.msra.mxu1 %v11078_v44 }
 0x349   : > { %9324 = vmatpush1.bf16.msra.mxu0 %v11081_v45  ;;  %8938 = vmatprep.subr.bf16.mxu1 %v11086_v46 }
 0x34a   : > { %9325 = vmatprep.subr.bf16.mxu0 %v11089_v47 }
 0x34c   : > { %8939 = vmatpush1.bf16.msra.mxu1 %v11084_v48 }
 0x34d   : > { %9326 = vmatpush1.bf16.msra.mxu0 %v11087_v49  ;;  %8940 = vmatprep.subr.bf16.mxu1 %v11092_v50 }
 0x34e   : > { %9327 = vmatprep.subr.bf16.mxu0 %v11095_v51 }
 0x350   : > { %8941 = vmatpush1.bf16.msra.mxu1 %v11090_v52 }
 0x351   : > { %9328 = vmatpush1.bf16.msra.mxu0 %v11093_v53  ;;  %8942 = vmatprep.subr.bf16.mxu1 %v11098_v54 }
 0x352   : > { %9329 = vmatprep.subr.bf16.mxu0 %v11101_v55 }
 0x354   : > { %8943 = vmatpush1.bf16.msra.mxu1 %v11096_v56 }
 0x355   : > { %9330 = vmatpush1.bf16.msra.mxu0 %v11099_v57  ;;  %8944 = vmatprep.subr.bf16.mxu1 %v11104_v58 }
 0x356   : > { %9331 = vmatprep.subr.bf16.mxu0 %v11107_v59 }
 0x358   : > { %8945 = vmatpush1.bf16.msra.mxu1 %v11102_v60 }
 0x359   : > { %9332 = vmatpush1.bf16.msra.mxu0 %v11105_v61  ;;  %8946 = vmatprep.subr.bf16.mxu1 %v11110_v62 }
 0x35a   : > { %9333 = vmatprep.subr.bf16.mxu0 %v11113_v63 }
 0x35c   : > { %8947 = vmatpush1.bf16.msra.mxu1 %v11108_v0 }
 0x35d   : > { %9334 = vmatpush1.bf16.msra.mxu0 %v11111_v1  ;;  %8948 = vmatprep.subr.bf16.mxu1 %v11116_v2 }
 0x35e   : > { %9335 = vmatprep.subr.bf16.mxu0 %v11119_v3 }
 0x360   : > { %8949 = vmatpush1.bf16.msra.mxu1 %v11114_v4 }
 0x361   : > { %9336 = vmatpush1.bf16.msra.mxu0 %v11117_v5  ;;  %8950 = vmatprep.subr.bf16.mxu1 %v11122_v6 }
 0x362   : > { %9337 = vmatprep.subr.bf16.mxu0 %v11125_v7 }
 0x364   : > { %8951 = vmatpush1.bf16.msra.mxu1 %v11120_v8 }
 0x365   : > { %9338 = vmatpush1.bf16.msra.mxu0 %v11123_v9  ;;  %8952 = vmatprep.subr.bf16.mxu1 %v11128_v10 }
 0x366   : > { %9339 = vmatprep.subr.bf16.mxu0 %v11131_v11 }
 0x368   : > { %8953 = vmatpush1.bf16.msra.mxu1 %v11126_v12 }
 0x369   : > { %9340 = vmatpush1.bf16.msra.mxu0 %v11129_v13  ;;  %8954 = vmatprep.subr.bf16.mxu1 %v11134_v14 }
 0x36a   : > { %9341 = vmatprep.subr.bf16.mxu0 %v11137_v15 }
 0x36c   : > { %8955 = vmatpush1.bf16.msra.mxu1 %v11132_v16 }
 0x36d   : > { %9342 = vmatpush1.bf16.msra.mxu0 %v11135_v17  ;;  %8956 = vmatprep.subr.bf16.mxu1 %v11140_v18 }
 0x36e   : > { %9343 = vmatprep.subr.bf16.mxu0 %v11143_v19 }
 0x370   : > { %8957 = vmatpush1.bf16.msra.mxu1 %v11138_v20 }
 0x371   : > { %9344 = vmatpush1.bf16.msra.mxu0 %v11141_v21  ;;  %8958 = vmatprep.subr.bf16.mxu1 %v11146_v22 }
 0x372   : > { %9345 = vmatprep.subr.bf16.mxu0 %v11149_v23 }
 0x374   : > { %8959 = vmatpush1.bf16.msra.mxu1 %v11144_v24 }
 0x375   : > { %9346 = vmatpush1.bf16.msra.mxu0 %v11147_v25  ;;  %8960 = vmatprep.subr.bf16.mxu1 %v11152_v26 }
 0x376   : > { %9347 = vmatprep.subr.bf16.mxu0 %v11155_v27 }
 0x378   : > { %8961 = vmatpush1.bf16.msra.mxu1 %v11150_v28 }
 0x379   : > { %9348 = vmatpush1.bf16.msra.mxu0 %v11153_v29  ;;  %8962 = vmatprep.subr.bf16.mxu1 %v11158_v30 }
 0x37a   : > { %9349 = vmatprep.subr.bf16.mxu0 %v11161_v31 }
 0x37c   : > { %8963 = vmatpush1.bf16.msra.mxu1 %v11156_v32 }
 0x37d   : > { %9350 = vmatpush1.bf16.msra.mxu0 %v11159_v33 }
 0x37f   : > { %8965 = vmatmul.mubr.bf16.vlgmr.msra.gmra.mrb[0].mxu1 %v11162_v34 }
 0x380   : > { %9352 = vmatmul.mubr.bf16.vlgmr.msra.gmra.mrb[0].mxu0 %v11165_v35 }
 0x452   : > { %v8966_v43 = vpop.f32.mrb[0].mxu1 }
 0x453   : > { %v9353_v44 = vpop.f32.mrb[0].mxu0  ;;  %v10136_v45 = vadd.f32 %v8966_v43, %v5521_v41  ;;  %v8968_v46 = vpop.f32.mrb[1].mxu1 }
 0x454   : > { %v9355_v47 = vpop.f32.mrb[1].mxu0  ;;  %v10138_v48 = vadd.f32 %v8968_v46, %v5525_v42  ;;  %v8970_v49 = vpop.f32.mrb[2].mxu1 }
 0x455   : > { %v9357_v50 = vpop.f32.mrb[2].mxu0  ;;  %v10137_v51 = vadd.f32 %v10136_v45, %v9353_v44  ;;  %v10140_v52 = vadd.f32 %v8970_v49, %v5521_v41  ;;  %v8972_v53 = vpop.f32.mrb[3].mxu1 }
 0x456   : > { %v9359_v54 = vpop.f32.mrb[3].mxu0  ;;  %v10139_v55 = vadd.f32 %v10138_v48, %v9355_v47  ;;  %v10142_v56 = vadd.f32 %v8972_v53, %v5525_v42  ;;  %9376 = sbr.rel (!%p11263_p6) target bundleno = 1125 (0x465), region = 88 }
 0x457   : > { %v9362_v57 = vmax.f32 %v10137_v51, 0.0  ;;  %v10141_v58 = vadd.f32 %v10140_v52, %v9357_v50 }
 0x458   : > { %v9363_v59 = vmax.f32 %v10139_v55, 0.0  ;;  %v10143_v60 = vadd.f32 %v10142_v56, %v9359_v54 }
 0x459   : > { %9366 = vst [vmem:[%s4888_s20] sm:$0xff] %v9362_v57  ;;  %v9364_v61 = vmax.f32 %v10141_v58, 0.0 }
 0x45a   : > { %9367 = vst [vmem:[%s4888_s20 + $0x8] sm:$0xff] %v9363_v59  ;;  %v9365_v62 = vmax.f32 %v10143_v60, 0.0 }
 0x45b   : > { %9368 = vst [vmem:[%s4888_s20 + $0x10] sm:$0xff] %v9364_v61 }
 0x45c   : > { %9369 = vst [vmem:[%s4888_s20 + $0x18] sm:$0xff] %v9365_v62 }
 0x460   : > { %v9395_v63 = vld [vmem:[%s4888_s20] sm:$0xff] }
 0x461   : > { %v9397_v0 = vld [vmem:[%s4888_s20 + $0x8] sm:$0xff]  ;;  %9396 = vst [vmem:[%s9382_s24] sm:$0xff] %v9395_v63 }
 0x462   : > { %v9399_v1 = vld [vmem:[%s4888_s20 + $0x10] sm:$0xff]  ;;  %9398 = vst [vmem:[%s9382_s24 + $0x8] sm:$0xff] %v9397_v0 }
 0x463   : > { %v9401_v2 = vld [vmem:[%s4888_s20 + $0x18] sm:$0xff]  ;;  %9400 = vst [vmem:[%s9382_s24 + $0x20] sm:$0xff] %v9399_v1 }
 0x464   : > { %9402 = vst [vmem:[%s9382_s24 + $0x28] sm:$0xff] %v9401_v2 }
 0x465 PF: > { %s13_s16 = sadd.s32 1, %s11206_s16   ;;  %s13155_s12 = smov %s11194_s13 }
 0x466   : > { %p10_p12 = scmp.ge.s32.totalorder %s13_s16, 4   ;;  %s13156_s13 = smov %s11268_s22 }
 0x467   : > { %s13157_s14 = smov %s11202_s15  ;;  %s13158_s15 = smov %s13160_s17 }
 0x468   :  { %12 = sbr.rel (!%p10_p12) target bundleno = 3 (0x3), region = 154 }

</bundles_post_ra>
